<compile_context>
chip_gen: v7x
topology: tpu7x:2x2x1
jax: 0.10.0
libtpu: 0.0.40
codegen_flags: <defaults>
</compile_context>

<pallas_src>
import functools
import math

import jax
import jax.numpy as jnp
from jax.experimental import pallas as pl
from jax.experimental.pallas import tpu as pltpu


def _interp_matrix(n_out: int, n_in: int) -> jnp.ndarray:
    """Linear-interpolation matrix W (n_out, n_in), align_corners=True:
    out[i] = sum_j W[i, j] * in[j]."""
    i = jnp.arange(n_out, dtype=jnp.float32)
    if n_out > 1:
        src = i * (float(n_in - 1) / float(n_out - 1))
    else:
        src = jnp.zeros((n_out,), dtype=jnp.float32)
    lo = jnp.clip(jnp.floor(src).astype(jnp.int32), 0, n_in - 1)
    hi = jnp.clip(lo + 1, 0, n_in - 1)
    frac = src - lo.astype(jnp.float32)
    rows = jnp.arange(n_out)
    w = jnp.zeros((n_out, n_in), dtype=jnp.float32)
    w = w.at[rows, lo].add(1.0 - frac)
    w = w.at[rows, hi].add(frac)
    return w


def _resize3d_kernel(x_ref, w_ref, o_ref):
    # x_ref: (TILE_C, K)   w_ref: (K, TILE_N)   o_ref: (TILE_C, TILE_N)
    # One lane-dense MXU matmul; f32 accumulation regardless of operand dtype.
    o_ref[...] = jnp.dot(
        x_ref[...], w_ref[...], preferred_element_type=jnp.float32
    ).astype(o_ref.dtype)


def _choose_tiles(C, K, HW_out, D_out, weight_itemsize):
    """Pick (tile_c, tile_d) so block shapes obey the (8,128) rule, the weight
    block fits a ~4 MiB VMEM budget, and (when legal) the grid has >=2
    'parallel' steps for v7x's two TensorCores."""
    # Channel tile: second-to-last dim of the 2-D blocks must be a multiple of
    # 8 or equal the full C extent.
    if C % 8 == 0:
        tile_c = min(C, 256)
        if C // tile_c == 1 and C >= 16:
            tile_c = C // 2  # >=2 balanced parallel steps, still 8-aligned
    else:
        tile_c = C  # full-extent block is always legal

    # D_out tile: weight block is (K, tile_d*HW_out); its last dim must be a
    # multiple of 128 (guaranteed when HW_out % 128 == 0) or the full N.
    tile_d = D_out
    if HW_out % 128 == 0:
        budget = 4 * 1024 * 1024
        while tile_d > 1 and K * tile_d * HW_out * weight_itemsize > budget:
            tile_d = -(-tile_d // 2)
        n_c = -(-C // tile_c)
        if n_c == 1 and tile_d == D_out and D_out >= 2:
            tile_d = -(-D_out // 2)  # give v7x's 2nd TensorCore work
    return tile_c, tile_d


@functools.partial(jax.jit, static_argnames=("size", "enable_zoom"))
def resize3d(x: jnp.ndarray, size=(32, 32, 32), enable_zoom: bool = False):
    """Pallas implementation of Resize3D.forward.  x: (C, D, H, W)."""
    if not enable_zoom:
        return x  # identity path, exactly as the PyTorch module

    C, D_in, H_in, W_in = x.shape
    D_out, H_out, W_out = size
    K = D_in * H_in * W_in
    N = D_out * H_out * W_out
    HW_out = H_out * W_out

    # Compute dtype: keep bf16 operands on the bf16 MXU path, otherwise f32.
    w_dtype = jnp.bfloat16 if x.dtype == jnp.bfloat16 else jnp.float32

    # Full Kronecker weight, pre-transposed to (K, N):
    #   W_full[(d,h,w), (D,H,W)] = wd[D,d] * wh[H,h] * ww[W,w]
    wd = _interp_matrix(D_out, D_in)
    wh = _interp_matrix(H_out, H_in)
    ww = _interp_matrix(W_out, W_in)
    w_full = jnp.einsum("Dd,Hh,Ww->dhwDHW", wd, wh, ww).reshape(K, N)
    w_full = w_full.astype(w_dtype)

    # Lane-dense 2-D views for the kernel.
    x2d = x.reshape(C, K)

    tile_c, tile_d = _choose_tiles(C, K, HW_out, D_out, jnp.dtype(w_dtype).itemsize)
    tile_n = tile_d * HW_out
    grid = (pl.cdiv(C, tile_c), pl.cdiv(D_out, tile_d))

    itemsize = jnp.dtype(x.dtype).itemsize
    cost = pl.CostEstimate(
        flops=2 * C * K * N,
        transcendentals=0,
        bytes_accessed=C * K * itemsize
        + C * N * itemsize
        + K * N * jnp.dtype(w_dtype).itemsize,
    )

    grid_spec = pltpu.PrefetchScalarGridSpec(
        num_scalar_prefetch=0,
        grid=grid,
        in_specs=[
            pl.BlockSpec((tile_c, K), lambda ci, di: (ci, 0)),
            pl.BlockSpec((K, tile_n), lambda ci, di: (0, di)),
        ],
        out_specs=pl.BlockSpec((tile_c, tile_n), lambda ci, di: (ci, di)),
    )

    out2d = pl.pallas_call(
        _resize3d_kernel,
        out_shape=jax.ShapeDtypeStruct((C, N), x.dtype),
        grid_spec=grid_spec,
        compiler_params=pltpu.CompilerParams(
            dimension_semantics=("parallel", "parallel"),
            # Raise v5e's 16 MiB default scoped VMEM; matches v6e/v7x default
            # and stays well under v7x's 64 MiB physical VMEM.
            vmem_limit_bytes=32 * 1024 * 1024,
        ),
        cost_estimate=cost,
    )(x2d, w_full)

    return out2d.reshape(C, D_out, H_out, W_out)


def _resize3d_reference(x, size):
    """Plain-JAX reference with identical align_corners=True semantics."""
    D_out, H_out, W_out = size
    _, D_in, H_in, W_in = x.shape
    wd = _interp_matrix(D_out, D_in)
    wh = _interp_matrix(H_out, H_in)
    ww = _interp_matrix(W_out, W_in)
    t = jnp.einsum("cdhw,Ww->cdhW", x.astype(jnp.float32), ww)
    t = jnp.einsum("cdhW,Hh->cdHW", t, wh)
    t = jnp.einsum("cdHW,Dd->cDHW", t, wd)
    return t.astype(x.dtype)


if __name__ == "__main__":
    key = jax.random.PRNGKey(0)
    C, D, H, W = 4, 8, 8, 8
    size = (16, 16, 16)
    x = jax.random.normal(key, (C, D, H, W), dtype=jnp.float32)

    # enable_zoom=True path: trilinear resize on the MXU.
    out = jax.block_until_ready(resize3d(x, size=size, enable_zoom=True))
    assert out.shape == (C,) + size
    assert out.dtype == x.dtype

    ref = _resize3d_reference(x, size)
    assert jnp.allclose(out, ref, atol=1e-4, rtol=1e-4), float(
        jnp.max(jnp.abs(out.astype(jnp.float32) - ref.astype(jnp.float32)))
    )

    # enable_zoom=False path: identity.
    ident = jax.block_until_ready(resize3d(x, size=size, enable_zoom=False))
    assert jnp.array_equal(ident, x)

    print("KERNEL_OK")
</pallas_src>

<mosaic_0001>
module attributes {stable_mosaic.version = 11 : i64} {
  func.func private @main(%arg0: i32) attributes {dimension_semantics = [#tpu.dimension_semantics<core_parallel>], iteration_bounds = array<i64: 2>, tpu.core_type = #tpu.core_type<sc_scalar_subcore>, window_params = []} {
    return
  }
}

module attributes {stable_mosaic.version = 11 : i64} {
  func.func private @main(%arg0: i32) attributes {dimension_semantics = [#tpu.dimension_semantics<core_parallel>], iteration_bounds = array<i64: 2>, tpu.core_type = #tpu.core_type<sc_scalar_subcore>, window_params = []} {
    return
  }
}

module attributes {stable_mosaic.version = 11 : i64} {
  func.func @_resize3d_kernel(%arg0: i32, %arg1: i32, %arg2: memref<4x512xf32, #tpu.memory_space<vmem>>, %arg3: memref<512x2048xf32, #tpu.memory_space<vmem>>, %arg4: memref<4x2048xf32, #tpu.memory_space<vmem>>) attributes {dimension_semantics = [#tpu.dimension_semantics<parallel>, #tpu.dimension_semantics<parallel>], iteration_bounds = array<i64: 1, 2>, scalar_prefetch = 0 : i64, scratch_operands = 0 : i64, tpu.core_type = #tpu.core_type<tc>, window_params = [{transform_indices = @transform_0, window_bounds = array<i64: 4, 512>}, {transform_indices = @transform_1, window_bounds = array<i64: 512, 2048>}, {transform_indices = @transform_2, window_bounds = array<i64: 4, 2048>}]} {
    %c0 = arith.constant 0 : index
    %c0_0 = arith.constant 0 : index
    %0 = vector.load %arg2[%c0, %c0_0] : memref<4x512xf32, #tpu.memory_space<vmem>>, vector<4x512xf32>
    %c0_1 = arith.constant 0 : index
    %c0_2 = arith.constant 0 : index
    %1 = vector.load %arg3[%c0_1, %c0_2] : memref<512x2048xf32, #tpu.memory_space<vmem>>, vector<512x2048xf32>
    %cst = arith.constant dense<0.000000e+00> : vector<4x2048xf32>
    %2 = tpu.matmul %0, %1, %cst {dimension_numbers = #tpu.dot_dimension_numbers<[1], [0], [0], [1], [0, 0, 1, 1], [], []>} : vector<4x512xf32>, vector<512x2048xf32>, vector<4x2048xf32> -> vector<4x2048xf32>
    %c0_3 = arith.constant 0 : index
    %c0_4 = arith.constant 0 : index
    %3 = vector.load %arg4[%c0_3, %c0_4] : memref<4x2048xf32, #tpu.memory_space<vmem>>, vector<4x2048xf32>
    tpu.vector_store %arg4[%c0_3, %c0_4], %2 {strides = array<i32>} : memref<4x2048xf32, #tpu.memory_space<vmem>>, vector<4x2048xf32>,
    return
  }
  func.func @transform_0(%arg0: i32, %arg1: i32) -> (i32, i32) {
    %c0_i32 = arith.constant 0 : i32
    %c0_i32_0 = arith.constant 0 : i32
    return %arg0, %c0_i32 : i32, i32
  }
  func.func @transform_1(%arg0: i32, %arg1: i32) -> (i32, i32) {
    %c0_i32 = arith.constant 0 : i32
    %c0_i32_0 = arith.constant 0 : i32
    return %c0_i32, %arg1 : i32, i32
  }
  func.func @transform_2(%arg0: i32, %arg1: i32) -> (i32, i32) {
    %c0_i32 = arith.constant 0 : i32
    return %arg0, %arg1 : i32, i32
  }
}

</mosaic_0001>

<bundles_post_ra>
// kernel: resize3d.1
= control target key start
LH: loop header
LB: loop body
LE: loop exit
PB: predicated region body
PF: predicated region fallthrough
CT: control target
= control target key end

     0   :  { %s5721_s9 = smov 0   ;;  %s5723_s10 = smov 0   ;;  %s8942_s0 = inlined_call_operand.vmem [shape: f32[4,512], index: 0, kind: input, shape index: {}]   ;;  %s8943_s1 = inlined_call_operand.vmem [shape: f32[512,4096], index: 1, kind: input, shape index: {}]   ;;  %s8944_s2 = inlined_call_operand.vmem [shape: f32[4,4096], index: 2, kind: output, shape index: {}]  }
   0x1   :  { %s5725_s11 = smov 0   ;;  %s5727_s12 = smov 0  }
   0x2   :  { %s5729_s13 = smov 0  }
   0x3 LB: > { %s21_s14 = sadd.s32 1, %s5700_s12  ;;  %p64_p1 = scmp.ne.s32.totalorder %s5692_s10, %s5688_s9  ;;  %s5704_s13 = sphi %s5729_s13, %s12_s13   ;;  %s5700_s12 = sphi %s5727_s12, %s8949_s12   ;;  %s5696_s11 = sphi %s5725_s11, %s8948_s11   ;;  %s5692_s10 = sphi %s5723_s10, %s8947_s10   ;;  %s5688_s9 = sphi %s5721_s9, %s8946_s9  }
   0x4   : > { %p22_p0 = scmp.ge.s32.totalorder %s21_s14, 2  ;;  %p65_p2 = scmp.eq.s32.totalorder %s5704_s13, 0 }
   0x5   : > { %s57_s16 = sadd.s32 1, %s5692_s10  ;;  %p4568_p5 = scmp.ge.s32.totalorder %s5704_s13, 2 }
   0x6   : > { %s8951_s14 = smov (%p22_p0, %s21_s14), 0  ;;  %p66_p3 = por %p65_p2, %p64_p1 }
   0x7   : > { %s54_s15 = ssub.s32 %s5700_s12, %s8951_s14  ;;  %126 = sbr.rel (%p4568_p5) target bundleno = 530 (0x212), region = 20 }
   0x8   : > { %p55_p4 = scmp.eq.s32.totalorder %s54_s15, 0 }
   0xa   : > { %s5756_s17 = scalar_select %p55_p4, %s5692_s10, %s57_s16  }
   0xe   : > { %129 = sbr.rel (!%p66_p3) target bundleno = 530 (0x212), region = 24  ;;  %s131_s18 = sand.u32 (%p66_p3), 1, %s5692_s10  }
   0xf   : > { %s4578_s19 = sshll.u32 (%p66_p3), %s5700_s12, 7  ;;  %s4569_s20 = sshll.u32 (%p66_p3), %s131_s18, 13 }
  0x10   : > { %s5764_s23 = scalar_lea.vmem (%p66_p3), %s8943_s1, %s4578_s19  ;;  %s5769_s24 = scalar_lea.vmem (%p66_p3), [#allocation2], %s4569_s20 }
  0x11   : > { %v149_v0 = vld [vmem:[%s5764_s23] sm:$0xff] (%p66_p3)  ;;  %v151_v1 = vld [vmem:[%s5764_s23 + $0x8] sm:$0xff] (%p66_p3)  ;;  %v153_v2 = vld [vmem:[%s5764_s23 + $0x10] sm:$0xff] (%p66_p3) }
  0x12   : > { %150 = vst [vmem:[%s5769_s24] sm:$0xff] (%p66_p3), %v149_v0  ;;  %152 = vst [vmem:[%s5769_s24 + $0x8] sm:$0xff] (%p66_p3), %v151_v1  ;;  %v155_v3 = vld [vmem:[%s5764_s23 + $0x18] sm:$0xff] (%p66_p3)  ;;  %v157_v4 = vld [vmem:[%s5764_s23 + $0x20] sm:$0xff] (%p66_p3) }
  0x13   : > { %154 = vst [vmem:[%s5769_s24 + $0x10] sm:$0xff] (%p66_p3), %v153_v2  ;;  %v159_v5 = vld [vmem:[%s5764_s23 + $0x28] sm:$0xff] (%p66_p3)  ;;  %156 = vst [vmem:[%s5769_s24 + $0x18] sm:$0xff] (%p66_p3), %v155_v3  ;;  %v161_v6 = vld [vmem:[%s5764_s23 + $0x30] sm:$0xff] (%p66_p3) }
  0x14   : > { %158 = vst [vmem:[%s5769_s24 + $0x20] sm:$0xff] (%p66_p3), %v157_v4  ;;  %160 = vst [vmem:[%s5769_s24 + $0x28] sm:$0xff] (%p66_p3), %v159_v5  ;;  %v163_v7 = vld [vmem:[%s5764_s23 + $0x38] sm:$0xff] (%p66_p3)  ;;  %v165_v8 = vld [vmem:[%s5764_s23 + $0x40] sm:$0xff] (%p66_p3) }
  0x15   : > { %162 = vst [vmem:[%s5769_s24 + $0x30] sm:$0xff] %v161_v6  ;;  %164 = vst [vmem:[%s5769_s24 + $0x38] sm:$0xff] %v163_v7  ;;  %v167_v9 = vld [vmem:[%s5764_s23 + $0x48] sm:$0xff]  ;;  %v169_v10 = vld [vmem:[%s5764_s23 + $0x50] sm:$0xff] }
  0x16   : > { %166 = vst [vmem:[%s5769_s24 + $0x40] sm:$0xff] %v165_v8  ;;  %v171_v11 = vld [vmem:[%s5764_s23 + $0x58] sm:$0xff]  ;;  %168 = vst [vmem:[%s5769_s24 + $0x48] sm:$0xff] %v167_v9  ;;  %v173_v12 = vld [vmem:[%s5764_s23 + $0x60] sm:$0xff] }
  0x17   : > { %170 = vst [vmem:[%s5769_s24 + $0x50] sm:$0xff] %v169_v10  ;;  %172 = vst [vmem:[%s5769_s24 + $0x58] sm:$0xff] %v171_v11  ;;  %v175_v13 = vld [vmem:[%s5764_s23 + $0x68] sm:$0xff]  ;;  %v177_v14 = vld [vmem:[%s5764_s23 + $0x70] sm:$0xff] }
  0x18   : > { %174 = vst [vmem:[%s5769_s24 + $0x60] sm:$0xff] %v173_v12  ;;  %176 = vst [vmem:[%s5769_s24 + $0x68] sm:$0xff] %v175_v13  ;;  %v179_v15 = vld [vmem:[%s5764_s23 + $0x78] sm:$0xff]  ;;  %v181_v16 = vld [vmem:[%s5764_s23 + $0x100] sm:$0xff] }
  0x19   : > { %178 = vst [vmem:[%s5769_s24 + $0x70] sm:$0xff] %v177_v14  ;;  %v183_v17 = vld [vmem:[%s5764_s23 + $0x108] sm:$0xff]  ;;  %180 = vst [vmem:[%s5769_s24 + $0x78] sm:$0xff] %v179_v15  ;;  %v185_v18 = vld [vmem:[%s5764_s23 + $0x110] sm:$0xff] }
  0x1a   : > { %182 = vst [vmem:[%s5769_s24 + $0x80] sm:$0xff] %v181_v16  ;;  %184 = vst [vmem:[%s5769_s24 + $0x88] sm:$0xff] %v183_v17  ;;  %v187_v19 = vld [vmem:[%s5764_s23 + $0x118] sm:$0xff]  ;;  %v189_v20 = vld [vmem:[%s5764_s23 + $0x120] sm:$0xff] }
  0x1b   : > { %186 = vst [vmem:[%s5769_s24 + $0x90] sm:$0xff] %v185_v18  ;;  %188 = vst [vmem:[%s5769_s24 + $0x98] sm:$0xff] %v187_v19  ;;  %v191_v21 = vld [vmem:[%s5764_s23 + $0x128] sm:$0xff]  ;;  %v193_v22 = vld [vmem:[%s5764_s23 + $0x130] sm:$0xff] }
  0x1c   : > { %190 = vst [vmem:[%s5769_s24 + $0xa0] sm:$0xff] %v189_v20  ;;  %v195_v23 = vld [vmem:[%s5764_s23 + $0x138] sm:$0xff]  ;;  %192 = vst [vmem:[%s5769_s24 + $0xa8] sm:$0xff] %v191_v21  ;;  %v197_v24 = vld [vmem:[%s5764_s23 + $0x140] sm:$0xff] }
  0x1d   : > { %194 = vst [vmem:[%s5769_s24 + $0xb0] sm:$0xff] %v193_v22  ;;  %196 = vst [vmem:[%s5769_s24 + $0xb8] sm:$0xff] %v195_v23  ;;  %v199_v25 = vld [vmem:[%s5764_s23 + $0x148] sm:$0xff]  ;;  %v201_v26 = vld [vmem:[%s5764_s23 + $0x150] sm:$0xff] }
  0x1e   : > { %198 = vst [vmem:[%s5769_s24 + $0xc0] sm:$0xff] %v197_v24  ;;  %200 = vst [vmem:[%s5769_s24 + $0xc8] sm:$0xff] %v199_v25  ;;  %v203_v27 = vld [vmem:[%s5764_s23 + $0x158] sm:$0xff]  ;;  %v205_v28 = vld [vmem:[%s5764_s23 + $0x160] sm:$0xff] }
  0x1f   : > { %202 = vst [vmem:[%s5769_s24 + $0xd0] sm:$0xff] %v201_v26  ;;  %v207_v29 = vld [vmem:[%s5764_s23 + $0x168] sm:$0xff]  ;;  %204 = vst [vmem:[%s5769_s24 + $0xd8] sm:$0xff] %v203_v27  ;;  %v209_v30 = vld [vmem:[%s5764_s23 + $0x170] sm:$0xff] }
  0x20   : > { %206 = vst [vmem:[%s5769_s24 + $0xe0] sm:$0xff] %v205_v28  ;;  %208 = vst [vmem:[%s5769_s24 + $0xe8] sm:$0xff] %v207_v29  ;;  %v211_v31 = vld [vmem:[%s5764_s23 + $0x178] sm:$0xff]  ;;  %v213_v32 = vld [vmem:[%s5764_s23 + $0x200] sm:$0xff] }
  0x21   : > { %210 = vst [vmem:[%s5769_s24 + $0xf0] sm:$0xff] %v209_v30  ;;  %212 = vst [vmem:[%s5769_s24 + $0xf8] sm:$0xff] %v211_v31  ;;  %v215_v33 = vld [vmem:[%s5764_s23 + $0x208] sm:$0xff]  ;;  %v217_v34 = vld [vmem:[%s5764_s23 + $0x210] sm:$0xff] }
  0x22   : > { %214 = vst [vmem:[%s5769_s24 + $0x100] sm:$0xff] %v213_v32  ;;  %v219_v35 = vld [vmem:[%s5764_s23 + $0x218] sm:$0xff]  ;;  %216 = vst [vmem:[%s5769_s24 + $0x108] sm:$0xff] %v215_v33  ;;  %v221_v36 = vld [vmem:[%s5764_s23 + $0x220] sm:$0xff] }
  0x23   : > { %218 = vst [vmem:[%s5769_s24 + $0x110] sm:$0xff] %v217_v34  ;;  %220 = vst [vmem:[%s5769_s24 + $0x118] sm:$0xff] %v219_v35  ;;  %v223_v37 = vld [vmem:[%s5764_s23 + $0x228] sm:$0xff]  ;;  %v225_v38 = vld [vmem:[%s5764_s23 + $0x230] sm:$0xff] }
  0x24   : > { %222 = vst [vmem:[%s5769_s24 + $0x120] sm:$0xff] %v221_v36  ;;  %224 = vst [vmem:[%s5769_s24 + $0x128] sm:$0xff] %v223_v37  ;;  %v227_v39 = vld [vmem:[%s5764_s23 + $0x238] sm:$0xff]  ;;  %v229_v40 = vld [vmem:[%s5764_s23 + $0x240] sm:$0xff] }
  0x25   : > { %226 = vst [vmem:[%s5769_s24 + $0x130] sm:$0xff] %v225_v38  ;;  %v231_v41 = vld [vmem:[%s5764_s23 + $0x248] sm:$0xff]  ;;  %228 = vst [vmem:[%s5769_s24 + $0x138] sm:$0xff] %v227_v39  ;;  %v233_v42 = vld [vmem:[%s5764_s23 + $0x250] sm:$0xff] }
  0x26   : > { %230 = vst [vmem:[%s5769_s24 + $0x140] sm:$0xff] %v229_v40  ;;  %232 = vst [vmem:[%s5769_s24 + $0x148] sm:$0xff] %v231_v41  ;;  %v235_v43 = vld [vmem:[%s5764_s23 + $0x258] sm:$0xff]  ;;  %v237_v44 = vld [vmem:[%s5764_s23 + $0x260] sm:$0xff] }
  0x27   : > { %234 = vst [vmem:[%s5769_s24 + $0x150] sm:$0xff] %v233_v42  ;;  %236 = vst [vmem:[%s5769_s24 + $0x158] sm:$0xff] %v235_v43  ;;  %v239_v45 = vld [vmem:[%s5764_s23 + $0x268] sm:$0xff]  ;;  %v241_v46 = vld [vmem:[%s5764_s23 + $0x270] sm:$0xff] }
  0x28   : > { %238 = vst [vmem:[%s5769_s24 + $0x160] sm:$0xff] %v237_v44  ;;  %v243_v47 = vld [vmem:[%s5764_s23 + $0x278] sm:$0xff]  ;;  %240 = vst [vmem:[%s5769_s24 + $0x168] sm:$0xff] %v239_v45  ;;  %v245_v48 = vld [vmem:[%s5764_s23 + $0x300] sm:$0xff] }
  0x29   : > { %242 = vst [vmem:[%s5769_s24 + $0x170] sm:$0xff] %v241_v46  ;;  %244 = vst [vmem:[%s5769_s24 + $0x178] sm:$0xff] %v243_v47  ;;  %v247_v49 = vld [vmem:[%s5764_s23 + $0x308] sm:$0xff]  ;;  %v249_v50 = vld [vmem:[%s5764_s23 + $0x310] sm:$0xff] }
  0x2a   : > { %246 = vst [vmem:[%s5769_s24 + $0x180] sm:$0xff] %v245_v48  ;;  %248 = vst [vmem:[%s5769_s24 + $0x188] sm:$0xff] %v247_v49  ;;  %v251_v51 = vld [vmem:[%s5764_s23 + $0x318] sm:$0xff]  ;;  %v253_v52 = vld [vmem:[%s5764_s23 + $0x320] sm:$0xff] }
  0x2b   : > { %250 = vst [vmem:[%s5769_s24 + $0x190] sm:$0xff] %v249_v50  ;;  %v255_v53 = vld [vmem:[%s5764_s23 + $0x328] sm:$0xff]  ;;  %252 = vst [vmem:[%s5769_s24 + $0x198] sm:$0xff] %v251_v51  ;;  %v257_v54 = vld [vmem:[%s5764_s23 + $0x330] sm:$0xff] }
  0x2c   : > { %254 = vst [vmem:[%s5769_s24 + $0x1a0] sm:$0xff] %v253_v52  ;;  %256 = vst [vmem:[%s5769_s24 + $0x1a8] sm:$0xff] %v255_v53  ;;  %v259_v55 = vld [vmem:[%s5764_s23 + $0x338] sm:$0xff]  ;;  %v261_v56 = vld [vmem:[%s5764_s23 + $0x340] sm:$0xff] }
  0x2d   : > { %258 = vst [vmem:[%s5769_s24 + $0x1b0] sm:$0xff] %v257_v54  ;;  %260 = vst [vmem:[%s5769_s24 + $0x1b8] sm:$0xff] %v259_v55  ;;  %v263_v57 = vld [vmem:[%s5764_s23 + $0x348] sm:$0xff]  ;;  %v265_v58 = vld [vmem:[%s5764_s23 + $0x350] sm:$0xff] }
  0x2e   : > { %262 = vst [vmem:[%s5769_s24 + $0x1c0] sm:$0xff] %v261_v56  ;;  %v267_v59 = vld [vmem:[%s5764_s23 + $0x358] sm:$0xff]  ;;  %264 = vst [vmem:[%s5769_s24 + $0x1c8] sm:$0xff] %v263_v57  ;;  %v269_v60 = vld [vmem:[%s5764_s23 + $0x360] sm:$0xff] }
  0x2f   : > { %266 = vst [vmem:[%s5769_s24 + $0x1d0] sm:$0xff] %v265_v58  ;;  %268 = vst [vmem:[%s5769_s24 + $0x1d8] sm:$0xff] %v267_v59  ;;  %v271_v61 = vld [vmem:[%s5764_s23 + $0x368] sm:$0xff]  ;;  %v273_v62 = vld [vmem:[%s5764_s23 + $0x370] sm:$0xff] }
  0x30   : > { %270 = vst [vmem:[%s5769_s24 + $0x1e0] sm:$0xff] %v269_v60  ;;  %272 = vst [vmem:[%s5769_s24 + $0x1e8] sm:$0xff] %v271_v61  ;;  %v275_v63 = vld [vmem:[%s5764_s23 + $0x378] sm:$0xff]  ;;  %v277_v0 = vld [vmem:[%s5764_s23 + $0x400] sm:$0xff] }
  0x31   : > { %274 = vst [vmem:[%s5769_s24 + $0x1f0] sm:$0xff] %v273_v62  ;;  %v279_v1 = vld [vmem:[%s5764_s23 + $0x408] sm:$0xff]  ;;  %276 = vst [vmem:[%s5769_s24 + $0x1f8] sm:$0xff] %v275_v63  ;;  %v281_v2 = vld [vmem:[%s5764_s23 + $0x410] sm:$0xff] }
  0x32   : > { %278 = vst [vmem:[%s5769_s24 + $0x200] sm:$0xff] %v277_v0  ;;  %280 = vst [vmem:[%s5769_s24 + $0x208] sm:$0xff] %v279_v1  ;;  %v283_v3 = vld [vmem:[%s5764_s23 + $0x418] sm:$0xff]  ;;  %v285_v4 = vld [vmem:[%s5764_s23 + $0x420] sm:$0xff] }
  0x33   : > { %282 = vst [vmem:[%s5769_s24 + $0x210] sm:$0xff] %v281_v2  ;;  %284 = vst [vmem:[%s5769_s24 + $0x218] sm:$0xff] %v283_v3  ;;  %v287_v5 = vld [vmem:[%s5764_s23 + $0x428] sm:$0xff]  ;;  %v289_v6 = vld [vmem:[%s5764_s23 + $0x430] sm:$0xff] }
  0x34   : > { %286 = vst [vmem:[%s5769_s24 + $0x220] sm:$0xff] %v285_v4  ;;  %v291_v7 = vld [vmem:[%s5764_s23 + $0x438] sm:$0xff]  ;;  %288 = vst [vmem:[%s5769_s24 + $0x228] sm:$0xff] %v287_v5  ;;  %v293_v8 = vld [vmem:[%s5764_s23 + $0x440] sm:$0xff] }
  0x35   : > { %290 = vst [vmem:[%s5769_s24 + $0x230] sm:$0xff] %v289_v6  ;;  %292 = vst [vmem:[%s5769_s24 + $0x238] sm:$0xff] %v291_v7  ;;  %v295_v9 = vld [vmem:[%s5764_s23 + $0x448] sm:$0xff]  ;;  %v297_v10 = vld [vmem:[%s5764_s23 + $0x450] sm:$0xff] }
  0x36   : > { %294 = vst [vmem:[%s5769_s24 + $0x240] sm:$0xff] %v293_v8  ;;  %296 = vst [vmem:[%s5769_s24 + $0x248] sm:$0xff] %v295_v9  ;;  %v299_v11 = vld [vmem:[%s5764_s23 + $0x458] sm:$0xff]  ;;  %v301_v12 = vld [vmem:[%s5764_s23 + $0x460] sm:$0xff] }
  0x37   : > { %298 = vst [vmem:[%s5769_s24 + $0x250] sm:$0xff] %v297_v10  ;;  %v303_v13 = vld [vmem:[%s5764_s23 + $0x468] sm:$0xff]  ;;  %300 = vst [vmem:[%s5769_s24 + $0x258] sm:$0xff] %v299_v11  ;;  %v305_v14 = vld [vmem:[%s5764_s23 + $0x470] sm:$0xff] }
  0x38   : > { %302 = vst [vmem:[%s5769_s24 + $0x260] sm:$0xff] %v301_v12  ;;  %304 = vst [vmem:[%s5769_s24 + $0x268] sm:$0xff] %v303_v13  ;;  %v307_v15 = vld [vmem:[%s5764_s23 + $0x478] sm:$0xff]  ;;  %v309_v16 = vld [vmem:[%s5764_s23 + $0x500] sm:$0xff] }
  0x39   : > { %306 = vst [vmem:[%s5769_s24 + $0x270] sm:$0xff] %v305_v14  ;;  %308 = vst [vmem:[%s5769_s24 + $0x278] sm:$0xff] %v307_v15  ;;  %v311_v17 = vld [vmem:[%s5764_s23 + $0x508] sm:$0xff]  ;;  %v313_v18 = vld [vmem:[%s5764_s23 + $0x510] sm:$0xff] }
  0x3a   : > { %310 = vst [vmem:[%s5769_s24 + $0x280] sm:$0xff] %v309_v16  ;;  %v315_v19 = vld [vmem:[%s5764_s23 + $0x518] sm:$0xff]  ;;  %312 = vst [vmem:[%s5769_s24 + $0x288] sm:$0xff] %v311_v17  ;;  %v317_v20 = vld [vmem:[%s5764_s23 + $0x520] sm:$0xff] }
  0x3b   : > { %314 = vst [vmem:[%s5769_s24 + $0x290] sm:$0xff] %v313_v18  ;;  %316 = vst [vmem:[%s5769_s24 + $0x298] sm:$0xff] %v315_v19  ;;  %v319_v21 = vld [vmem:[%s5764_s23 + $0x528] sm:$0xff]  ;;  %v321_v22 = vld [vmem:[%s5764_s23 + $0x530] sm:$0xff] }
  0x3c   : > { %318 = vst [vmem:[%s5769_s24 + $0x2a0] sm:$0xff] %v317_v20  ;;  %320 = vst [vmem:[%s5769_s24 + $0x2a8] sm:$0xff] %v319_v21  ;;  %v323_v23 = vld [vmem:[%s5764_s23 + $0x538] sm:$0xff]  ;;  %v325_v24 = vld [vmem:[%s5764_s23 + $0x540] sm:$0xff] }
  0x3d   : > { %322 = vst [vmem:[%s5769_s24 + $0x2b0] sm:$0xff] %v321_v22  ;;  %v327_v25 = vld [vmem:[%s5764_s23 + $0x548] sm:$0xff]  ;;  %324 = vst [vmem:[%s5769_s24 + $0x2b8] sm:$0xff] %v323_v23  ;;  %v329_v26 = vld [vmem:[%s5764_s23 + $0x550] sm:$0xff] }
  0x3e   : > { %326 = vst [vmem:[%s5769_s24 + $0x2c0] sm:$0xff] %v325_v24  ;;  %328 = vst [vmem:[%s5769_s24 + $0x2c8] sm:$0xff] %v327_v25  ;;  %v331_v27 = vld [vmem:[%s5764_s23 + $0x558] sm:$0xff]  ;;  %v333_v28 = vld [vmem:[%s5764_s23 + $0x560] sm:$0xff] }
  0x3f   : > { %330 = vst [vmem:[%s5769_s24 + $0x2d0] sm:$0xff] %v329_v26  ;;  %332 = vst [vmem:[%s5769_s24 + $0x2d8] sm:$0xff] %v331_v27  ;;  %v335_v29 = vld [vmem:[%s5764_s23 + $0x568] sm:$0xff]  ;;  %v337_v30 = vld [vmem:[%s5764_s23 + $0x570] sm:$0xff] }
  0x40   : > { %334 = vst [vmem:[%s5769_s24 + $0x2e0] sm:$0xff] %v333_v28  ;;  %v339_v31 = vld [vmem:[%s5764_s23 + $0x578] sm:$0xff]  ;;  %336 = vst [vmem:[%s5769_s24 + $0x2e8] sm:$0xff] %v335_v29  ;;  %v341_v32 = vld [vmem:[%s5764_s23 + $0x600] sm:$0xff] }
  0x41   : > { %338 = vst [vmem:[%s5769_s24 + $0x2f0] sm:$0xff] %v337_v30  ;;  %340 = vst [vmem:[%s5769_s24 + $0x2f8] sm:$0xff] %v339_v31  ;;  %v343_v33 = vld [vmem:[%s5764_s23 + $0x608] sm:$0xff]  ;;  %v345_v34 = vld [vmem:[%s5764_s23 + $0x610] sm:$0xff] }
  0x42   : > { %342 = vst [vmem:[%s5769_s24 + $0x300] sm:$0xff] %v341_v32  ;;  %344 = vst [vmem:[%s5769_s24 + $0x308] sm:$0xff] %v343_v33  ;;  %v347_v35 = vld [vmem:[%s5764_s23 + $0x618] sm:$0xff]  ;;  %v349_v36 = vld [vmem:[%s5764_s23 + $0x620] sm:$0xff] }
  0x43   : > { %346 = vst [vmem:[%s5769_s24 + $0x310] sm:$0xff] %v345_v34  ;;  %v351_v37 = vld [vmem:[%s5764_s23 + $0x628] sm:$0xff]  ;;  %348 = vst [vmem:[%s5769_s24 + $0x318] sm:$0xff] %v347_v35  ;;  %v353_v38 = vld [vmem:[%s5764_s23 + $0x630] sm:$0xff] }
  0x44   : > { %350 = vst [vmem:[%s5769_s24 + $0x320] sm:$0xff] %v349_v36  ;;  %352 = vst [vmem:[%s5769_s24 + $0x328] sm:$0xff] %v351_v37  ;;  %v355_v39 = vld [vmem:[%s5764_s23 + $0x638] sm:$0xff]  ;;  %v357_v40 = vld [vmem:[%s5764_s23 + $0x640] sm:$0xff] }
  0x45   : > { %354 = vst [vmem:[%s5769_s24 + $0x330] sm:$0xff] %v353_v38  ;;  %356 = vst [vmem:[%s5769_s24 + $0x338] sm:$0xff] %v355_v39  ;;  %v359_v41 = vld [vmem:[%s5764_s23 + $0x648] sm:$0xff]  ;;  %v361_v42 = vld [vmem:[%s5764_s23 + $0x650] sm:$0xff] }
  0x46   : > { %358 = vst [vmem:[%s5769_s24 + $0x340] sm:$0xff] %v357_v40  ;;  %v363_v43 = vld [vmem:[%s5764_s23 + $0x658] sm:$0xff]  ;;  %360 = vst [vmem:[%s5769_s24 + $0x348] sm:$0xff] %v359_v41  ;;  %v365_v44 = vld [vmem:[%s5764_s23 + $0x660] sm:$0xff] }
  0x47   : > { %362 = vst [vmem:[%s5769_s24 + $0x350] sm:$0xff] %v361_v42  ;;  %364 = vst [vmem:[%s5769_s24 + $0x358] sm:$0xff] %v363_v43  ;;  %v367_v45 = vld [vmem:[%s5764_s23 + $0x668] sm:$0xff]  ;;  %v369_v46 = vld [vmem:[%s5764_s23 + $0x670] sm:$0xff] }
  0x48   : > { %366 = vst [vmem:[%s5769_s24 + $0x360] sm:$0xff] %v365_v44  ;;  %368 = vst [vmem:[%s5769_s24 + $0x368] sm:$0xff] %v367_v45  ;;  %v371_v47 = vld [vmem:[%s5764_s23 + $0x678] sm:$0xff]  ;;  %v373_v48 = vld [vmem:[%s5764_s23 + $0x700] sm:$0xff] }
  0x49   : > { %370 = vst [vmem:[%s5769_s24 + $0x370] sm:$0xff] %v369_v46  ;;  %v375_v49 = vld [vmem:[%s5764_s23 + $0x708] sm:$0xff]  ;;  %372 = vst [vmem:[%s5769_s24 + $0x378] sm:$0xff] %v371_v47  ;;  %v377_v50 = vld [vmem:[%s5764_s23 + $0x710] sm:$0xff] }
  0x4a   : > { %374 = vst [vmem:[%s5769_s24 + $0x380] sm:$0xff] %v373_v48  ;;  %376 = vst [vmem:[%s5769_s24 + $0x388] sm:$0xff] %v375_v49  ;;  %v379_v51 = vld [vmem:[%s5764_s23 + $0x718] sm:$0xff]  ;;  %v381_v52 = vld [vmem:[%s5764_s23 + $0x720] sm:$0xff] }
  0x4b   : > { %378 = vst [vmem:[%s5769_s24 + $0x390] sm:$0xff] %v377_v50  ;;  %380 = vst [vmem:[%s5769_s24 + $0x398] sm:$0xff] %v379_v51  ;;  %v383_v53 = vld [vmem:[%s5764_s23 + $0x728] sm:$0xff]  ;;  %v385_v54 = vld [vmem:[%s5764_s23 + $0x730] sm:$0xff] }
  0x4c   : > { %382 = vst [vmem:[%s5769_s24 + $0x3a0] sm:$0xff] %v381_v52  ;;  %v387_v55 = vld [vmem:[%s5764_s23 + $0x738] sm:$0xff]  ;;  %384 = vst [vmem:[%s5769_s24 + $0x3a8] sm:$0xff] %v383_v53  ;;  %v389_v56 = vld [vmem:[%s5764_s23 + $0x740] sm:$0xff] }
  0x4d   : > { %386 = vst [vmem:[%s5769_s24 + $0x3b0] sm:$0xff] %v385_v54  ;;  %388 = vst [vmem:[%s5769_s24 + $0x3b8] sm:$0xff] %v387_v55  ;;  %v391_v57 = vld [vmem:[%s5764_s23 + $0x748] sm:$0xff]  ;;  %v393_v58 = vld [vmem:[%s5764_s23 + $0x750] sm:$0xff] }
  0x4e   : > { %390 = vst [vmem:[%s5769_s24 + $0x3c0] sm:$0xff] %v389_v56  ;;  %392 = vst [vmem:[%s5769_s24 + $0x3c8] sm:$0xff] %v391_v57  ;;  %v395_v59 = vld [vmem:[%s5764_s23 + $0x758] sm:$0xff]  ;;  %v397_v60 = vld [vmem:[%s5764_s23 + $0x760] sm:$0xff] }
  0x4f   : > { %394 = vst [vmem:[%s5769_s24 + $0x3d0] sm:$0xff] %v393_v58  ;;  %v399_v61 = vld [vmem:[%s5764_s23 + $0x768] sm:$0xff]  ;;  %396 = vst [vmem:[%s5769_s24 + $0x3d8] sm:$0xff] %v395_v59  ;;  %v401_v62 = vld [vmem:[%s5764_s23 + $0x770] sm:$0xff] }
  0x50   : > { %398 = vst [vmem:[%s5769_s24 + $0x3e0] sm:$0xff] %v397_v60  ;;  %400 = vst [vmem:[%s5769_s24 + $0x3e8] sm:$0xff] %v399_v61  ;;  %v403_v63 = vld [vmem:[%s5764_s23 + $0x778] sm:$0xff]  ;;  %v405_v0 = vld [vmem:[%s5764_s23 + $0x800] sm:$0xff] }
  0x51   : > { %402 = vst [vmem:[%s5769_s24 + $0x3f0] sm:$0xff] %v401_v62  ;;  %404 = vst [vmem:[%s5769_s24 + $0x3f8] sm:$0xff] %v403_v63  ;;  %v407_v1 = vld [vmem:[%s5764_s23 + $0x808] sm:$0xff]  ;;  %v409_v2 = vld [vmem:[%s5764_s23 + $0x810] sm:$0xff] }
  0x52   : > { %406 = vst [vmem:[%s5769_s24 + $0x400] sm:$0xff] %v405_v0  ;;  %v411_v3 = vld [vmem:[%s5764_s23 + $0x818] sm:$0xff]  ;;  %408 = vst [vmem:[%s5769_s24 + $0x408] sm:$0xff] %v407_v1  ;;  %v413_v4 = vld [vmem:[%s5764_s23 + $0x820] sm:$0xff] }
  0x53   : > { %410 = vst [vmem:[%s5769_s24 + $0x410] sm:$0xff] %v409_v2  ;;  %412 = vst [vmem:[%s5769_s24 + $0x418] sm:$0xff] %v411_v3  ;;  %v415_v5 = vld [vmem:[%s5764_s23 + $0x828] sm:$0xff]  ;;  %v417_v6 = vld [vmem:[%s5764_s23 + $0x830] sm:$0xff] }
  0x54   : > { %414 = vst [vmem:[%s5769_s24 + $0x420] sm:$0xff] %v413_v4  ;;  %416 = vst [vmem:[%s5769_s24 + $0x428] sm:$0xff] %v415_v5  ;;  %v419_v7 = vld [vmem:[%s5764_s23 + $0x838] sm:$0xff]  ;;  %v421_v8 = vld [vmem:[%s5764_s23 + $0x840] sm:$0xff] }
  0x55   : > { %418 = vst [vmem:[%s5769_s24 + $0x430] sm:$0xff] %v417_v6  ;;  %v423_v9 = vld [vmem:[%s5764_s23 + $0x848] sm:$0xff]  ;;  %420 = vst [vmem:[%s5769_s24 + $0x438] sm:$0xff] %v419_v7  ;;  %v425_v10 = vld [vmem:[%s5764_s23 + $0x850] sm:$0xff] }
  0x56   : > { %422 = vst [vmem:[%s5769_s24 + $0x440] sm:$0xff] %v421_v8  ;;  %424 = vst [vmem:[%s5769_s24 + $0x448] sm:$0xff] %v423_v9  ;;  %v427_v11 = vld [vmem:[%s5764_s23 + $0x858] sm:$0xff]  ;;  %v429_v12 = vld [vmem:[%s5764_s23 + $0x860] sm:$0xff] }
  0x57   : > { %426 = vst [vmem:[%s5769_s24 + $0x450] sm:$0xff] %v425_v10  ;;  %428 = vst [vmem:[%s5769_s24 + $0x458] sm:$0xff] %v427_v11  ;;  %v431_v13 = vld [vmem:[%s5764_s23 + $0x868] sm:$0xff]  ;;  %v433_v14 = vld [vmem:[%s5764_s23 + $0x870] sm:$0xff] }
  0x58   : > { %430 = vst [vmem:[%s5769_s24 + $0x460] sm:$0xff] %v429_v12  ;;  %v435_v15 = vld [vmem:[%s5764_s23 + $0x878] sm:$0xff]  ;;  %432 = vst [vmem:[%s5769_s24 + $0x468] sm:$0xff] %v431_v13  ;;  %v437_v16 = vld [vmem:[%s5764_s23 + $0x900] sm:$0xff] }
  0x59   : > { %434 = vst [vmem:[%s5769_s24 + $0x470] sm:$0xff] %v433_v14  ;;  %436 = vst [vmem:[%s5769_s24 + $0x478] sm:$0xff] %v435_v15  ;;  %v439_v17 = vld [vmem:[%s5764_s23 + $0x908] sm:$0xff]  ;;  %v441_v18 = vld [vmem:[%s5764_s23 + $0x910] sm:$0xff] }
  0x5a   : > { %438 = vst [vmem:[%s5769_s24 + $0x480] sm:$0xff] %v437_v16  ;;  %440 = vst [vmem:[%s5769_s24 + $0x488] sm:$0xff] %v439_v17  ;;  %v443_v19 = vld [vmem:[%s5764_s23 + $0x918] sm:$0xff]  ;;  %v445_v20 = vld [vmem:[%s5764_s23 + $0x920] sm:$0xff] }
  0x5b   : > { %442 = vst [vmem:[%s5769_s24 + $0x490] sm:$0xff] %v441_v18  ;;  %v447_v21 = vld [vmem:[%s5764_s23 + $0x928] sm:$0xff]  ;;  %444 = vst [vmem:[%s5769_s24 + $0x498] sm:$0xff] %v443_v19  ;;  %v449_v22 = vld [vmem:[%s5764_s23 + $0x930] sm:$0xff] }
  0x5c   : > { %446 = vst [vmem:[%s5769_s24 + $0x4a0] sm:$0xff] %v445_v20  ;;  %448 = vst [vmem:[%s5769_s24 + $0x4a8] sm:$0xff] %v447_v21  ;;  %v451_v23 = vld [vmem:[%s5764_s23 + $0x938] sm:$0xff]  ;;  %v453_v24 = vld [vmem:[%s5764_s23 + $0x940] sm:$0xff] }
  0x5d   : > { %450 = vst [vmem:[%s5769_s24 + $0x4b0] sm:$0xff] %v449_v22  ;;  %452 = vst [vmem:[%s5769_s24 + $0x4b8] sm:$0xff] %v451_v23  ;;  %v455_v25 = vld [vmem:[%s5764_s23 + $0x948] sm:$0xff]  ;;  %v457_v26 = vld [vmem:[%s5764_s23 + $0x950] sm:$0xff] }
  0x5e   : > { %454 = vst [vmem:[%s5769_s24 + $0x4c0] sm:$0xff] %v453_v24  ;;  %v459_v27 = vld [vmem:[%s5764_s23 + $0x958] sm:$0xff]  ;;  %456 = vst [vmem:[%s5769_s24 + $0x4c8] sm:$0xff] %v455_v25  ;;  %v461_v28 = vld [vmem:[%s5764_s23 + $0x960] sm:$0xff] }
  0x5f   : > { %458 = vst [vmem:[%s5769_s24 + $0x4d0] sm:$0xff] %v457_v26  ;;  %460 = vst [vmem:[%s5769_s24 + $0x4d8] sm:$0xff] %v459_v27  ;;  %v463_v29 = vld [vmem:[%s5764_s23 + $0x968] sm:$0xff]  ;;  %v465_v30 = vld [vmem:[%s5764_s23 + $0x970] sm:$0xff] }
  0x60   : > { %462 = vst [vmem:[%s5769_s24 + $0x4e0] sm:$0xff] %v461_v28  ;;  %464 = vst [vmem:[%s5769_s24 + $0x4e8] sm:$0xff] %v463_v29  ;;  %v467_v31 = vld [vmem:[%s5764_s23 + $0x978] sm:$0xff]  ;;  %v469_v32 = vld [vmem:[%s5764_s23 + $0xa00] sm:$0xff] }
  0x61   : > { %466 = vst [vmem:[%s5769_s24 + $0x4f0] sm:$0xff] %v465_v30  ;;  %v471_v33 = vld [vmem:[%s5764_s23 + $0xa08] sm:$0xff]  ;;  %468 = vst [vmem:[%s5769_s24 + $0x4f8] sm:$0xff] %v467_v31  ;;  %v473_v34 = vld [vmem:[%s5764_s23 + $0xa10] sm:$0xff] }
  0x62   : > { %470 = vst [vmem:[%s5769_s24 + $0x500] sm:$0xff] %v469_v32  ;;  %472 = vst [vmem:[%s5769_s24 + $0x508] sm:$0xff] %v471_v33  ;;  %v475_v35 = vld [vmem:[%s5764_s23 + $0xa18] sm:$0xff]  ;;  %v477_v36 = vld [vmem:[%s5764_s23 + $0xa20] sm:$0xff] }
  0x63   : > { %474 = vst [vmem:[%s5769_s24 + $0x510] sm:$0xff] %v473_v34  ;;  %476 = vst [vmem:[%s5769_s24 + $0x518] sm:$0xff] %v475_v35  ;;  %v479_v37 = vld [vmem:[%s5764_s23 + $0xa28] sm:$0xff]  ;;  %v481_v38 = vld [vmem:[%s5764_s23 + $0xa30] sm:$0xff] }
  0x64   : > { %478 = vst [vmem:[%s5769_s24 + $0x520] sm:$0xff] %v477_v36  ;;  %v483_v39 = vld [vmem:[%s5764_s23 + $0xa38] sm:$0xff]  ;;  %480 = vst [vmem:[%s5769_s24 + $0x528] sm:$0xff] %v479_v37  ;;  %v485_v40 = vld [vmem:[%s5764_s23 + $0xa40] sm:$0xff] }
  0x65   : > { %482 = vst [vmem:[%s5769_s24 + $0x530] sm:$0xff] %v481_v38  ;;  %484 = vst [vmem:[%s5769_s24 + $0x538] sm:$0xff] %v483_v39  ;;  %v487_v41 = vld [vmem:[%s5764_s23 + $0xa48] sm:$0xff]  ;;  %v489_v42 = vld [vmem:[%s5764_s23 + $0xa50] sm:$0xff] }
  0x66   : > { %486 = vst [vmem:[%s5769_s24 + $0x540] sm:$0xff] %v485_v40  ;;  %488 = vst [vmem:[%s5769_s24 + $0x548] sm:$0xff] %v487_v41  ;;  %v491_v43 = vld [vmem:[%s5764_s23 + $0xa58] sm:$0xff]  ;;  %v493_v44 = vld [vmem:[%s5764_s23 + $0xa60] sm:$0xff] }
  0x67   : > { %490 = vst [vmem:[%s5769_s24 + $0x550] sm:$0xff] %v489_v42  ;;  %v495_v45 = vld [vmem:[%s5764_s23 + $0xa68] sm:$0xff]  ;;  %492 = vst [vmem:[%s5769_s24 + $0x558] sm:$0xff] %v491_v43  ;;  %v497_v46 = vld [vmem:[%s5764_s23 + $0xa70] sm:$0xff] }
  0x68   : > { %494 = vst [vmem:[%s5769_s24 + $0x560] sm:$0xff] %v493_v44  ;;  %496 = vst [vmem:[%s5769_s24 + $0x568] sm:$0xff] %v495_v45  ;;  %v499_v47 = vld [vmem:[%s5764_s23 + $0xa78] sm:$0xff]  ;;  %v501_v48 = vld [vmem:[%s5764_s23 + $0xb00] sm:$0xff] }
  0x69   : > { %498 = vst [vmem:[%s5769_s24 + $0x570] sm:$0xff] %v497_v46  ;;  %500 = vst [vmem:[%s5769_s24 + $0x578] sm:$0xff] %v499_v47  ;;  %v503_v49 = vld [vmem:[%s5764_s23 + $0xb08] sm:$0xff]  ;;  %v505_v50 = vld [vmem:[%s5764_s23 + $0xb10] sm:$0xff] }
  0x6a   : > { %502 = vst [vmem:[%s5769_s24 + $0x580] sm:$0xff] %v501_v48  ;;  %v507_v51 = vld [vmem:[%s5764_s23 + $0xb18] sm:$0xff]  ;;  %504 = vst [vmem:[%s5769_s24 + $0x588] sm:$0xff] %v503_v49  ;;  %v509_v52 = vld [vmem:[%s5764_s23 + $0xb20] sm:$0xff] }
  0x6b   : > { %506 = vst [vmem:[%s5769_s24 + $0x590] sm:$0xff] %v505_v50  ;;  %508 = vst [vmem:[%s5769_s24 + $0x598] sm:$0xff] %v507_v51  ;;  %v511_v53 = vld [vmem:[%s5764_s23 + $0xb28] sm:$0xff]  ;;  %v513_v54 = vld [vmem:[%s5764_s23 + $0xb30] sm:$0xff] }
  0x6c   : > { %510 = vst [vmem:[%s5769_s24 + $0x5a0] sm:$0xff] %v509_v52  ;;  %512 = vst [vmem:[%s5769_s24 + $0x5a8] sm:$0xff] %v511_v53  ;;  %v515_v55 = vld [vmem:[%s5764_s23 + $0xb38] sm:$0xff]  ;;  %v517_v56 = vld [vmem:[%s5764_s23 + $0xb40] sm:$0xff] }
  0x6d   : > { %514 = vst [vmem:[%s5769_s24 + $0x5b0] sm:$0xff] %v513_v54  ;;  %v519_v57 = vld [vmem:[%s5764_s23 + $0xb48] sm:$0xff]  ;;  %516 = vst [vmem:[%s5769_s24 + $0x5b8] sm:$0xff] %v515_v55  ;;  %v521_v58 = vld [vmem:[%s5764_s23 + $0xb50] sm:$0xff] }
  0x6e   : > { %518 = vst [vmem:[%s5769_s24 + $0x5c0] sm:$0xff] %v517_v56  ;;  %520 = vst [vmem:[%s5769_s24 + $0x5c8] sm:$0xff] %v519_v57  ;;  %v523_v59 = vld [vmem:[%s5764_s23 + $0xb58] sm:$0xff]  ;;  %v525_v60 = vld [vmem:[%s5764_s23 + $0xb60] sm:$0xff] }
  0x6f   : > { %522 = vst [vmem:[%s5769_s24 + $0x5d0] sm:$0xff] %v521_v58  ;;  %524 = vst [vmem:[%s5769_s24 + $0x5d8] sm:$0xff] %v523_v59  ;;  %v527_v61 = vld [vmem:[%s5764_s23 + $0xb68] sm:$0xff]  ;;  %v529_v62 = vld [vmem:[%s5764_s23 + $0xb70] sm:$0xff] }
  0x70   : > { %526 = vst [vmem:[%s5769_s24 + $0x5e0] sm:$0xff] %v525_v60  ;;  %v531_v63 = vld [vmem:[%s5764_s23 + $0xb78] sm:$0xff]  ;;  %528 = vst [vmem:[%s5769_s24 + $0x5e8] sm:$0xff] %v527_v61  ;;  %v533_v0 = vld [vmem:[%s5764_s23 + $0xc00] sm:$0xff] }
  0x71   : > { %530 = vst [vmem:[%s5769_s24 + $0x5f0] sm:$0xff] %v529_v62  ;;  %532 = vst [vmem:[%s5769_s24 + $0x5f8] sm:$0xff] %v531_v63  ;;  %v535_v1 = vld [vmem:[%s5764_s23 + $0xc08] sm:$0xff]  ;;  %v537_v2 = vld [vmem:[%s5764_s23 + $0xc10] sm:$0xff] }
  0x72   : > { %534 = vst [vmem:[%s5769_s24 + $0x600] sm:$0xff] %v533_v0  ;;  %536 = vst [vmem:[%s5769_s24 + $0x608] sm:$0xff] %v535_v1  ;;  %v539_v3 = vld [vmem:[%s5764_s23 + $0xc18] sm:$0xff]  ;;  %v541_v4 = vld [vmem:[%s5764_s23 + $0xc20] sm:$0xff] }
  0x73   : > { %538 = vst [vmem:[%s5769_s24 + $0x610] sm:$0xff] %v537_v2  ;;  %v543_v5 = vld [vmem:[%s5764_s23 + $0xc28] sm:$0xff]  ;;  %540 = vst [vmem:[%s5769_s24 + $0x618] sm:$0xff] %v539_v3  ;;  %v545_v6 = vld [vmem:[%s5764_s23 + $0xc30] sm:$0xff] }
  0x74   : > { %542 = vst [vmem:[%s5769_s24 + $0x620] sm:$0xff] %v541_v4  ;;  %544 = vst [vmem:[%s5769_s24 + $0x628] sm:$0xff] %v543_v5  ;;  %v547_v7 = vld [vmem:[%s5764_s23 + $0xc38] sm:$0xff]  ;;  %v549_v8 = vld [vmem:[%s5764_s23 + $0xc40] sm:$0xff] }
  0x75   : > { %546 = vst [vmem:[%s5769_s24 + $0x630] sm:$0xff] %v545_v6  ;;  %548 = vst [vmem:[%s5769_s24 + $0x638] sm:$0xff] %v547_v7  ;;  %v551_v9 = vld [vmem:[%s5764_s23 + $0xc48] sm:$0xff]  ;;  %v553_v10 = vld [vmem:[%s5764_s23 + $0xc50] sm:$0xff] }
  0x76   : > { %550 = vst [vmem:[%s5769_s24 + $0x640] sm:$0xff] %v549_v8  ;;  %v555_v11 = vld [vmem:[%s5764_s23 + $0xc58] sm:$0xff]  ;;  %552 = vst [vmem:[%s5769_s24 + $0x648] sm:$0xff] %v551_v9  ;;  %v557_v12 = vld [vmem:[%s5764_s23 + $0xc60] sm:$0xff] }
  0x77   : > { %554 = vst [vmem:[%s5769_s24 + $0x650] sm:$0xff] %v553_v10  ;;  %556 = vst [vmem:[%s5769_s24 + $0x658] sm:$0xff] %v555_v11  ;;  %v559_v13 = vld [vmem:[%s5764_s23 + $0xc68] sm:$0xff]  ;;  %v561_v14 = vld [vmem:[%s5764_s23 + $0xc70] sm:$0xff] }
  0x78   : > { %558 = vst [vmem:[%s5769_s24 + $0x660] sm:$0xff] %v557_v12  ;;  %560 = vst [vmem:[%s5769_s24 + $0x668] sm:$0xff] %v559_v13  ;;  %v563_v15 = vld [vmem:[%s5764_s23 + $0xc78] sm:$0xff]  ;;  %v565_v16 = vld [vmem:[%s5764_s23 + $0xd00] sm:$0xff] }
  0x79   : > { %562 = vst [vmem:[%s5769_s24 + $0x670] sm:$0xff] %v561_v14  ;;  %v567_v17 = vld [vmem:[%s5764_s23 + $0xd08] sm:$0xff]  ;;  %564 = vst [vmem:[%s5769_s24 + $0x678] sm:$0xff] %v563_v15  ;;  %v569_v18 = vld [vmem:[%s5764_s23 + $0xd10] sm:$0xff] }
  0x7a   : > { %566 = vst [vmem:[%s5769_s24 + $0x680] sm:$0xff] %v565_v16  ;;  %568 = vst [vmem:[%s5769_s24 + $0x688] sm:$0xff] %v567_v17  ;;  %v571_v19 = vld [vmem:[%s5764_s23 + $0xd18] sm:$0xff]  ;;  %v573_v20 = vld [vmem:[%s5764_s23 + $0xd20] sm:$0xff] }
  0x7b   : > { %570 = vst [vmem:[%s5769_s24 + $0x690] sm:$0xff] %v569_v18  ;;  %572 = vst [vmem:[%s5769_s24 + $0x698] sm:$0xff] %v571_v19  ;;  %v575_v21 = vld [vmem:[%s5764_s23 + $0xd28] sm:$0xff]  ;;  %v577_v22 = vld [vmem:[%s5764_s23 + $0xd30] sm:$0xff] }
  0x7c   : > { %574 = vst [vmem:[%s5769_s24 + $0x6a0] sm:$0xff] %v573_v20  ;;  %v579_v23 = vld [vmem:[%s5764_s23 + $0xd38] sm:$0xff]  ;;  %576 = vst [vmem:[%s5769_s24 + $0x6a8] sm:$0xff] %v575_v21  ;;  %v581_v24 = vld [vmem:[%s5764_s23 + $0xd40] sm:$0xff] }
  0x7d   : > { %578 = vst [vmem:[%s5769_s24 + $0x6b0] sm:$0xff] %v577_v22  ;;  %580 = vst [vmem:[%s5769_s24 + $0x6b8] sm:$0xff] %v579_v23  ;;  %v583_v25 = vld [vmem:[%s5764_s23 + $0xd48] sm:$0xff]  ;;  %v585_v26 = vld [vmem:[%s5764_s23 + $0xd50] sm:$0xff] }
  0x7e   : > { %582 = vst [vmem:[%s5769_s24 + $0x6c0] sm:$0xff] %v581_v24  ;;  %584 = vst [vmem:[%s5769_s24 + $0x6c8] sm:$0xff] %v583_v25  ;;  %v587_v27 = vld [vmem:[%s5764_s23 + $0xd58] sm:$0xff]  ;;  %v589_v28 = vld [vmem:[%s5764_s23 + $0xd60] sm:$0xff] }
  0x7f   : > { %586 = vst [vmem:[%s5769_s24 + $0x6d0] sm:$0xff] %v585_v26  ;;  %v591_v29 = vld [vmem:[%s5764_s23 + $0xd68] sm:$0xff]  ;;  %588 = vst [vmem:[%s5769_s24 + $0x6d8] sm:$0xff] %v587_v27  ;;  %v593_v30 = vld [vmem:[%s5764_s23 + $0xd70] sm:$0xff] }
  0x80   : > { %590 = vst [vmem:[%s5769_s24 + $0x6e0] sm:$0xff] %v589_v28  ;;  %592 = vst [vmem:[%s5769_s24 + $0x6e8] sm:$0xff] %v591_v29  ;;  %v595_v31 = vld [vmem:[%s5764_s23 + $0xd78] sm:$0xff]  ;;  %v597_v32 = vld [vmem:[%s5764_s23 + $0xe00] sm:$0xff] }
  0x81   : > { %594 = vst [vmem:[%s5769_s24 + $0x6f0] sm:$0xff] %v593_v30  ;;  %596 = vst [vmem:[%s5769_s24 + $0x6f8] sm:$0xff] %v595_v31  ;;  %v599_v33 = vld [vmem:[%s5764_s23 + $0xe08] sm:$0xff]  ;;  %v601_v34 = vld [vmem:[%s5764_s23 + $0xe10] sm:$0xff] }
  0x82   : > { %598 = vst [vmem:[%s5769_s24 + $0x700] sm:$0xff] %v597_v32  ;;  %v603_v35 = vld [vmem:[%s5764_s23 + $0xe18] sm:$0xff]  ;;  %600 = vst [vmem:[%s5769_s24 + $0x708] sm:$0xff] %v599_v33  ;;  %v605_v36 = vld [vmem:[%s5764_s23 + $0xe20] sm:$0xff] }
  0x83   : > { %602 = vst [vmem:[%s5769_s24 + $0x710] sm:$0xff] %v601_v34  ;;  %604 = vst [vmem:[%s5769_s24 + $0x718] sm:$0xff] %v603_v35  ;;  %v607_v37 = vld [vmem:[%s5764_s23 + $0xe28] sm:$0xff]  ;;  %v609_v38 = vld [vmem:[%s5764_s23 + $0xe30] sm:$0xff] }
  0x84   : > { %606 = vst [vmem:[%s5769_s24 + $0x720] sm:$0xff] %v605_v36  ;;  %608 = vst [vmem:[%s5769_s24 + $0x728] sm:$0xff] %v607_v37  ;;  %v611_v39 = vld [vmem:[%s5764_s23 + $0xe38] sm:$0xff]  ;;  %v613_v40 = vld [vmem:[%s5764_s23 + $0xe40] sm:$0xff] }
  0x85   : > { %610 = vst [vmem:[%s5769_s24 + $0x730] sm:$0xff] %v609_v38  ;;  %v615_v41 = vld [vmem:[%s5764_s23 + $0xe48] sm:$0xff]  ;;  %612 = vst [vmem:[%s5769_s24 + $0x738] sm:$0xff] %v611_v39  ;;  %v617_v42 = vld [vmem:[%s5764_s23 + $0xe50] sm:$0xff] }
  0x86   : > { %614 = vst [vmem:[%s5769_s24 + $0x740] sm:$0xff] %v613_v40  ;;  %616 = vst [vmem:[%s5769_s24 + $0x748] sm:$0xff] %v615_v41  ;;  %v619_v43 = vld [vmem:[%s5764_s23 + $0xe58] sm:$0xff]  ;;  %v621_v44 = vld [vmem:[%s5764_s23 + $0xe60] sm:$0xff] }
  0x87   : > { %618 = vst [vmem:[%s5769_s24 + $0x750] sm:$0xff] %v617_v42  ;;  %620 = vst [vmem:[%s5769_s24 + $0x758] sm:$0xff] %v619_v43  ;;  %v623_v45 = vld [vmem:[%s5764_s23 + $0xe68] sm:$0xff]  ;;  %v625_v46 = vld [vmem:[%s5764_s23 + $0xe70] sm:$0xff] }
  0x88   : > { %622 = vst [vmem:[%s5769_s24 + $0x760] sm:$0xff] %v621_v44  ;;  %v627_v47 = vld [vmem:[%s5764_s23 + $0xe78] sm:$0xff]  ;;  %624 = vst [vmem:[%s5769_s24 + $0x768] sm:$0xff] %v623_v45  ;;  %v629_v48 = vld [vmem:[%s5764_s23 + $0xf00] sm:$0xff] }
  0x89   : > { %626 = vst [vmem:[%s5769_s24 + $0x770] sm:$0xff] %v625_v46  ;;  %628 = vst [vmem:[%s5769_s24 + $0x778] sm:$0xff] %v627_v47  ;;  %v631_v49 = vld [vmem:[%s5764_s23 + $0xf08] sm:$0xff]  ;;  %v633_v50 = vld [vmem:[%s5764_s23 + $0xf10] sm:$0xff] }
  0x8a   : > { %630 = vst [vmem:[%s5769_s24 + $0x780] sm:$0xff] %v629_v48  ;;  %632 = vst [vmem:[%s5769_s24 + $0x788] sm:$0xff] %v631_v49  ;;  %v635_v51 = vld [vmem:[%s5764_s23 + $0xf18] sm:$0xff]  ;;  %v637_v52 = vld [vmem:[%s5764_s23 + $0xf20] sm:$0xff] }
  0x8b   : > { %634 = vst [vmem:[%s5769_s24 + $0x790] sm:$0xff] %v633_v50  ;;  %v639_v53 = vld [vmem:[%s5764_s23 + $0xf28] sm:$0xff]  ;;  %636 = vst [vmem:[%s5769_s24 + $0x798] sm:$0xff] %v635_v51  ;;  %v641_v54 = vld [vmem:[%s5764_s23 + $0xf30] sm:$0xff] }
  0x8c   : > { %638 = vst [vmem:[%s5769_s24 + $0x7a0] sm:$0xff] %v637_v52  ;;  %640 = vst [vmem:[%s5769_s24 + $0x7a8] sm:$0xff] %v639_v53  ;;  %v643_v55 = vld [vmem:[%s5764_s23 + $0xf38] sm:$0xff]  ;;  %v645_v56 = vld [vmem:[%s5764_s23 + $0xf40] sm:$0xff] }
  0x8d   : > { %642 = vst [vmem:[%s5769_s24 + $0x7b0] sm:$0xff] %v641_v54  ;;  %644 = vst [vmem:[%s5769_s24 + $0x7b8] sm:$0xff] %v643_v55  ;;  %v647_v57 = vld [vmem:[%s5764_s23 + $0xf48] sm:$0xff]  ;;  %v649_v58 = vld [vmem:[%s5764_s23 + $0xf50] sm:$0xff] }
  0x8e   : > { %646 = vst [vmem:[%s5769_s24 + $0x7c0] sm:$0xff] %v645_v56  ;;  %v651_v59 = vld [vmem:[%s5764_s23 + $0xf58] sm:$0xff]  ;;  %648 = vst [vmem:[%s5769_s24 + $0x7c8] sm:$0xff] %v647_v57  ;;  %v653_v60 = vld [vmem:[%s5764_s23 + $0xf60] sm:$0xff] }
  0x8f   : > { %650 = vst [vmem:[%s5769_s24 + $0x7d0] sm:$0xff] %v649_v58  ;;  %652 = vst [vmem:[%s5769_s24 + $0x7d8] sm:$0xff] %v651_v59  ;;  %v655_v61 = vld [vmem:[%s5764_s23 + $0xf68] sm:$0xff]  ;;  %v657_v62 = vld [vmem:[%s5764_s23 + $0xf70] sm:$0xff] }
  0x90   : > { %654 = vst [vmem:[%s5769_s24 + $0x7e0] sm:$0xff] %v653_v60  ;;  %656 = vst [vmem:[%s5769_s24 + $0x7e8] sm:$0xff] %v655_v61  ;;  %v659_v63 = vld [vmem:[%s5764_s23 + $0xf78] sm:$0xff]  ;;  %v661_v0 = vld [vmem:[%s5764_s23 + $0x1000] sm:$0xff] }
  0x91   : > { %658 = vst [vmem:[%s5769_s24 + $0x7f0] sm:$0xff] %v657_v62  ;;  %v663_v1 = vld [vmem:[%s5764_s23 + $0x1008] sm:$0xff]  ;;  %660 = vst [vmem:[%s5769_s24 + $0x7f8] sm:$0xff] %v659_v63  ;;  %v665_v2 = vld [vmem:[%s5764_s23 + $0x1010] sm:$0xff] }
  0x92   : > { %662 = vst [vmem:[%s5769_s24 + $0x800] sm:$0xff] %v661_v0  ;;  %664 = vst [vmem:[%s5769_s24 + $0x808] sm:$0xff] %v663_v1  ;;  %v667_v3 = vld [vmem:[%s5764_s23 + $0x1018] sm:$0xff]  ;;  %v669_v4 = vld [vmem:[%s5764_s23 + $0x1020] sm:$0xff] }
  0x93   : > { %666 = vst [vmem:[%s5769_s24 + $0x810] sm:$0xff] %v665_v2  ;;  %668 = vst [vmem:[%s5769_s24 + $0x818] sm:$0xff] %v667_v3  ;;  %v671_v5 = vld [vmem:[%s5764_s23 + $0x1028] sm:$0xff]  ;;  %v673_v6 = vld [vmem:[%s5764_s23 + $0x1030] sm:$0xff] }
  0x94   : > { %670 = vst [vmem:[%s5769_s24 + $0x820] sm:$0xff] %v669_v4  ;;  %v675_v7 = vld [vmem:[%s5764_s23 + $0x1038] sm:$0xff]  ;;  %672 = vst [vmem:[%s5769_s24 + $0x828] sm:$0xff] %v671_v5  ;;  %v677_v8 = vld [vmem:[%s5764_s23 + $0x1040] sm:$0xff] }
  0x95   : > { %674 = vst [vmem:[%s5769_s24 + $0x830] sm:$0xff] %v673_v6  ;;  %676 = vst [vmem:[%s5769_s24 + $0x838] sm:$0xff] %v675_v7  ;;  %v679_v9 = vld [vmem:[%s5764_s23 + $0x1048] sm:$0xff]  ;;  %v681_v10 = vld [vmem:[%s5764_s23 + $0x1050] sm:$0xff] }
  0x96   : > { %678 = vst [vmem:[%s5769_s24 + $0x840] sm:$0xff] %v677_v8  ;;  %680 = vst [vmem:[%s5769_s24 + $0x848] sm:$0xff] %v679_v9  ;;  %v683_v11 = vld [vmem:[%s5764_s23 + $0x1058] sm:$0xff]  ;;  %v685_v12 = vld [vmem:[%s5764_s23 + $0x1060] sm:$0xff] }
  0x97   : > { %682 = vst [vmem:[%s5769_s24 + $0x850] sm:$0xff] %v681_v10  ;;  %v687_v13 = vld [vmem:[%s5764_s23 + $0x1068] sm:$0xff]  ;;  %684 = vst [vmem:[%s5769_s24 + $0x858] sm:$0xff] %v683_v11  ;;  %v689_v14 = vld [vmem:[%s5764_s23 + $0x1070] sm:$0xff] }
  0x98   : > { %686 = vst [vmem:[%s5769_s24 + $0x860] sm:$0xff] %v685_v12  ;;  %688 = vst [vmem:[%s5769_s24 + $0x868] sm:$0xff] %v687_v13  ;;  %v691_v15 = vld [vmem:[%s5764_s23 + $0x1078] sm:$0xff]  ;;  %v693_v16 = vld [vmem:[%s5764_s23 + $0x1100] sm:$0xff] }
  0x99   : > { %690 = vst [vmem:[%s5769_s24 + $0x870] sm:$0xff] %v689_v14  ;;  %692 = vst [vmem:[%s5769_s24 + $0x878] sm:$0xff] %v691_v15  ;;  %v695_v17 = vld [vmem:[%s5764_s23 + $0x1108] sm:$0xff]  ;;  %v697_v18 = vld [vmem:[%s5764_s23 + $0x1110] sm:$0xff] }
  0x9a   : > { %694 = vst [vmem:[%s5769_s24 + $0x880] sm:$0xff] %v693_v16  ;;  %v699_v19 = vld [vmem:[%s5764_s23 + $0x1118] sm:$0xff]  ;;  %696 = vst [vmem:[%s5769_s24 + $0x888] sm:$0xff] %v695_v17  ;;  %v701_v20 = vld [vmem:[%s5764_s23 + $0x1120] sm:$0xff] }
  0x9b   : > { %698 = vst [vmem:[%s5769_s24 + $0x890] sm:$0xff] %v697_v18  ;;  %700 = vst [vmem:[%s5769_s24 + $0x898] sm:$0xff] %v699_v19  ;;  %v703_v21 = vld [vmem:[%s5764_s23 + $0x1128] sm:$0xff]  ;;  %v705_v22 = vld [vmem:[%s5764_s23 + $0x1130] sm:$0xff] }
  0x9c   : > { %702 = vst [vmem:[%s5769_s24 + $0x8a0] sm:$0xff] %v701_v20  ;;  %704 = vst [vmem:[%s5769_s24 + $0x8a8] sm:$0xff] %v703_v21  ;;  %v707_v23 = vld [vmem:[%s5764_s23 + $0x1138] sm:$0xff]  ;;  %v709_v24 = vld [vmem:[%s5764_s23 + $0x1140] sm:$0xff] }
  0x9d   : > { %706 = vst [vmem:[%s5769_s24 + $0x8b0] sm:$0xff] %v705_v22  ;;  %v711_v25 = vld [vmem:[%s5764_s23 + $0x1148] sm:$0xff]  ;;  %708 = vst [vmem:[%s5769_s24 + $0x8b8] sm:$0xff] %v707_v23  ;;  %v713_v26 = vld [vmem:[%s5764_s23 + $0x1150] sm:$0xff] }
  0x9e   : > { %710 = vst [vmem:[%s5769_s24 + $0x8c0] sm:$0xff] %v709_v24  ;;  %712 = vst [vmem:[%s5769_s24 + $0x8c8] sm:$0xff] %v711_v25  ;;  %v715_v27 = vld [vmem:[%s5764_s23 + $0x1158] sm:$0xff]  ;;  %v717_v28 = vld [vmem:[%s5764_s23 + $0x1160] sm:$0xff] }
  0x9f   : > { %714 = vst [vmem:[%s5769_s24 + $0x8d0] sm:$0xff] %v713_v26  ;;  %716 = vst [vmem:[%s5769_s24 + $0x8d8] sm:$0xff] %v715_v27  ;;  %v719_v29 = vld [vmem:[%s5764_s23 + $0x1168] sm:$0xff]  ;;  %v721_v30 = vld [vmem:[%s5764_s23 + $0x1170] sm:$0xff] }
  0xa0   : > { %718 = vst [vmem:[%s5769_s24 + $0x8e0] sm:$0xff] %v717_v28  ;;  %v723_v31 = vld [vmem:[%s5764_s23 + $0x1178] sm:$0xff]  ;;  %720 = vst [vmem:[%s5769_s24 + $0x8e8] sm:$0xff] %v719_v29  ;;  %v725_v32 = vld [vmem:[%s5764_s23 + $0x1200] sm:$0xff] }
  0xa1   : > { %722 = vst [vmem:[%s5769_s24 + $0x8f0] sm:$0xff] %v721_v30  ;;  %724 = vst [vmem:[%s5769_s24 + $0x8f8] sm:$0xff] %v723_v31  ;;  %v727_v33 = vld [vmem:[%s5764_s23 + $0x1208] sm:$0xff]  ;;  %v729_v34 = vld [vmem:[%s5764_s23 + $0x1210] sm:$0xff] }
  0xa2   : > { %726 = vst [vmem:[%s5769_s24 + $0x900] sm:$0xff] %v725_v32  ;;  %728 = vst [vmem:[%s5769_s24 + $0x908] sm:$0xff] %v727_v33  ;;  %v731_v35 = vld [vmem:[%s5764_s23 + $0x1218] sm:$0xff]  ;;  %v733_v36 = vld [vmem:[%s5764_s23 + $0x1220] sm:$0xff] }
  0xa3   : > { %730 = vst [vmem:[%s5769_s24 + $0x910] sm:$0xff] %v729_v34  ;;  %v735_v37 = vld [vmem:[%s5764_s23 + $0x1228] sm:$0xff]  ;;  %732 = vst [vmem:[%s5769_s24 + $0x918] sm:$0xff] %v731_v35  ;;  %v737_v38 = vld [vmem:[%s5764_s23 + $0x1230] sm:$0xff] }
  0xa4   : > { %734 = vst [vmem:[%s5769_s24 + $0x920] sm:$0xff] %v733_v36  ;;  %736 = vst [vmem:[%s5769_s24 + $0x928] sm:$0xff] %v735_v37  ;;  %v739_v39 = vld [vmem:[%s5764_s23 + $0x1238] sm:$0xff]  ;;  %v741_v40 = vld [vmem:[%s5764_s23 + $0x1240] sm:$0xff] }
  0xa5   : > { %738 = vst [vmem:[%s5769_s24 + $0x930] sm:$0xff] %v737_v38  ;;  %740 = vst [vmem:[%s5769_s24 + $0x938] sm:$0xff] %v739_v39  ;;  %v743_v41 = vld [vmem:[%s5764_s23 + $0x1248] sm:$0xff]  ;;  %v745_v42 = vld [vmem:[%s5764_s23 + $0x1250] sm:$0xff] }
  0xa6   : > { %742 = vst [vmem:[%s5769_s24 + $0x940] sm:$0xff] %v741_v40  ;;  %v747_v43 = vld [vmem:[%s5764_s23 + $0x1258] sm:$0xff]  ;;  %744 = vst [vmem:[%s5769_s24 + $0x948] sm:$0xff] %v743_v41  ;;  %v749_v44 = vld [vmem:[%s5764_s23 + $0x1260] sm:$0xff] }
  0xa7   : > { %746 = vst [vmem:[%s5769_s24 + $0x950] sm:$0xff] %v745_v42  ;;  %748 = vst [vmem:[%s5769_s24 + $0x958] sm:$0xff] %v747_v43  ;;  %v751_v45 = vld [vmem:[%s5764_s23 + $0x1268] sm:$0xff]  ;;  %v753_v46 = vld [vmem:[%s5764_s23 + $0x1270] sm:$0xff] }
  0xa8   : > { %750 = vst [vmem:[%s5769_s24 + $0x960] sm:$0xff] %v749_v44  ;;  %752 = vst [vmem:[%s5769_s24 + $0x968] sm:$0xff] %v751_v45  ;;  %v755_v47 = vld [vmem:[%s5764_s23 + $0x1278] sm:$0xff]  ;;  %v757_v48 = vld [vmem:[%s5764_s23 + $0x1300] sm:$0xff] }
  0xa9   : > { %754 = vst [vmem:[%s5769_s24 + $0x970] sm:$0xff] %v753_v46  ;;  %v759_v49 = vld [vmem:[%s5764_s23 + $0x1308] sm:$0xff]  ;;  %756 = vst [vmem:[%s5769_s24 + $0x978] sm:$0xff] %v755_v47  ;;  %v761_v50 = vld [vmem:[%s5764_s23 + $0x1310] sm:$0xff] }
  0xaa   : > { %758 = vst [vmem:[%s5769_s24 + $0x980] sm:$0xff] %v757_v48  ;;  %760 = vst [vmem:[%s5769_s24 + $0x988] sm:$0xff] %v759_v49  ;;  %v763_v51 = vld [vmem:[%s5764_s23 + $0x1318] sm:$0xff]  ;;  %v765_v52 = vld [vmem:[%s5764_s23 + $0x1320] sm:$0xff] }
  0xab   : > { %762 = vst [vmem:[%s5769_s24 + $0x990] sm:$0xff] %v761_v50  ;;  %764 = vst [vmem:[%s5769_s24 + $0x998] sm:$0xff] %v763_v51  ;;  %v767_v53 = vld [vmem:[%s5764_s23 + $0x1328] sm:$0xff]  ;;  %v769_v54 = vld [vmem:[%s5764_s23 + $0x1330] sm:$0xff] }
  0xac   : > { %766 = vst [vmem:[%s5769_s24 + $0x9a0] sm:$0xff] %v765_v52  ;;  %v771_v55 = vld [vmem:[%s5764_s23 + $0x1338] sm:$0xff]  ;;  %768 = vst [vmem:[%s5769_s24 + $0x9a8] sm:$0xff] %v767_v53  ;;  %v773_v56 = vld [vmem:[%s5764_s23 + $0x1340] sm:$0xff] }
  0xad   : > { %770 = vst [vmem:[%s5769_s24 + $0x9b0] sm:$0xff] %v769_v54  ;;  %772 = vst [vmem:[%s5769_s24 + $0x9b8] sm:$0xff] %v771_v55  ;;  %v775_v57 = vld [vmem:[%s5764_s23 + $0x1348] sm:$0xff]  ;;  %v777_v58 = vld [vmem:[%s5764_s23 + $0x1350] sm:$0xff] }
  0xae   : > { %774 = vst [vmem:[%s5769_s24 + $0x9c0] sm:$0xff] %v773_v56  ;;  %776 = vst [vmem:[%s5769_s24 + $0x9c8] sm:$0xff] %v775_v57  ;;  %v779_v59 = vld [vmem:[%s5764_s23 + $0x1358] sm:$0xff]  ;;  %v781_v60 = vld [vmem:[%s5764_s23 + $0x1360] sm:$0xff] }
  0xaf   : > { %778 = vst [vmem:[%s5769_s24 + $0x9d0] sm:$0xff] %v777_v58  ;;  %v783_v61 = vld [vmem:[%s5764_s23 + $0x1368] sm:$0xff]  ;;  %780 = vst [vmem:[%s5769_s24 + $0x9d8] sm:$0xff] %v779_v59  ;;  %v785_v62 = vld [vmem:[%s5764_s23 + $0x1370] sm:$0xff] }
  0xb0   : > { %782 = vst [vmem:[%s5769_s24 + $0x9e0] sm:$0xff] %v781_v60  ;;  %784 = vst [vmem:[%s5769_s24 + $0x9e8] sm:$0xff] %v783_v61  ;;  %v787_v63 = vld [vmem:[%s5764_s23 + $0x1378] sm:$0xff]  ;;  %v789_v0 = vld [vmem:[%s5764_s23 + $0x1400] sm:$0xff] }
  0xb1   : > { %786 = vst [vmem:[%s5769_s24 + $0x9f0] sm:$0xff] %v785_v62  ;;  %788 = vst [vmem:[%s5769_s24 + $0x9f8] sm:$0xff] %v787_v63  ;;  %v791_v1 = vld [vmem:[%s5764_s23 + $0x1408] sm:$0xff]  ;;  %v793_v2 = vld [vmem:[%s5764_s23 + $0x1410] sm:$0xff] }
  0xb2   : > { %790 = vst [vmem:[%s5769_s24 + $0xa00] sm:$0xff] %v789_v0  ;;  %v795_v3 = vld [vmem:[%s5764_s23 + $0x1418] sm:$0xff]  ;;  %792 = vst [vmem:[%s5769_s24 + $0xa08] sm:$0xff] %v791_v1  ;;  %v797_v4 = vld [vmem:[%s5764_s23 + $0x1420] sm:$0xff] }
  0xb3   : > { %794 = vst [vmem:[%s5769_s24 + $0xa10] sm:$0xff] %v793_v2  ;;  %796 = vst [vmem:[%s5769_s24 + $0xa18] sm:$0xff] %v795_v3  ;;  %v799_v5 = vld [vmem:[%s5764_s23 + $0x1428] sm:$0xff]  ;;  %v801_v6 = vld [vmem:[%s5764_s23 + $0x1430] sm:$0xff] }
  0xb4   : > { %798 = vst [vmem:[%s5769_s24 + $0xa20] sm:$0xff] %v797_v4  ;;  %800 = vst [vmem:[%s5769_s24 + $0xa28] sm:$0xff] %v799_v5  ;;  %v803_v7 = vld [vmem:[%s5764_s23 + $0x1438] sm:$0xff]  ;;  %v805_v8 = vld [vmem:[%s5764_s23 + $0x1440] sm:$0xff] }
  0xb5   : > { %802 = vst [vmem:[%s5769_s24 + $0xa30] sm:$0xff] %v801_v6  ;;  %v807_v9 = vld [vmem:[%s5764_s23 + $0x1448] sm:$0xff]  ;;  %804 = vst [vmem:[%s5769_s24 + $0xa38] sm:$0xff] %v803_v7  ;;  %v809_v10 = vld [vmem:[%s5764_s23 + $0x1450] sm:$0xff] }
  0xb6   : > { %806 = vst [vmem:[%s5769_s24 + $0xa40] sm:$0xff] %v805_v8  ;;  %808 = vst [vmem:[%s5769_s24 + $0xa48] sm:$0xff] %v807_v9  ;;  %v811_v11 = vld [vmem:[%s5764_s23 + $0x1458] sm:$0xff]  ;;  %v813_v12 = vld [vmem:[%s5764_s23 + $0x1460] sm:$0xff] }
  0xb7   : > { %810 = vst [vmem:[%s5769_s24 + $0xa50] sm:$0xff] %v809_v10  ;;  %812 = vst [vmem:[%s5769_s24 + $0xa58] sm:$0xff] %v811_v11  ;;  %v815_v13 = vld [vmem:[%s5764_s23 + $0x1468] sm:$0xff]  ;;  %v817_v14 = vld [vmem:[%s5764_s23 + $0x1470] sm:$0xff] }
  0xb8   : > { %814 = vst [vmem:[%s5769_s24 + $0xa60] sm:$0xff] %v813_v12  ;;  %v819_v15 = vld [vmem:[%s5764_s23 + $0x1478] sm:$0xff]  ;;  %816 = vst [vmem:[%s5769_s24 + $0xa68] sm:$0xff] %v815_v13  ;;  %v821_v16 = vld [vmem:[%s5764_s23 + $0x1500] sm:$0xff] }
  0xb9   : > { %818 = vst [vmem:[%s5769_s24 + $0xa70] sm:$0xff] %v817_v14  ;;  %820 = vst [vmem:[%s5769_s24 + $0xa78] sm:$0xff] %v819_v15  ;;  %v823_v17 = vld [vmem:[%s5764_s23 + $0x1508] sm:$0xff]  ;;  %v825_v18 = vld [vmem:[%s5764_s23 + $0x1510] sm:$0xff] }
  0xba   : > { %822 = vst [vmem:[%s5769_s24 + $0xa80] sm:$0xff] %v821_v16  ;;  %824 = vst [vmem:[%s5769_s24 + $0xa88] sm:$0xff] %v823_v17  ;;  %v827_v19 = vld [vmem:[%s5764_s23 + $0x1518] sm:$0xff]  ;;  %v829_v20 = vld [vmem:[%s5764_s23 + $0x1520] sm:$0xff] }
  0xbb   : > { %826 = vst [vmem:[%s5769_s24 + $0xa90] sm:$0xff] %v825_v18  ;;  %v831_v21 = vld [vmem:[%s5764_s23 + $0x1528] sm:$0xff]  ;;  %828 = vst [vmem:[%s5769_s24 + $0xa98] sm:$0xff] %v827_v19  ;;  %v833_v22 = vld [vmem:[%s5764_s23 + $0x1530] sm:$0xff] }
  0xbc   : > { %830 = vst [vmem:[%s5769_s24 + $0xaa0] sm:$0xff] %v829_v20  ;;  %832 = vst [vmem:[%s5769_s24 + $0xaa8] sm:$0xff] %v831_v21  ;;  %v835_v23 = vld [vmem:[%s5764_s23 + $0x1538] sm:$0xff]  ;;  %v837_v24 = vld [vmem:[%s5764_s23 + $0x1540] sm:$0xff] }
  0xbd   : > { %834 = vst [vmem:[%s5769_s24 + $0xab0] sm:$0xff] %v833_v22  ;;  %836 = vst [vmem:[%s5769_s24 + $0xab8] sm:$0xff] %v835_v23  ;;  %v839_v25 = vld [vmem:[%s5764_s23 + $0x1548] sm:$0xff]  ;;  %v841_v26 = vld [vmem:[%s5764_s23 + $0x1550] sm:$0xff] }
  0xbe   : > { %838 = vst [vmem:[%s5769_s24 + $0xac0] sm:$0xff] %v837_v24  ;;  %v843_v27 = vld [vmem:[%s5764_s23 + $0x1558] sm:$0xff]  ;;  %840 = vst [vmem:[%s5769_s24 + $0xac8] sm:$0xff] %v839_v25  ;;  %v845_v28 = vld [vmem:[%s5764_s23 + $0x1560] sm:$0xff] }
  0xbf   : > { %842 = vst [vmem:[%s5769_s24 + $0xad0] sm:$0xff] %v841_v26  ;;  %844 = vst [vmem:[%s5769_s24 + $0xad8] sm:$0xff] %v843_v27  ;;  %v847_v29 = vld [vmem:[%s5764_s23 + $0x1568] sm:$0xff]  ;;  %v849_v30 = vld [vmem:[%s5764_s23 + $0x1570] sm:$0xff] }
  0xc0   : > { %846 = vst [vmem:[%s5769_s24 + $0xae0] sm:$0xff] %v845_v28  ;;  %848 = vst [vmem:[%s5769_s24 + $0xae8] sm:$0xff] %v847_v29  ;;  %v851_v31 = vld [vmem:[%s5764_s23 + $0x1578] sm:$0xff]  ;;  %v853_v32 = vld [vmem:[%s5764_s23 + $0x1600] sm:$0xff] }
  0xc1   : > { %850 = vst [vmem:[%s5769_s24 + $0xaf0] sm:$0xff] %v849_v30  ;;  %v855_v33 = vld [vmem:[%s5764_s23 + $0x1608] sm:$0xff]  ;;  %852 = vst [vmem:[%s5769_s24 + $0xaf8] sm:$0xff] %v851_v31  ;;  %v857_v34 = vld [vmem:[%s5764_s23 + $0x1610] sm:$0xff] }
  0xc2   : > { %854 = vst [vmem:[%s5769_s24 + $0xb00] sm:$0xff] %v853_v32  ;;  %856 = vst [vmem:[%s5769_s24 + $0xb08] sm:$0xff] %v855_v33  ;;  %v859_v35 = vld [vmem:[%s5764_s23 + $0x1618] sm:$0xff]  ;;  %v861_v36 = vld [vmem:[%s5764_s23 + $0x1620] sm:$0xff] }
  0xc3   : > { %858 = vst [vmem:[%s5769_s24 + $0xb10] sm:$0xff] %v857_v34  ;;  %860 = vst [vmem:[%s5769_s24 + $0xb18] sm:$0xff] %v859_v35  ;;  %v863_v37 = vld [vmem:[%s5764_s23 + $0x1628] sm:$0xff]  ;;  %v865_v38 = vld [vmem:[%s5764_s23 + $0x1630] sm:$0xff] }
  0xc4   : > { %862 = vst [vmem:[%s5769_s24 + $0xb20] sm:$0xff] %v861_v36  ;;  %v867_v39 = vld [vmem:[%s5764_s23 + $0x1638] sm:$0xff]  ;;  %864 = vst [vmem:[%s5769_s24 + $0xb28] sm:$0xff] %v863_v37  ;;  %v869_v40 = vld [vmem:[%s5764_s23 + $0x1640] sm:$0xff] }
  0xc5   : > { %866 = vst [vmem:[%s5769_s24 + $0xb30] sm:$0xff] %v865_v38  ;;  %868 = vst [vmem:[%s5769_s24 + $0xb38] sm:$0xff] %v867_v39  ;;  %v871_v41 = vld [vmem:[%s5764_s23 + $0x1648] sm:$0xff]  ;;  %v873_v42 = vld [vmem:[%s5764_s23 + $0x1650] sm:$0xff] }
  0xc6   : > { %870 = vst [vmem:[%s5769_s24 + $0xb40] sm:$0xff] %v869_v40  ;;  %872 = vst [vmem:[%s5769_s24 + $0xb48] sm:$0xff] %v871_v41  ;;  %v875_v43 = vld [vmem:[%s5764_s23 + $0x1658] sm:$0xff]  ;;  %v877_v44 = vld [vmem:[%s5764_s23 + $0x1660] sm:$0xff] }
  0xc7   : > { %874 = vst [vmem:[%s5769_s24 + $0xb50] sm:$0xff] %v873_v42  ;;  %v879_v45 = vld [vmem:[%s5764_s23 + $0x1668] sm:$0xff]  ;;  %876 = vst [vmem:[%s5769_s24 + $0xb58] sm:$0xff] %v875_v43  ;;  %v881_v46 = vld [vmem:[%s5764_s23 + $0x1670] sm:$0xff] }
  0xc8   : > { %878 = vst [vmem:[%s5769_s24 + $0xb60] sm:$0xff] %v877_v44  ;;  %880 = vst [vmem:[%s5769_s24 + $0xb68] sm:$0xff] %v879_v45  ;;  %v883_v47 = vld [vmem:[%s5764_s23 + $0x1678] sm:$0xff]  ;;  %v885_v48 = vld [vmem:[%s5764_s23 + $0x1700] sm:$0xff] }
  0xc9   : > { %882 = vst [vmem:[%s5769_s24 + $0xb70] sm:$0xff] %v881_v46  ;;  %884 = vst [vmem:[%s5769_s24 + $0xb78] sm:$0xff] %v883_v47  ;;  %v887_v49 = vld [vmem:[%s5764_s23 + $0x1708] sm:$0xff]  ;;  %v889_v50 = vld [vmem:[%s5764_s23 + $0x1710] sm:$0xff] }
  0xca   : > { %886 = vst [vmem:[%s5769_s24 + $0xb80] sm:$0xff] %v885_v48  ;;  %v891_v51 = vld [vmem:[%s5764_s23 + $0x1718] sm:$0xff]  ;;  %888 = vst [vmem:[%s5769_s24 + $0xb88] sm:$0xff] %v887_v49  ;;  %v893_v52 = vld [vmem:[%s5764_s23 + $0x1720] sm:$0xff] }
  0xcb   : > { %890 = vst [vmem:[%s5769_s24 + $0xb90] sm:$0xff] %v889_v50  ;;  %892 = vst [vmem:[%s5769_s24 + $0xb98] sm:$0xff] %v891_v51  ;;  %v895_v53 = vld [vmem:[%s5764_s23 + $0x1728] sm:$0xff]  ;;  %v897_v54 = vld [vmem:[%s5764_s23 + $0x1730] sm:$0xff] }
  0xcc   : > { %894 = vst [vmem:[%s5769_s24 + $0xba0] sm:$0xff] %v893_v52  ;;  %896 = vst [vmem:[%s5769_s24 + $0xba8] sm:$0xff] %v895_v53  ;;  %v899_v55 = vld [vmem:[%s5764_s23 + $0x1738] sm:$0xff]  ;;  %v901_v56 = vld [vmem:[%s5764_s23 + $0x1740] sm:$0xff] }
  0xcd   : > { %898 = vst [vmem:[%s5769_s24 + $0xbb0] sm:$0xff] %v897_v54  ;;  %v903_v57 = vld [vmem:[%s5764_s23 + $0x1748] sm:$0xff]  ;;  %900 = vst [vmem:[%s5769_s24 + $0xbb8] sm:$0xff] %v899_v55  ;;  %v905_v58 = vld [vmem:[%s5764_s23 + $0x1750] sm:$0xff] }
  0xce   : > { %902 = vst [vmem:[%s5769_s24 + $0xbc0] sm:$0xff] %v901_v56  ;;  %904 = vst [vmem:[%s5769_s24 + $0xbc8] sm:$0xff] %v903_v57  ;;  %v907_v59 = vld [vmem:[%s5764_s23 + $0x1758] sm:$0xff]  ;;  %v909_v60 = vld [vmem:[%s5764_s23 + $0x1760] sm:$0xff] }
  0xcf   : > { %906 = vst [vmem:[%s5769_s24 + $0xbd0] sm:$0xff] %v905_v58  ;;  %908 = vst [vmem:[%s5769_s24 + $0xbd8] sm:$0xff] %v907_v59  ;;  %v911_v61 = vld [vmem:[%s5764_s23 + $0x1768] sm:$0xff]  ;;  %v913_v62 = vld [vmem:[%s5764_s23 + $0x1770] sm:$0xff] }
  0xd0   : > { %910 = vst [vmem:[%s5769_s24 + $0xbe0] sm:$0xff] %v909_v60  ;;  %v915_v63 = vld [vmem:[%s5764_s23 + $0x1778] sm:$0xff]  ;;  %912 = vst [vmem:[%s5769_s24 + $0xbe8] sm:$0xff] %v911_v61  ;;  %v917_v0 = vld [vmem:[%s5764_s23 + $0x1800] sm:$0xff] }
  0xd1   : > { %914 = vst [vmem:[%s5769_s24 + $0xbf0] sm:$0xff] %v913_v62  ;;  %916 = vst [vmem:[%s5769_s24 + $0xbf8] sm:$0xff] %v915_v63  ;;  %v919_v1 = vld [vmem:[%s5764_s23 + $0x1808] sm:$0xff]  ;;  %v921_v2 = vld [vmem:[%s5764_s23 + $0x1810] sm:$0xff] }
  0xd2   : > { %918 = vst [vmem:[%s5769_s24 + $0xc00] sm:$0xff] %v917_v0  ;;  %920 = vst [vmem:[%s5769_s24 + $0xc08] sm:$0xff] %v919_v1  ;;  %v923_v3 = vld [vmem:[%s5764_s23 + $0x1818] sm:$0xff]  ;;  %v925_v4 = vld [vmem:[%s5764_s23 + $0x1820] sm:$0xff] }
  0xd3   : > { %922 = vst [vmem:[%s5769_s24 + $0xc10] sm:$0xff] %v921_v2  ;;  %v927_v5 = vld [vmem:[%s5764_s23 + $0x1828] sm:$0xff]  ;;  %924 = vst [vmem:[%s5769_s24 + $0xc18] sm:$0xff] %v923_v3  ;;  %v929_v6 = vld [vmem:[%s5764_s23 + $0x1830] sm:$0xff] }
  0xd4   : > { %926 = vst [vmem:[%s5769_s24 + $0xc20] sm:$0xff] %v925_v4  ;;  %928 = vst [vmem:[%s5769_s24 + $0xc28] sm:$0xff] %v927_v5  ;;  %v931_v7 = vld [vmem:[%s5764_s23 + $0x1838] sm:$0xff]  ;;  %v933_v8 = vld [vmem:[%s5764_s23 + $0x1840] sm:$0xff] }
  0xd5   : > { %930 = vst [vmem:[%s5769_s24 + $0xc30] sm:$0xff] %v929_v6  ;;  %932 = vst [vmem:[%s5769_s24 + $0xc38] sm:$0xff] %v931_v7  ;;  %v935_v9 = vld [vmem:[%s5764_s23 + $0x1848] sm:$0xff]  ;;  %v937_v10 = vld [vmem:[%s5764_s23 + $0x1850] sm:$0xff] }
  0xd6   : > { %934 = vst [vmem:[%s5769_s24 + $0xc40] sm:$0xff] %v933_v8  ;;  %v939_v11 = vld [vmem:[%s5764_s23 + $0x1858] sm:$0xff]  ;;  %936 = vst [vmem:[%s5769_s24 + $0xc48] sm:$0xff] %v935_v9  ;;  %v941_v12 = vld [vmem:[%s5764_s23 + $0x1860] sm:$0xff] }
  0xd7   : > { %938 = vst [vmem:[%s5769_s24 + $0xc50] sm:$0xff] %v937_v10  ;;  %940 = vst [vmem:[%s5769_s24 + $0xc58] sm:$0xff] %v939_v11  ;;  %v943_v13 = vld [vmem:[%s5764_s23 + $0x1868] sm:$0xff]  ;;  %v945_v14 = vld [vmem:[%s5764_s23 + $0x1870] sm:$0xff] }
  0xd8   : > { %942 = vst [vmem:[%s5769_s24 + $0xc60] sm:$0xff] %v941_v12  ;;  %944 = vst [vmem:[%s5769_s24 + $0xc68] sm:$0xff] %v943_v13  ;;  %v947_v15 = vld [vmem:[%s5764_s23 + $0x1878] sm:$0xff]  ;;  %v949_v16 = vld [vmem:[%s5764_s23 + $0x1900] sm:$0xff] }
  0xd9   : > { %946 = vst [vmem:[%s5769_s24 + $0xc70] sm:$0xff] %v945_v14  ;;  %v951_v17 = vld [vmem:[%s5764_s23 + $0x1908] sm:$0xff]  ;;  %948 = vst [vmem:[%s5769_s24 + $0xc78] sm:$0xff] %v947_v15  ;;  %v953_v18 = vld [vmem:[%s5764_s23 + $0x1910] sm:$0xff] }
  0xda   : > { %950 = vst [vmem:[%s5769_s24 + $0xc80] sm:$0xff] %v949_v16  ;;  %952 = vst [vmem:[%s5769_s24 + $0xc88] sm:$0xff] %v951_v17  ;;  %v955_v19 = vld [vmem:[%s5764_s23 + $0x1918] sm:$0xff]  ;;  %v957_v20 = vld [vmem:[%s5764_s23 + $0x1920] sm:$0xff] }
  0xdb   : > { %954 = vst [vmem:[%s5769_s24 + $0xc90] sm:$0xff] %v953_v18  ;;  %956 = vst [vmem:[%s5769_s24 + $0xc98] sm:$0xff] %v955_v19  ;;  %v959_v21 = vld [vmem:[%s5764_s23 + $0x1928] sm:$0xff]  ;;  %v961_v22 = vld [vmem:[%s5764_s23 + $0x1930] sm:$0xff] }
  0xdc   : > { %958 = vst [vmem:[%s5769_s24 + $0xca0] sm:$0xff] %v957_v20  ;;  %v963_v23 = vld [vmem:[%s5764_s23 + $0x1938] sm:$0xff]  ;;  %960 = vst [vmem:[%s5769_s24 + $0xca8] sm:$0xff] %v959_v21  ;;  %v965_v24 = vld [vmem:[%s5764_s23 + $0x1940] sm:$0xff] }
  0xdd   : > { %962 = vst [vmem:[%s5769_s24 + $0xcb0] sm:$0xff] %v961_v22  ;;  %964 = vst [vmem:[%s5769_s24 + $0xcb8] sm:$0xff] %v963_v23  ;;  %v967_v25 = vld [vmem:[%s5764_s23 + $0x1948] sm:$0xff]  ;;  %v969_v26 = vld [vmem:[%s5764_s23 + $0x1950] sm:$0xff] }
  0xde   : > { %966 = vst [vmem:[%s5769_s24 + $0xcc0] sm:$0xff] %v965_v24  ;;  %968 = vst [vmem:[%s5769_s24 + $0xcc8] sm:$0xff] %v967_v25  ;;  %v971_v27 = vld [vmem:[%s5764_s23 + $0x1958] sm:$0xff]  ;;  %v973_v28 = vld [vmem:[%s5764_s23 + $0x1960] sm:$0xff] }
  0xdf   : > { %970 = vst [vmem:[%s5769_s24 + $0xcd0] sm:$0xff] %v969_v26  ;;  %v975_v29 = vld [vmem:[%s5764_s23 + $0x1968] sm:$0xff]  ;;  %972 = vst [vmem:[%s5769_s24 + $0xcd8] sm:$0xff] %v971_v27  ;;  %v977_v30 = vld [vmem:[%s5764_s23 + $0x1970] sm:$0xff] }
  0xe0   : > { %974 = vst [vmem:[%s5769_s24 + $0xce0] sm:$0xff] %v973_v28  ;;  %976 = vst [vmem:[%s5769_s24 + $0xce8] sm:$0xff] %v975_v29  ;;  %v979_v31 = vld [vmem:[%s5764_s23 + $0x1978] sm:$0xff]  ;;  %v981_v32 = vld [vmem:[%s5764_s23 + $0x1a00] sm:$0xff] }
  0xe1   : > { %978 = vst [vmem:[%s5769_s24 + $0xcf0] sm:$0xff] %v977_v30  ;;  %980 = vst [vmem:[%s5769_s24 + $0xcf8] sm:$0xff] %v979_v31  ;;  %v983_v33 = vld [vmem:[%s5764_s23 + $0x1a08] sm:$0xff]  ;;  %v985_v34 = vld [vmem:[%s5764_s23 + $0x1a10] sm:$0xff] }
  0xe2   : > { %982 = vst [vmem:[%s5769_s24 + $0xd00] sm:$0xff] %v981_v32  ;;  %v987_v35 = vld [vmem:[%s5764_s23 + $0x1a18] sm:$0xff]  ;;  %984 = vst [vmem:[%s5769_s24 + $0xd08] sm:$0xff] %v983_v33  ;;  %v989_v36 = vld [vmem:[%s5764_s23 + $0x1a20] sm:$0xff] }
  0xe3   : > { %986 = vst [vmem:[%s5769_s24 + $0xd10] sm:$0xff] %v985_v34  ;;  %988 = vst [vmem:[%s5769_s24 + $0xd18] sm:$0xff] %v987_v35  ;;  %v991_v37 = vld [vmem:[%s5764_s23 + $0x1a28] sm:$0xff]  ;;  %v993_v38 = vld [vmem:[%s5764_s23 + $0x1a30] sm:$0xff] }
  0xe4   : > { %990 = vst [vmem:[%s5769_s24 + $0xd20] sm:$0xff] %v989_v36  ;;  %992 = vst [vmem:[%s5769_s24 + $0xd28] sm:$0xff] %v991_v37  ;;  %v995_v39 = vld [vmem:[%s5764_s23 + $0x1a38] sm:$0xff]  ;;  %v997_v40 = vld [vmem:[%s5764_s23 + $0x1a40] sm:$0xff] }
  0xe5   : > { %994 = vst [vmem:[%s5769_s24 + $0xd30] sm:$0xff] %v993_v38  ;;  %v999_v41 = vld [vmem:[%s5764_s23 + $0x1a48] sm:$0xff]  ;;  %996 = vst [vmem:[%s5769_s24 + $0xd38] sm:$0xff] %v995_v39  ;;  %v1001_v42 = vld [vmem:[%s5764_s23 + $0x1a50] sm:$0xff] }
  0xe6   : > { %998 = vst [vmem:[%s5769_s24 + $0xd40] sm:$0xff] %v997_v40  ;;  %1000 = vst [vmem:[%s5769_s24 + $0xd48] sm:$0xff] %v999_v41  ;;  %v1003_v43 = vld [vmem:[%s5764_s23 + $0x1a58] sm:$0xff]  ;;  %v1005_v44 = vld [vmem:[%s5764_s23 + $0x1a60] sm:$0xff] }
  0xe7   : > { %1002 = vst [vmem:[%s5769_s24 + $0xd50] sm:$0xff] %v1001_v42  ;;  %1004 = vst [vmem:[%s5769_s24 + $0xd58] sm:$0xff] %v1003_v43  ;;  %v1007_v45 = vld [vmem:[%s5764_s23 + $0x1a68] sm:$0xff]  ;;  %v1009_v46 = vld [vmem:[%s5764_s23 + $0x1a70] sm:$0xff] }
  0xe8   : > { %1006 = vst [vmem:[%s5769_s24 + $0xd60] sm:$0xff] %v1005_v44  ;;  %v1011_v47 = vld [vmem:[%s5764_s23 + $0x1a78] sm:$0xff]  ;;  %1008 = vst [vmem:[%s5769_s24 + $0xd68] sm:$0xff] %v1007_v45  ;;  %v1013_v48 = vld [vmem:[%s5764_s23 + $0x1b00] sm:$0xff] }
  0xe9   : > { %1010 = vst [vmem:[%s5769_s24 + $0xd70] sm:$0xff] %v1009_v46  ;;  %1012 = vst [vmem:[%s5769_s24 + $0xd78] sm:$0xff] %v1011_v47  ;;  %v1015_v49 = vld [vmem:[%s5764_s23 + $0x1b08] sm:$0xff]  ;;  %v1017_v50 = vld [vmem:[%s5764_s23 + $0x1b10] sm:$0xff] }
  0xea   : > { %1014 = vst [vmem:[%s5769_s24 + $0xd80] sm:$0xff] %v1013_v48  ;;  %1016 = vst [vmem:[%s5769_s24 + $0xd88] sm:$0xff] %v1015_v49  ;;  %v1019_v51 = vld [vmem:[%s5764_s23 + $0x1b18] sm:$0xff]  ;;  %v1021_v52 = vld [vmem:[%s5764_s23 + $0x1b20] sm:$0xff] }
  0xeb   : > { %1018 = vst [vmem:[%s5769_s24 + $0xd90] sm:$0xff] %v1017_v50  ;;  %v1023_v53 = vld [vmem:[%s5764_s23 + $0x1b28] sm:$0xff]  ;;  %1020 = vst [vmem:[%s5769_s24 + $0xd98] sm:$0xff] %v1019_v51  ;;  %v1025_v54 = vld [vmem:[%s5764_s23 + $0x1b30] sm:$0xff] }
  0xec   : > { %1022 = vst [vmem:[%s5769_s24 + $0xda0] sm:$0xff] %v1021_v52  ;;  %1024 = vst [vmem:[%s5769_s24 + $0xda8] sm:$0xff] %v1023_v53  ;;  %v1027_v55 = vld [vmem:[%s5764_s23 + $0x1b38] sm:$0xff]  ;;  %v1029_v56 = vld [vmem:[%s5764_s23 + $0x1b40] sm:$0xff] }
  0xed   : > { %1026 = vst [vmem:[%s5769_s24 + $0xdb0] sm:$0xff] %v1025_v54  ;;  %1028 = vst [vmem:[%s5769_s24 + $0xdb8] sm:$0xff] %v1027_v55  ;;  %v1031_v57 = vld [vmem:[%s5764_s23 + $0x1b48] sm:$0xff]  ;;  %v1033_v58 = vld [vmem:[%s5764_s23 + $0x1b50] sm:$0xff] }
  0xee   : > { %1030 = vst [vmem:[%s5769_s24 + $0xdc0] sm:$0xff] %v1029_v56  ;;  %v1035_v59 = vld [vmem:[%s5764_s23 + $0x1b58] sm:$0xff]  ;;  %1032 = vst [vmem:[%s5769_s24 + $0xdc8] sm:$0xff] %v1031_v57  ;;  %v1037_v60 = vld [vmem:[%s5764_s23 + $0x1b60] sm:$0xff] }
  0xef   : > { %1034 = vst [vmem:[%s5769_s24 + $0xdd0] sm:$0xff] %v1033_v58  ;;  %1036 = vst [vmem:[%s5769_s24 + $0xdd8] sm:$0xff] %v1035_v59  ;;  %v1039_v61 = vld [vmem:[%s5764_s23 + $0x1b68] sm:$0xff]  ;;  %v1041_v62 = vld [vmem:[%s5764_s23 + $0x1b70] sm:$0xff] }
  0xf0   : > { %1038 = vst [vmem:[%s5769_s24 + $0xde0] sm:$0xff] %v1037_v60  ;;  %1040 = vst [vmem:[%s5769_s24 + $0xde8] sm:$0xff] %v1039_v61  ;;  %v1043_v63 = vld [vmem:[%s5764_s23 + $0x1b78] sm:$0xff]  ;;  %v1045_v0 = vld [vmem:[%s5764_s23 + $0x1c00] sm:$0xff] }
  0xf1   : > { %1042 = vst [vmem:[%s5769_s24 + $0xdf0] sm:$0xff] %v1041_v62  ;;  %v1047_v1 = vld [vmem:[%s5764_s23 + $0x1c08] sm:$0xff]  ;;  %1044 = vst [vmem:[%s5769_s24 + $0xdf8] sm:$0xff] %v1043_v63  ;;  %v1049_v2 = vld [vmem:[%s5764_s23 + $0x1c10] sm:$0xff] }
  0xf2   : > { %1046 = vst [vmem:[%s5769_s24 + $0xe00] sm:$0xff] %v1045_v0  ;;  %1048 = vst [vmem:[%s5769_s24 + $0xe08] sm:$0xff] %v1047_v1  ;;  %v1051_v3 = vld [vmem:[%s5764_s23 + $0x1c18] sm:$0xff]  ;;  %v1053_v4 = vld [vmem:[%s5764_s23 + $0x1c20] sm:$0xff] }
  0xf3   : > { %1050 = vst [vmem:[%s5769_s24 + $0xe10] sm:$0xff] %v1049_v2  ;;  %1052 = vst [vmem:[%s5769_s24 + $0xe18] sm:$0xff] %v1051_v3  ;;  %v1055_v5 = vld [vmem:[%s5764_s23 + $0x1c28] sm:$0xff]  ;;  %v1057_v6 = vld [vmem:[%s5764_s23 + $0x1c30] sm:$0xff] }
  0xf4   : > { %1054 = vst [vmem:[%s5769_s24 + $0xe20] sm:$0xff] %v1053_v4  ;;  %v1059_v7 = vld [vmem:[%s5764_s23 + $0x1c38] sm:$0xff]  ;;  %1056 = vst [vmem:[%s5769_s24 + $0xe28] sm:$0xff] %v1055_v5  ;;  %v1061_v8 = vld [vmem:[%s5764_s23 + $0x1c40] sm:$0xff] }
  0xf5   : > { %1058 = vst [vmem:[%s5769_s24 + $0xe30] sm:$0xff] %v1057_v6  ;;  %1060 = vst [vmem:[%s5769_s24 + $0xe38] sm:$0xff] %v1059_v7  ;;  %v1063_v9 = vld [vmem:[%s5764_s23 + $0x1c48] sm:$0xff]  ;;  %v1065_v10 = vld [vmem:[%s5764_s23 + $0x1c50] sm:$0xff] }
  0xf6   : > { %1062 = vst [vmem:[%s5769_s24 + $0xe40] sm:$0xff] %v1061_v8  ;;  %1064 = vst [vmem:[%s5769_s24 + $0xe48] sm:$0xff] %v1063_v9  ;;  %v1067_v11 = vld [vmem:[%s5764_s23 + $0x1c58] sm:$0xff]  ;;  %v1069_v12 = vld [vmem:[%s5764_s23 + $0x1c60] sm:$0xff] }
  0xf7   : > { %1066 = vst [vmem:[%s5769_s24 + $0xe50] sm:$0xff] %v1065_v10  ;;  %v1071_v13 = vld [vmem:[%s5764_s23 + $0x1c68] sm:$0xff]  ;;  %1068 = vst [vmem:[%s5769_s24 + $0xe58] sm:$0xff] %v1067_v11  ;;  %v1073_v14 = vld [vmem:[%s5764_s23 + $0x1c70] sm:$0xff] }
  0xf8   : > { %1070 = vst [vmem:[%s5769_s24 + $0xe60] sm:$0xff] %v1069_v12  ;;  %1072 = vst [vmem:[%s5769_s24 + $0xe68] sm:$0xff] %v1071_v13  ;;  %v1075_v15 = vld [vmem:[%s5764_s23 + $0x1c78] sm:$0xff]  ;;  %v1077_v16 = vld [vmem:[%s5764_s23 + $0x1d00] sm:$0xff] }
  0xf9   : > { %1074 = vst [vmem:[%s5769_s24 + $0xe70] sm:$0xff] %v1073_v14  ;;  %1076 = vst [vmem:[%s5769_s24 + $0xe78] sm:$0xff] %v1075_v15  ;;  %v1079_v17 = vld [vmem:[%s5764_s23 + $0x1d08] sm:$0xff]  ;;  %v1081_v18 = vld [vmem:[%s5764_s23 + $0x1d10] sm:$0xff] }
  0xfa   : > { %1078 = vst [vmem:[%s5769_s24 + $0xe80] sm:$0xff] %v1077_v16  ;;  %v1083_v19 = vld [vmem:[%s5764_s23 + $0x1d18] sm:$0xff]  ;;  %1080 = vst [vmem:[%s5769_s24 + $0xe88] sm:$0xff] %v1079_v17  ;;  %v1085_v20 = vld [vmem:[%s5764_s23 + $0x1d20] sm:$0xff] }
  0xfb   : > { %1082 = vst [vmem:[%s5769_s24 + $0xe90] sm:$0xff] %v1081_v18  ;;  %1084 = vst [vmem:[%s5769_s24 + $0xe98] sm:$0xff] %v1083_v19  ;;  %v1087_v21 = vld [vmem:[%s5764_s23 + $0x1d28] sm:$0xff]  ;;  %v1089_v22 = vld [vmem:[%s5764_s23 + $0x1d30] sm:$0xff] }
  0xfc   : > { %1086 = vst [vmem:[%s5769_s24 + $0xea0] sm:$0xff] %v1085_v20  ;;  %1088 = vst [vmem:[%s5769_s24 + $0xea8] sm:$0xff] %v1087_v21  ;;  %v1091_v23 = vld [vmem:[%s5764_s23 + $0x1d38] sm:$0xff]  ;;  %v1093_v24 = vld [vmem:[%s5764_s23 + $0x1d40] sm:$0xff] }
  0xfd   : > { %1090 = vst [vmem:[%s5769_s24 + $0xeb0] sm:$0xff] %v1089_v22  ;;  %v1095_v25 = vld [vmem:[%s5764_s23 + $0x1d48] sm:$0xff]  ;;  %1092 = vst [vmem:[%s5769_s24 + $0xeb8] sm:$0xff] %v1091_v23  ;;  %v1097_v26 = vld [vmem:[%s5764_s23 + $0x1d50] sm:$0xff] }
  0xfe   : > { %1094 = vst [vmem:[%s5769_s24 + $0xec0] sm:$0xff] %v1093_v24  ;;  %1096 = vst [vmem:[%s5769_s24 + $0xec8] sm:$0xff] %v1095_v25  ;;  %v1099_v27 = vld [vmem:[%s5764_s23 + $0x1d58] sm:$0xff]  ;;  %v1101_v28 = vld [vmem:[%s5764_s23 + $0x1d60] sm:$0xff] }
  0xff   : > { %1098 = vst [vmem:[%s5769_s24 + $0xed0] sm:$0xff] %v1097_v26  ;;  %1100 = vst [vmem:[%s5769_s24 + $0xed8] sm:$0xff] %v1099_v27  ;;  %v1103_v29 = vld [vmem:[%s5764_s23 + $0x1d68] sm:$0xff]  ;;  %v1105_v30 = vld [vmem:[%s5764_s23 + $0x1d70] sm:$0xff] }
 0x100   : > { %1102 = vst [vmem:[%s5769_s24 + $0xee0] sm:$0xff] %v1101_v28  ;;  %v1107_v31 = vld [vmem:[%s5764_s23 + $0x1d78] sm:$0xff]  ;;  %1104 = vst [vmem:[%s5769_s24 + $0xee8] sm:$0xff] %v1103_v29  ;;  %v1109_v32 = vld [vmem:[%s5764_s23 + $0x1e00] sm:$0xff] }
 0x101   : > { %1106 = vst [vmem:[%s5769_s24 + $0xef0] sm:$0xff] %v1105_v30  ;;  %1108 = vst [vmem:[%s5769_s24 + $0xef8] sm:$0xff] %v1107_v31  ;;  %v1111_v33 = vld [vmem:[%s5764_s23 + $0x1e08] sm:$0xff]  ;;  %v1113_v34 = vld [vmem:[%s5764_s23 + $0x1e10] sm:$0xff] }
 0x102   : > { %1110 = vst [vmem:[%s5769_s24 + $0xf00] sm:$0xff] %v1109_v32  ;;  %1112 = vst [vmem:[%s5769_s24 + $0xf08] sm:$0xff] %v1111_v33  ;;  %v1115_v35 = vld [vmem:[%s5764_s23 + $0x1e18] sm:$0xff]  ;;  %v1117_v36 = vld [vmem:[%s5764_s23 + $0x1e20] sm:$0xff] }
 0x103   : > { %1114 = vst [vmem:[%s5769_s24 + $0xf10] sm:$0xff] %v1113_v34  ;;  %v1119_v37 = vld [vmem:[%s5764_s23 + $0x1e28] sm:$0xff]  ;;  %1116 = vst [vmem:[%s5769_s24 + $0xf18] sm:$0xff] %v1115_v35  ;;  %v1121_v38 = vld [vmem:[%s5764_s23 + $0x1e30] sm:$0xff] }
 0x104   : > { %1118 = vst [vmem:[%s5769_s24 + $0xf20] sm:$0xff] %v1117_v36  ;;  %1120 = vst [vmem:[%s5769_s24 + $0xf28] sm:$0xff] %v1119_v37  ;;  %v1123_v39 = vld [vmem:[%s5764_s23 + $0x1e38] sm:$0xff]  ;;  %v1125_v40 = vld [vmem:[%s5764_s23 + $0x1e40] sm:$0xff] }
 0x105   : > { %1122 = vst [vmem:[%s5769_s24 + $0xf30] sm:$0xff] %v1121_v38  ;;  %1124 = vst [vmem:[%s5769_s24 + $0xf38] sm:$0xff] %v1123_v39  ;;  %v1127_v41 = vld [vmem:[%s5764_s23 + $0x1e48] sm:$0xff]  ;;  %v1129_v42 = vld [vmem:[%s5764_s23 + $0x1e50] sm:$0xff] }
 0x106   : > { %1126 = vst [vmem:[%s5769_s24 + $0xf40] sm:$0xff] %v1125_v40  ;;  %v1131_v43 = vld [vmem:[%s5764_s23 + $0x1e58] sm:$0xff]  ;;  %1128 = vst [vmem:[%s5769_s24 + $0xf48] sm:$0xff] %v1127_v41  ;;  %v1133_v44 = vld [vmem:[%s5764_s23 + $0x1e60] sm:$0xff] }
 0x107   : > { %1130 = vst [vmem:[%s5769_s24 + $0xf50] sm:$0xff] %v1129_v42  ;;  %1132 = vst [vmem:[%s5769_s24 + $0xf58] sm:$0xff] %v1131_v43  ;;  %v1135_v45 = vld [vmem:[%s5764_s23 + $0x1e68] sm:$0xff]  ;;  %v1137_v46 = vld [vmem:[%s5764_s23 + $0x1e70] sm:$0xff] }
 0x108   : > { %1134 = vst [vmem:[%s5769_s24 + $0xf60] sm:$0xff] %v1133_v44  ;;  %1136 = vst [vmem:[%s5769_s24 + $0xf68] sm:$0xff] %v1135_v45  ;;  %v1139_v47 = vld [vmem:[%s5764_s23 + $0x1e78] sm:$0xff]  ;;  %v1141_v48 = vld [vmem:[%s5764_s23 + $0x1f00] sm:$0xff] }
 0x109   : > { %1138 = vst [vmem:[%s5769_s24 + $0xf70] sm:$0xff] %v1137_v46  ;;  %v1143_v49 = vld [vmem:[%s5764_s23 + $0x1f08] sm:$0xff]  ;;  %1140 = vst [vmem:[%s5769_s24 + $0xf78] sm:$0xff] %v1139_v47  ;;  %v1145_v50 = vld [vmem:[%s5764_s23 + $0x1f10] sm:$0xff] }
 0x10a   : > { %1142 = vst [vmem:[%s5769_s24 + $0xf80] sm:$0xff] %v1141_v48  ;;  %1144 = vst [vmem:[%s5769_s24 + $0xf88] sm:$0xff] %v1143_v49  ;;  %v1147_v51 = vld [vmem:[%s5764_s23 + $0x1f18] sm:$0xff]  ;;  %v1149_v52 = vld [vmem:[%s5764_s23 + $0x1f20] sm:$0xff] }
 0x10b   : > { %1146 = vst [vmem:[%s5769_s24 + $0xf90] sm:$0xff] %v1145_v50  ;;  %1148 = vst [vmem:[%s5769_s24 + $0xf98] sm:$0xff] %v1147_v51  ;;  %v1151_v53 = vld [vmem:[%s5764_s23 + $0x1f28] sm:$0xff]  ;;  %v1153_v54 = vld [vmem:[%s5764_s23 + $0x1f30] sm:$0xff] }
 0x10c   : > { %1150 = vst [vmem:[%s5769_s24 + $0xfa0] sm:$0xff] %v1149_v52  ;;  %v1155_v55 = vld [vmem:[%s5764_s23 + $0x1f38] sm:$0xff]  ;;  %1152 = vst [vmem:[%s5769_s24 + $0xfa8] sm:$0xff] %v1151_v53  ;;  %v1157_v56 = vld [vmem:[%s5764_s23 + $0x1f40] sm:$0xff] }
 0x10d   : > { %1154 = vst [vmem:[%s5769_s24 + $0xfb0] sm:$0xff] %v1153_v54  ;;  %1156 = vst [vmem:[%s5769_s24 + $0xfb8] sm:$0xff] %v1155_v55  ;;  %v1159_v57 = vld [vmem:[%s5764_s23 + $0x1f48] sm:$0xff]  ;;  %v1161_v58 = vld [vmem:[%s5764_s23 + $0x1f50] sm:$0xff] }
 0x10e   : > { %1158 = vst [vmem:[%s5769_s24 + $0xfc0] sm:$0xff] %v1157_v56  ;;  %1160 = vst [vmem:[%s5769_s24 + $0xfc8] sm:$0xff] %v1159_v57  ;;  %v1163_v59 = vld [vmem:[%s5764_s23 + $0x1f58] sm:$0xff]  ;;  %v1165_v60 = vld [vmem:[%s5764_s23 + $0x1f60] sm:$0xff] }
 0x10f   : > { %1162 = vst [vmem:[%s5769_s24 + $0xfd0] sm:$0xff] %v1161_v58  ;;  %v1167_v61 = vld [vmem:[%s5764_s23 + $0x1f68] sm:$0xff]  ;;  %1164 = vst [vmem:[%s5769_s24 + $0xfd8] sm:$0xff] %v1163_v59  ;;  %v1169_v62 = vld [vmem:[%s5764_s23 + $0x1f70] sm:$0xff] }
 0x110   : > { %1166 = vst [vmem:[%s5769_s24 + $0xfe0] sm:$0xff] %v1165_v60  ;;  %1168 = vst [vmem:[%s5769_s24 + $0xfe8] sm:$0xff] %v1167_v61  ;;  %v1171_v63 = vld [vmem:[%s5764_s23 + $0x1f78] sm:$0xff]  ;;  %v1173_v0 = vld [vmem:[%s5764_s23 + $0x2000] sm:$0xff] }
 0x111   : > { %1170 = vst [vmem:[%s5769_s24 + $0xff0] sm:$0xff] %v1169_v62  ;;  %1172 = vst [vmem:[%s5769_s24 + $0xff8] sm:$0xff] %v1171_v63  ;;  %v1175_v1 = vld [vmem:[%s5764_s23 + $0x2008] sm:$0xff]  ;;  %v1177_v2 = vld [vmem:[%s5764_s23 + $0x2010] sm:$0xff] }
 0x112   : > { %1174 = vst [vmem:[%s5769_s24 + $0x1000] sm:$0xff] %v1173_v0  ;;  %v1179_v3 = vld [vmem:[%s5764_s23 + $0x2018] sm:$0xff]  ;;  %1176 = vst [vmem:[%s5769_s24 + $0x1008] sm:$0xff] %v1175_v1  ;;  %v1181_v4 = vld [vmem:[%s5764_s23 + $0x2020] sm:$0xff] }
 0x113   : > { %1178 = vst [vmem:[%s5769_s24 + $0x1010] sm:$0xff] %v1177_v2  ;;  %1180 = vst [vmem:[%s5769_s24 + $0x1018] sm:$0xff] %v1179_v3  ;;  %v1183_v5 = vld [vmem:[%s5764_s23 + $0x2028] sm:$0xff]  ;;  %v1185_v6 = vld [vmem:[%s5764_s23 + $0x2030] sm:$0xff] }
 0x114   : > { %1182 = vst [vmem:[%s5769_s24 + $0x1020] sm:$0xff] %v1181_v4  ;;  %1184 = vst [vmem:[%s5769_s24 + $0x1028] sm:$0xff] %v1183_v5  ;;  %v1187_v7 = vld [vmem:[%s5764_s23 + $0x2038] sm:$0xff]  ;;  %v1189_v8 = vld [vmem:[%s5764_s23 + $0x2040] sm:$0xff] }
 0x115   : > { %1186 = vst [vmem:[%s5769_s24 + $0x1030] sm:$0xff] %v1185_v6  ;;  %v1191_v9 = vld [vmem:[%s5764_s23 + $0x2048] sm:$0xff]  ;;  %1188 = vst [vmem:[%s5769_s24 + $0x1038] sm:$0xff] %v1187_v7  ;;  %v1193_v10 = vld [vmem:[%s5764_s23 + $0x2050] sm:$0xff] }
 0x116   : > { %1190 = vst [vmem:[%s5769_s24 + $0x1040] sm:$0xff] %v1189_v8  ;;  %1192 = vst [vmem:[%s5769_s24 + $0x1048] sm:$0xff] %v1191_v9  ;;  %v1195_v11 = vld [vmem:[%s5764_s23 + $0x2058] sm:$0xff]  ;;  %v1197_v12 = vld [vmem:[%s5764_s23 + $0x2060] sm:$0xff] }
 0x117   : > { %1194 = vst [vmem:[%s5769_s24 + $0x1050] sm:$0xff] %v1193_v10  ;;  %1196 = vst [vmem:[%s5769_s24 + $0x1058] sm:$0xff] %v1195_v11  ;;  %v1199_v13 = vld [vmem:[%s5764_s23 + $0x2068] sm:$0xff]  ;;  %v1201_v14 = vld [vmem:[%s5764_s23 + $0x2070] sm:$0xff] }
 0x118   : > { %1198 = vst [vmem:[%s5769_s24 + $0x1060] sm:$0xff] %v1197_v12  ;;  %v1203_v15 = vld [vmem:[%s5764_s23 + $0x2078] sm:$0xff]  ;;  %1200 = vst [vmem:[%s5769_s24 + $0x1068] sm:$0xff] %v1199_v13  ;;  %v1205_v16 = vld [vmem:[%s5764_s23 + $0x2100] sm:$0xff] }
 0x119   : > { %1202 = vst [vmem:[%s5769_s24 + $0x1070] sm:$0xff] %v1201_v14  ;;  %1204 = vst [vmem:[%s5769_s24 + $0x1078] sm:$0xff] %v1203_v15  ;;  %v1207_v17 = vld [vmem:[%s5764_s23 + $0x2108] sm:$0xff]  ;;  %v1209_v18 = vld [vmem:[%s5764_s23 + $0x2110] sm:$0xff] }
 0x11a   : > { %1206 = vst [vmem:[%s5769_s24 + $0x1080] sm:$0xff] %v1205_v16  ;;  %1208 = vst [vmem:[%s5769_s24 + $0x1088] sm:$0xff] %v1207_v17  ;;  %v1211_v19 = vld [vmem:[%s5764_s23 + $0x2118] sm:$0xff]  ;;  %v1213_v20 = vld [vmem:[%s5764_s23 + $0x2120] sm:$0xff] }
 0x11b   : > { %1210 = vst [vmem:[%s5769_s24 + $0x1090] sm:$0xff] %v1209_v18  ;;  %v1215_v21 = vld [vmem:[%s5764_s23 + $0x2128] sm:$0xff]  ;;  %1212 = vst [vmem:[%s5769_s24 + $0x1098] sm:$0xff] %v1211_v19  ;;  %v1217_v22 = vld [vmem:[%s5764_s23 + $0x2130] sm:$0xff] }
 0x11c   : > { %1214 = vst [vmem:[%s5769_s24 + $0x10a0] sm:$0xff] %v1213_v20  ;;  %1216 = vst [vmem:[%s5769_s24 + $0x10a8] sm:$0xff] %v1215_v21  ;;  %v1219_v23 = vld [vmem:[%s5764_s23 + $0x2138] sm:$0xff]  ;;  %v1221_v24 = vld [vmem:[%s5764_s23 + $0x2140] sm:$0xff] }
 0x11d   : > { %1218 = vst [vmem:[%s5769_s24 + $0x10b0] sm:$0xff] %v1217_v22  ;;  %1220 = vst [vmem:[%s5769_s24 + $0x10b8] sm:$0xff] %v1219_v23  ;;  %v1223_v25 = vld [vmem:[%s5764_s23 + $0x2148] sm:$0xff]  ;;  %v1225_v26 = vld [vmem:[%s5764_s23 + $0x2150] sm:$0xff] }
 0x11e   : > { %1222 = vst [vmem:[%s5769_s24 + $0x10c0] sm:$0xff] %v1221_v24  ;;  %v1227_v27 = vld [vmem:[%s5764_s23 + $0x2158] sm:$0xff]  ;;  %1224 = vst [vmem:[%s5769_s24 + $0x10c8] sm:$0xff] %v1223_v25  ;;  %v1229_v28 = vld [vmem:[%s5764_s23 + $0x2160] sm:$0xff] }
 0x11f   : > { %1226 = vst [vmem:[%s5769_s24 + $0x10d0] sm:$0xff] %v1225_v26  ;;  %1228 = vst [vmem:[%s5769_s24 + $0x10d8] sm:$0xff] %v1227_v27  ;;  %v1231_v29 = vld [vmem:[%s5764_s23 + $0x2168] sm:$0xff]  ;;  %v1233_v30 = vld [vmem:[%s5764_s23 + $0x2170] sm:$0xff] }
 0x120   : > { %1230 = vst [vmem:[%s5769_s24 + $0x10e0] sm:$0xff] %v1229_v28  ;;  %1232 = vst [vmem:[%s5769_s24 + $0x10e8] sm:$0xff] %v1231_v29  ;;  %v1235_v31 = vld [vmem:[%s5764_s23 + $0x2178] sm:$0xff]  ;;  %v1237_v32 = vld [vmem:[%s5764_s23 + $0x2200] sm:$0xff] }
 0x121   : > { %1234 = vst [vmem:[%s5769_s24 + $0x10f0] sm:$0xff] %v1233_v30  ;;  %v1239_v33 = vld [vmem:[%s5764_s23 + $0x2208] sm:$0xff]  ;;  %1236 = vst [vmem:[%s5769_s24 + $0x10f8] sm:$0xff] %v1235_v31  ;;  %v1241_v34 = vld [vmem:[%s5764_s23 + $0x2210] sm:$0xff] }
 0x122   : > { %1238 = vst [vmem:[%s5769_s24 + $0x1100] sm:$0xff] %v1237_v32  ;;  %1240 = vst [vmem:[%s5769_s24 + $0x1108] sm:$0xff] %v1239_v33  ;;  %v1243_v35 = vld [vmem:[%s5764_s23 + $0x2218] sm:$0xff]  ;;  %v1245_v36 = vld [vmem:[%s5764_s23 + $0x2220] sm:$0xff] }
 0x123   : > { %1242 = vst [vmem:[%s5769_s24 + $0x1110] sm:$0xff] %v1241_v34  ;;  %1244 = vst [vmem:[%s5769_s24 + $0x1118] sm:$0xff] %v1243_v35  ;;  %v1247_v37 = vld [vmem:[%s5764_s23 + $0x2228] sm:$0xff]  ;;  %v1249_v38 = vld [vmem:[%s5764_s23 + $0x2230] sm:$0xff] }
 0x124   : > { %1246 = vst [vmem:[%s5769_s24 + $0x1120] sm:$0xff] %v1245_v36  ;;  %v1251_v39 = vld [vmem:[%s5764_s23 + $0x2238] sm:$0xff]  ;;  %1248 = vst [vmem:[%s5769_s24 + $0x1128] sm:$0xff] %v1247_v37  ;;  %v1253_v40 = vld [vmem:[%s5764_s23 + $0x2240] sm:$0xff] }
 0x125   : > { %1250 = vst [vmem:[%s5769_s24 + $0x1130] sm:$0xff] %v1249_v38  ;;  %1252 = vst [vmem:[%s5769_s24 + $0x1138] sm:$0xff] %v1251_v39  ;;  %v1255_v41 = vld [vmem:[%s5764_s23 + $0x2248] sm:$0xff]  ;;  %v1257_v42 = vld [vmem:[%s5764_s23 + $0x2250] sm:$0xff] }
 0x126   : > { %1254 = vst [vmem:[%s5769_s24 + $0x1140] sm:$0xff] %v1253_v40  ;;  %1256 = vst [vmem:[%s5769_s24 + $0x1148] sm:$0xff] %v1255_v41  ;;  %v1259_v43 = vld [vmem:[%s5764_s23 + $0x2258] sm:$0xff]  ;;  %v1261_v44 = vld [vmem:[%s5764_s23 + $0x2260] sm:$0xff] }
 0x127   : > { %1258 = vst [vmem:[%s5769_s24 + $0x1150] sm:$0xff] %v1257_v42  ;;  %v1263_v45 = vld [vmem:[%s5764_s23 + $0x2268] sm:$0xff]  ;;  %1260 = vst [vmem:[%s5769_s24 + $0x1158] sm:$0xff] %v1259_v43  ;;  %v1265_v46 = vld [vmem:[%s5764_s23 + $0x2270] sm:$0xff] }
 0x128   : > { %1262 = vst [vmem:[%s5769_s24 + $0x1160] sm:$0xff] %v1261_v44  ;;  %1264 = vst [vmem:[%s5769_s24 + $0x1168] sm:$0xff] %v1263_v45  ;;  %v1267_v47 = vld [vmem:[%s5764_s23 + $0x2278] sm:$0xff]  ;;  %v1269_v48 = vld [vmem:[%s5764_s23 + $0x2300] sm:$0xff] }
 0x129   : > { %1266 = vst [vmem:[%s5769_s24 + $0x1170] sm:$0xff] %v1265_v46  ;;  %1268 = vst [vmem:[%s5769_s24 + $0x1178] sm:$0xff] %v1267_v47  ;;  %v1271_v49 = vld [vmem:[%s5764_s23 + $0x2308] sm:$0xff]  ;;  %v1273_v50 = vld [vmem:[%s5764_s23 + $0x2310] sm:$0xff] }
 0x12a   : > { %1270 = vst [vmem:[%s5769_s24 + $0x1180] sm:$0xff] %v1269_v48  ;;  %v1275_v51 = vld [vmem:[%s5764_s23 + $0x2318] sm:$0xff]  ;;  %1272 = vst [vmem:[%s5769_s24 + $0x1188] sm:$0xff] %v1271_v49  ;;  %v1277_v52 = vld [vmem:[%s5764_s23 + $0x2320] sm:$0xff] }
 0x12b   : > { %1274 = vst [vmem:[%s5769_s24 + $0x1190] sm:$0xff] %v1273_v50  ;;  %1276 = vst [vmem:[%s5769_s24 + $0x1198] sm:$0xff] %v1275_v51  ;;  %v1279_v53 = vld [vmem:[%s5764_s23 + $0x2328] sm:$0xff]  ;;  %v1281_v54 = vld [vmem:[%s5764_s23 + $0x2330] sm:$0xff] }
 0x12c   : > { %1278 = vst [vmem:[%s5769_s24 + $0x11a0] sm:$0xff] %v1277_v52  ;;  %1280 = vst [vmem:[%s5769_s24 + $0x11a8] sm:$0xff] %v1279_v53  ;;  %v1283_v55 = vld [vmem:[%s5764_s23 + $0x2338] sm:$0xff]  ;;  %v1285_v56 = vld [vmem:[%s5764_s23 + $0x2340] sm:$0xff] }
 0x12d   : > { %1282 = vst [vmem:[%s5769_s24 + $0x11b0] sm:$0xff] %v1281_v54  ;;  %v1287_v57 = vld [vmem:[%s5764_s23 + $0x2348] sm:$0xff]  ;;  %1284 = vst [vmem:[%s5769_s24 + $0x11b8] sm:$0xff] %v1283_v55  ;;  %v1289_v58 = vld [vmem:[%s5764_s23 + $0x2350] sm:$0xff] }
 0x12e   : > { %1286 = vst [vmem:[%s5769_s24 + $0x11c0] sm:$0xff] %v1285_v56  ;;  %1288 = vst [vmem:[%s5769_s24 + $0x11c8] sm:$0xff] %v1287_v57  ;;  %v1291_v59 = vld [vmem:[%s5764_s23 + $0x2358] sm:$0xff]  ;;  %v1293_v60 = vld [vmem:[%s5764_s23 + $0x2360] sm:$0xff] }
 0x12f   : > { %1290 = vst [vmem:[%s5769_s24 + $0x11d0] sm:$0xff] %v1289_v58  ;;  %1292 = vst [vmem:[%s5769_s24 + $0x11d8] sm:$0xff] %v1291_v59  ;;  %v1295_v61 = vld [vmem:[%s5764_s23 + $0x2368] sm:$0xff]  ;;  %v1297_v62 = vld [vmem:[%s5764_s23 + $0x2370] sm:$0xff] }
 0x130   : > { %1294 = vst [vmem:[%s5769_s24 + $0x11e0] sm:$0xff] %v1293_v60  ;;  %v1299_v63 = vld [vmem:[%s5764_s23 + $0x2378] sm:$0xff]  ;;  %1296 = vst [vmem:[%s5769_s24 + $0x11e8] sm:$0xff] %v1295_v61  ;;  %v1301_v0 = vld [vmem:[%s5764_s23 + $0x2400] sm:$0xff] }
 0x131   : > { %1298 = vst [vmem:[%s5769_s24 + $0x11f0] sm:$0xff] %v1297_v62  ;;  %1300 = vst [vmem:[%s5769_s24 + $0x11f8] sm:$0xff] %v1299_v63  ;;  %v1303_v1 = vld [vmem:[%s5764_s23 + $0x2408] sm:$0xff]  ;;  %v1305_v2 = vld [vmem:[%s5764_s23 + $0x2410] sm:$0xff] }
 0x132   : > { %1302 = vst [vmem:[%s5769_s24 + $0x1200] sm:$0xff] %v1301_v0  ;;  %1304 = vst [vmem:[%s5769_s24 + $0x1208] sm:$0xff] %v1303_v1  ;;  %v1307_v3 = vld [vmem:[%s5764_s23 + $0x2418] sm:$0xff]  ;;  %v1309_v4 = vld [vmem:[%s5764_s23 + $0x2420] sm:$0xff] }
 0x133   : > { %1306 = vst [vmem:[%s5769_s24 + $0x1210] sm:$0xff] %v1305_v2  ;;  %v1311_v5 = vld [vmem:[%s5764_s23 + $0x2428] sm:$0xff]  ;;  %1308 = vst [vmem:[%s5769_s24 + $0x1218] sm:$0xff] %v1307_v3  ;;  %v1313_v6 = vld [vmem:[%s5764_s23 + $0x2430] sm:$0xff] }
 0x134   : > { %1310 = vst [vmem:[%s5769_s24 + $0x1220] sm:$0xff] %v1309_v4  ;;  %1312 = vst [vmem:[%s5769_s24 + $0x1228] sm:$0xff] %v1311_v5  ;;  %v1315_v7 = vld [vmem:[%s5764_s23 + $0x2438] sm:$0xff]  ;;  %v1317_v8 = vld [vmem:[%s5764_s23 + $0x2440] sm:$0xff] }
 0x135   : > { %1314 = vst [vmem:[%s5769_s24 + $0x1230] sm:$0xff] %v1313_v6  ;;  %1316 = vst [vmem:[%s5769_s24 + $0x1238] sm:$0xff] %v1315_v7  ;;  %v1319_v9 = vld [vmem:[%s5764_s23 + $0x2448] sm:$0xff]  ;;  %v1321_v10 = vld [vmem:[%s5764_s23 + $0x2450] sm:$0xff] }
 0x136   : > { %1318 = vst [vmem:[%s5769_s24 + $0x1240] sm:$0xff] %v1317_v8  ;;  %v1323_v11 = vld [vmem:[%s5764_s23 + $0x2458] sm:$0xff]  ;;  %1320 = vst [vmem:[%s5769_s24 + $0x1248] sm:$0xff] %v1319_v9  ;;  %v1325_v12 = vld [vmem:[%s5764_s23 + $0x2460] sm:$0xff] }
 0x137   : > { %1322 = vst [vmem:[%s5769_s24 + $0x1250] sm:$0xff] %v1321_v10  ;;  %1324 = vst [vmem:[%s5769_s24 + $0x1258] sm:$0xff] %v1323_v11  ;;  %v1327_v13 = vld [vmem:[%s5764_s23 + $0x2468] sm:$0xff]  ;;  %v1329_v14 = vld [vmem:[%s5764_s23 + $0x2470] sm:$0xff] }
 0x138   : > { %1326 = vst [vmem:[%s5769_s24 + $0x1260] sm:$0xff] %v1325_v12  ;;  %1328 = vst [vmem:[%s5769_s24 + $0x1268] sm:$0xff] %v1327_v13  ;;  %v1331_v15 = vld [vmem:[%s5764_s23 + $0x2478] sm:$0xff]  ;;  %v1333_v16 = vld [vmem:[%s5764_s23 + $0x2500] sm:$0xff] }
 0x139   : > { %1330 = vst [vmem:[%s5769_s24 + $0x1270] sm:$0xff] %v1329_v14  ;;  %v1335_v17 = vld [vmem:[%s5764_s23 + $0x2508] sm:$0xff]  ;;  %1332 = vst [vmem:[%s5769_s24 + $0x1278] sm:$0xff] %v1331_v15  ;;  %v1337_v18 = vld [vmem:[%s5764_s23 + $0x2510] sm:$0xff] }
 0x13a   : > { %1334 = vst [vmem:[%s5769_s24 + $0x1280] sm:$0xff] %v1333_v16  ;;  %1336 = vst [vmem:[%s5769_s24 + $0x1288] sm:$0xff] %v1335_v17  ;;  %v1339_v19 = vld [vmem:[%s5764_s23 + $0x2518] sm:$0xff]  ;;  %v1341_v20 = vld [vmem:[%s5764_s23 + $0x2520] sm:$0xff] }
 0x13b   : > { %1338 = vst [vmem:[%s5769_s24 + $0x1290] sm:$0xff] %v1337_v18  ;;  %1340 = vst [vmem:[%s5769_s24 + $0x1298] sm:$0xff] %v1339_v19  ;;  %v1343_v21 = vld [vmem:[%s5764_s23 + $0x2528] sm:$0xff]  ;;  %v1345_v22 = vld [vmem:[%s5764_s23 + $0x2530] sm:$0xff] }
 0x13c   : > { %1342 = vst [vmem:[%s5769_s24 + $0x12a0] sm:$0xff] %v1341_v20  ;;  %v1347_v23 = vld [vmem:[%s5764_s23 + $0x2538] sm:$0xff]  ;;  %1344 = vst [vmem:[%s5769_s24 + $0x12a8] sm:$0xff] %v1343_v21  ;;  %v1349_v24 = vld [vmem:[%s5764_s23 + $0x2540] sm:$0xff] }
 0x13d   : > { %1346 = vst [vmem:[%s5769_s24 + $0x12b0] sm:$0xff] %v1345_v22  ;;  %1348 = vst [vmem:[%s5769_s24 + $0x12b8] sm:$0xff] %v1347_v23  ;;  %v1351_v25 = vld [vmem:[%s5764_s23 + $0x2548] sm:$0xff]  ;;  %v1353_v26 = vld [vmem:[%s5764_s23 + $0x2550] sm:$0xff] }
 0x13e   : > { %1350 = vst [vmem:[%s5769_s24 + $0x12c0] sm:$0xff] %v1349_v24  ;;  %1352 = vst [vmem:[%s5769_s24 + $0x12c8] sm:$0xff] %v1351_v25  ;;  %v1355_v27 = vld [vmem:[%s5764_s23 + $0x2558] sm:$0xff]  ;;  %v1357_v28 = vld [vmem:[%s5764_s23 + $0x2560] sm:$0xff] }
 0x13f   : > { %1354 = vst [vmem:[%s5769_s24 + $0x12d0] sm:$0xff] %v1353_v26  ;;  %v1359_v29 = vld [vmem:[%s5764_s23 + $0x2568] sm:$0xff]  ;;  %1356 = vst [vmem:[%s5769_s24 + $0x12d8] sm:$0xff] %v1355_v27  ;;  %v1361_v30 = vld [vmem:[%s5764_s23 + $0x2570] sm:$0xff] }
 0x140   : > { %1358 = vst [vmem:[%s5769_s24 + $0x12e0] sm:$0xff] %v1357_v28  ;;  %1360 = vst [vmem:[%s5769_s24 + $0x12e8] sm:$0xff] %v1359_v29  ;;  %v1363_v31 = vld [vmem:[%s5764_s23 + $0x2578] sm:$0xff]  ;;  %v1365_v32 = vld [vmem:[%s5764_s23 + $0x2600] sm:$0xff] }
 0x141   : > { %1362 = vst [vmem:[%s5769_s24 + $0x12f0] sm:$0xff] %v1361_v30  ;;  %1364 = vst [vmem:[%s5769_s24 + $0x12f8] sm:$0xff] %v1363_v31  ;;  %v1367_v33 = vld [vmem:[%s5764_s23 + $0x2608] sm:$0xff]  ;;  %v1369_v34 = vld [vmem:[%s5764_s23 + $0x2610] sm:$0xff] }
 0x142   : > { %1366 = vst [vmem:[%s5769_s24 + $0x1300] sm:$0xff] %v1365_v32  ;;  %v1371_v35 = vld [vmem:[%s5764_s23 + $0x2618] sm:$0xff]  ;;  %1368 = vst [vmem:[%s5769_s24 + $0x1308] sm:$0xff] %v1367_v33  ;;  %v1373_v36 = vld [vmem:[%s5764_s23 + $0x2620] sm:$0xff] }
 0x143   : > { %1370 = vst [vmem:[%s5769_s24 + $0x1310] sm:$0xff] %v1369_v34  ;;  %1372 = vst [vmem:[%s5769_s24 + $0x1318] sm:$0xff] %v1371_v35  ;;  %v1375_v37 = vld [vmem:[%s5764_s23 + $0x2628] sm:$0xff]  ;;  %v1377_v38 = vld [vmem:[%s5764_s23 + $0x2630] sm:$0xff] }
 0x144   : > { %1374 = vst [vmem:[%s5769_s24 + $0x1320] sm:$0xff] %v1373_v36  ;;  %1376 = vst [vmem:[%s5769_s24 + $0x1328] sm:$0xff] %v1375_v37  ;;  %v1379_v39 = vld [vmem:[%s5764_s23 + $0x2638] sm:$0xff]  ;;  %v1381_v40 = vld [vmem:[%s5764_s23 + $0x2640] sm:$0xff] }
 0x145   : > { %1378 = vst [vmem:[%s5769_s24 + $0x1330] sm:$0xff] %v1377_v38  ;;  %v1383_v41 = vld [vmem:[%s5764_s23 + $0x2648] sm:$0xff]  ;;  %1380 = vst [vmem:[%s5769_s24 + $0x1338] sm:$0xff] %v1379_v39  ;;  %v1385_v42 = vld [vmem:[%s5764_s23 + $0x2650] sm:$0xff] }
 0x146   : > { %1382 = vst [vmem:[%s5769_s24 + $0x1340] sm:$0xff] %v1381_v40  ;;  %1384 = vst [vmem:[%s5769_s24 + $0x1348] sm:$0xff] %v1383_v41  ;;  %v1387_v43 = vld [vmem:[%s5764_s23 + $0x2658] sm:$0xff]  ;;  %v1389_v44 = vld [vmem:[%s5764_s23 + $0x2660] sm:$0xff] }
 0x147   : > { %1386 = vst [vmem:[%s5769_s24 + $0x1350] sm:$0xff] %v1385_v42  ;;  %1388 = vst [vmem:[%s5769_s24 + $0x1358] sm:$0xff] %v1387_v43  ;;  %v1391_v45 = vld [vmem:[%s5764_s23 + $0x2668] sm:$0xff]  ;;  %v1393_v46 = vld [vmem:[%s5764_s23 + $0x2670] sm:$0xff] }
 0x148   : > { %1390 = vst [vmem:[%s5769_s24 + $0x1360] sm:$0xff] %v1389_v44  ;;  %v1395_v47 = vld [vmem:[%s5764_s23 + $0x2678] sm:$0xff]  ;;  %1392 = vst [vmem:[%s5769_s24 + $0x1368] sm:$0xff] %v1391_v45  ;;  %v1397_v48 = vld [vmem:[%s5764_s23 + $0x2700] sm:$0xff] }
 0x149   : > { %1394 = vst [vmem:[%s5769_s24 + $0x1370] sm:$0xff] %v1393_v46  ;;  %1396 = vst [vmem:[%s5769_s24 + $0x1378] sm:$0xff] %v1395_v47  ;;  %v1399_v49 = vld [vmem:[%s5764_s23 + $0x2708] sm:$0xff]  ;;  %v1401_v50 = vld [vmem:[%s5764_s23 + $0x2710] sm:$0xff] }
 0x14a   : > { %1398 = vst [vmem:[%s5769_s24 + $0x1380] sm:$0xff] %v1397_v48  ;;  %1400 = vst [vmem:[%s5769_s24 + $0x1388] sm:$0xff] %v1399_v49  ;;  %v1403_v51 = vld [vmem:[%s5764_s23 + $0x2718] sm:$0xff]  ;;  %v1405_v52 = vld [vmem:[%s5764_s23 + $0x2720] sm:$0xff] }
 0x14b   : > { %1402 = vst [vmem:[%s5769_s24 + $0x1390] sm:$0xff] %v1401_v50  ;;  %v1407_v53 = vld [vmem:[%s5764_s23 + $0x2728] sm:$0xff]  ;;  %1404 = vst [vmem:[%s5769_s24 + $0x1398] sm:$0xff] %v1403_v51  ;;  %v1409_v54 = vld [vmem:[%s5764_s23 + $0x2730] sm:$0xff] }
 0x14c   : > { %1406 = vst [vmem:[%s5769_s24 + $0x13a0] sm:$0xff] %v1405_v52  ;;  %1408 = vst [vmem:[%s5769_s24 + $0x13a8] sm:$0xff] %v1407_v53  ;;  %v1411_v55 = vld [vmem:[%s5764_s23 + $0x2738] sm:$0xff]  ;;  %v1413_v56 = vld [vmem:[%s5764_s23 + $0x2740] sm:$0xff] }
 0x14d   : > { %1410 = vst [vmem:[%s5769_s24 + $0x13b0] sm:$0xff] %v1409_v54  ;;  %1412 = vst [vmem:[%s5769_s24 + $0x13b8] sm:$0xff] %v1411_v55  ;;  %v1415_v57 = vld [vmem:[%s5764_s23 + $0x2748] sm:$0xff]  ;;  %v1417_v58 = vld [vmem:[%s5764_s23 + $0x2750] sm:$0xff] }
 0x14e   : > { %1414 = vst [vmem:[%s5769_s24 + $0x13c0] sm:$0xff] %v1413_v56  ;;  %v1419_v59 = vld [vmem:[%s5764_s23 + $0x2758] sm:$0xff]  ;;  %1416 = vst [vmem:[%s5769_s24 + $0x13c8] sm:$0xff] %v1415_v57  ;;  %v1421_v60 = vld [vmem:[%s5764_s23 + $0x2760] sm:$0xff] }
 0x14f   : > { %1418 = vst [vmem:[%s5769_s24 + $0x13d0] sm:$0xff] %v1417_v58  ;;  %1420 = vst [vmem:[%s5769_s24 + $0x13d8] sm:$0xff] %v1419_v59  ;;  %v1423_v61 = vld [vmem:[%s5764_s23 + $0x2768] sm:$0xff]  ;;  %v1425_v62 = vld [vmem:[%s5764_s23 + $0x2770] sm:$0xff] }
 0x150   : > { %1422 = vst [vmem:[%s5769_s24 + $0x13e0] sm:$0xff] %v1421_v60  ;;  %1424 = vst [vmem:[%s5769_s24 + $0x13e8] sm:$0xff] %v1423_v61  ;;  %v1427_v63 = vld [vmem:[%s5764_s23 + $0x2778] sm:$0xff]  ;;  %v1429_v0 = vld [vmem:[%s5764_s23 + $0x2800] sm:$0xff] }
 0x151   : > { %1426 = vst [vmem:[%s5769_s24 + $0x13f0] sm:$0xff] %v1425_v62  ;;  %v1431_v1 = vld [vmem:[%s5764_s23 + $0x2808] sm:$0xff]  ;;  %1428 = vst [vmem:[%s5769_s24 + $0x13f8] sm:$0xff] %v1427_v63  ;;  %v1433_v2 = vld [vmem:[%s5764_s23 + $0x2810] sm:$0xff] }
 0x152   : > { %1430 = vst [vmem:[%s5769_s24 + $0x1400] sm:$0xff] %v1429_v0  ;;  %1432 = vst [vmem:[%s5769_s24 + $0x1408] sm:$0xff] %v1431_v1  ;;  %v1435_v3 = vld [vmem:[%s5764_s23 + $0x2818] sm:$0xff]  ;;  %v1437_v4 = vld [vmem:[%s5764_s23 + $0x2820] sm:$0xff] }
 0x153   : > { %1434 = vst [vmem:[%s5769_s24 + $0x1410] sm:$0xff] %v1433_v2  ;;  %1436 = vst [vmem:[%s5769_s24 + $0x1418] sm:$0xff] %v1435_v3  ;;  %v1439_v5 = vld [vmem:[%s5764_s23 + $0x2828] sm:$0xff]  ;;  %v1441_v6 = vld [vmem:[%s5764_s23 + $0x2830] sm:$0xff] }
 0x154   : > { %1438 = vst [vmem:[%s5769_s24 + $0x1420] sm:$0xff] %v1437_v4  ;;  %v1443_v7 = vld [vmem:[%s5764_s23 + $0x2838] sm:$0xff]  ;;  %1440 = vst [vmem:[%s5769_s24 + $0x1428] sm:$0xff] %v1439_v5  ;;  %v1445_v8 = vld [vmem:[%s5764_s23 + $0x2840] sm:$0xff] }
 0x155   : > { %1442 = vst [vmem:[%s5769_s24 + $0x1430] sm:$0xff] %v1441_v6  ;;  %1444 = vst [vmem:[%s5769_s24 + $0x1438] sm:$0xff] %v1443_v7  ;;  %v1447_v9 = vld [vmem:[%s5764_s23 + $0x2848] sm:$0xff]  ;;  %v1449_v10 = vld [vmem:[%s5764_s23 + $0x2850] sm:$0xff] }
 0x156   : > { %1446 = vst [vmem:[%s5769_s24 + $0x1440] sm:$0xff] %v1445_v8  ;;  %1448 = vst [vmem:[%s5769_s24 + $0x1448] sm:$0xff] %v1447_v9  ;;  %v1451_v11 = vld [vmem:[%s5764_s23 + $0x2858] sm:$0xff]  ;;  %v1453_v12 = vld [vmem:[%s5764_s23 + $0x2860] sm:$0xff] }
 0x157   : > { %1450 = vst [vmem:[%s5769_s24 + $0x1450] sm:$0xff] %v1449_v10  ;;  %v1455_v13 = vld [vmem:[%s5764_s23 + $0x2868] sm:$0xff]  ;;  %1452 = vst [vmem:[%s5769_s24 + $0x1458] sm:$0xff] %v1451_v11  ;;  %v1457_v14 = vld [vmem:[%s5764_s23 + $0x2870] sm:$0xff] }
 0x158   : > { %1454 = vst [vmem:[%s5769_s24 + $0x1460] sm:$0xff] %v1453_v12  ;;  %1456 = vst [vmem:[%s5769_s24 + $0x1468] sm:$0xff] %v1455_v13  ;;  %v1459_v15 = vld [vmem:[%s5764_s23 + $0x2878] sm:$0xff]  ;;  %v1461_v16 = vld [vmem:[%s5764_s23 + $0x2900] sm:$0xff] }
 0x159   : > { %1458 = vst [vmem:[%s5769_s24 + $0x1470] sm:$0xff] %v1457_v14  ;;  %1460 = vst [vmem:[%s5769_s24 + $0x1478] sm:$0xff] %v1459_v15  ;;  %v1463_v17 = vld [vmem:[%s5764_s23 + $0x2908] sm:$0xff]  ;;  %v1465_v18 = vld [vmem:[%s5764_s23 + $0x2910] sm:$0xff] }
 0x15a   : > { %1462 = vst [vmem:[%s5769_s24 + $0x1480] sm:$0xff] %v1461_v16  ;;  %v1467_v19 = vld [vmem:[%s5764_s23 + $0x2918] sm:$0xff]  ;;  %1464 = vst [vmem:[%s5769_s24 + $0x1488] sm:$0xff] %v1463_v17  ;;  %v1469_v20 = vld [vmem:[%s5764_s23 + $0x2920] sm:$0xff] }
 0x15b   : > { %1466 = vst [vmem:[%s5769_s24 + $0x1490] sm:$0xff] %v1465_v18  ;;  %1468 = vst [vmem:[%s5769_s24 + $0x1498] sm:$0xff] %v1467_v19  ;;  %v1471_v21 = vld [vmem:[%s5764_s23 + $0x2928] sm:$0xff]  ;;  %v1473_v22 = vld [vmem:[%s5764_s23 + $0x2930] sm:$0xff] }
 0x15c   : > { %1470 = vst [vmem:[%s5769_s24 + $0x14a0] sm:$0xff] %v1469_v20  ;;  %1472 = vst [vmem:[%s5769_s24 + $0x14a8] sm:$0xff] %v1471_v21  ;;  %v1475_v23 = vld [vmem:[%s5764_s23 + $0x2938] sm:$0xff]  ;;  %v1477_v24 = vld [vmem:[%s5764_s23 + $0x2940] sm:$0xff] }
 0x15d   : > { %1474 = vst [vmem:[%s5769_s24 + $0x14b0] sm:$0xff] %v1473_v22  ;;  %v1479_v25 = vld [vmem:[%s5764_s23 + $0x2948] sm:$0xff]  ;;  %1476 = vst [vmem:[%s5769_s24 + $0x14b8] sm:$0xff] %v1475_v23  ;;  %v1481_v26 = vld [vmem:[%s5764_s23 + $0x2950] sm:$0xff] }
 0x15e   : > { %1478 = vst [vmem:[%s5769_s24 + $0x14c0] sm:$0xff] %v1477_v24  ;;  %1480 = vst [vmem:[%s5769_s24 + $0x14c8] sm:$0xff] %v1479_v25  ;;  %v1483_v27 = vld [vmem:[%s5764_s23 + $0x2958] sm:$0xff]  ;;  %v1485_v28 = vld [vmem:[%s5764_s23 + $0x2960] sm:$0xff] }
 0x15f   : > { %1482 = vst [vmem:[%s5769_s24 + $0x14d0] sm:$0xff] %v1481_v26  ;;  %1484 = vst [vmem:[%s5769_s24 + $0x14d8] sm:$0xff] %v1483_v27  ;;  %v1487_v29 = vld [vmem:[%s5764_s23 + $0x2968] sm:$0xff]  ;;  %v1489_v30 = vld [vmem:[%s5764_s23 + $0x2970] sm:$0xff] }
 0x160   : > { %1486 = vst [vmem:[%s5769_s24 + $0x14e0] sm:$0xff] %v1485_v28  ;;  %v1491_v31 = vld [vmem:[%s5764_s23 + $0x2978] sm:$0xff]  ;;  %1488 = vst [vmem:[%s5769_s24 + $0x14e8] sm:$0xff] %v1487_v29  ;;  %v1493_v32 = vld [vmem:[%s5764_s23 + $0x2a00] sm:$0xff] }
 0x161   : > { %1490 = vst [vmem:[%s5769_s24 + $0x14f0] sm:$0xff] %v1489_v30  ;;  %1492 = vst [vmem:[%s5769_s24 + $0x14f8] sm:$0xff] %v1491_v31  ;;  %v1495_v33 = vld [vmem:[%s5764_s23 + $0x2a08] sm:$0xff]  ;;  %v1497_v34 = vld [vmem:[%s5764_s23 + $0x2a10] sm:$0xff] }
 0x162   : > { %1494 = vst [vmem:[%s5769_s24 + $0x1500] sm:$0xff] %v1493_v32  ;;  %1496 = vst [vmem:[%s5769_s24 + $0x1508] sm:$0xff] %v1495_v33  ;;  %v1499_v35 = vld [vmem:[%s5764_s23 + $0x2a18] sm:$0xff]  ;;  %v1501_v36 = vld [vmem:[%s5764_s23 + $0x2a20] sm:$0xff] }
 0x163   : > { %1498 = vst [vmem:[%s5769_s24 + $0x1510] sm:$0xff] %v1497_v34  ;;  %v1503_v37 = vld [vmem:[%s5764_s23 + $0x2a28] sm:$0xff]  ;;  %1500 = vst [vmem:[%s5769_s24 + $0x1518] sm:$0xff] %v1499_v35  ;;  %v1505_v38 = vld [vmem:[%s5764_s23 + $0x2a30] sm:$0xff] }
 0x164   : > { %1502 = vst [vmem:[%s5769_s24 + $0x1520] sm:$0xff] %v1501_v36  ;;  %1504 = vst [vmem:[%s5769_s24 + $0x1528] sm:$0xff] %v1503_v37  ;;  %v1507_v39 = vld [vmem:[%s5764_s23 + $0x2a38] sm:$0xff]  ;;  %v1509_v40 = vld [vmem:[%s5764_s23 + $0x2a40] sm:$0xff] }
 0x165   : > { %1506 = vst [vmem:[%s5769_s24 + $0x1530] sm:$0xff] %v1505_v38  ;;  %1508 = vst [vmem:[%s5769_s24 + $0x1538] sm:$0xff] %v1507_v39  ;;  %v1511_v41 = vld [vmem:[%s5764_s23 + $0x2a48] sm:$0xff]  ;;  %v1513_v42 = vld [vmem:[%s5764_s23 + $0x2a50] sm:$0xff] }
 0x166   : > { %1510 = vst [vmem:[%s5769_s24 + $0x1540] sm:$0xff] %v1509_v40  ;;  %v1515_v43 = vld [vmem:[%s5764_s23 + $0x2a58] sm:$0xff]  ;;  %1512 = vst [vmem:[%s5769_s24 + $0x1548] sm:$0xff] %v1511_v41  ;;  %v1517_v44 = vld [vmem:[%s5764_s23 + $0x2a60] sm:$0xff] }
 0x167   : > { %1514 = vst [vmem:[%s5769_s24 + $0x1550] sm:$0xff] %v1513_v42  ;;  %1516 = vst [vmem:[%s5769_s24 + $0x1558] sm:$0xff] %v1515_v43  ;;  %v1519_v45 = vld [vmem:[%s5764_s23 + $0x2a68] sm:$0xff]  ;;  %v1521_v46 = vld [vmem:[%s5764_s23 + $0x2a70] sm:$0xff] }
 0x168   : > { %1518 = vst [vmem:[%s5769_s24 + $0x1560] sm:$0xff] %v1517_v44  ;;  %1520 = vst [vmem:[%s5769_s24 + $0x1568] sm:$0xff] %v1519_v45  ;;  %v1523_v47 = vld [vmem:[%s5764_s23 + $0x2a78] sm:$0xff]  ;;  %v1525_v48 = vld [vmem:[%s5764_s23 + $0x2b00] sm:$0xff] }
 0x169   : > { %1522 = vst [vmem:[%s5769_s24 + $0x1570] sm:$0xff] %v1521_v46  ;;  %v1527_v49 = vld [vmem:[%s5764_s23 + $0x2b08] sm:$0xff]  ;;  %1524 = vst [vmem:[%s5769_s24 + $0x1578] sm:$0xff] %v1523_v47  ;;  %v1529_v50 = vld [vmem:[%s5764_s23 + $0x2b10] sm:$0xff] }
 0x16a   : > { %1526 = vst [vmem:[%s5769_s24 + $0x1580] sm:$0xff] %v1525_v48  ;;  %1528 = vst [vmem:[%s5769_s24 + $0x1588] sm:$0xff] %v1527_v49  ;;  %v1531_v51 = vld [vmem:[%s5764_s23 + $0x2b18] sm:$0xff]  ;;  %v1533_v52 = vld [vmem:[%s5764_s23 + $0x2b20] sm:$0xff] }
 0x16b   : > { %1530 = vst [vmem:[%s5769_s24 + $0x1590] sm:$0xff] %v1529_v50  ;;  %1532 = vst [vmem:[%s5769_s24 + $0x1598] sm:$0xff] %v1531_v51  ;;  %v1535_v53 = vld [vmem:[%s5764_s23 + $0x2b28] sm:$0xff]  ;;  %v1537_v54 = vld [vmem:[%s5764_s23 + $0x2b30] sm:$0xff] }
 0x16c   : > { %1534 = vst [vmem:[%s5769_s24 + $0x15a0] sm:$0xff] %v1533_v52  ;;  %v1539_v55 = vld [vmem:[%s5764_s23 + $0x2b38] sm:$0xff]  ;;  %1536 = vst [vmem:[%s5769_s24 + $0x15a8] sm:$0xff] %v1535_v53  ;;  %v1541_v56 = vld [vmem:[%s5764_s23 + $0x2b40] sm:$0xff] }
 0x16d   : > { %1538 = vst [vmem:[%s5769_s24 + $0x15b0] sm:$0xff] %v1537_v54  ;;  %1540 = vst [vmem:[%s5769_s24 + $0x15b8] sm:$0xff] %v1539_v55  ;;  %v1543_v57 = vld [vmem:[%s5764_s23 + $0x2b48] sm:$0xff]  ;;  %v1545_v58 = vld [vmem:[%s5764_s23 + $0x2b50] sm:$0xff] }
 0x16e   : > { %1542 = vst [vmem:[%s5769_s24 + $0x15c0] sm:$0xff] %v1541_v56  ;;  %1544 = vst [vmem:[%s5769_s24 + $0x15c8] sm:$0xff] %v1543_v57  ;;  %v1547_v59 = vld [vmem:[%s5764_s23 + $0x2b58] sm:$0xff]  ;;  %v1549_v60 = vld [vmem:[%s5764_s23 + $0x2b60] sm:$0xff] }
 0x16f   : > { %1546 = vst [vmem:[%s5769_s24 + $0x15d0] sm:$0xff] %v1545_v58  ;;  %v1551_v61 = vld [vmem:[%s5764_s23 + $0x2b68] sm:$0xff]  ;;  %1548 = vst [vmem:[%s5769_s24 + $0x15d8] sm:$0xff] %v1547_v59  ;;  %v1553_v62 = vld [vmem:[%s5764_s23 + $0x2b70] sm:$0xff] }
 0x170   : > { %1550 = vst [vmem:[%s5769_s24 + $0x15e0] sm:$0xff] %v1549_v60  ;;  %1552 = vst [vmem:[%s5769_s24 + $0x15e8] sm:$0xff] %v1551_v61  ;;  %v1555_v63 = vld [vmem:[%s5764_s23 + $0x2b78] sm:$0xff]  ;;  %v1557_v0 = vld [vmem:[%s5764_s23 + $0x2c00] sm:$0xff] }
 0x171   : > { %1554 = vst [vmem:[%s5769_s24 + $0x15f0] sm:$0xff] %v1553_v62  ;;  %1556 = vst [vmem:[%s5769_s24 + $0x15f8] sm:$0xff] %v1555_v63  ;;  %v1559_v1 = vld [vmem:[%s5764_s23 + $0x2c08] sm:$0xff]  ;;  %v1561_v2 = vld [vmem:[%s5764_s23 + $0x2c10] sm:$0xff] }
 0x172   : > { %1558 = vst [vmem:[%s5769_s24 + $0x1600] sm:$0xff] %v1557_v0  ;;  %v1563_v3 = vld [vmem:[%s5764_s23 + $0x2c18] sm:$0xff]  ;;  %1560 = vst [vmem:[%s5769_s24 + $0x1608] sm:$0xff] %v1559_v1  ;;  %v1565_v4 = vld [vmem:[%s5764_s23 + $0x2c20] sm:$0xff] }
 0x173   : > { %1562 = vst [vmem:[%s5769_s24 + $0x1610] sm:$0xff] %v1561_v2  ;;  %1564 = vst [vmem:[%s5769_s24 + $0x1618] sm:$0xff] %v1563_v3  ;;  %v1567_v5 = vld [vmem:[%s5764_s23 + $0x2c28] sm:$0xff]  ;;  %v1569_v6 = vld [vmem:[%s5764_s23 + $0x2c30] sm:$0xff] }
 0x174   : > { %1566 = vst [vmem:[%s5769_s24 + $0x1620] sm:$0xff] %v1565_v4  ;;  %1568 = vst [vmem:[%s5769_s24 + $0x1628] sm:$0xff] %v1567_v5  ;;  %v1571_v7 = vld [vmem:[%s5764_s23 + $0x2c38] sm:$0xff]  ;;  %v1573_v8 = vld [vmem:[%s5764_s23 + $0x2c40] sm:$0xff] }
 0x175   : > { %1570 = vst [vmem:[%s5769_s24 + $0x1630] sm:$0xff] %v1569_v6  ;;  %v1575_v9 = vld [vmem:[%s5764_s23 + $0x2c48] sm:$0xff]  ;;  %1572 = vst [vmem:[%s5769_s24 + $0x1638] sm:$0xff] %v1571_v7  ;;  %v1577_v10 = vld [vmem:[%s5764_s23 + $0x2c50] sm:$0xff] }
 0x176   : > { %1574 = vst [vmem:[%s5769_s24 + $0x1640] sm:$0xff] %v1573_v8  ;;  %1576 = vst [vmem:[%s5769_s24 + $0x1648] sm:$0xff] %v1575_v9  ;;  %v1579_v11 = vld [vmem:[%s5764_s23 + $0x2c58] sm:$0xff]  ;;  %v1581_v12 = vld [vmem:[%s5764_s23 + $0x2c60] sm:$0xff] }
 0x177   : > { %1578 = vst [vmem:[%s5769_s24 + $0x1650] sm:$0xff] %v1577_v10  ;;  %1580 = vst [vmem:[%s5769_s24 + $0x1658] sm:$0xff] %v1579_v11  ;;  %v1583_v13 = vld [vmem:[%s5764_s23 + $0x2c68] sm:$0xff]  ;;  %v1585_v14 = vld [vmem:[%s5764_s23 + $0x2c70] sm:$0xff] }
 0x178   : > { %1582 = vst [vmem:[%s5769_s24 + $0x1660] sm:$0xff] %v1581_v12  ;;  %v1587_v15 = vld [vmem:[%s5764_s23 + $0x2c78] sm:$0xff]  ;;  %1584 = vst [vmem:[%s5769_s24 + $0x1668] sm:$0xff] %v1583_v13  ;;  %v1589_v16 = vld [vmem:[%s5764_s23 + $0x2d00] sm:$0xff] }
 0x179   : > { %1586 = vst [vmem:[%s5769_s24 + $0x1670] sm:$0xff] %v1585_v14  ;;  %1588 = vst [vmem:[%s5769_s24 + $0x1678] sm:$0xff] %v1587_v15  ;;  %v1591_v17 = vld [vmem:[%s5764_s23 + $0x2d08] sm:$0xff]  ;;  %v1593_v18 = vld [vmem:[%s5764_s23 + $0x2d10] sm:$0xff] }
 0x17a   : > { %1590 = vst [vmem:[%s5769_s24 + $0x1680] sm:$0xff] %v1589_v16  ;;  %1592 = vst [vmem:[%s5769_s24 + $0x1688] sm:$0xff] %v1591_v17  ;;  %v1595_v19 = vld [vmem:[%s5764_s23 + $0x2d18] sm:$0xff]  ;;  %v1597_v20 = vld [vmem:[%s5764_s23 + $0x2d20] sm:$0xff] }
 0x17b   : > { %1594 = vst [vmem:[%s5769_s24 + $0x1690] sm:$0xff] %v1593_v18  ;;  %v1599_v21 = vld [vmem:[%s5764_s23 + $0x2d28] sm:$0xff]  ;;  %1596 = vst [vmem:[%s5769_s24 + $0x1698] sm:$0xff] %v1595_v19  ;;  %v1601_v22 = vld [vmem:[%s5764_s23 + $0x2d30] sm:$0xff] }
 0x17c   : > { %1598 = vst [vmem:[%s5769_s24 + $0x16a0] sm:$0xff] %v1597_v20  ;;  %1600 = vst [vmem:[%s5769_s24 + $0x16a8] sm:$0xff] %v1599_v21  ;;  %v1603_v23 = vld [vmem:[%s5764_s23 + $0x2d38] sm:$0xff]  ;;  %v1605_v24 = vld [vmem:[%s5764_s23 + $0x2d40] sm:$0xff] }
 0x17d   : > { %1602 = vst [vmem:[%s5769_s24 + $0x16b0] sm:$0xff] %v1601_v22  ;;  %1604 = vst [vmem:[%s5769_s24 + $0x16b8] sm:$0xff] %v1603_v23  ;;  %v1607_v25 = vld [vmem:[%s5764_s23 + $0x2d48] sm:$0xff]  ;;  %v1609_v26 = vld [vmem:[%s5764_s23 + $0x2d50] sm:$0xff] }
 0x17e   : > { %1606 = vst [vmem:[%s5769_s24 + $0x16c0] sm:$0xff] %v1605_v24  ;;  %v1611_v27 = vld [vmem:[%s5764_s23 + $0x2d58] sm:$0xff]  ;;  %1608 = vst [vmem:[%s5769_s24 + $0x16c8] sm:$0xff] %v1607_v25  ;;  %v1613_v28 = vld [vmem:[%s5764_s23 + $0x2d60] sm:$0xff] }
 0x17f   : > { %1610 = vst [vmem:[%s5769_s24 + $0x16d0] sm:$0xff] %v1609_v26  ;;  %1612 = vst [vmem:[%s5769_s24 + $0x16d8] sm:$0xff] %v1611_v27  ;;  %v1615_v29 = vld [vmem:[%s5764_s23 + $0x2d68] sm:$0xff]  ;;  %v1617_v30 = vld [vmem:[%s5764_s23 + $0x2d70] sm:$0xff] }
 0x180   : > { %1614 = vst [vmem:[%s5769_s24 + $0x16e0] sm:$0xff] %v1613_v28  ;;  %1616 = vst [vmem:[%s5769_s24 + $0x16e8] sm:$0xff] %v1615_v29  ;;  %v1619_v31 = vld [vmem:[%s5764_s23 + $0x2d78] sm:$0xff]  ;;  %v1621_v32 = vld [vmem:[%s5764_s23 + $0x2e00] sm:$0xff] }
 0x181   : > { %1618 = vst [vmem:[%s5769_s24 + $0x16f0] sm:$0xff] %v1617_v30  ;;  %v1623_v33 = vld [vmem:[%s5764_s23 + $0x2e08] sm:$0xff]  ;;  %1620 = vst [vmem:[%s5769_s24 + $0x16f8] sm:$0xff] %v1619_v31  ;;  %v1625_v34 = vld [vmem:[%s5764_s23 + $0x2e10] sm:$0xff] }
 0x182   : > { %1622 = vst [vmem:[%s5769_s24 + $0x1700] sm:$0xff] %v1621_v32  ;;  %1624 = vst [vmem:[%s5769_s24 + $0x1708] sm:$0xff] %v1623_v33  ;;  %v1627_v35 = vld [vmem:[%s5764_s23 + $0x2e18] sm:$0xff]  ;;  %v1629_v36 = vld [vmem:[%s5764_s23 + $0x2e20] sm:$0xff] }
 0x183   : > { %1626 = vst [vmem:[%s5769_s24 + $0x1710] sm:$0xff] %v1625_v34  ;;  %1628 = vst [vmem:[%s5769_s24 + $0x1718] sm:$0xff] %v1627_v35  ;;  %v1631_v37 = vld [vmem:[%s5764_s23 + $0x2e28] sm:$0xff]  ;;  %v1633_v38 = vld [vmem:[%s5764_s23 + $0x2e30] sm:$0xff] }
 0x184   : > { %1630 = vst [vmem:[%s5769_s24 + $0x1720] sm:$0xff] %v1629_v36  ;;  %v1635_v39 = vld [vmem:[%s5764_s23 + $0x2e38] sm:$0xff]  ;;  %1632 = vst [vmem:[%s5769_s24 + $0x1728] sm:$0xff] %v1631_v37  ;;  %v1637_v40 = vld [vmem:[%s5764_s23 + $0x2e40] sm:$0xff] }
 0x185   : > { %1634 = vst [vmem:[%s5769_s24 + $0x1730] sm:$0xff] %v1633_v38  ;;  %1636 = vst [vmem:[%s5769_s24 + $0x1738] sm:$0xff] %v1635_v39  ;;  %v1639_v41 = vld [vmem:[%s5764_s23 + $0x2e48] sm:$0xff]  ;;  %v1641_v42 = vld [vmem:[%s5764_s23 + $0x2e50] sm:$0xff] }
 0x186   : > { %1638 = vst [vmem:[%s5769_s24 + $0x1740] sm:$0xff] %v1637_v40  ;;  %1640 = vst [vmem:[%s5769_s24 + $0x1748] sm:$0xff] %v1639_v41  ;;  %v1643_v43 = vld [vmem:[%s5764_s23 + $0x2e58] sm:$0xff]  ;;  %v1645_v44 = vld [vmem:[%s5764_s23 + $0x2e60] sm:$0xff] }
 0x187   : > { %1642 = vst [vmem:[%s5769_s24 + $0x1750] sm:$0xff] %v1641_v42  ;;  %v1647_v45 = vld [vmem:[%s5764_s23 + $0x2e68] sm:$0xff]  ;;  %1644 = vst [vmem:[%s5769_s24 + $0x1758] sm:$0xff] %v1643_v43  ;;  %v1649_v46 = vld [vmem:[%s5764_s23 + $0x2e70] sm:$0xff] }
 0x188   : > { %1646 = vst [vmem:[%s5769_s24 + $0x1760] sm:$0xff] %v1645_v44  ;;  %1648 = vst [vmem:[%s5769_s24 + $0x1768] sm:$0xff] %v1647_v45  ;;  %v1651_v47 = vld [vmem:[%s5764_s23 + $0x2e78] sm:$0xff]  ;;  %v1653_v48 = vld [vmem:[%s5764_s23 + $0x2f00] sm:$0xff] }
 0x189   : > { %1650 = vst [vmem:[%s5769_s24 + $0x1770] sm:$0xff] %v1649_v46  ;;  %1652 = vst [vmem:[%s5769_s24 + $0x1778] sm:$0xff] %v1651_v47  ;;  %v1655_v49 = vld [vmem:[%s5764_s23 + $0x2f08] sm:$0xff]  ;;  %v1657_v50 = vld [vmem:[%s5764_s23 + $0x2f10] sm:$0xff] }
 0x18a   : > { %1654 = vst [vmem:[%s5769_s24 + $0x1780] sm:$0xff] %v1653_v48  ;;  %v1659_v51 = vld [vmem:[%s5764_s23 + $0x2f18] sm:$0xff]  ;;  %1656 = vst [vmem:[%s5769_s24 + $0x1788] sm:$0xff] %v1655_v49  ;;  %v1661_v52 = vld [vmem:[%s5764_s23 + $0x2f20] sm:$0xff] }
 0x18b   : > { %1658 = vst [vmem:[%s5769_s24 + $0x1790] sm:$0xff] %v1657_v50  ;;  %1660 = vst [vmem:[%s5769_s24 + $0x1798] sm:$0xff] %v1659_v51  ;;  %v1663_v53 = vld [vmem:[%s5764_s23 + $0x2f28] sm:$0xff]  ;;  %v1665_v54 = vld [vmem:[%s5764_s23 + $0x2f30] sm:$0xff] }
 0x18c   : > { %1662 = vst [vmem:[%s5769_s24 + $0x17a0] sm:$0xff] %v1661_v52  ;;  %1664 = vst [vmem:[%s5769_s24 + $0x17a8] sm:$0xff] %v1663_v53  ;;  %v1667_v55 = vld [vmem:[%s5764_s23 + $0x2f38] sm:$0xff]  ;;  %v1669_v56 = vld [vmem:[%s5764_s23 + $0x2f40] sm:$0xff] }
 0x18d   : > { %1666 = vst [vmem:[%s5769_s24 + $0x17b0] sm:$0xff] %v1665_v54  ;;  %v1671_v57 = vld [vmem:[%s5764_s23 + $0x2f48] sm:$0xff]  ;;  %1668 = vst [vmem:[%s5769_s24 + $0x17b8] sm:$0xff] %v1667_v55  ;;  %v1673_v58 = vld [vmem:[%s5764_s23 + $0x2f50] sm:$0xff] }
 0x18e   : > { %1670 = vst [vmem:[%s5769_s24 + $0x17c0] sm:$0xff] %v1669_v56  ;;  %1672 = vst [vmem:[%s5769_s24 + $0x17c8] sm:$0xff] %v1671_v57  ;;  %v1675_v59 = vld [vmem:[%s5764_s23 + $0x2f58] sm:$0xff]  ;;  %v1677_v60 = vld [vmem:[%s5764_s23 + $0x2f60] sm:$0xff] }
 0x18f   : > { %1674 = vst [vmem:[%s5769_s24 + $0x17d0] sm:$0xff] %v1673_v58  ;;  %1676 = vst [vmem:[%s5769_s24 + $0x17d8] sm:$0xff] %v1675_v59  ;;  %v1679_v61 = vld [vmem:[%s5764_s23 + $0x2f68] sm:$0xff]  ;;  %v1681_v62 = vld [vmem:[%s5764_s23 + $0x2f70] sm:$0xff] }
 0x190   : > { %1678 = vst [vmem:[%s5769_s24 + $0x17e0] sm:$0xff] %v1677_v60  ;;  %v1683_v63 = vld [vmem:[%s5764_s23 + $0x2f78] sm:$0xff]  ;;  %1680 = vst [vmem:[%s5769_s24 + $0x17e8] sm:$0xff] %v1679_v61  ;;  %v1685_v0 = vld [vmem:[%s5764_s23 + $0x3000] sm:$0xff] }
 0x191   : > { %1682 = vst [vmem:[%s5769_s24 + $0x17f0] sm:$0xff] %v1681_v62  ;;  %1684 = vst [vmem:[%s5769_s24 + $0x17f8] sm:$0xff] %v1683_v63  ;;  %v1687_v1 = vld [vmem:[%s5764_s23 + $0x3008] sm:$0xff]  ;;  %v1689_v2 = vld [vmem:[%s5764_s23 + $0x3010] sm:$0xff] }
 0x192   : > { %1686 = vst [vmem:[%s5769_s24 + $0x1800] sm:$0xff] %v1685_v0  ;;  %1688 = vst [vmem:[%s5769_s24 + $0x1808] sm:$0xff] %v1687_v1  ;;  %v1691_v3 = vld [vmem:[%s5764_s23 + $0x3018] sm:$0xff]  ;;  %v1693_v4 = vld [vmem:[%s5764_s23 + $0x3020] sm:$0xff] }
 0x193   : > { %1690 = vst [vmem:[%s5769_s24 + $0x1810] sm:$0xff] %v1689_v2  ;;  %v1695_v5 = vld [vmem:[%s5764_s23 + $0x3028] sm:$0xff]  ;;  %1692 = vst [vmem:[%s5769_s24 + $0x1818] sm:$0xff] %v1691_v3  ;;  %v1697_v6 = vld [vmem:[%s5764_s23 + $0x3030] sm:$0xff] }
 0x194   : > { %1694 = vst [vmem:[%s5769_s24 + $0x1820] sm:$0xff] %v1693_v4  ;;  %1696 = vst [vmem:[%s5769_s24 + $0x1828] sm:$0xff] %v1695_v5  ;;  %v1699_v7 = vld [vmem:[%s5764_s23 + $0x3038] sm:$0xff]  ;;  %v1701_v8 = vld [vmem:[%s5764_s23 + $0x3040] sm:$0xff] }
 0x195   : > { %1698 = vst [vmem:[%s5769_s24 + $0x1830] sm:$0xff] %v1697_v6  ;;  %1700 = vst [vmem:[%s5769_s24 + $0x1838] sm:$0xff] %v1699_v7  ;;  %v1703_v9 = vld [vmem:[%s5764_s23 + $0x3048] sm:$0xff]  ;;  %v1705_v10 = vld [vmem:[%s5764_s23 + $0x3050] sm:$0xff] }
 0x196   : > { %1702 = vst [vmem:[%s5769_s24 + $0x1840] sm:$0xff] %v1701_v8  ;;  %v1707_v11 = vld [vmem:[%s5764_s23 + $0x3058] sm:$0xff]  ;;  %1704 = vst [vmem:[%s5769_s24 + $0x1848] sm:$0xff] %v1703_v9  ;;  %v1709_v12 = vld [vmem:[%s5764_s23 + $0x3060] sm:$0xff] }
 0x197   : > { %1706 = vst [vmem:[%s5769_s24 + $0x1850] sm:$0xff] %v1705_v10  ;;  %1708 = vst [vmem:[%s5769_s24 + $0x1858] sm:$0xff] %v1707_v11  ;;  %v1711_v13 = vld [vmem:[%s5764_s23 + $0x3068] sm:$0xff]  ;;  %v1713_v14 = vld [vmem:[%s5764_s23 + $0x3070] sm:$0xff] }
 0x198   : > { %1710 = vst [vmem:[%s5769_s24 + $0x1860] sm:$0xff] %v1709_v12  ;;  %1712 = vst [vmem:[%s5769_s24 + $0x1868] sm:$0xff] %v1711_v13  ;;  %v1715_v15 = vld [vmem:[%s5764_s23 + $0x3078] sm:$0xff]  ;;  %v1717_v16 = vld [vmem:[%s5764_s23 + $0x3100] sm:$0xff] }
 0x199   : > { %1714 = vst [vmem:[%s5769_s24 + $0x1870] sm:$0xff] %v1713_v14  ;;  %v1719_v17 = vld [vmem:[%s5764_s23 + $0x3108] sm:$0xff]  ;;  %1716 = vst [vmem:[%s5769_s24 + $0x1878] sm:$0xff] %v1715_v15  ;;  %v1721_v18 = vld [vmem:[%s5764_s23 + $0x3110] sm:$0xff] }
 0x19a   : > { %1718 = vst [vmem:[%s5769_s24 + $0x1880] sm:$0xff] %v1717_v16  ;;  %1720 = vst [vmem:[%s5769_s24 + $0x1888] sm:$0xff] %v1719_v17  ;;  %v1723_v19 = vld [vmem:[%s5764_s23 + $0x3118] sm:$0xff]  ;;  %v1725_v20 = vld [vmem:[%s5764_s23 + $0x3120] sm:$0xff] }
 0x19b   : > { %1722 = vst [vmem:[%s5769_s24 + $0x1890] sm:$0xff] %v1721_v18  ;;  %1724 = vst [vmem:[%s5769_s24 + $0x1898] sm:$0xff] %v1723_v19  ;;  %v1727_v21 = vld [vmem:[%s5764_s23 + $0x3128] sm:$0xff]  ;;  %v1729_v22 = vld [vmem:[%s5764_s23 + $0x3130] sm:$0xff] }
 0x19c   : > { %1726 = vst [vmem:[%s5769_s24 + $0x18a0] sm:$0xff] %v1725_v20  ;;  %v1731_v23 = vld [vmem:[%s5764_s23 + $0x3138] sm:$0xff]  ;;  %1728 = vst [vmem:[%s5769_s24 + $0x18a8] sm:$0xff] %v1727_v21  ;;  %v1733_v24 = vld [vmem:[%s5764_s23 + $0x3140] sm:$0xff] }
 0x19d   : > { %1730 = vst [vmem:[%s5769_s24 + $0x18b0] sm:$0xff] %v1729_v22  ;;  %1732 = vst [vmem:[%s5769_s24 + $0x18b8] sm:$0xff] %v1731_v23  ;;  %v1735_v25 = vld [vmem:[%s5764_s23 + $0x3148] sm:$0xff]  ;;  %v1737_v26 = vld [vmem:[%s5764_s23 + $0x3150] sm:$0xff] }
 0x19e   : > { %1734 = vst [vmem:[%s5769_s24 + $0x18c0] sm:$0xff] %v1733_v24  ;;  %1736 = vst [vmem:[%s5769_s24 + $0x18c8] sm:$0xff] %v1735_v25  ;;  %v1739_v27 = vld [vmem:[%s5764_s23 + $0x3158] sm:$0xff]  ;;  %v1741_v28 = vld [vmem:[%s5764_s23 + $0x3160] sm:$0xff] }
 0x19f   : > { %1738 = vst [vmem:[%s5769_s24 + $0x18d0] sm:$0xff] %v1737_v26  ;;  %v1743_v29 = vld [vmem:[%s5764_s23 + $0x3168] sm:$0xff]  ;;  %1740 = vst [vmem:[%s5769_s24 + $0x18d8] sm:$0xff] %v1739_v27  ;;  %v1745_v30 = vld [vmem:[%s5764_s23 + $0x3170] sm:$0xff] }
 0x1a0   : > { %1742 = vst [vmem:[%s5769_s24 + $0x18e0] sm:$0xff] %v1741_v28  ;;  %1744 = vst [vmem:[%s5769_s24 + $0x18e8] sm:$0xff] %v1743_v29  ;;  %v1747_v31 = vld [vmem:[%s5764_s23 + $0x3178] sm:$0xff]  ;;  %v1749_v32 = vld [vmem:[%s5764_s23 + $0x3200] sm:$0xff] }
 0x1a1   : > { %1746 = vst [vmem:[%s5769_s24 + $0x18f0] sm:$0xff] %v1745_v30  ;;  %1748 = vst [vmem:[%s5769_s24 + $0x18f8] sm:$0xff] %v1747_v31  ;;  %v1751_v33 = vld [vmem:[%s5764_s23 + $0x3208] sm:$0xff]  ;;  %v1753_v34 = vld [vmem:[%s5764_s23 + $0x3210] sm:$0xff] }
 0x1a2   : > { %1750 = vst [vmem:[%s5769_s24 + $0x1900] sm:$0xff] %v1749_v32  ;;  %v1755_v35 = vld [vmem:[%s5764_s23 + $0x3218] sm:$0xff]  ;;  %1752 = vst [vmem:[%s5769_s24 + $0x1908] sm:$0xff] %v1751_v33  ;;  %v1757_v36 = vld [vmem:[%s5764_s23 + $0x3220] sm:$0xff] }
 0x1a3   : > { %1754 = vst [vmem:[%s5769_s24 + $0x1910] sm:$0xff] %v1753_v34  ;;  %1756 = vst [vmem:[%s5769_s24 + $0x1918] sm:$0xff] %v1755_v35  ;;  %v1759_v37 = vld [vmem:[%s5764_s23 + $0x3228] sm:$0xff]  ;;  %v1761_v38 = vld [vmem:[%s5764_s23 + $0x3230] sm:$0xff] }
 0x1a4   : > { %1758 = vst [vmem:[%s5769_s24 + $0x1920] sm:$0xff] %v1757_v36  ;;  %1760 = vst [vmem:[%s5769_s24 + $0x1928] sm:$0xff] %v1759_v37  ;;  %v1763_v39 = vld [vmem:[%s5764_s23 + $0x3238] sm:$0xff]  ;;  %v1765_v40 = vld [vmem:[%s5764_s23 + $0x3240] sm:$0xff] }
 0x1a5   : > { %1762 = vst [vmem:[%s5769_s24 + $0x1930] sm:$0xff] %v1761_v38  ;;  %v1767_v41 = vld [vmem:[%s5764_s23 + $0x3248] sm:$0xff]  ;;  %1764 = vst [vmem:[%s5769_s24 + $0x1938] sm:$0xff] %v1763_v39  ;;  %v1769_v42 = vld [vmem:[%s5764_s23 + $0x3250] sm:$0xff] }
 0x1a6   : > { %1766 = vst [vmem:[%s5769_s24 + $0x1940] sm:$0xff] %v1765_v40  ;;  %1768 = vst [vmem:[%s5769_s24 + $0x1948] sm:$0xff] %v1767_v41  ;;  %v1771_v43 = vld [vmem:[%s5764_s23 + $0x3258] sm:$0xff]  ;;  %v1773_v44 = vld [vmem:[%s5764_s23 + $0x3260] sm:$0xff] }
 0x1a7   : > { %1770 = vst [vmem:[%s5769_s24 + $0x1950] sm:$0xff] %v1769_v42  ;;  %1772 = vst [vmem:[%s5769_s24 + $0x1958] sm:$0xff] %v1771_v43  ;;  %v1775_v45 = vld [vmem:[%s5764_s23 + $0x3268] sm:$0xff]  ;;  %v1777_v46 = vld [vmem:[%s5764_s23 + $0x3270] sm:$0xff] }
 0x1a8   : > { %1774 = vst [vmem:[%s5769_s24 + $0x1960] sm:$0xff] %v1773_v44  ;;  %v1779_v47 = vld [vmem:[%s5764_s23 + $0x3278] sm:$0xff]  ;;  %1776 = vst [vmem:[%s5769_s24 + $0x1968] sm:$0xff] %v1775_v45  ;;  %v1781_v48 = vld [vmem:[%s5764_s23 + $0x3300] sm:$0xff] }
 0x1a9   : > { %1778 = vst [vmem:[%s5769_s24 + $0x1970] sm:$0xff] %v1777_v46  ;;  %1780 = vst [vmem:[%s5769_s24 + $0x1978] sm:$0xff] %v1779_v47  ;;  %v1783_v49 = vld [vmem:[%s5764_s23 + $0x3308] sm:$0xff]  ;;  %v1785_v50 = vld [vmem:[%s5764_s23 + $0x3310] sm:$0xff] }
 0x1aa   : > { %1782 = vst [vmem:[%s5769_s24 + $0x1980] sm:$0xff] %v1781_v48  ;;  %1784 = vst [vmem:[%s5769_s24 + $0x1988] sm:$0xff] %v1783_v49  ;;  %v1787_v51 = vld [vmem:[%s5764_s23 + $0x3318] sm:$0xff]  ;;  %v1789_v52 = vld [vmem:[%s5764_s23 + $0x3320] sm:$0xff] }
 0x1ab   : > { %1786 = vst [vmem:[%s5769_s24 + $0x1990] sm:$0xff] %v1785_v50  ;;  %v1791_v53 = vld [vmem:[%s5764_s23 + $0x3328] sm:$0xff]  ;;  %1788 = vst [vmem:[%s5769_s24 + $0x1998] sm:$0xff] %v1787_v51  ;;  %v1793_v54 = vld [vmem:[%s5764_s23 + $0x3330] sm:$0xff] }
 0x1ac   : > { %1790 = vst [vmem:[%s5769_s24 + $0x19a0] sm:$0xff] %v1789_v52  ;;  %1792 = vst [vmem:[%s5769_s24 + $0x19a8] sm:$0xff] %v1791_v53  ;;  %v1795_v55 = vld [vmem:[%s5764_s23 + $0x3338] sm:$0xff]  ;;  %v1797_v56 = vld [vmem:[%s5764_s23 + $0x3340] sm:$0xff] }
 0x1ad   : > { %1794 = vst [vmem:[%s5769_s24 + $0x19b0] sm:$0xff] %v1793_v54  ;;  %1796 = vst [vmem:[%s5769_s24 + $0x19b8] sm:$0xff] %v1795_v55  ;;  %v1799_v57 = vld [vmem:[%s5764_s23 + $0x3348] sm:$0xff]  ;;  %v1801_v58 = vld [vmem:[%s5764_s23 + $0x3350] sm:$0xff] }
 0x1ae   : > { %1798 = vst [vmem:[%s5769_s24 + $0x19c0] sm:$0xff] %v1797_v56  ;;  %v1803_v59 = vld [vmem:[%s5764_s23 + $0x3358] sm:$0xff]  ;;  %1800 = vst [vmem:[%s5769_s24 + $0x19c8] sm:$0xff] %v1799_v57  ;;  %v1805_v60 = vld [vmem:[%s5764_s23 + $0x3360] sm:$0xff] }
 0x1af   : > { %1802 = vst [vmem:[%s5769_s24 + $0x19d0] sm:$0xff] %v1801_v58  ;;  %1804 = vst [vmem:[%s5769_s24 + $0x19d8] sm:$0xff] %v1803_v59  ;;  %v1807_v61 = vld [vmem:[%s5764_s23 + $0x3368] sm:$0xff]  ;;  %v1809_v62 = vld [vmem:[%s5764_s23 + $0x3370] sm:$0xff] }
 0x1b0   : > { %1806 = vst [vmem:[%s5769_s24 + $0x19e0] sm:$0xff] %v1805_v60  ;;  %1808 = vst [vmem:[%s5769_s24 + $0x19e8] sm:$0xff] %v1807_v61  ;;  %v1811_v63 = vld [vmem:[%s5764_s23 + $0x3378] sm:$0xff]  ;;  %v1813_v0 = vld [vmem:[%s5764_s23 + $0x3400] sm:$0xff] }
 0x1b1   : > { %1810 = vst [vmem:[%s5769_s24 + $0x19f0] sm:$0xff] %v1809_v62  ;;  %v1815_v1 = vld [vmem:[%s5764_s23 + $0x3408] sm:$0xff]  ;;  %1812 = vst [vmem:[%s5769_s24 + $0x19f8] sm:$0xff] %v1811_v63  ;;  %v1817_v2 = vld [vmem:[%s5764_s23 + $0x3410] sm:$0xff] }
 0x1b2   : > { %1814 = vst [vmem:[%s5769_s24 + $0x1a00] sm:$0xff] %v1813_v0  ;;  %1816 = vst [vmem:[%s5769_s24 + $0x1a08] sm:$0xff] %v1815_v1  ;;  %v1819_v3 = vld [vmem:[%s5764_s23 + $0x3418] sm:$0xff]  ;;  %v1821_v4 = vld [vmem:[%s5764_s23 + $0x3420] sm:$0xff] }
 0x1b3   : > { %1818 = vst [vmem:[%s5769_s24 + $0x1a10] sm:$0xff] %v1817_v2  ;;  %1820 = vst [vmem:[%s5769_s24 + $0x1a18] sm:$0xff] %v1819_v3  ;;  %v1823_v5 = vld [vmem:[%s5764_s23 + $0x3428] sm:$0xff]  ;;  %v1825_v6 = vld [vmem:[%s5764_s23 + $0x3430] sm:$0xff] }
 0x1b4   : > { %1822 = vst [vmem:[%s5769_s24 + $0x1a20] sm:$0xff] %v1821_v4  ;;  %v1827_v7 = vld [vmem:[%s5764_s23 + $0x3438] sm:$0xff]  ;;  %1824 = vst [vmem:[%s5769_s24 + $0x1a28] sm:$0xff] %v1823_v5  ;;  %v1829_v8 = vld [vmem:[%s5764_s23 + $0x3440] sm:$0xff] }
 0x1b5   : > { %1826 = vst [vmem:[%s5769_s24 + $0x1a30] sm:$0xff] %v1825_v6  ;;  %1828 = vst [vmem:[%s5769_s24 + $0x1a38] sm:$0xff] %v1827_v7  ;;  %v1831_v9 = vld [vmem:[%s5764_s23 + $0x3448] sm:$0xff]  ;;  %v1833_v10 = vld [vmem:[%s5764_s23 + $0x3450] sm:$0xff] }
 0x1b6   : > { %1830 = vst [vmem:[%s5769_s24 + $0x1a40] sm:$0xff] %v1829_v8  ;;  %1832 = vst [vmem:[%s5769_s24 + $0x1a48] sm:$0xff] %v1831_v9  ;;  %v1835_v11 = vld [vmem:[%s5764_s23 + $0x3458] sm:$0xff]  ;;  %v1837_v12 = vld [vmem:[%s5764_s23 + $0x3460] sm:$0xff] }
 0x1b7   : > { %1834 = vst [vmem:[%s5769_s24 + $0x1a50] sm:$0xff] %v1833_v10  ;;  %v1839_v13 = vld [vmem:[%s5764_s23 + $0x3468] sm:$0xff]  ;;  %1836 = vst [vmem:[%s5769_s24 + $0x1a58] sm:$0xff] %v1835_v11  ;;  %v1841_v14 = vld [vmem:[%s5764_s23 + $0x3470] sm:$0xff] }
 0x1b8   : > { %1838 = vst [vmem:[%s5769_s24 + $0x1a60] sm:$0xff] %v1837_v12  ;;  %1840 = vst [vmem:[%s5769_s24 + $0x1a68] sm:$0xff] %v1839_v13  ;;  %v1843_v15 = vld [vmem:[%s5764_s23 + $0x3478] sm:$0xff]  ;;  %v1845_v16 = vld [vmem:[%s5764_s23 + $0x3500] sm:$0xff] }
 0x1b9   : > { %1842 = vst [vmem:[%s5769_s24 + $0x1a70] sm:$0xff] %v1841_v14  ;;  %1844 = vst [vmem:[%s5769_s24 + $0x1a78] sm:$0xff] %v1843_v15  ;;  %v1847_v17 = vld [vmem:[%s5764_s23 + $0x3508] sm:$0xff]  ;;  %v1849_v18 = vld [vmem:[%s5764_s23 + $0x3510] sm:$0xff] }
 0x1ba   : > { %1846 = vst [vmem:[%s5769_s24 + $0x1a80] sm:$0xff] %v1845_v16  ;;  %v1851_v19 = vld [vmem:[%s5764_s23 + $0x3518] sm:$0xff]  ;;  %1848 = vst [vmem:[%s5769_s24 + $0x1a88] sm:$0xff] %v1847_v17  ;;  %v1853_v20 = vld [vmem:[%s5764_s23 + $0x3520] sm:$0xff] }
 0x1bb   : > { %1850 = vst [vmem:[%s5769_s24 + $0x1a90] sm:$0xff] %v1849_v18  ;;  %1852 = vst [vmem:[%s5769_s24 + $0x1a98] sm:$0xff] %v1851_v19  ;;  %v1855_v21 = vld [vmem:[%s5764_s23 + $0x3528] sm:$0xff]  ;;  %v1857_v22 = vld [vmem:[%s5764_s23 + $0x3530] sm:$0xff] }
 0x1bc   : > { %1854 = vst [vmem:[%s5769_s24 + $0x1aa0] sm:$0xff] %v1853_v20  ;;  %1856 = vst [vmem:[%s5769_s24 + $0x1aa8] sm:$0xff] %v1855_v21  ;;  %v1859_v23 = vld [vmem:[%s5764_s23 + $0x3538] sm:$0xff]  ;;  %v1861_v24 = vld [vmem:[%s5764_s23 + $0x3540] sm:$0xff] }
 0x1bd   : > { %1858 = vst [vmem:[%s5769_s24 + $0x1ab0] sm:$0xff] %v1857_v22  ;;  %v1863_v25 = vld [vmem:[%s5764_s23 + $0x3548] sm:$0xff]  ;;  %1860 = vst [vmem:[%s5769_s24 + $0x1ab8] sm:$0xff] %v1859_v23  ;;  %v1865_v26 = vld [vmem:[%s5764_s23 + $0x3550] sm:$0xff] }
 0x1be   : > { %1862 = vst [vmem:[%s5769_s24 + $0x1ac0] sm:$0xff] %v1861_v24  ;;  %1864 = vst [vmem:[%s5769_s24 + $0x1ac8] sm:$0xff] %v1863_v25  ;;  %v1867_v27 = vld [vmem:[%s5764_s23 + $0x3558] sm:$0xff]  ;;  %v1869_v28 = vld [vmem:[%s5764_s23 + $0x3560] sm:$0xff] }
 0x1bf   : > { %1866 = vst [vmem:[%s5769_s24 + $0x1ad0] sm:$0xff] %v1865_v26  ;;  %1868 = vst [vmem:[%s5769_s24 + $0x1ad8] sm:$0xff] %v1867_v27  ;;  %v1871_v29 = vld [vmem:[%s5764_s23 + $0x3568] sm:$0xff]  ;;  %v1873_v30 = vld [vmem:[%s5764_s23 + $0x3570] sm:$0xff] }
 0x1c0   : > { %1870 = vst [vmem:[%s5769_s24 + $0x1ae0] sm:$0xff] %v1869_v28  ;;  %v1875_v31 = vld [vmem:[%s5764_s23 + $0x3578] sm:$0xff]  ;;  %1872 = vst [vmem:[%s5769_s24 + $0x1ae8] sm:$0xff] %v1871_v29  ;;  %v1877_v32 = vld [vmem:[%s5764_s23 + $0x3600] sm:$0xff] }
 0x1c1   : > { %1874 = vst [vmem:[%s5769_s24 + $0x1af0] sm:$0xff] %v1873_v30  ;;  %1876 = vst [vmem:[%s5769_s24 + $0x1af8] sm:$0xff] %v1875_v31  ;;  %v1879_v33 = vld [vmem:[%s5764_s23 + $0x3608] sm:$0xff]  ;;  %v1881_v34 = vld [vmem:[%s5764_s23 + $0x3610] sm:$0xff] }
 0x1c2   : > { %1878 = vst [vmem:[%s5769_s24 + $0x1b00] sm:$0xff] %v1877_v32  ;;  %1880 = vst [vmem:[%s5769_s24 + $0x1b08] sm:$0xff] %v1879_v33  ;;  %v1883_v35 = vld [vmem:[%s5764_s23 + $0x3618] sm:$0xff]  ;;  %v1885_v36 = vld [vmem:[%s5764_s23 + $0x3620] sm:$0xff] }
 0x1c3   : > { %1882 = vst [vmem:[%s5769_s24 + $0x1b10] sm:$0xff] %v1881_v34  ;;  %v1887_v37 = vld [vmem:[%s5764_s23 + $0x3628] sm:$0xff]  ;;  %1884 = vst [vmem:[%s5769_s24 + $0x1b18] sm:$0xff] %v1883_v35  ;;  %v1889_v38 = vld [vmem:[%s5764_s23 + $0x3630] sm:$0xff] }
 0x1c4   : > { %1886 = vst [vmem:[%s5769_s24 + $0x1b20] sm:$0xff] %v1885_v36  ;;  %1888 = vst [vmem:[%s5769_s24 + $0x1b28] sm:$0xff] %v1887_v37  ;;  %v1891_v39 = vld [vmem:[%s5764_s23 + $0x3638] sm:$0xff]  ;;  %v1893_v40 = vld [vmem:[%s5764_s23 + $0x3640] sm:$0xff] }
 0x1c5   : > { %1890 = vst [vmem:[%s5769_s24 + $0x1b30] sm:$0xff] %v1889_v38  ;;  %1892 = vst [vmem:[%s5769_s24 + $0x1b38] sm:$0xff] %v1891_v39  ;;  %v1895_v41 = vld [vmem:[%s5764_s23 + $0x3648] sm:$0xff]  ;;  %v1897_v42 = vld [vmem:[%s5764_s23 + $0x3650] sm:$0xff] }
 0x1c6   : > { %1894 = vst [vmem:[%s5769_s24 + $0x1b40] sm:$0xff] %v1893_v40  ;;  %v1899_v43 = vld [vmem:[%s5764_s23 + $0x3658] sm:$0xff]  ;;  %1896 = vst [vmem:[%s5769_s24 + $0x1b48] sm:$0xff] %v1895_v41  ;;  %v1901_v44 = vld [vmem:[%s5764_s23 + $0x3660] sm:$0xff] }
 0x1c7   : > { %1898 = vst [vmem:[%s5769_s24 + $0x1b50] sm:$0xff] %v1897_v42  ;;  %1900 = vst [vmem:[%s5769_s24 + $0x1b58] sm:$0xff] %v1899_v43  ;;  %v1903_v45 = vld [vmem:[%s5764_s23 + $0x3668] sm:$0xff]  ;;  %v1905_v46 = vld [vmem:[%s5764_s23 + $0x3670] sm:$0xff] }
 0x1c8   : > { %1902 = vst [vmem:[%s5769_s24 + $0x1b60] sm:$0xff] %v1901_v44  ;;  %1904 = vst [vmem:[%s5769_s24 + $0x1b68] sm:$0xff] %v1903_v45  ;;  %v1907_v47 = vld [vmem:[%s5764_s23 + $0x3678] sm:$0xff]  ;;  %v1909_v48 = vld [vmem:[%s5764_s23 + $0x3700] sm:$0xff] }
 0x1c9   : > { %1906 = vst [vmem:[%s5769_s24 + $0x1b70] sm:$0xff] %v1905_v46  ;;  %v1911_v49 = vld [vmem:[%s5764_s23 + $0x3708] sm:$0xff]  ;;  %1908 = vst [vmem:[%s5769_s24 + $0x1b78] sm:$0xff] %v1907_v47  ;;  %v1913_v50 = vld [vmem:[%s5764_s23 + $0x3710] sm:$0xff] }
 0x1ca   : > { %1910 = vst [vmem:[%s5769_s24 + $0x1b80] sm:$0xff] %v1909_v48  ;;  %1912 = vst [vmem:[%s5769_s24 + $0x1b88] sm:$0xff] %v1911_v49  ;;  %v1915_v51 = vld [vmem:[%s5764_s23 + $0x3718] sm:$0xff]  ;;  %v1917_v52 = vld [vmem:[%s5764_s23 + $0x3720] sm:$0xff] }
 0x1cb   : > { %1914 = vst [vmem:[%s5769_s24 + $0x1b90] sm:$0xff] %v1913_v50  ;;  %1916 = vst [vmem:[%s5769_s24 + $0x1b98] sm:$0xff] %v1915_v51  ;;  %v1919_v53 = vld [vmem:[%s5764_s23 + $0x3728] sm:$0xff]  ;;  %v1921_v54 = vld [vmem:[%s5764_s23 + $0x3730] sm:$0xff] }
 0x1cc   : > { %1918 = vst [vmem:[%s5769_s24 + $0x1ba0] sm:$0xff] %v1917_v52  ;;  %v1923_v55 = vld [vmem:[%s5764_s23 + $0x3738] sm:$0xff]  ;;  %1920 = vst [vmem:[%s5769_s24 + $0x1ba8] sm:$0xff] %v1919_v53  ;;  %v1925_v56 = vld [vmem:[%s5764_s23 + $0x3740] sm:$0xff] }
 0x1cd   : > { %1922 = vst [vmem:[%s5769_s24 + $0x1bb0] sm:$0xff] %v1921_v54  ;;  %1924 = vst [vmem:[%s5769_s24 + $0x1bb8] sm:$0xff] %v1923_v55  ;;  %v1927_v57 = vld [vmem:[%s5764_s23 + $0x3748] sm:$0xff]  ;;  %v1929_v58 = vld [vmem:[%s5764_s23 + $0x3750] sm:$0xff] }
 0x1ce   : > { %1926 = vst [vmem:[%s5769_s24 + $0x1bc0] sm:$0xff] %v1925_v56  ;;  %1928 = vst [vmem:[%s5769_s24 + $0x1bc8] sm:$0xff] %v1927_v57  ;;  %v1931_v59 = vld [vmem:[%s5764_s23 + $0x3758] sm:$0xff]  ;;  %v1933_v60 = vld [vmem:[%s5764_s23 + $0x3760] sm:$0xff] }
 0x1cf   : > { %1930 = vst [vmem:[%s5769_s24 + $0x1bd0] sm:$0xff] %v1929_v58  ;;  %v1935_v61 = vld [vmem:[%s5764_s23 + $0x3768] sm:$0xff]  ;;  %1932 = vst [vmem:[%s5769_s24 + $0x1bd8] sm:$0xff] %v1931_v59  ;;  %v1937_v62 = vld [vmem:[%s5764_s23 + $0x3770] sm:$0xff] }
 0x1d0   : > { %1934 = vst [vmem:[%s5769_s24 + $0x1be0] sm:$0xff] %v1933_v60  ;;  %1936 = vst [vmem:[%s5769_s24 + $0x1be8] sm:$0xff] %v1935_v61  ;;  %v1939_v63 = vld [vmem:[%s5764_s23 + $0x3778] sm:$0xff]  ;;  %v1941_v0 = vld [vmem:[%s5764_s23 + $0x3800] sm:$0xff] }
 0x1d1   : > { %1938 = vst [vmem:[%s5769_s24 + $0x1bf0] sm:$0xff] %v1937_v62  ;;  %1940 = vst [vmem:[%s5769_s24 + $0x1bf8] sm:$0xff] %v1939_v63  ;;  %v1943_v1 = vld [vmem:[%s5764_s23 + $0x3808] sm:$0xff]  ;;  %v1945_v2 = vld [vmem:[%s5764_s23 + $0x3810] sm:$0xff] }
 0x1d2   : > { %1942 = vst [vmem:[%s5769_s24 + $0x1c00] sm:$0xff] %v1941_v0  ;;  %v1947_v3 = vld [vmem:[%s5764_s23 + $0x3818] sm:$0xff]  ;;  %1944 = vst [vmem:[%s5769_s24 + $0x1c08] sm:$0xff] %v1943_v1  ;;  %v1949_v4 = vld [vmem:[%s5764_s23 + $0x3820] sm:$0xff] }
 0x1d3   : > { %1946 = vst [vmem:[%s5769_s24 + $0x1c10] sm:$0xff] %v1945_v2  ;;  %1948 = vst [vmem:[%s5769_s24 + $0x1c18] sm:$0xff] %v1947_v3  ;;  %v1951_v5 = vld [vmem:[%s5764_s23 + $0x3828] sm:$0xff]  ;;  %v1953_v6 = vld [vmem:[%s5764_s23 + $0x3830] sm:$0xff] }
 0x1d4   : > { %1950 = vst [vmem:[%s5769_s24 + $0x1c20] sm:$0xff] %v1949_v4  ;;  %1952 = vst [vmem:[%s5769_s24 + $0x1c28] sm:$0xff] %v1951_v5  ;;  %v1955_v7 = vld [vmem:[%s5764_s23 + $0x3838] sm:$0xff]  ;;  %v1957_v8 = vld [vmem:[%s5764_s23 + $0x3840] sm:$0xff] }
 0x1d5   : > { %1954 = vst [vmem:[%s5769_s24 + $0x1c30] sm:$0xff] %v1953_v6  ;;  %v1959_v9 = vld [vmem:[%s5764_s23 + $0x3848] sm:$0xff]  ;;  %1956 = vst [vmem:[%s5769_s24 + $0x1c38] sm:$0xff] %v1955_v7  ;;  %v1961_v10 = vld [vmem:[%s5764_s23 + $0x3850] sm:$0xff] }
 0x1d6   : > { %1958 = vst [vmem:[%s5769_s24 + $0x1c40] sm:$0xff] %v1957_v8  ;;  %1960 = vst [vmem:[%s5769_s24 + $0x1c48] sm:$0xff] %v1959_v9  ;;  %v1963_v11 = vld [vmem:[%s5764_s23 + $0x3858] sm:$0xff]  ;;  %v1965_v12 = vld [vmem:[%s5764_s23 + $0x3860] sm:$0xff] }
 0x1d7   : > { %1962 = vst [vmem:[%s5769_s24 + $0x1c50] sm:$0xff] %v1961_v10  ;;  %1964 = vst [vmem:[%s5769_s24 + $0x1c58] sm:$0xff] %v1963_v11  ;;  %v1967_v13 = vld [vmem:[%s5764_s23 + $0x3868] sm:$0xff]  ;;  %v1969_v14 = vld [vmem:[%s5764_s23 + $0x3870] sm:$0xff] }
 0x1d8   : > { %1966 = vst [vmem:[%s5769_s24 + $0x1c60] sm:$0xff] %v1965_v12  ;;  %v1971_v15 = vld [vmem:[%s5764_s23 + $0x3878] sm:$0xff]  ;;  %1968 = vst [vmem:[%s5769_s24 + $0x1c68] sm:$0xff] %v1967_v13  ;;  %v1973_v16 = vld [vmem:[%s5764_s23 + $0x3900] sm:$0xff] }
 0x1d9   : > { %1970 = vst [vmem:[%s5769_s24 + $0x1c70] sm:$0xff] %v1969_v14  ;;  %1972 = vst [vmem:[%s5769_s24 + $0x1c78] sm:$0xff] %v1971_v15  ;;  %v1975_v17 = vld [vmem:[%s5764_s23 + $0x3908] sm:$0xff]  ;;  %v1977_v18 = vld [vmem:[%s5764_s23 + $0x3910] sm:$0xff] }
 0x1da   : > { %1974 = vst [vmem:[%s5769_s24 + $0x1c80] sm:$0xff] %v1973_v16  ;;  %1976 = vst [vmem:[%s5769_s24 + $0x1c88] sm:$0xff] %v1975_v17  ;;  %v1979_v19 = vld [vmem:[%s5764_s23 + $0x3918] sm:$0xff]  ;;  %v1981_v20 = vld [vmem:[%s5764_s23 + $0x3920] sm:$0xff] }
 0x1db   : > { %1978 = vst [vmem:[%s5769_s24 + $0x1c90] sm:$0xff] %v1977_v18  ;;  %v1983_v21 = vld [vmem:[%s5764_s23 + $0x3928] sm:$0xff]  ;;  %1980 = vst [vmem:[%s5769_s24 + $0x1c98] sm:$0xff] %v1979_v19  ;;  %v1985_v22 = vld [vmem:[%s5764_s23 + $0x3930] sm:$0xff] }
 0x1dc   : > { %1982 = vst [vmem:[%s5769_s24 + $0x1ca0] sm:$0xff] %v1981_v20  ;;  %1984 = vst [vmem:[%s5769_s24 + $0x1ca8] sm:$0xff] %v1983_v21  ;;  %v1987_v23 = vld [vmem:[%s5764_s23 + $0x3938] sm:$0xff]  ;;  %v1989_v24 = vld [vmem:[%s5764_s23 + $0x3940] sm:$0xff] }
 0x1dd   : > { %1986 = vst [vmem:[%s5769_s24 + $0x1cb0] sm:$0xff] %v1985_v22  ;;  %1988 = vst [vmem:[%s5769_s24 + $0x1cb8] sm:$0xff] %v1987_v23  ;;  %v1991_v25 = vld [vmem:[%s5764_s23 + $0x3948] sm:$0xff]  ;;  %v1993_v26 = vld [vmem:[%s5764_s23 + $0x3950] sm:$0xff] }
 0x1de   : > { %1990 = vst [vmem:[%s5769_s24 + $0x1cc0] sm:$0xff] %v1989_v24  ;;  %v1995_v27 = vld [vmem:[%s5764_s23 + $0x3958] sm:$0xff]  ;;  %1992 = vst [vmem:[%s5769_s24 + $0x1cc8] sm:$0xff] %v1991_v25  ;;  %v1997_v28 = vld [vmem:[%s5764_s23 + $0x3960] sm:$0xff] }
 0x1df   : > { %1994 = vst [vmem:[%s5769_s24 + $0x1cd0] sm:$0xff] %v1993_v26  ;;  %1996 = vst [vmem:[%s5769_s24 + $0x1cd8] sm:$0xff] %v1995_v27  ;;  %v1999_v29 = vld [vmem:[%s5764_s23 + $0x3968] sm:$0xff]  ;;  %v2001_v30 = vld [vmem:[%s5764_s23 + $0x3970] sm:$0xff] }
 0x1e0   : > { %1998 = vst [vmem:[%s5769_s24 + $0x1ce0] sm:$0xff] %v1997_v28  ;;  %2000 = vst [vmem:[%s5769_s24 + $0x1ce8] sm:$0xff] %v1999_v29  ;;  %v2003_v31 = vld [vmem:[%s5764_s23 + $0x3978] sm:$0xff]  ;;  %v2005_v32 = vld [vmem:[%s5764_s23 + $0x3a00] sm:$0xff] }
 0x1e1   : > { %2002 = vst [vmem:[%s5769_s24 + $0x1cf0] sm:$0xff] %v2001_v30  ;;  %v2007_v33 = vld [vmem:[%s5764_s23 + $0x3a08] sm:$0xff]  ;;  %2004 = vst [vmem:[%s5769_s24 + $0x1cf8] sm:$0xff] %v2003_v31  ;;  %v2009_v34 = vld [vmem:[%s5764_s23 + $0x3a10] sm:$0xff] }
 0x1e2   : > { %2006 = vst [vmem:[%s5769_s24 + $0x1d00] sm:$0xff] %v2005_v32  ;;  %2008 = vst [vmem:[%s5769_s24 + $0x1d08] sm:$0xff] %v2007_v33  ;;  %v2011_v35 = vld [vmem:[%s5764_s23 + $0x3a18] sm:$0xff]  ;;  %v2013_v36 = vld [vmem:[%s5764_s23 + $0x3a20] sm:$0xff] }
 0x1e3   : > { %2010 = vst [vmem:[%s5769_s24 + $0x1d10] sm:$0xff] %v2009_v34  ;;  %2012 = vst [vmem:[%s5769_s24 + $0x1d18] sm:$0xff] %v2011_v35  ;;  %v2015_v37 = vld [vmem:[%s5764_s23 + $0x3a28] sm:$0xff]  ;;  %v2017_v38 = vld [vmem:[%s5764_s23 + $0x3a30] sm:$0xff] }
 0x1e4   : > { %2014 = vst [vmem:[%s5769_s24 + $0x1d20] sm:$0xff] %v2013_v36  ;;  %v2019_v39 = vld [vmem:[%s5764_s23 + $0x3a38] sm:$0xff]  ;;  %2016 = vst [vmem:[%s5769_s24 + $0x1d28] sm:$0xff] %v2015_v37  ;;  %v2021_v40 = vld [vmem:[%s5764_s23 + $0x3a40] sm:$0xff] }
 0x1e5   : > { %2018 = vst [vmem:[%s5769_s24 + $0x1d30] sm:$0xff] %v2017_v38  ;;  %2020 = vst [vmem:[%s5769_s24 + $0x1d38] sm:$0xff] %v2019_v39  ;;  %v2023_v41 = vld [vmem:[%s5764_s23 + $0x3a48] sm:$0xff]  ;;  %v2025_v42 = vld [vmem:[%s5764_s23 + $0x3a50] sm:$0xff] }
 0x1e6   : > { %2022 = vst [vmem:[%s5769_s24 + $0x1d40] sm:$0xff] %v2021_v40  ;;  %2024 = vst [vmem:[%s5769_s24 + $0x1d48] sm:$0xff] %v2023_v41  ;;  %v2027_v43 = vld [vmem:[%s5764_s23 + $0x3a58] sm:$0xff]  ;;  %v2029_v44 = vld [vmem:[%s5764_s23 + $0x3a60] sm:$0xff] }
 0x1e7   : > { %2026 = vst [vmem:[%s5769_s24 + $0x1d50] sm:$0xff] %v2025_v42  ;;  %v2031_v45 = vld [vmem:[%s5764_s23 + $0x3a68] sm:$0xff]  ;;  %2028 = vst [vmem:[%s5769_s24 + $0x1d58] sm:$0xff] %v2027_v43  ;;  %v2033_v46 = vld [vmem:[%s5764_s23 + $0x3a70] sm:$0xff] }
 0x1e8   : > { %2030 = vst [vmem:[%s5769_s24 + $0x1d60] sm:$0xff] %v2029_v44  ;;  %2032 = vst [vmem:[%s5769_s24 + $0x1d68] sm:$0xff] %v2031_v45  ;;  %v2035_v47 = vld [vmem:[%s5764_s23 + $0x3a78] sm:$0xff]  ;;  %v2037_v48 = vld [vmem:[%s5764_s23 + $0x3b00] sm:$0xff] }
 0x1e9   : > { %2034 = vst [vmem:[%s5769_s24 + $0x1d70] sm:$0xff] %v2033_v46  ;;  %2036 = vst [vmem:[%s5769_s24 + $0x1d78] sm:$0xff] %v2035_v47  ;;  %v2039_v49 = vld [vmem:[%s5764_s23 + $0x3b08] sm:$0xff]  ;;  %v2041_v50 = vld [vmem:[%s5764_s23 + $0x3b10] sm:$0xff] }
 0x1ea   : > { %2038 = vst [vmem:[%s5769_s24 + $0x1d80] sm:$0xff] %v2037_v48  ;;  %v2043_v51 = vld [vmem:[%s5764_s23 + $0x3b18] sm:$0xff]  ;;  %2040 = vst [vmem:[%s5769_s24 + $0x1d88] sm:$0xff] %v2039_v49  ;;  %v2045_v52 = vld [vmem:[%s5764_s23 + $0x3b20] sm:$0xff] }
 0x1eb   : > { %2042 = vst [vmem:[%s5769_s24 + $0x1d90] sm:$0xff] %v2041_v50  ;;  %2044 = vst [vmem:[%s5769_s24 + $0x1d98] sm:$0xff] %v2043_v51  ;;  %v2047_v53 = vld [vmem:[%s5764_s23 + $0x3b28] sm:$0xff]  ;;  %v2049_v54 = vld [vmem:[%s5764_s23 + $0x3b30] sm:$0xff] }
 0x1ec   : > { %2046 = vst [vmem:[%s5769_s24 + $0x1da0] sm:$0xff] %v2045_v52  ;;  %2048 = vst [vmem:[%s5769_s24 + $0x1da8] sm:$0xff] %v2047_v53  ;;  %v2051_v55 = vld [vmem:[%s5764_s23 + $0x3b38] sm:$0xff]  ;;  %v2053_v56 = vld [vmem:[%s5764_s23 + $0x3b40] sm:$0xff] }
 0x1ed   : > { %2050 = vst [vmem:[%s5769_s24 + $0x1db0] sm:$0xff] %v2049_v54  ;;  %v2055_v57 = vld [vmem:[%s5764_s23 + $0x3b48] sm:$0xff]  ;;  %2052 = vst [vmem:[%s5769_s24 + $0x1db8] sm:$0xff] %v2051_v55  ;;  %v2057_v58 = vld [vmem:[%s5764_s23 + $0x3b50] sm:$0xff] }
 0x1ee   : > { %2054 = vst [vmem:[%s5769_s24 + $0x1dc0] sm:$0xff] %v2053_v56  ;;  %2056 = vst [vmem:[%s5769_s24 + $0x1dc8] sm:$0xff] %v2055_v57  ;;  %v2059_v59 = vld [vmem:[%s5764_s23 + $0x3b58] sm:$0xff]  ;;  %v2061_v60 = vld [vmem:[%s5764_s23 + $0x3b60] sm:$0xff] }
 0x1ef   : > { %2058 = vst [vmem:[%s5769_s24 + $0x1dd0] sm:$0xff] %v2057_v58  ;;  %2060 = vst [vmem:[%s5769_s24 + $0x1dd8] sm:$0xff] %v2059_v59  ;;  %v2063_v61 = vld [vmem:[%s5764_s23 + $0x3b68] sm:$0xff]  ;;  %v2065_v62 = vld [vmem:[%s5764_s23 + $0x3b70] sm:$0xff] }
 0x1f0   : > { %2062 = vst [vmem:[%s5769_s24 + $0x1de0] sm:$0xff] %v2061_v60  ;;  %v2067_v63 = vld [vmem:[%s5764_s23 + $0x3b78] sm:$0xff]  ;;  %2064 = vst [vmem:[%s5769_s24 + $0x1de8] sm:$0xff] %v2063_v61  ;;  %v2069_v0 = vld [vmem:[%s5764_s23 + $0x3c00] sm:$0xff] }
 0x1f1   : > { %2066 = vst [vmem:[%s5769_s24 + $0x1df0] sm:$0xff] %v2065_v62  ;;  %2068 = vst [vmem:[%s5769_s24 + $0x1df8] sm:$0xff] %v2067_v63  ;;  %v2071_v1 = vld [vmem:[%s5764_s23 + $0x3c08] sm:$0xff]  ;;  %v2073_v2 = vld [vmem:[%s5764_s23 + $0x3c10] sm:$0xff] }
 0x1f2   : > { %2070 = vst [vmem:[%s5769_s24 + $0x1e00] sm:$0xff] %v2069_v0  ;;  %2072 = vst [vmem:[%s5769_s24 + $0x1e08] sm:$0xff] %v2071_v1  ;;  %v2075_v3 = vld [vmem:[%s5764_s23 + $0x3c18] sm:$0xff]  ;;  %v2077_v4 = vld [vmem:[%s5764_s23 + $0x3c20] sm:$0xff] }
 0x1f3   : > { %2074 = vst [vmem:[%s5769_s24 + $0x1e10] sm:$0xff] %v2073_v2  ;;  %v2079_v5 = vld [vmem:[%s5764_s23 + $0x3c28] sm:$0xff]  ;;  %2076 = vst [vmem:[%s5769_s24 + $0x1e18] sm:$0xff] %v2075_v3  ;;  %v2081_v6 = vld [vmem:[%s5764_s23 + $0x3c30] sm:$0xff] }
 0x1f4   : > { %2078 = vst [vmem:[%s5769_s24 + $0x1e20] sm:$0xff] %v2077_v4  ;;  %2080 = vst [vmem:[%s5769_s24 + $0x1e28] sm:$0xff] %v2079_v5  ;;  %v2083_v7 = vld [vmem:[%s5764_s23 + $0x3c38] sm:$0xff]  ;;  %v2085_v8 = vld [vmem:[%s5764_s23 + $0x3c40] sm:$0xff] }
 0x1f5   : > { %2082 = vst [vmem:[%s5769_s24 + $0x1e30] sm:$0xff] %v2081_v6  ;;  %2084 = vst [vmem:[%s5769_s24 + $0x1e38] sm:$0xff] %v2083_v7  ;;  %v2087_v9 = vld [vmem:[%s5764_s23 + $0x3c48] sm:$0xff]  ;;  %v2089_v10 = vld [vmem:[%s5764_s23 + $0x3c50] sm:$0xff] }
 0x1f6   : > { %2086 = vst [vmem:[%s5769_s24 + $0x1e40] sm:$0xff] %v2085_v8  ;;  %v2091_v11 = vld [vmem:[%s5764_s23 + $0x3c58] sm:$0xff]  ;;  %2088 = vst [vmem:[%s5769_s24 + $0x1e48] sm:$0xff] %v2087_v9  ;;  %v2093_v12 = vld [vmem:[%s5764_s23 + $0x3c60] sm:$0xff] }
 0x1f7   : > { %2090 = vst [vmem:[%s5769_s24 + $0x1e50] sm:$0xff] %v2089_v10  ;;  %2092 = vst [vmem:[%s5769_s24 + $0x1e58] sm:$0xff] %v2091_v11  ;;  %v2095_v13 = vld [vmem:[%s5764_s23 + $0x3c68] sm:$0xff]  ;;  %v2097_v14 = vld [vmem:[%s5764_s23 + $0x3c70] sm:$0xff] }
 0x1f8   : > { %2094 = vst [vmem:[%s5769_s24 + $0x1e60] sm:$0xff] %v2093_v12  ;;  %2096 = vst [vmem:[%s5769_s24 + $0x1e68] sm:$0xff] %v2095_v13  ;;  %v2099_v15 = vld [vmem:[%s5764_s23 + $0x3c78] sm:$0xff]  ;;  %v2101_v16 = vld [vmem:[%s5764_s23 + $0x3d00] sm:$0xff] }
 0x1f9   : > { %2098 = vst [vmem:[%s5769_s24 + $0x1e70] sm:$0xff] %v2097_v14  ;;  %v2103_v17 = vld [vmem:[%s5764_s23 + $0x3d08] sm:$0xff]  ;;  %2100 = vst [vmem:[%s5769_s24 + $0x1e78] sm:$0xff] %v2099_v15  ;;  %v2105_v18 = vld [vmem:[%s5764_s23 + $0x3d10] sm:$0xff] }
 0x1fa   : > { %2102 = vst [vmem:[%s5769_s24 + $0x1e80] sm:$0xff] %v2101_v16  ;;  %2104 = vst [vmem:[%s5769_s24 + $0x1e88] sm:$0xff] %v2103_v17  ;;  %v2107_v19 = vld [vmem:[%s5764_s23 + $0x3d18] sm:$0xff]  ;;  %v2109_v20 = vld [vmem:[%s5764_s23 + $0x3d20] sm:$0xff] }
 0x1fb   : > { %2106 = vst [vmem:[%s5769_s24 + $0x1e90] sm:$0xff] %v2105_v18  ;;  %2108 = vst [vmem:[%s5769_s24 + $0x1e98] sm:$0xff] %v2107_v19  ;;  %v2111_v21 = vld [vmem:[%s5764_s23 + $0x3d28] sm:$0xff]  ;;  %v2113_v22 = vld [vmem:[%s5764_s23 + $0x3d30] sm:$0xff] }
 0x1fc   : > { %2110 = vst [vmem:[%s5769_s24 + $0x1ea0] sm:$0xff] %v2109_v20  ;;  %v2115_v23 = vld [vmem:[%s5764_s23 + $0x3d38] sm:$0xff]  ;;  %2112 = vst [vmem:[%s5769_s24 + $0x1ea8] sm:$0xff] %v2111_v21  ;;  %v2117_v24 = vld [vmem:[%s5764_s23 + $0x3d40] sm:$0xff] }
 0x1fd   : > { %2114 = vst [vmem:[%s5769_s24 + $0x1eb0] sm:$0xff] %v2113_v22  ;;  %2116 = vst [vmem:[%s5769_s24 + $0x1eb8] sm:$0xff] %v2115_v23  ;;  %v2119_v25 = vld [vmem:[%s5764_s23 + $0x3d48] sm:$0xff]  ;;  %v2121_v26 = vld [vmem:[%s5764_s23 + $0x3d50] sm:$0xff] }
 0x1fe   : > { %2118 = vst [vmem:[%s5769_s24 + $0x1ec0] sm:$0xff] %v2117_v24  ;;  %2120 = vst [vmem:[%s5769_s24 + $0x1ec8] sm:$0xff] %v2119_v25  ;;  %v2123_v27 = vld [vmem:[%s5764_s23 + $0x3d58] sm:$0xff]  ;;  %v2125_v28 = vld [vmem:[%s5764_s23 + $0x3d60] sm:$0xff] }
 0x1ff   : > { %2122 = vst [vmem:[%s5769_s24 + $0x1ed0] sm:$0xff] %v2121_v26  ;;  %v2127_v29 = vld [vmem:[%s5764_s23 + $0x3d68] sm:$0xff]  ;;  %2124 = vst [vmem:[%s5769_s24 + $0x1ed8] sm:$0xff] %v2123_v27  ;;  %v2129_v30 = vld [vmem:[%s5764_s23 + $0x3d70] sm:$0xff] }
 0x200   : > { %2126 = vst [vmem:[%s5769_s24 + $0x1ee0] sm:$0xff] %v2125_v28  ;;  %2128 = vst [vmem:[%s5769_s24 + $0x1ee8] sm:$0xff] %v2127_v29  ;;  %v2131_v31 = vld [vmem:[%s5764_s23 + $0x3d78] sm:$0xff]  ;;  %v2133_v32 = vld [vmem:[%s5764_s23 + $0x3e00] sm:$0xff] }
 0x201   : > { %2130 = vst [vmem:[%s5769_s24 + $0x1ef0] sm:$0xff] %v2129_v30  ;;  %2132 = vst [vmem:[%s5769_s24 + $0x1ef8] sm:$0xff] %v2131_v31  ;;  %v2135_v33 = vld [vmem:[%s5764_s23 + $0x3e08] sm:$0xff]  ;;  %v2137_v34 = vld [vmem:[%s5764_s23 + $0x3e10] sm:$0xff] }
 0x202   : > { %2134 = vst [vmem:[%s5769_s24 + $0x1f00] sm:$0xff] %v2133_v32  ;;  %v2139_v35 = vld [vmem:[%s5764_s23 + $0x3e18] sm:$0xff]  ;;  %2136 = vst [vmem:[%s5769_s24 + $0x1f08] sm:$0xff] %v2135_v33  ;;  %v2141_v36 = vld [vmem:[%s5764_s23 + $0x3e20] sm:$0xff] }
 0x203   : > { %2138 = vst [vmem:[%s5769_s24 + $0x1f10] sm:$0xff] %v2137_v34  ;;  %2140 = vst [vmem:[%s5769_s24 + $0x1f18] sm:$0xff] %v2139_v35  ;;  %v2143_v37 = vld [vmem:[%s5764_s23 + $0x3e28] sm:$0xff]  ;;  %v2145_v38 = vld [vmem:[%s5764_s23 + $0x3e30] sm:$0xff] }
 0x204   : > { %2142 = vst [vmem:[%s5769_s24 + $0x1f20] sm:$0xff] %v2141_v36  ;;  %2144 = vst [vmem:[%s5769_s24 + $0x1f28] sm:$0xff] %v2143_v37  ;;  %v2147_v39 = vld [vmem:[%s5764_s23 + $0x3e38] sm:$0xff]  ;;  %v2149_v40 = vld [vmem:[%s5764_s23 + $0x3e40] sm:$0xff] }
 0x205   : > { %2146 = vst [vmem:[%s5769_s24 + $0x1f30] sm:$0xff] %v2145_v38  ;;  %v2151_v41 = vld [vmem:[%s5764_s23 + $0x3e48] sm:$0xff]  ;;  %2148 = vst [vmem:[%s5769_s24 + $0x1f38] sm:$0xff] %v2147_v39  ;;  %v2153_v42 = vld [vmem:[%s5764_s23 + $0x3e50] sm:$0xff] }
 0x206   : > { %2150 = vst [vmem:[%s5769_s24 + $0x1f40] sm:$0xff] %v2149_v40  ;;  %2152 = vst [vmem:[%s5769_s24 + $0x1f48] sm:$0xff] %v2151_v41  ;;  %v2155_v43 = vld [vmem:[%s5764_s23 + $0x3e58] sm:$0xff]  ;;  %v2157_v44 = vld [vmem:[%s5764_s23 + $0x3e60] sm:$0xff] }
 0x207   : > { %2154 = vst [vmem:[%s5769_s24 + $0x1f50] sm:$0xff] %v2153_v42  ;;  %2156 = vst [vmem:[%s5769_s24 + $0x1f58] sm:$0xff] %v2155_v43  ;;  %v2159_v45 = vld [vmem:[%s5764_s23 + $0x3e68] sm:$0xff]  ;;  %v2161_v46 = vld [vmem:[%s5764_s23 + $0x3e70] sm:$0xff] }
 0x208   : > { %2158 = vst [vmem:[%s5769_s24 + $0x1f60] sm:$0xff] %v2157_v44  ;;  %v2163_v47 = vld [vmem:[%s5764_s23 + $0x3e78] sm:$0xff]  ;;  %2160 = vst [vmem:[%s5769_s24 + $0x1f68] sm:$0xff] %v2159_v45  ;;  %v2165_v48 = vld [vmem:[%s5764_s23 + $0x3f00] sm:$0xff] }
 0x209   : > { %2162 = vst [vmem:[%s5769_s24 + $0x1f70] sm:$0xff] %v2161_v46  ;;  %2164 = vst [vmem:[%s5769_s24 + $0x1f78] sm:$0xff] %v2163_v47  ;;  %v2167_v49 = vld [vmem:[%s5764_s23 + $0x3f08] sm:$0xff]  ;;  %v2169_v50 = vld [vmem:[%s5764_s23 + $0x3f10] sm:$0xff] }
 0x20a   : > { %2166 = vst [vmem:[%s5769_s24 + $0x1f80] sm:$0xff] %v2165_v48  ;;  %2168 = vst [vmem:[%s5769_s24 + $0x1f88] sm:$0xff] %v2167_v49  ;;  %v2171_v51 = vld [vmem:[%s5764_s23 + $0x3f18] sm:$0xff]  ;;  %v2173_v52 = vld [vmem:[%s5764_s23 + $0x3f20] sm:$0xff] }
 0x20b   : > { %2170 = vst [vmem:[%s5769_s24 + $0x1f90] sm:$0xff] %v2169_v50  ;;  %v2175_v53 = vld [vmem:[%s5764_s23 + $0x3f28] sm:$0xff]  ;;  %2172 = vst [vmem:[%s5769_s24 + $0x1f98] sm:$0xff] %v2171_v51  ;;  %v2177_v54 = vld [vmem:[%s5764_s23 + $0x3f30] sm:$0xff] }
 0x20c   : > { %2174 = vst [vmem:[%s5769_s24 + $0x1fa0] sm:$0xff] %v2173_v52  ;;  %2176 = vst [vmem:[%s5769_s24 + $0x1fa8] sm:$0xff] %v2175_v53  ;;  %v2179_v55 = vld [vmem:[%s5764_s23 + $0x3f38] sm:$0xff]  ;;  %v2181_v56 = vld [vmem:[%s5764_s23 + $0x3f40] sm:$0xff] }
 0x20d   : > { %2178 = vst [vmem:[%s5769_s24 + $0x1fb0] sm:$0xff] %v2177_v54  ;;  %2180 = vst [vmem:[%s5769_s24 + $0x1fb8] sm:$0xff] %v2179_v55  ;;  %v2183_v57 = vld [vmem:[%s5764_s23 + $0x3f48] sm:$0xff]  ;;  %v2185_v58 = vld [vmem:[%s5764_s23 + $0x3f50] sm:$0xff] }
 0x20e   : > { %2182 = vst [vmem:[%s5769_s24 + $0x1fc0] sm:$0xff] %v2181_v56  ;;  %v2187_v59 = vld [vmem:[%s5764_s23 + $0x3f58] sm:$0xff]  ;;  %2184 = vst [vmem:[%s5769_s24 + $0x1fc8] sm:$0xff] %v2183_v57  ;;  %v2189_v60 = vld [vmem:[%s5764_s23 + $0x3f60] sm:$0xff] }
 0x20f   : > { %2186 = vst [vmem:[%s5769_s24 + $0x1fd0] sm:$0xff] %v2185_v58  ;;  %2188 = vst [vmem:[%s5769_s24 + $0x1fd8] sm:$0xff] %v2187_v59  ;;  %v2191_v61 = vld [vmem:[%s5764_s23 + $0x3f68] sm:$0xff]  ;;  %v2193_v62 = vld [vmem:[%s5764_s23 + $0x3f70] sm:$0xff] }
 0x210   : > { %2190 = vst [vmem:[%s5769_s24 + $0x1fe0] sm:$0xff] %v2189_v60  ;;  %2192 = vst [vmem:[%s5769_s24 + $0x1fe8] sm:$0xff] %v2191_v61  ;;  %v2195_v63 = vld [vmem:[%s5764_s23 + $0x3f78] sm:$0xff] }
 0x211   : > { %2194 = vst [vmem:[%s5769_s24 + $0x1ff0] sm:$0xff] %v2193_v62  ;;  %2196 = vst [vmem:[%s5769_s24 + $0x1ff8] sm:$0xff] %v2195_v63 }
 0x212 PF: > { %p4572_p6 = scmp.ge.s32.totalorder %s5704_s13, 1  ;;  %p2201_p7 = scmp.lt.s32.totalorder %s5704_s13, 3 }
 0x214   : > { %p2202_p8 = pnand %p4572_p6, %p2201_p7 }
 0x215   : > { %s2208_s25 = sand.u32 (!%p2202_p8), 1, %s5688_s9   ;;  %v7822_v0 = vld [vmem:[%s8942_s0] sm:$0xff] (!%p2202_p8)  ;;  %s4574_s15 = sshll.u32 (!%p2202_p8), %s5696_s11, 4 }
 0x216   : > { %2205 = sbr.rel (%p2202_p8) target bundleno = 1269 (0x4f5), region = 47  ;;  %s4573_s28 = sshll.u32 (!%p2202_p8), %s2208_s25, 13  ;;  %v7826_v1 = vcombine.high (!%p2202_p8), %v7822_v0, %v7822_v0 }
 0x217   : > { %s7828_s29 = scalar_lea.vmem (!%p2202_p8), [#allocation2], %s4573_s28  ;;  %p8541_p9 = scmp.lt.s32.totalorder (!%p2202_p8), %s4574_s15, 31 }
 0x218   : > { %v2257_v2 = vld [vmem:[%s7828_s29 + $0x8] sm:$0xff] (!%p2202_p8)  ;;  %v2259_v4 = vld [vmem:[%s7828_s29 + $0x18] sm:$0xff] (!%p2202_p8)  ;;  %3350 = vmatprep.mubr.f32.mxu0 (!%p2202_p8), %v7826_v1  ;;  %3492 = vmatprep.mubr.f32.mxu1 (!%p2202_p8), %v7826_v1  ;;  %v2256_v7 = vld [vmem:[%s7828_s29] sm:$0xff] (!%p2202_p8) }
 0x219   : > { %v2273_v3 = vld [vmem:[%s7828_s29 + $0x88] sm:$0xff] (!%p2202_p8)  ;;  %v2275_v6 = vld [vmem:[%s7828_s29 + $0x98] sm:$0xff] (!%p2202_p8)  ;;  %v2272_v8 = vld [vmem:[%s7828_s29 + $0x80] sm:$0xff] (!%p2202_p8) }
 0x21a   : > { %v4579_v5 = vpack.c.bf16 (!%p2202_p8), %v2273_v3, %v2257_v2  ;;  %v4707_v9 = vpack.c.bf16 (!%p2202_p8), %v2275_v6, %v2259_v4  ;;  %v4581_v10 = vpack.c.bf16 (!%p2202_p8), %v2272_v8, %v2256_v7  ;;  %v2258_v11 = vld [vmem:[%s7828_s29 + $0x10] sm:$0xff] (!%p2202_p8)  ;;  %v2289_v13 = vld [vmem:[%s7828_s29 + $0x108] sm:$0xff] (!%p2202_p8)  ;;  %v2291_v16 = vld [vmem:[%s7828_s29 + $0x118] sm:$0xff] (!%p2202_p8) }
 0x21b   : > { %v2274_v12 = vld [vmem:[%s7828_s29 + $0x90] sm:$0xff] (!%p2202_p8)  ;;  %v2305_v15 = vld [vmem:[%s7828_s29 + $0x188] sm:$0xff] (!%p2202_p8)  ;;  %v2307_v17 = vld [vmem:[%s7828_s29 + $0x198] sm:$0xff] (!%p2202_p8) }
 0x21c   : > { %4580 = vmatprep.subr.bf16.mxu0 (!%p2202_p8), %v4579_v5  ;;  %v4709_v14 = vpack.c.bf16 (!%p2202_p8), %v2274_v12, %v2258_v11  ;;  %4708 = vmatprep.subr.bf16.mxu1 (!%p2202_p8), %v4707_v9  ;;  %v4583_v18 = vpack.c.bf16 (!%p2202_p8), %v2305_v15, %v2289_v13  ;;  %v4711_v19 = vpack.c.bf16 (!%p2202_p8), %v2307_v17, %v2291_v16  ;;  %v2288_v20 = vld [vmem:[%s7828_s29 + $0x100] sm:$0xff] (!%p2202_p8)  ;;  %v2290_v22 = vld [vmem:[%s7828_s29 + $0x110] sm:$0xff] (!%p2202_p8)  ;;  %v2321_v25 = vld [vmem:[%s7828_s29 + $0x208] sm:$0xff] (!%p2202_p8) }
 0x21d   : > { %4582 = vmatpush1.bf16.msra.mxu0 %v4581_v10  ;;  %v2304_v21 = vld [vmem:[%s7828_s29 + $0x180] sm:$0xff]  ;;  %v2306_v24 = vld [vmem:[%s7828_s29 + $0x190] sm:$0xff]  ;;  %v2337_v26 = vld [vmem:[%s7828_s29 + $0x288] sm:$0xff]  ;;  %s8953_s15 = smov (!%p8541_p9, %s4574_s15), 31 }
 0x21e   : > { %4710 = vmatpush1.bf16.msra.mxu1 %v4709_v14  ;;  %v4585_v23 = vpack.c.bf16 %v2304_v21, %v2288_v20  ;;  %4584 = vmatprep.subr.bf16.mxu0 %v4583_v18  ;;  %v4713_v27 = vpack.c.bf16 %v2306_v24, %v2290_v22  ;;  %v4587_v28 = vpack.c.bf16 %v2337_v26, %v2321_v25  ;;  %v2323_v29 = vld [vmem:[%s7828_s29 + $0x218] sm:$0xff]  ;;  %v2320_v31 = vld [vmem:[%s7828_s29 + $0x200] sm:$0xff]  ;;  %v2322_v34 = vld [vmem:[%s7828_s29 + $0x210] sm:$0xff]  ;;  %s4575_s11 = sshll.u32 %s8953_s15, 2 }
 0x21f   : > { %4712 = vmatprep.subr.bf16.mxu1 %v4711_v19  ;;  %v2339_v30 = vld [vmem:[%s7828_s29 + $0x298] sm:$0xff]  ;;  %v2336_v33 = vld [vmem:[%s7828_s29 + $0x280] sm:$0xff]  ;;  %v2338_v35 = vld [vmem:[%s7828_s29 + $0x290] sm:$0xff]  ;;  %s8575_s20 = scalar_lea.vmem %s8944_s2, %s4575_s11 }
 0x220   : > { %v4715_v32 = vpack.c.bf16 %v2339_v30, %v2323_v29  ;;  %v4589_v36 = vpack.c.bf16 %v2336_v33, %v2320_v31  ;;  %v2353_v37 = vld [vmem:[%s7828_s29 + $0x308] sm:$0xff]  ;;  %v2355_v39 = vld [vmem:[%s7828_s29 + $0x318] sm:$0xff]  ;;  %v4717_v40 = vpack.c.bf16 %v2338_v35, %v2322_v34  ;;  %v2352_v43 = vld [vmem:[%s7828_s29 + $0x300] sm:$0xff] }
 0x221   : > { %4586 = vmatpush1.bf16.msra.mxu0 %v4585_v23  ;;  %v2369_v38 = vld [vmem:[%s7828_s29 + $0x388] sm:$0xff]  ;;  %v2371_v42 = vld [vmem:[%s7828_s29 + $0x398] sm:$0xff]  ;;  %v2368_v44 = vld [vmem:[%s7828_s29 + $0x380] sm:$0xff] }
 0x222   : > { %4714 = vmatpush1.bf16.msra.mxu1 %v4713_v27  ;;  %4588 = vmatprep.subr.bf16.mxu0 %v4587_v28  ;;  %v4591_v41 = vpack.c.bf16 %v2369_v38, %v2353_v37  ;;  %v4719_v45 = vpack.c.bf16 %v2371_v42, %v2355_v39  ;;  %v2354_v46 = vld [vmem:[%s7828_s29 + $0x310] sm:$0xff]  ;;  %v2385_v48 = vld [vmem:[%s7828_s29 + $0x408] sm:$0xff]  ;;  %v2387_v50 = vld [vmem:[%s7828_s29 + $0x418] sm:$0xff]  ;;  %v4593_v52 = vpack.c.bf16 %v2368_v44, %v2352_v43 }
 0x223   : > { %4716 = vmatprep.subr.bf16.mxu1 %v4715_v32  ;;  %v2370_v47 = vld [vmem:[%s7828_s29 + $0x390] sm:$0xff]  ;;  %v2401_v49 = vld [vmem:[%s7828_s29 + $0x488] sm:$0xff]  ;;  %v2403_v51 = vld [vmem:[%s7828_s29 + $0x498] sm:$0xff] }
 0x224   : > { %v4721_v53 = vpack.c.bf16 %v2370_v47, %v2354_v46  ;;  %v4595_v54 = vpack.c.bf16 %v2401_v49, %v2385_v48  ;;  %v2384_v55 = vld [vmem:[%s7828_s29 + $0x400] sm:$0xff]  ;;  %v2386_v57 = vld [vmem:[%s7828_s29 + $0x410] sm:$0xff]  ;;  %v4723_v58 = vpack.c.bf16 %v2403_v51, %v2387_v50  ;;  %v2417_v60 = vld [vmem:[%s7828_s29 + $0x508] sm:$0xff] }
 0x225   : > { %4590 = vmatpush1.bf16.msra.mxu0 %v4589_v36  ;;  %v2400_v56 = vld [vmem:[%s7828_s29 + $0x480] sm:$0xff]  ;;  %v2402_v59 = vld [vmem:[%s7828_s29 + $0x490] sm:$0xff]  ;;  %v2433_v61 = vld [vmem:[%s7828_s29 + $0x588] sm:$0xff] }
 0x226   : > { %4718 = vmatpush1.bf16.msra.mxu1 %v4717_v40  ;;  %4592 = vmatprep.subr.bf16.mxu0 %v4591_v41  ;;  %v2419_v62 = vld [vmem:[%s7828_s29 + $0x518] sm:$0xff]  ;;  %v4597_v2 = vpack.c.bf16 %v2400_v56, %v2384_v55  ;;  %v4725_v3 = vpack.c.bf16 %v2402_v59, %v2386_v57  ;;  %v4599_v4 = vpack.c.bf16 %v2433_v61, %v2417_v60  ;;  %v2416_v5 = vld [vmem:[%s7828_s29 + $0x500] sm:$0xff]  ;;  %v2418_v7 = vld [vmem:[%s7828_s29 + $0x510] sm:$0xff] }
 0x227   : > { %4720 = vmatprep.subr.bf16.mxu1 %v4719_v45  ;;  %v2435_v63 = vld [vmem:[%s7828_s29 + $0x598] sm:$0xff]  ;;  %v2432_v6 = vld [vmem:[%s7828_s29 + $0x580] sm:$0xff]  ;;  %v2434_v9 = vld [vmem:[%s7828_s29 + $0x590] sm:$0xff] }
 0x228   : > { %v4727_v8 = vpack.c.bf16 %v2435_v63, %v2419_v62  ;;  %v2449_v10 = vld [vmem:[%s7828_s29 + $0x608] sm:$0xff]  ;;  %v2451_v12 = vld [vmem:[%s7828_s29 + $0x618] sm:$0xff]  ;;  %v4601_v14 = vpack.c.bf16 %v2432_v6, %v2416_v5  ;;  %v4729_v15 = vpack.c.bf16 %v2434_v9, %v2418_v7  ;;  %v2448_v17 = vld [vmem:[%s7828_s29 + $0x600] sm:$0xff] }
 0x229   : > { %4594 = vmatpush1.bf16.msra.mxu0 %v4593_v52  ;;  %v2465_v11 = vld [vmem:[%s7828_s29 + $0x688] sm:$0xff]  ;;  %v2467_v13 = vld [vmem:[%s7828_s29 + $0x698] sm:$0xff]  ;;  %v2464_v18 = vld [vmem:[%s7828_s29 + $0x680] sm:$0xff] }
 0x22a   : > { %4722 = vmatpush1.bf16.msra.mxu1 %v4721_v53  ;;  %4596 = vmatprep.subr.bf16.mxu0 %v4595_v54  ;;  %v4603_v16 = vpack.c.bf16 %v2465_v11, %v2449_v10  ;;  %v2450_v19 = vld [vmem:[%s7828_s29 + $0x610] sm:$0xff]  ;;  %v4731_v20 = vpack.c.bf16 %v2467_v13, %v2451_v12  ;;  %v2481_v22 = vld [vmem:[%s7828_s29 + $0x708] sm:$0xff]  ;;  %v2483_v24 = vld [vmem:[%s7828_s29 + $0x718] sm:$0xff]  ;;  %v4605_v26 = vpack.c.bf16 %v2464_v18, %v2448_v17 }
 0x22b   : > { %4724 = vmatprep.subr.bf16.mxu1 %v4723_v58  ;;  %v2466_v21 = vld [vmem:[%s7828_s29 + $0x690] sm:$0xff]  ;;  %v2497_v23 = vld [vmem:[%s7828_s29 + $0x788] sm:$0xff]  ;;  %v2499_v25 = vld [vmem:[%s7828_s29 + $0x798] sm:$0xff] }
 0x22c   : > { %v4733_v27 = vpack.c.bf16 %v2466_v21, %v2450_v19  ;;  %v4607_v28 = vpack.c.bf16 %v2497_v23, %v2481_v22  ;;  %v2480_v29 = vld [vmem:[%s7828_s29 + $0x700] sm:$0xff]  ;;  %v2482_v31 = vld [vmem:[%s7828_s29 + $0x710] sm:$0xff]  ;;  %v4735_v32 = vpack.c.bf16 %v2499_v25, %v2483_v24  ;;  %v2513_v34 = vld [vmem:[%s7828_s29 + $0x808] sm:$0xff] }
 0x22d   : > { %4598 = vmatpush1.bf16.msra.mxu0 %v4597_v2  ;;  %v2496_v30 = vld [vmem:[%s7828_s29 + $0x780] sm:$0xff]  ;;  %v2498_v33 = vld [vmem:[%s7828_s29 + $0x790] sm:$0xff]  ;;  %v2529_v35 = vld [vmem:[%s7828_s29 + $0x888] sm:$0xff] }
 0x22e   : > { %4726 = vmatpush1.bf16.msra.mxu1 %v4725_v3  ;;  %4600 = vmatprep.subr.bf16.mxu0 %v4599_v4  ;;  %v2515_v36 = vld [vmem:[%s7828_s29 + $0x818] sm:$0xff]  ;;  %v4609_v38 = vpack.c.bf16 %v2496_v30, %v2480_v29  ;;  %v4737_v39 = vpack.c.bf16 %v2498_v33, %v2482_v31  ;;  %v4611_v40 = vpack.c.bf16 %v2529_v35, %v2513_v34  ;;  %v2512_v41 = vld [vmem:[%s7828_s29 + $0x800] sm:$0xff]  ;;  %v2514_v43 = vld [vmem:[%s7828_s29 + $0x810] sm:$0xff] }
 0x22f   : > { %4728 = vmatprep.subr.bf16.mxu1 %v4727_v8  ;;  %v2531_v37 = vld [vmem:[%s7828_s29 + $0x898] sm:$0xff]  ;;  %v2528_v42 = vld [vmem:[%s7828_s29 + $0x880] sm:$0xff]  ;;  %v2530_v45 = vld [vmem:[%s7828_s29 + $0x890] sm:$0xff] }
 0x230   : > { %v4739_v44 = vpack.c.bf16 %v2531_v37, %v2515_v36  ;;  %v2545_v46 = vld [vmem:[%s7828_s29 + $0x908] sm:$0xff]  ;;  %v2547_v48 = vld [vmem:[%s7828_s29 + $0x918] sm:$0xff]  ;;  %v4613_v50 = vpack.c.bf16 %v2528_v42, %v2512_v41  ;;  %v4741_v51 = vpack.c.bf16 %v2530_v45, %v2514_v43  ;;  %v2544_v53 = vld [vmem:[%s7828_s29 + $0x900] sm:$0xff] }
 0x231   : > { %4602 = vmatpush1.bf16.msra.mxu0 %v4601_v14  ;;  %v2561_v47 = vld [vmem:[%s7828_s29 + $0x988] sm:$0xff]  ;;  %v2563_v49 = vld [vmem:[%s7828_s29 + $0x998] sm:$0xff]  ;;  %v2560_v54 = vld [vmem:[%s7828_s29 + $0x980] sm:$0xff] }
 0x232   : > { %4730 = vmatpush1.bf16.msra.mxu1 %v4729_v15  ;;  %4604 = vmatprep.subr.bf16.mxu0 %v4603_v16  ;;  %v4615_v52 = vpack.c.bf16 %v2561_v47, %v2545_v46  ;;  %v2546_v55 = vld [vmem:[%s7828_s29 + $0x910] sm:$0xff]  ;;  %v4743_v56 = vpack.c.bf16 %v2563_v49, %v2547_v48  ;;  %v2577_v58 = vld [vmem:[%s7828_s29 + $0xa08] sm:$0xff]  ;;  %v2579_v60 = vld [vmem:[%s7828_s29 + $0xa18] sm:$0xff]  ;;  %v4617_v62 = vpack.c.bf16 %v2560_v54, %v2544_v53 }
 0x233   : > { %4732 = vmatprep.subr.bf16.mxu1 %v4731_v20  ;;  %v2562_v57 = vld [vmem:[%s7828_s29 + $0x990] sm:$0xff]  ;;  %v2593_v59 = vld [vmem:[%s7828_s29 + $0xa88] sm:$0xff]  ;;  %v2595_v61 = vld [vmem:[%s7828_s29 + $0xa98] sm:$0xff] }
 0x234   : > { %v4745_v63 = vpack.c.bf16 %v2562_v57, %v2546_v55  ;;  %v4619_v2 = vpack.c.bf16 %v2593_v59, %v2577_v58  ;;  %v2576_v3 = vld [vmem:[%s7828_s29 + $0xa00] sm:$0xff]  ;;  %v2578_v5 = vld [vmem:[%s7828_s29 + $0xa10] sm:$0xff]  ;;  %v4747_v6 = vpack.c.bf16 %v2595_v61, %v2579_v60  ;;  %v2609_v8 = vld [vmem:[%s7828_s29 + $0xb08] sm:$0xff] }
 0x235   : > { %4606 = vmatpush1.bf16.msra.mxu0 %v4605_v26  ;;  %v2592_v4 = vld [vmem:[%s7828_s29 + $0xa80] sm:$0xff]  ;;  %v2594_v7 = vld [vmem:[%s7828_s29 + $0xa90] sm:$0xff]  ;;  %v2625_v9 = vld [vmem:[%s7828_s29 + $0xb88] sm:$0xff] }
 0x236   : > { %4734 = vmatpush1.bf16.msra.mxu1 %v4733_v27  ;;  %4608 = vmatprep.subr.bf16.mxu0 %v4607_v28  ;;  %v2611_v10 = vld [vmem:[%s7828_s29 + $0xb18] sm:$0xff]  ;;  %v4621_v12 = vpack.c.bf16 %v2592_v4, %v2576_v3  ;;  %v4749_v13 = vpack.c.bf16 %v2594_v7, %v2578_v5  ;;  %v4623_v14 = vpack.c.bf16 %v2625_v9, %v2609_v8  ;;  %v2608_v15 = vld [vmem:[%s7828_s29 + $0xb00] sm:$0xff]  ;;  %v2610_v17 = vld [vmem:[%s7828_s29 + $0xb10] sm:$0xff] }
 0x237   : > { %4736 = vmatprep.subr.bf16.mxu1 %v4735_v32  ;;  %v2627_v11 = vld [vmem:[%s7828_s29 + $0xb98] sm:$0xff]  ;;  %v2624_v16 = vld [vmem:[%s7828_s29 + $0xb80] sm:$0xff]  ;;  %v2626_v19 = vld [vmem:[%s7828_s29 + $0xb90] sm:$0xff] }
 0x238   : > { %v4751_v18 = vpack.c.bf16 %v2627_v11, %v2611_v10  ;;  %v2641_v20 = vld [vmem:[%s7828_s29 + $0xc08] sm:$0xff]  ;;  %v2643_v22 = vld [vmem:[%s7828_s29 + $0xc18] sm:$0xff]  ;;  %v4625_v24 = vpack.c.bf16 %v2624_v16, %v2608_v15  ;;  %v4753_v25 = vpack.c.bf16 %v2626_v19, %v2610_v17  ;;  %v2640_v27 = vld [vmem:[%s7828_s29 + $0xc00] sm:$0xff] }
 0x239   : > { %4610 = vmatpush1.bf16.msra.mxu0 %v4609_v38  ;;  %v2657_v21 = vld [vmem:[%s7828_s29 + $0xc88] sm:$0xff]  ;;  %v2659_v23 = vld [vmem:[%s7828_s29 + $0xc98] sm:$0xff]  ;;  %v2656_v28 = vld [vmem:[%s7828_s29 + $0xc80] sm:$0xff] }
 0x23a   : > { %4738 = vmatpush1.bf16.msra.mxu1 %v4737_v39  ;;  %4612 = vmatprep.subr.bf16.mxu0 %v4611_v40  ;;  %v4627_v26 = vpack.c.bf16 %v2657_v21, %v2641_v20  ;;  %v2642_v29 = vld [vmem:[%s7828_s29 + $0xc10] sm:$0xff]  ;;  %v4755_v30 = vpack.c.bf16 %v2659_v23, %v2643_v22  ;;  %v2673_v32 = vld [vmem:[%s7828_s29 + $0xd08] sm:$0xff]  ;;  %v2675_v34 = vld [vmem:[%s7828_s29 + $0xd18] sm:$0xff]  ;;  %v4629_v36 = vpack.c.bf16 %v2656_v28, %v2640_v27 }
 0x23b   : > { %4740 = vmatprep.subr.bf16.mxu1 %v4739_v44  ;;  %v2658_v31 = vld [vmem:[%s7828_s29 + $0xc90] sm:$0xff]  ;;  %v2689_v33 = vld [vmem:[%s7828_s29 + $0xd88] sm:$0xff]  ;;  %v2691_v35 = vld [vmem:[%s7828_s29 + $0xd98] sm:$0xff] }
 0x23c   : > { %v4757_v37 = vpack.c.bf16 %v2658_v31, %v2642_v29  ;;  %v4631_v38 = vpack.c.bf16 %v2689_v33, %v2673_v32  ;;  %v2672_v39 = vld [vmem:[%s7828_s29 + $0xd00] sm:$0xff]  ;;  %v2674_v41 = vld [vmem:[%s7828_s29 + $0xd10] sm:$0xff]  ;;  %v4759_v42 = vpack.c.bf16 %v2691_v35, %v2675_v34  ;;  %v2705_v44 = vld [vmem:[%s7828_s29 + $0xe08] sm:$0xff] }
 0x23d   : > { %4614 = vmatpush1.bf16.msra.mxu0 %v4613_v50  ;;  %v2688_v40 = vld [vmem:[%s7828_s29 + $0xd80] sm:$0xff]  ;;  %v2690_v43 = vld [vmem:[%s7828_s29 + $0xd90] sm:$0xff]  ;;  %v2721_v45 = vld [vmem:[%s7828_s29 + $0xe88] sm:$0xff] }
 0x23e   : > { %4742 = vmatpush1.bf16.msra.mxu1 %v4741_v51  ;;  %4616 = vmatprep.subr.bf16.mxu0 %v4615_v52  ;;  %v2707_v46 = vld [vmem:[%s7828_s29 + $0xe18] sm:$0xff]  ;;  %v4633_v48 = vpack.c.bf16 %v2688_v40, %v2672_v39  ;;  %v4761_v49 = vpack.c.bf16 %v2690_v43, %v2674_v41  ;;  %v4635_v50 = vpack.c.bf16 %v2721_v45, %v2705_v44  ;;  %v2704_v51 = vld [vmem:[%s7828_s29 + $0xe00] sm:$0xff]  ;;  %v2706_v53 = vld [vmem:[%s7828_s29 + $0xe10] sm:$0xff] }
 0x23f   : > { %4744 = vmatprep.subr.bf16.mxu1 %v4743_v56  ;;  %v2723_v47 = vld [vmem:[%s7828_s29 + $0xe98] sm:$0xff]  ;;  %v2720_v52 = vld [vmem:[%s7828_s29 + $0xe80] sm:$0xff]  ;;  %v2722_v55 = vld [vmem:[%s7828_s29 + $0xe90] sm:$0xff] }
 0x240   : > { %v4763_v54 = vpack.c.bf16 %v2723_v47, %v2707_v46  ;;  %v2737_v56 = vld [vmem:[%s7828_s29 + $0xf08] sm:$0xff]  ;;  %v2739_v58 = vld [vmem:[%s7828_s29 + $0xf18] sm:$0xff]  ;;  %v4637_v60 = vpack.c.bf16 %v2720_v52, %v2704_v51  ;;  %v4765_v61 = vpack.c.bf16 %v2722_v55, %v2706_v53  ;;  %v2738_v3 = vld [vmem:[%s7828_s29 + $0xf10] sm:$0xff] }
 0x241   : > { %4618 = vmatpush1.bf16.msra.mxu0 %v4617_v62  ;;  %v2753_v57 = vld [vmem:[%s7828_s29 + $0xf88] sm:$0xff]  ;;  %v2755_v59 = vld [vmem:[%s7828_s29 + $0xf98] sm:$0xff]  ;;  %v2754_v5 = vld [vmem:[%s7828_s29 + $0xf90] sm:$0xff] }
 0x242   : > { %4746 = vmatpush1.bf16.msra.mxu1 %v4745_v63  ;;  %4620 = vmatprep.subr.bf16.mxu0 %v4619_v2  ;;  %v4639_v62 = vpack.c.bf16 %v2753_v57, %v2737_v56  ;;  %v2736_v63 = vld [vmem:[%s7828_s29 + $0xf00] sm:$0xff]  ;;  %v4767_v4 = vpack.c.bf16 %v2755_v59, %v2739_v58  ;;  %v2785_v7 = vld [vmem:[%s7828_s29 + $0x1088] sm:$0xff]  ;;  %v2771_v8 = vld [vmem:[%s7828_s29 + $0x1018] sm:$0xff]  ;;  %v4769_v11 = vpack.c.bf16 %v2754_v5, %v2738_v3 }
 0x243   : > { %4748 = vmatprep.subr.bf16.mxu1 %v4747_v6  ;;  %v2752_v2 = vld [vmem:[%s7828_s29 + $0xf80] sm:$0xff]  ;;  %v2769_v6 = vld [vmem:[%s7828_s29 + $0x1008] sm:$0xff]  ;;  %v2787_v9 = vld [vmem:[%s7828_s29 + $0x1098] sm:$0xff] }
 0x244   : > { %v4641_v10 = vpack.c.bf16 %v2752_v2, %v2736_v63  ;;  %v2770_v15 = vld [vmem:[%s7828_s29 + $0x1010] sm:$0xff]  ;;  %v4771_v16 = vpack.c.bf16 %v2787_v9, %v2771_v8  ;;  %v2817_v19 = vld [vmem:[%s7828_s29 + $0x1188] sm:$0xff]  ;;  %v2803_v20 = vld [vmem:[%s7828_s29 + $0x1118] sm:$0xff] }
 0x245   : > { %4622 = vmatpush1.bf16.msra.mxu0 %v4621_v12  ;;  %v4643_v12 = vpack.c.bf16 %v2785_v7, %v2769_v6  ;;  %v2786_v17 = vld [vmem:[%s7828_s29 + $0x1090] sm:$0xff]  ;;  %v2819_v21 = vld [vmem:[%s7828_s29 + $0x1198] sm:$0xff]  ;;  %v2849_v31 = vld [vmem:[%s7828_s29 + $0x1288] sm:$0xff] }
 0x246   : > { %4750 = vmatpush1.bf16.msra.mxu1 %v4749_v13  ;;  %4624 = vmatprep.subr.bf16.mxu0 %v4623_v14  ;;  %v2768_v13 = vld [vmem:[%s7828_s29 + $0x1000] sm:$0xff]  ;;  %v4773_v23 = vpack.c.bf16 %v2786_v17, %v2770_v15  ;;  %v2802_v27 = vld [vmem:[%s7828_s29 + $0x1110] sm:$0xff]  ;;  %v4775_v28 = vpack.c.bf16 %v2819_v21, %v2803_v20  ;;  %v2835_v32 = vld [vmem:[%s7828_s29 + $0x1218] sm:$0xff] }
 0x247   : > { %4752 = vmatprep.subr.bf16.mxu1 %v4751_v18  ;;  %v2784_v14 = vld [vmem:[%s7828_s29 + $0x1080] sm:$0xff]  ;;  %v2801_v18 = vld [vmem:[%s7828_s29 + $0x1108] sm:$0xff]  ;;  %v2818_v29 = vld [vmem:[%s7828_s29 + $0x1190] sm:$0xff] }
 0x248   : > { %v4645_v22 = vpack.c.bf16 %v2784_v14, %v2768_v13  ;;  %v2851_v33 = vld [vmem:[%s7828_s29 + $0x1298] sm:$0xff]  ;;  %v4777_v35 = vpack.c.bf16 %v2818_v29, %v2802_v27  ;;  %v2834_v39 = vld [vmem:[%s7828_s29 + $0x1210] sm:$0xff]  ;;  %v2881_v43 = vld [vmem:[%s7828_s29 + $0x1388] sm:$0xff] }
 0x249   : > { %4626 = vmatpush1.bf16.msra.mxu0 %v4625_v24  ;;  %v4647_v24 = vpack.c.bf16 %v2817_v19, %v2801_v18  ;;  %v4779_v40 = vpack.c.bf16 %v2851_v33, %v2835_v32  ;;  %v2850_v41 = vld [vmem:[%s7828_s29 + $0x1290] sm:$0xff]  ;;  %v2883_v44 = vld [vmem:[%s7828_s29 + $0x1398] sm:$0xff]  ;;  %v2897_v53 = vld [vmem:[%s7828_s29 + $0x1408] sm:$0xff] }
 0x24a   : > { %4754 = vmatpush1.bf16.msra.mxu1 %v4753_v25  ;;  %4628 = vmatprep.subr.bf16.mxu0 %v4627_v26  ;;  %v2800_v25 = vld [vmem:[%s7828_s29 + $0x1100] sm:$0xff]  ;;  %v4781_v46 = vpack.c.bf16 %v2850_v41, %v2834_v39  ;;  %v2882_v52 = vld [vmem:[%s7828_s29 + $0x1390] sm:$0xff]  ;;  %v2899_v55 = vld [vmem:[%s7828_s29 + $0x1418] sm:$0xff] }
 0x24b   : > { %4756 = vmatprep.subr.bf16.mxu1 %v4755_v30  ;;  %v2816_v26 = vld [vmem:[%s7828_s29 + $0x1180] sm:$0xff]  ;;  %v2833_v30 = vld [vmem:[%s7828_s29 + $0x1208] sm:$0xff]  ;;  %v2915_v56 = vld [vmem:[%s7828_s29 + $0x1498] sm:$0xff] }
 0x24c   : > { %v4649_v34 = vpack.c.bf16 %v2816_v26, %v2800_v25  ;;  %v4787_v63 = vpack.c.bf16 %v2915_v56, %v2899_v55  ;;  %v2914_v2 = vld [vmem:[%s7828_s29 + $0x1490] sm:$0xff]  ;;  %v2929_v3 = vld [vmem:[%s7828_s29 + $0x1508] sm:$0xff]  ;;  %v2931_v5 = vld [vmem:[%s7828_s29 + $0x1518] sm:$0xff] }
 0x24d   : > { %4630 = vmatpush1.bf16.msra.mxu0 %v4629_v36  ;;  %v4651_v36 = vpack.c.bf16 %v2849_v31, %v2833_v30  ;;  %v2947_v6 = vld [vmem:[%s7828_s29 + $0x1598] sm:$0xff]  ;;  %v2946_v14 = vld [vmem:[%s7828_s29 + $0x1590] sm:$0xff]  ;;  %v2961_v15 = vld [vmem:[%s7828_s29 + $0x1608] sm:$0xff] }
 0x24e   : > { %4758 = vmatpush1.bf16.msra.mxu1 %v4757_v37  ;;  %4632 = vmatprep.subr.bf16.mxu0 %v4631_v38  ;;  %v2832_v37 = vld [vmem:[%s7828_s29 + $0x1200] sm:$0xff]  ;;  %v4791_v13 = vpack.c.bf16 %v2947_v6, %v2931_v5  ;;  %v2963_v17 = vld [vmem:[%s7828_s29 + $0x1618] sm:$0xff]  ;;  %v8020_v25 = vld [vmem:[%s8942_s0 + $0x8] sm:$0xff] }
 0x24f   : > { %4760 = vmatprep.subr.bf16.mxu1 %v4759_v42  ;;  %v2848_v38 = vld [vmem:[%s7828_s29 + $0x1280] sm:$0xff]  ;;  %v2865_v42 = vld [vmem:[%s7828_s29 + $0x1308] sm:$0xff]  ;;  %v2979_v18 = vld [vmem:[%s7828_s29 + $0x1698] sm:$0xff]  ;;  %v8027_v30 = vcombine.high %v8020_v25, %v8020_v25 }
 0x250   : > { %v4653_v45 = vpack.c.bf16 %v2848_v38, %v2832_v37  ;;  %v4655_v47 = vpack.c.bf16 %v2881_v43, %v2865_v42  ;;  %v2960_v20 = vld [vmem:[%s7828_s29 + $0x1600] sm:$0xff]  ;;  %v4795_v26 = vpack.c.bf16 %v2979_v18, %v2963_v17  ;;  %v2978_v27 = vld [vmem:[%s7828_s29 + $0x1690] sm:$0xff]  ;;  %v3009_v29 = vld [vmem:[%s7828_s29 + $0x1788] sm:$0xff] }
 0x251   : > { %4634 = vmatpush1.bf16.msra.mxu0 %v4633_v48  ;;  %v2864_v48 = vld [vmem:[%s7828_s29 + $0x1300] sm:$0xff]  ;;  %v2995_v31 = vld [vmem:[%s7828_s29 + $0x1718] sm:$0xff]  ;;  %v2994_v38 = vld [vmem:[%s7828_s29 + $0x1710] sm:$0xff] }
 0x252   : > { %4762 = vmatpush1.bf16.msra.mxu1 %v4761_v49  ;;  %4636 = vmatprep.subr.bf16.mxu0 %v4635_v50  ;;  %v2880_v49 = vld [vmem:[%s7828_s29 + $0x1380] sm:$0xff]  ;;  %v2866_v50 = vld [vmem:[%s7828_s29 + $0x1310] sm:$0xff]  ;;  %v3011_v32 = vld [vmem:[%s7828_s29 + $0x1798] sm:$0xff] }
 0x253   : > { %4764 = vmatprep.subr.bf16.mxu1 %v4763_v54  ;;  %v2913_v54 = vld [vmem:[%s7828_s29 + $0x1488] sm:$0xff]  ;;  %v4657_v57 = vpack.c.bf16 %v2880_v49, %v2864_v48  ;;  %v4785_v58 = vpack.c.bf16 %v2882_v52, %v2866_v50  ;;  %v3008_v37 = vld [vmem:[%s7828_s29 + $0x1780] sm:$0xff]  ;;  %v4799_v39 = vpack.c.bf16 %v3011_v32, %v2995_v31  ;;  %v3027_v43 = vld [vmem:[%s7828_s29 + $0x1818] sm:$0xff] }
 0x254   : > { %v4659_v59 = vpack.c.bf16 %v2913_v54, %v2897_v53  ;;  %v3025_v41 = vld [vmem:[%s7828_s29 + $0x1808] sm:$0xff]  ;;  %v3040_v48 = vld [vmem:[%s7828_s29 + $0x1880] sm:$0xff]  ;;  %v3026_v49 = vld [vmem:[%s7828_s29 + $0x1810] sm:$0xff] }
 0x255   : > { %4638 = vmatpush1.bf16.msra.mxu0 %v4637_v60  ;;  %v2896_v60 = vld [vmem:[%s7828_s29 + $0x1400] sm:$0xff]  ;;  %v3041_v42 = vld [vmem:[%s7828_s29 + $0x1888] sm:$0xff]  ;;  %v3059_v54 = vld [vmem:[%s7828_s29 + $0x1918] sm:$0xff] }
 0x256   : > { %4766 = vmatpush1.bf16.msra.mxu1 %v4765_v61  ;;  %4640 = vmatprep.subr.bf16.mxu0 %v4639_v62  ;;  %v2912_v61 = vld [vmem:[%s7828_s29 + $0x1480] sm:$0xff]  ;;  %v2898_v62 = vld [vmem:[%s7828_s29 + $0x1410] sm:$0xff]  ;;  %v3057_v52 = vld [vmem:[%s7828_s29 + $0x1908] sm:$0xff] }
 0x257   : > { %4768 = vmatprep.subr.bf16.mxu1 %v4767_v4  ;;  %v2945_v4 = vld [vmem:[%s7828_s29 + $0x1588] sm:$0xff]  ;;  %v4661_v7 = vpack.c.bf16 %v2912_v61, %v2896_v60  ;;  %v4789_v8 = vpack.c.bf16 %v2914_v2, %v2898_v62  ;;  %v3075_v55 = vld [vmem:[%s7828_s29 + $0x1998] sm:$0xff]  ;;  %v3072_v60 = vld [vmem:[%s7828_s29 + $0x1980] sm:$0xff] }
 0x258   : > { %v4663_v9 = vpack.c.bf16 %v2945_v4, %v2929_v3  ;;  %v3073_v53 = vld [vmem:[%s7828_s29 + $0x1988] sm:$0xff]  ;;  %v3058_v61 = vld [vmem:[%s7828_s29 + $0x1910] sm:$0xff]  ;;  %v4807_v62 = vpack.c.bf16 %v3075_v55, %v3059_v54  ;;  %v3091_v4 = vld [vmem:[%s7828_s29 + $0x1a18] sm:$0xff] }
 0x259   : > { %4642 = vmatpush1.bf16.msra.mxu0 %v4641_v10  ;;  %v2928_v10 = vld [vmem:[%s7828_s29 + $0x1500] sm:$0xff]  ;;  %v3089_v2 = vld [vmem:[%s7828_s29 + $0x1a08] sm:$0xff]  ;;  %v3107_v5 = vld [vmem:[%s7828_s29 + $0x1a98] sm:$0xff] }
 0x25a   : > { %4770 = vmatpush1.bf16.msra.mxu1 %v4769_v11  ;;  %4644 = vmatprep.subr.bf16.mxu0 %v4643_v12  ;;  %v2944_v11 = vld [vmem:[%s7828_s29 + $0x1580] sm:$0xff]  ;;  %v2930_v12 = vld [vmem:[%s7828_s29 + $0x1510] sm:$0xff]  ;;  %v3105_v3 = vld [vmem:[%s7828_s29 + $0x1a88] sm:$0xff] }
 0x25b   : > { %4772 = vmatprep.subr.bf16.mxu1 %v4771_v16  ;;  %v2977_v16 = vld [vmem:[%s7828_s29 + $0x1688] sm:$0xff]  ;;  %v4665_v19 = vpack.c.bf16 %v2944_v11, %v2928_v10  ;;  %v4793_v21 = vpack.c.bf16 %v2946_v14, %v2930_v12  ;;  %v3104_v10 = vld [vmem:[%s7828_s29 + $0x1a80] sm:$0xff]  ;;  %v3090_v11 = vld [vmem:[%s7828_s29 + $0x1a10] sm:$0xff]  ;;  %v4811_v12 = vpack.c.bf16 %v3107_v5, %v3091_v4 }
 0x25c   : > { %3351 = vmatmul.mubr.f32.vlgmr.msra.gmra.mrb[0].mxu0 %v7822_v0  ;;  %v3121_v14 = vld [vmem:[%s7828_s29 + $0x1b08] sm:$0xff]  ;;  %v3139_v17 = vld [vmem:[%s7828_s29 + $0x1b98] sm:$0xff] }
 0x25d   : > { %4646 = vmatpush1.bf16.msra.mxu0 %v4645_v22  ;;  %3493 = vmatmul.mubr.f32.vlgmr.msra.gmra.mrb[0].mxu1 %v7822_v0  ;;  %v2867_v0 = vld [vmem:[%s7828_s29 + $0x1318] sm:$0xff]  ;;  %v4667_v22 = vpack.c.bf16 %v2977_v16, %v2961_v15  ;;  %v3137_v15 = vld [vmem:[%s7828_s29 + $0x1b88] sm:$0xff] }
 0x25e   : > { %4774 = vmatpush1.bf16.msra.mxu1 %v4773_v23  ;;  %4648 = vmatprep.subr.bf16.mxu0 %v4647_v24  ;;  %v4783_v51 = vpack.c.bf16 %v2883_v44, %v2867_v0  ;;  %v2976_v23 = vld [vmem:[%s7828_s29 + $0x1680] sm:$0xff]  ;;  %v2962_v24 = vld [vmem:[%s7828_s29 + $0x1610] sm:$0xff]  ;;  %v3043_v0 = vld [vmem:[%s7828_s29 + $0x1898] sm:$0xff] }
 0x25f   : > { %4776 = vmatprep.subr.bf16.mxu1 %v4775_v28  ;;  %v2993_v28 = vld [vmem:[%s7828_s29 + $0x1708] sm:$0xff]  ;;  %v4669_v33 = vpack.c.bf16 %v2976_v23, %v2960_v20  ;;  %3421 = vmatprep.mubr.f32.mxu0 %v8027_v30  ;;  %v4803_v50 = vpack.c.bf16 %v3043_v0, %v3027_v43  ;;  %v3123_v16 = vld [vmem:[%s7828_s29 + $0x1b18] sm:$0xff]  ;;  %v4687_v20 = vpack.c.bf16 %v3137_v15, %v3121_v14  ;;  %v3122_v23 = vld [vmem:[%s7828_s29 + $0x1b10] sm:$0xff] }
 0x260   : > { %3563 = vmatprep.mubr.f32.mxu1 %v8027_v30  ;;  %v3171_v31 = vld [vmem:[%s7828_s29 + $0x1c98] sm:$0xff]  ;;  %v2277_v14 = vld [vmem:[%s7828_s29 + $0xa8] sm:$0xff] }
 0x261   : > { %4650 = vmatpush1.bf16.msra.mxu0 %v4649_v34  ;;  %v4797_v34 = vpack.c.bf16 %v2978_v27, %v2962_v24  ;;  %v4815_v24 = vpack.c.bf16 %v3139_v17, %v3123_v16  ;;  %v3153_v27 = vld [vmem:[%s7828_s29 + $0x1c08] sm:$0xff]  ;;  %v3203_v43 = vld [vmem:[%s7828_s29 + $0x1d98] sm:$0xff] }
 0x262   : > { %4778 = vmatpush1.bf16.msra.mxu1 %v4777_v35  ;;  %4652 = vmatprep.subr.bf16.mxu0 %v4651_v36  ;;  %v4671_v35 = vpack.c.bf16 %v3009_v29, %v2993_v28  ;;  %v2992_v36 = vld [vmem:[%s7828_s29 + $0x1700] sm:$0xff]  ;;  %v3169_v28 = vld [vmem:[%s7828_s29 + $0x1c88] sm:$0xff]  ;;  %v3155_v29 = vld [vmem:[%s7828_s29 + $0x1c18] sm:$0xff] }
 0x263   : > { %4780 = vmatprep.subr.bf16.mxu1 %v4779_v40  ;;  %v3010_v40 = vld [vmem:[%s7828_s29 + $0x1790] sm:$0xff]  ;;  %v4673_v44 = vpack.c.bf16 %v3008_v37, %v2992_v36  ;;  %v3168_v36 = vld [vmem:[%s7828_s29 + $0x1c80] sm:$0xff]  ;;  %v3235_v54 = vld [vmem:[%s7828_s29 + $0x1e98] sm:$0xff] }
 0x264   : > { %v3154_v37 = vld [vmem:[%s7828_s29 + $0x1c10] sm:$0xff]  ;;  %v3267_v4 = vld [vmem:[%s7828_s29 + $0x1f98] sm:$0xff] }
 0x265   : > { %4654 = vmatpush1.bf16.msra.mxu0 %v4653_v45  ;;  %v4801_v45 = vpack.c.bf16 %v3010_v40, %v2994_v38  ;;  %v4819_v38 = vpack.c.bf16 %v3171_v31, %v3155_v29  ;;  %v3185_v40 = vld [vmem:[%s7828_s29 + $0x1d08] sm:$0xff]  ;;  %v2263_v15 = vld [vmem:[%s7828_s29 + $0x38] sm:$0xff] }
 0x266   : > { %4782 = vmatpush1.bf16.msra.mxu1 %v4781_v46  ;;  %4656 = vmatprep.subr.bf16.mxu0 %v4655_v47  ;;  %v4675_v46 = vpack.c.bf16 %v3041_v42, %v3025_v41  ;;  %v3024_v47 = vld [vmem:[%s7828_s29 + $0x1800] sm:$0xff]  ;;  %v3201_v41 = vld [vmem:[%s7828_s29 + $0x1d88] sm:$0xff]  ;;  %v3187_v42 = vld [vmem:[%s7828_s29 + $0x1d18] sm:$0xff] }
 0x267   : > { %4784 = vmatprep.subr.bf16.mxu1 %v4783_v51  ;;  %v3042_v51 = vld [vmem:[%s7828_s29 + $0x1890] sm:$0xff]  ;;  %v4677_v56 = vpack.c.bf16 %v3040_v48, %v3024_v47  ;;  %v3200_v47 = vld [vmem:[%s7828_s29 + $0x1d80] sm:$0xff]  ;;  %v2279_v16 = vld [vmem:[%s7828_s29 + $0xb8] sm:$0xff] }
 0x268   : > { %v3186_v48 = vld [vmem:[%s7828_s29 + $0x1d10] sm:$0xff]  ;;  %v2311_v29 = vld [vmem:[%s7828_s29 + $0x1b8] sm:$0xff] }
 0x269   : > { %4658 = vmatpush1.bf16.msra.mxu0 %v4657_v57  ;;  %v4805_v57 = vpack.c.bf16 %v3042_v51, %v3026_v49  ;;  %v4823_v49 = vpack.c.bf16 %v3203_v43, %v3187_v42  ;;  %v3217_v51 = vld [vmem:[%s7828_s29 + $0x1e08] sm:$0xff]  ;;  %v2343_v42 = vld [vmem:[%s7828_s29 + $0x2b8] sm:$0xff] }
 0x26a   : > { %4786 = vmatpush1.bf16.msra.mxu1 %v4785_v58  ;;  %4660 = vmatprep.subr.bf16.mxu0 %v4659_v59  ;;  %v4679_v58 = vpack.c.bf16 %v3073_v53, %v3057_v52  ;;  %v3056_v59 = vld [vmem:[%s7828_s29 + $0x1900] sm:$0xff]  ;;  %v3233_v52 = vld [vmem:[%s7828_s29 + $0x1e88] sm:$0xff]  ;;  %v3219_v53 = vld [vmem:[%s7828_s29 + $0x1e18] sm:$0xff] }
 0x26b   : > { %4788 = vmatprep.subr.bf16.mxu1 %v4787_v63  ;;  %v3074_v63 = vld [vmem:[%s7828_s29 + $0x1990] sm:$0xff]  ;;  %v4681_v6 = vpack.c.bf16 %v3072_v60, %v3056_v59  ;;  %v3232_v59 = vld [vmem:[%s7828_s29 + $0x1e80] sm:$0xff] }
 0x26c   : > { %v3218_v60 = vld [vmem:[%s7828_s29 + $0x1e10] sm:$0xff] }
 0x26d   : > { %4662 = vmatpush1.bf16.msra.mxu0 %v4661_v7  ;;  %v4809_v7 = vpack.c.bf16 %v3074_v63, %v3058_v61  ;;  %v4827_v61 = vpack.c.bf16 %v3235_v54, %v3219_v53  ;;  %v3249_v63 = vld [vmem:[%s7828_s29 + $0x1f08] sm:$0xff] }
 0x26e   : > { %4790 = vmatpush1.bf16.msra.mxu1 %v4789_v8  ;;  %4664 = vmatprep.subr.bf16.mxu0 %v4663_v9  ;;  %v4683_v8 = vpack.c.bf16 %v3105_v3, %v3089_v2  ;;  %v3088_v9 = vld [vmem:[%s7828_s29 + $0x1a00] sm:$0xff]  ;;  %v3265_v2 = vld [vmem:[%s7828_s29 + $0x1f88] sm:$0xff]  ;;  %v3251_v3 = vld [vmem:[%s7828_s29 + $0x1f18] sm:$0xff] }
 0x26f   : > { %4792 = vmatprep.subr.bf16.mxu1 %v4791_v13  ;;  %v3106_v13 = vld [vmem:[%s7828_s29 + $0x1a90] sm:$0xff]  ;;  %v4685_v18 = vpack.c.bf16 %v3104_v10, %v3088_v9  ;;  %v3264_v9 = vld [vmem:[%s7828_s29 + $0x1f80] sm:$0xff] }
 0x270   : > { %v3250_v10 = vld [vmem:[%s7828_s29 + $0x1f10] sm:$0xff] }
 0x271   : > { %4666 = vmatpush1.bf16.msra.mxu0 %v4665_v19  ;;  %v4813_v19 = vpack.c.bf16 %v3106_v13, %v3090_v11  ;;  %v4831_v11 = vpack.c.bf16 %v3267_v4, %v3251_v3  ;;  %v2261_v13 = vld [vmem:[%s7828_s29 + $0x28] sm:$0xff] }
 0x272   : > { %4794 = vmatpush1.bf16.msra.mxu1 %v4793_v21  ;;  %4668 = vmatprep.subr.bf16.mxu0 %v4667_v22  ;;  %v3120_v21 = vld [vmem:[%s7828_s29 + $0x1b00] sm:$0xff] }
 0x273   : > { %4796 = vmatprep.subr.bf16.mxu1 %v4795_v26  ;;  %v3136_v22 = vld [vmem:[%s7828_s29 + $0x1b80] sm:$0xff]  ;;  %v3138_v26 = vld [vmem:[%s7828_s29 + $0x1b90] sm:$0xff] }
 0x274   : > { %v4689_v32 = vpack.c.bf16 %v3136_v22, %v3120_v21  ;;  %v2276_v21 = vld [vmem:[%s7828_s29 + $0xa0] sm:$0xff]  ;;  %v2262_v22 = vld [vmem:[%s7828_s29 + $0x30] sm:$0xff] }
 0x275   : > { %4670 = vmatpush1.bf16.msra.mxu0 %v4669_v33  ;;  %v4817_v33 = vpack.c.bf16 %v3138_v26, %v3122_v23  ;;  %v4963_v23 = vpack.c.bf16 %v2279_v16, %v2263_v15  ;;  %v2293_v26 = vld [vmem:[%s7828_s29 + $0x128] sm:$0xff] }
 0x276   : > { %4798 = vmatpush1.bf16.msra.mxu1 %v4797_v34  ;;  %4672 = vmatprep.subr.bf16.mxu0 %v4671_v35  ;;  %v4691_v34 = vpack.c.bf16 %v3169_v28, %v3153_v27  ;;  %v3152_v35 = vld [vmem:[%s7828_s29 + $0x1c00] sm:$0xff]  ;;  %v2309_v27 = vld [vmem:[%s7828_s29 + $0x1a8] sm:$0xff]  ;;  %v2295_v28 = vld [vmem:[%s7828_s29 + $0x138] sm:$0xff] }
 0x277   : > { %4800 = vmatprep.subr.bf16.mxu1 %v4799_v39  ;;  %v3170_v39 = vld [vmem:[%s7828_s29 + $0x1c90] sm:$0xff]  ;;  %v4693_v0 = vpack.c.bf16 %v3168_v36, %v3152_v35  ;;  %v2308_v35 = vld [vmem:[%s7828_s29 + $0x1a0] sm:$0xff] }
 0x278   : > { %v2294_v36 = vld [vmem:[%s7828_s29 + $0x130] sm:$0xff] }
 0x279   : > { %4674 = vmatpush1.bf16.msra.mxu0 %v4673_v44  ;;  %v4821_v44 = vpack.c.bf16 %v3170_v39, %v3154_v37  ;;  %v4967_v37 = vpack.c.bf16 %v2311_v29, %v2295_v28  ;;  %v2325_v39 = vld [vmem:[%s7828_s29 + $0x228] sm:$0xff] }
 0x27a   : > { %4802 = vmatpush1.bf16.msra.mxu1 %v4801_v45  ;;  %4676 = vmatprep.subr.bf16.mxu0 %v4675_v46  ;;  %v4695_v45 = vpack.c.bf16 %v3201_v41, %v3185_v40  ;;  %v3184_v46 = vld [vmem:[%s7828_s29 + $0x1d00] sm:$0xff]  ;;  %v2341_v40 = vld [vmem:[%s7828_s29 + $0x2a8] sm:$0xff]  ;;  %v2327_v41 = vld [vmem:[%s7828_s29 + $0x238] sm:$0xff] }
 0x27b   : > { %4804 = vmatprep.subr.bf16.mxu1 %v4803_v50  ;;  %v3202_v50 = vld [vmem:[%s7828_s29 + $0x1d90] sm:$0xff]  ;;  %v4697_v55 = vpack.c.bf16 %v3200_v47, %v3184_v46  ;;  %v2340_v46 = vld [vmem:[%s7828_s29 + $0x2a0] sm:$0xff] }
 0x27c   : > { %v2326_v47 = vld [vmem:[%s7828_s29 + $0x230] sm:$0xff] }
 0x27d   : > { %4678 = vmatpush1.bf16.msra.mxu0 %v4677_v56  ;;  %v4825_v56 = vpack.c.bf16 %v3202_v50, %v3186_v48  ;;  %v4971_v48 = vpack.c.bf16 %v2343_v42, %v2327_v41  ;;  %v2357_v50 = vld [vmem:[%s7828_s29 + $0x328] sm:$0xff] }
 0x27e   : > { %4806 = vmatpush1.bf16.msra.mxu1 %v4805_v57  ;;  %4680 = vmatprep.subr.bf16.mxu0 %v4679_v58  ;;  %v4699_v57 = vpack.c.bf16 %v3233_v52, %v3217_v51  ;;  %v3216_v58 = vld [vmem:[%s7828_s29 + $0x1e00] sm:$0xff]  ;;  %v2373_v51 = vld [vmem:[%s7828_s29 + $0x3a8] sm:$0xff]  ;;  %v2375_v52 = vld [vmem:[%s7828_s29 + $0x3b8] sm:$0xff] }
 0x27f   : > { %4808 = vmatprep.subr.bf16.mxu1 %v4807_v62  ;;  %v3234_v62 = vld [vmem:[%s7828_s29 + $0x1e90] sm:$0xff]  ;;  %v4701_v5 = vpack.c.bf16 %v3232_v59, %v3216_v58 }
 0x280   : > { %v2358_v58 = vld [vmem:[%s7828_s29 + $0x330] sm:$0xff] }
 0x281   : > { %4682 = vmatpush1.bf16.msra.mxu0 %v4681_v6  ;;  %v4829_v6 = vpack.c.bf16 %v3234_v62, %v3218_v60  ;;  %v2374_v60 = vld [vmem:[%s7828_s29 + $0x3b0] sm:$0xff]  ;;  %v2405_v62 = vld [vmem:[%s7828_s29 + $0x4a8] sm:$0xff] }
 0x282   : > { %4810 = vmatpush1.bf16.msra.mxu1 %v4809_v7  ;;  %4684 = vmatprep.subr.bf16.mxu0 %v4683_v8  ;;  %v4703_v7 = vpack.c.bf16 %v3265_v2, %v3249_v63  ;;  %v3248_v8 = vld [vmem:[%s7828_s29 + $0x1f00] sm:$0xff]  ;;  %v2391_v63 = vld [vmem:[%s7828_s29 + $0x438] sm:$0xff]  ;;  %v4977_v4 = vpack.c.bf16 %v2374_v60, %v2358_v58  ;;  %v2534_v58 = vld [vmem:[%s7828_s29 + $0x8b0] sm:$0xff] }
 0x283   : > { %4812 = vmatprep.subr.bf16.mxu1 %v4811_v12  ;;  %v3266_v12 = vld [vmem:[%s7828_s29 + $0x1f90] sm:$0xff]  ;;  %v4705_v17 = vpack.c.bf16 %v3264_v9, %v3248_v8  ;;  %v2407_v2 = vld [vmem:[%s7828_s29 + $0x4b8] sm:$0xff]  ;;  %v2565_v60 = vld [vmem:[%s7828_s29 + $0x9a8] sm:$0xff] }
 0x284   : > { %v2390_v8 = vld [vmem:[%s7828_s29 + $0x430] sm:$0xff]  ;;  %v4979_v9 = vpack.c.bf16 %v2407_v2, %v2391_v63 }
 0x285   : > { %4686 = vmatpush1.bf16.msra.mxu0 %v4685_v18  ;;  %v4833_v18 = vpack.c.bf16 %v3266_v12, %v3250_v10  ;;  %v2406_v10 = vld [vmem:[%s7828_s29 + $0x4b0] sm:$0xff]  ;;  %v2437_v12 = vld [vmem:[%s7828_s29 + $0x5a8] sm:$0xff] }
 0x286   : > { %4814 = vmatpush1.bf16.msra.mxu1 %v4813_v19  ;;  %4688 = vmatprep.subr.bf16.mxu0 %v4687_v20  ;;  %v4835_v19 = vpack.c.bf16 %v2277_v14, %v2261_v13  ;;  %v2260_v20 = vld [vmem:[%s7828_s29 + $0x20] sm:$0xff]  ;;  %v2423_v13 = vld [vmem:[%s7828_s29 + $0x538] sm:$0xff]  ;;  %v4981_v16 = vpack.c.bf16 %v2406_v10, %v2390_v8  ;;  %v2566_v8 = vld [vmem:[%s7828_s29 + $0x9b0] sm:$0xff] }
 0x287   : > { %4816 = vmatprep.subr.bf16.mxu1 %v4815_v24  ;;  %v2278_v24 = vld [vmem:[%s7828_s29 + $0xb0] sm:$0xff]  ;;  %v4837_v31 = vpack.c.bf16 %v2276_v21, %v2260_v20  ;;  %v2439_v14 = vld [vmem:[%s7828_s29 + $0x5b8] sm:$0xff]  ;;  %v2597_v10 = vld [vmem:[%s7828_s29 + $0xaa8] sm:$0xff] }
 0x288   : > { %v2422_v20 = vld [vmem:[%s7828_s29 + $0x530] sm:$0xff]  ;;  %v4983_v21 = vpack.c.bf16 %v2439_v14, %v2423_v13 }
 0x289   : > { %4690 = vmatpush1.bf16.msra.mxu0 %v4689_v32  ;;  %v4965_v32 = vpack.c.bf16 %v2278_v24, %v2262_v22  ;;  %v2438_v22 = vld [vmem:[%s7828_s29 + $0x5b0] sm:$0xff]  ;;  %v2469_v24 = vld [vmem:[%s7828_s29 + $0x6a8] sm:$0xff] }
 0x28a   : > { %4818 = vmatpush1.bf16.msra.mxu1 %v4817_v33  ;;  %4692 = vmatprep.subr.bf16.mxu0 %v4691_v34  ;;  %v4839_v33 = vpack.c.bf16 %v2309_v27, %v2293_v26  ;;  %v2292_v34 = vld [vmem:[%s7828_s29 + $0x120] sm:$0xff]  ;;  %v2455_v26 = vld [vmem:[%s7828_s29 + $0x638] sm:$0xff]  ;;  %v4985_v29 = vpack.c.bf16 %v2438_v22, %v2422_v20  ;;  %v2598_v20 = vld [vmem:[%s7828_s29 + $0xab0] sm:$0xff] }
 0x28b   : > { %4820 = vmatprep.subr.bf16.mxu1 %v4819_v38  ;;  %v2310_v38 = vld [vmem:[%s7828_s29 + $0x1b0] sm:$0xff]  ;;  %v4841_v43 = vpack.c.bf16 %v2308_v35, %v2292_v34  ;;  %v2471_v27 = vld [vmem:[%s7828_s29 + $0x6b8] sm:$0xff]  ;;  %v2629_v22 = vld [vmem:[%s7828_s29 + $0xba8] sm:$0xff] }
 0x28c   : > { %v2454_v34 = vld [vmem:[%s7828_s29 + $0x630] sm:$0xff]  ;;  %v4987_v35 = vpack.c.bf16 %v2471_v27, %v2455_v26 }
 0x28d   : > { %4694 = vmatpush1.bf16.msra.mxu0 %v4693_v0  ;;  %v4969_v0 = vpack.c.bf16 %v2310_v38, %v2294_v36  ;;  %v2470_v36 = vld [vmem:[%s7828_s29 + $0x6b0] sm:$0xff]  ;;  %v2501_v38 = vld [vmem:[%s7828_s29 + $0x7a8] sm:$0xff] }
 0x28e   : > { %4822 = vmatpush1.bf16.msra.mxu1 %v4821_v44  ;;  %4696 = vmatprep.subr.bf16.mxu0 %v4695_v45  ;;  %v4843_v44 = vpack.c.bf16 %v2341_v40, %v2325_v39  ;;  %v2324_v45 = vld [vmem:[%s7828_s29 + $0x220] sm:$0xff]  ;;  %v2487_v39 = vld [vmem:[%s7828_s29 + $0x738] sm:$0xff]  ;;  %v4989_v42 = vpack.c.bf16 %v2470_v36, %v2454_v34  ;;  %v2630_v34 = vld [vmem:[%s7828_s29 + $0xbb0] sm:$0xff] }
 0x28f   : > { %4824 = vmatprep.subr.bf16.mxu1 %v4823_v49  ;;  %v2342_v49 = vld [vmem:[%s7828_s29 + $0x2b0] sm:$0xff]  ;;  %v4845_v53 = vpack.c.bf16 %v2340_v46, %v2324_v45  ;;  %v2503_v40 = vld [vmem:[%s7828_s29 + $0x7b8] sm:$0xff]  ;;  %v2661_v36 = vld [vmem:[%s7828_s29 + $0xca8] sm:$0xff] }
 0x290   : > { %v4973_v54 = vpack.c.bf16 %v2342_v49, %v2326_v47  ;;  %v2486_v45 = vld [vmem:[%s7828_s29 + $0x730] sm:$0xff]  ;;  %v4991_v46 = vpack.c.bf16 %v2503_v40, %v2487_v39  ;;  %v2533_v49 = vld [vmem:[%s7828_s29 + $0x8a8] sm:$0xff] }
 0x291   : > { %4698 = vmatpush1.bf16.msra.mxu0 %v4697_v55  ;;  %v4847_v55 = vpack.c.bf16 %v2373_v51, %v2357_v50  ;;  %v2502_v47 = vld [vmem:[%s7828_s29 + $0x7b0] sm:$0xff]  ;;  %v2519_v50 = vld [vmem:[%s7828_s29 + $0x838] sm:$0xff] }
 0x292   : > { %4826 = vmatpush1.bf16.msra.mxu1 %v4825_v56  ;;  %4700 = vmatprep.subr.bf16.mxu0 %v4699_v57  ;;  %v2356_v56 = vld [vmem:[%s7828_s29 + $0x320] sm:$0xff]  ;;  %v2535_v51 = vld [vmem:[%s7828_s29 + $0x8b8] sm:$0xff] }
 0x293   : > { %4828 = vmatprep.subr.bf16.mxu1 %v4827_v61  ;;  %v2372_v57 = vld [vmem:[%s7828_s29 + $0x3a0] sm:$0xff]  ;;  %v2389_v61 = vld [vmem:[%s7828_s29 + $0x428] sm:$0xff] }
 0x294   : > { %v4849_v3 = vpack.c.bf16 %v2372_v57, %v2356_v56  ;;  %v2518_v56 = vld [vmem:[%s7828_s29 + $0x830] sm:$0xff]  ;;  %v4995_v57 = vpack.c.bf16 %v2535_v51, %v2519_v50 }
 0x295   : > { %4702 = vmatpush1.bf16.msra.mxu0 %v4701_v5  ;;  %v4851_v5 = vpack.c.bf16 %v2405_v62, %v2389_v61  ;;  %v2551_v61 = vld [vmem:[%s7828_s29 + $0x938] sm:$0xff]  ;;  %v4997_v2 = vpack.c.bf16 %v2534_v58, %v2518_v56  ;;  %v2694_v56 = vld [vmem:[%s7828_s29 + $0xdb0] sm:$0xff]  ;;  %v2725_v58 = vld [vmem:[%s7828_s29 + $0xea8] sm:$0xff] }
 0x296   : > { %4830 = vmatpush1.bf16.msra.mxu1 %v4829_v6  ;;  %4704 = vmatprep.subr.bf16.mxu0 %v4703_v7  ;;  %v2388_v6 = vld [vmem:[%s7828_s29 + $0x420] sm:$0xff]  ;;  %v2567_v62 = vld [vmem:[%s7828_s29 + $0x9b8] sm:$0xff] }
 0x297   : > { %4832 = vmatprep.subr.bf16.mxu1 %v4831_v11  ;;  %v2404_v7 = vld [vmem:[%s7828_s29 + $0x4a0] sm:$0xff]  ;;  %v2421_v11 = vld [vmem:[%s7828_s29 + $0x528] sm:$0xff] }
 0x298   : > { %v4853_v15 = vpack.c.bf16 %v2404_v7, %v2388_v6  ;;  %v2550_v6 = vld [vmem:[%s7828_s29 + $0x930] sm:$0xff]  ;;  %v4999_v7 = vpack.c.bf16 %v2567_v62, %v2551_v61 }
 0x299   : > { %4706 = vmatpush1.bf16.msra.mxu0 %v4705_v17  ;;  %v4855_v17 = vpack.c.bf16 %v2437_v12, %v2421_v11  ;;  %v2583_v11 = vld [vmem:[%s7828_s29 + $0xa38] sm:$0xff]  ;;  %v5001_v14 = vpack.c.bf16 %v2566_v8, %v2550_v6  ;;  %v2726_v6 = vld [vmem:[%s7828_s29 + $0xeb0] sm:$0xff]  ;;  %v2757_v8 = vld [vmem:[%s7828_s29 + $0xfa8] sm:$0xff] }
 0x29a   : > { %4834 = vmatpush1.bf16.msra.mxu1 %v4833_v18  ;;  %4836 = vmatprep.subr.bf16.mxu0 %v4835_v19  ;;  %v2420_v18 = vld [vmem:[%s7828_s29 + $0x520] sm:$0xff]  ;;  %v2599_v12 = vld [vmem:[%s7828_s29 + $0xab8] sm:$0xff] }
 0x29b   : > { %4964 = vmatprep.subr.bf16.mxu1 %v4963_v23  ;;  %v2436_v19 = vld [vmem:[%s7828_s29 + $0x5a0] sm:$0xff]  ;;  %v2453_v23 = vld [vmem:[%s7828_s29 + $0x628] sm:$0xff] }
 0x29c   : > { %3422 = vmatmul.mubr.f32.vlgmr.msra.gmra.mrb[0].mxu0 %v8020_v25  ;;  %v4857_v28 = vpack.c.bf16 %v2436_v19, %v2420_v18  ;;  %v2582_v18 = vld [vmem:[%s7828_s29 + $0xa30] sm:$0xff]  ;;  %v5003_v19 = vpack.c.bf16 %v2599_v12, %v2583_v11 }
 0x29d   : > { %3564 = vmatmul.mubr.f32.vlgmr.msra.gmra.mrb[0].mxu1 %v8020_v25  ;;  %4838 = vmatpush1.bf16.msra.mxu0 %v4837_v31  ;;  %v2359_v25 = vld [vmem:[%s7828_s29 + $0x338] sm:$0xff]  ;;  %v4859_v31 = vpack.c.bf16 %v2469_v24, %v2453_v23  ;;  %v5005_v27 = vpack.c.bf16 %v2598_v20, %v2582_v18  ;;  %v2758_v18 = vld [vmem:[%s7828_s29 + $0xfb0] sm:$0xff]  ;;  %v2789_v20 = vld [vmem:[%s7828_s29 + $0x10a8] sm:$0xff] }
 0x29e   : > { %4966 = vmatpush1.bf16.msra.mxu1 %v4965_v32  ;;  %4840 = vmatprep.subr.bf16.mxu0 %v4839_v33  ;;  %v4975_v59 = vpack.c.bf16 %v2375_v52, %v2359_v25  ;;  %v2452_v32 = vld [vmem:[%s7828_s29 + $0x620] sm:$0xff]  ;;  %v4993_v52 = vpack.c.bf16 %v2502_v47, %v2486_v45  ;;  %v2615_v23 = vld [vmem:[%s7828_s29 + $0xb38] sm:$0xff]  ;;  %v2662_v45 = vld [vmem:[%s7828_s29 + $0xcb0] sm:$0xff] }
 0x29f   : > { %4968 = vmatprep.subr.bf16.mxu1 %v4967_v37  ;;  %3634 = vmatprep.mubr.f32.mxu0 %v7826_v1  ;;  %v2468_v33 = vld [vmem:[%s7828_s29 + $0x6a0] sm:$0xff]  ;;  %v2485_v37 = vld [vmem:[%s7828_s29 + $0x728] sm:$0xff]  ;;  %v2631_v24 = vld [vmem:[%s7828_s29 + $0xbb8] sm:$0xff] }
 0x2a0   : > { %3776 = vmatprep.mubr.f32.mxu1 %v7826_v1  ;;  %v4861_v41 = vpack.c.bf16 %v2468_v33, %v2452_v32  ;;  %v2614_v32 = vld [vmem:[%s7828_s29 + $0xb30] sm:$0xff]  ;;  %v5007_v33 = vpack.c.bf16 %v2631_v24, %v2615_v23  ;;  %v2693_v47 = vld [vmem:[%s7828_s29 + $0xda8] sm:$0xff] }
 0x2a1   : > { %4842 = vmatpush1.bf16.msra.mxu0 %v4841_v43  ;;  %v4863_v43 = vpack.c.bf16 %v2501_v38, %v2485_v37  ;;  %v2647_v37 = vld [vmem:[%s7828_s29 + $0xc38] sm:$0xff]  ;;  %v5009_v40 = vpack.c.bf16 %v2630_v34, %v2614_v32  ;;  %v2790_v32 = vld [vmem:[%s7828_s29 + $0x10b0] sm:$0xff]  ;;  %v2821_v34 = vld [vmem:[%s7828_s29 + $0x11a8] sm:$0xff] }
 0x2a2   : > { %4970 = vmatpush1.bf16.msra.mxu1 %v4969_v0  ;;  %4844 = vmatprep.subr.bf16.mxu0 %v4843_v44  ;;  %v2484_v0 = vld [vmem:[%s7828_s29 + $0x720] sm:$0xff]  ;;  %v2663_v38 = vld [vmem:[%s7828_s29 + $0xcb8] sm:$0xff] }
 0x2a3   : > { %4972 = vmatprep.subr.bf16.mxu1 %v4971_v48  ;;  %v2500_v44 = vld [vmem:[%s7828_s29 + $0x7a0] sm:$0xff]  ;;  %v2517_v48 = vld [vmem:[%s7828_s29 + $0x828] sm:$0xff] }
 0x2a4   : > { %v4865_v25 = vpack.c.bf16 %v2500_v44, %v2484_v0  ;;  %v2646_v0 = vld [vmem:[%s7828_s29 + $0xc30] sm:$0xff]  ;;  %v5011_v44 = vpack.c.bf16 %v2663_v38, %v2647_v37 }
 0x2a5   : > { %4846 = vmatpush1.bf16.msra.mxu0 %v4845_v53  ;;  %v4867_v53 = vpack.c.bf16 %v2533_v49, %v2517_v48  ;;  %v2679_v48 = vld [vmem:[%s7828_s29 + $0xd38] sm:$0xff]  ;;  %v5013_v51 = vpack.c.bf16 %v2662_v45, %v2646_v0  ;;  %v2822_v0 = vld [vmem:[%s7828_s29 + $0x11b0] sm:$0xff]  ;;  %v2853_v45 = vld [vmem:[%s7828_s29 + $0x12a8] sm:$0xff] }
 0x2a6   : > { %4974 = vmatpush1.bf16.msra.mxu1 %v4973_v54  ;;  %4848 = vmatprep.subr.bf16.mxu0 %v4847_v55  ;;  %v2516_v54 = vld [vmem:[%s7828_s29 + $0x820] sm:$0xff]  ;;  %v2695_v49 = vld [vmem:[%s7828_s29 + $0xdb8] sm:$0xff] }
 0x2a7   : > { %4976 = vmatprep.subr.bf16.mxu1 %v4975_v59  ;;  %v2532_v55 = vld [vmem:[%s7828_s29 + $0x8a0] sm:$0xff]  ;;  %v2549_v59 = vld [vmem:[%s7828_s29 + $0x928] sm:$0xff] }
 0x2a8   : > { %v4869_v63 = vpack.c.bf16 %v2532_v55, %v2516_v54  ;;  %v2678_v54 = vld [vmem:[%s7828_s29 + $0xd30] sm:$0xff]  ;;  %v5015_v55 = vpack.c.bf16 %v2695_v49, %v2679_v48  ;;  %v2855_v48 = vld [vmem:[%s7828_s29 + $0x12b8] sm:$0xff] }
 0x2a9   : > { %4850 = vmatpush1.bf16.msra.mxu0 %v4849_v3  ;;  %v4871_v3 = vpack.c.bf16 %v2565_v60, %v2549_v59  ;;  %v2711_v59 = vld [vmem:[%s7828_s29 + $0xe38] sm:$0xff]  ;;  %v5017_v62 = vpack.c.bf16 %v2694_v56, %v2678_v54  ;;  %v2869_v56 = vld [vmem:[%s7828_s29 + $0x1328] sm:$0xff] }
 0x2aa   : > { %4978 = vmatpush1.bf16.msra.mxu1 %v4977_v4  ;;  %4852 = vmatprep.subr.bf16.mxu0 %v4851_v5  ;;  %v2548_v4 = vld [vmem:[%s7828_s29 + $0x920] sm:$0xff]  ;;  %v2727_v60 = vld [vmem:[%s7828_s29 + $0xeb8] sm:$0xff] }
 0x2ab   : > { %4980 = vmatprep.subr.bf16.mxu1 %v4979_v9  ;;  %v2564_v5 = vld [vmem:[%s7828_s29 + $0x9a0] sm:$0xff]  ;;  %v2581_v9 = vld [vmem:[%s7828_s29 + $0xa28] sm:$0xff] }
 0x2ac   : > { %v4873_v13 = vpack.c.bf16 %v2564_v5, %v2548_v4  ;;  %v2710_v4 = vld [vmem:[%s7828_s29 + $0xe30] sm:$0xff]  ;;  %v5019_v5 = vpack.c.bf16 %v2727_v60, %v2711_v59  ;;  %v2887_v59 = vld [vmem:[%s7828_s29 + $0x13b8] sm:$0xff] }
 0x2ad   : > { %4854 = vmatpush1.bf16.msra.mxu0 %v4853_v15  ;;  %v4875_v15 = vpack.c.bf16 %v2597_v10, %v2581_v9  ;;  %v2743_v9 = vld [vmem:[%s7828_s29 + $0xf38] sm:$0xff]  ;;  %v5021_v12 = vpack.c.bf16 %v2726_v6, %v2710_v4  ;;  %v2901_v6 = vld [vmem:[%s7828_s29 + $0x1428] sm:$0xff] }
 0x2ae   : > { %4982 = vmatpush1.bf16.msra.mxu1 %v4981_v16  ;;  %4856 = vmatprep.subr.bf16.mxu0 %v4855_v17  ;;  %v2580_v16 = vld [vmem:[%s7828_s29 + $0xa20] sm:$0xff]  ;;  %v2759_v10 = vld [vmem:[%s7828_s29 + $0xfb8] sm:$0xff] }
 0x2af   : > { %4984 = vmatprep.subr.bf16.mxu1 %v4983_v21  ;;  %v2596_v17 = vld [vmem:[%s7828_s29 + $0xaa0] sm:$0xff]  ;;  %v2613_v21 = vld [vmem:[%s7828_s29 + $0xb28] sm:$0xff] }
 0x2b0   : > { %v4877_v26 = vpack.c.bf16 %v2596_v17, %v2580_v16  ;;  %v2742_v16 = vld [vmem:[%s7828_s29 + $0xf30] sm:$0xff]  ;;  %v5023_v17 = vpack.c.bf16 %v2759_v10, %v2743_v9  ;;  %v2919_v9 = vld [vmem:[%s7828_s29 + $0x14b8] sm:$0xff] }
 0x2b1   : > { %4858 = vmatpush1.bf16.msra.mxu0 %v4857_v28  ;;  %v4879_v28 = vpack.c.bf16 %v2629_v22, %v2613_v21  ;;  %v2775_v21 = vld [vmem:[%s7828_s29 + $0x1038] sm:$0xff]  ;;  %v5025_v24 = vpack.c.bf16 %v2758_v18, %v2742_v16  ;;  %v2933_v18 = vld [vmem:[%s7828_s29 + $0x1528] sm:$0xff] }
 0x2b2   : > { %4986 = vmatpush1.bf16.msra.mxu1 %v4985_v29  ;;  %4860 = vmatprep.subr.bf16.mxu0 %v4859_v31  ;;  %v2612_v29 = vld [vmem:[%s7828_s29 + $0xb20] sm:$0xff]  ;;  %v2791_v22 = vld [vmem:[%s7828_s29 + $0x10b8] sm:$0xff] }
 0x2b3   : > { %4988 = vmatprep.subr.bf16.mxu1 %v4987_v35  ;;  %v2628_v31 = vld [vmem:[%s7828_s29 + $0xba0] sm:$0xff]  ;;  %v2645_v35 = vld [vmem:[%s7828_s29 + $0xc28] sm:$0xff] }
 0x2b4   : > { %v4881_v39 = vpack.c.bf16 %v2628_v31, %v2612_v29  ;;  %v2774_v29 = vld [vmem:[%s7828_s29 + $0x1030] sm:$0xff]  ;;  %v5027_v31 = vpack.c.bf16 %v2791_v22, %v2775_v21  ;;  %v2951_v21 = vld [vmem:[%s7828_s29 + $0x15b8] sm:$0xff] }
 0x2b5   : > { %4862 = vmatpush1.bf16.msra.mxu0 %v4861_v41  ;;  %v4883_v41 = vpack.c.bf16 %v2661_v36, %v2645_v35  ;;  %v2807_v35 = vld [vmem:[%s7828_s29 + $0x1138] sm:$0xff]  ;;  %v5029_v38 = vpack.c.bf16 %v2790_v32, %v2774_v29  ;;  %v2965_v32 = vld [vmem:[%s7828_s29 + $0x1628] sm:$0xff] }
 0x2b6   : > { %4990 = vmatpush1.bf16.msra.mxu1 %v4989_v42  ;;  %4864 = vmatprep.subr.bf16.mxu0 %v4863_v43  ;;  %v2644_v42 = vld [vmem:[%s7828_s29 + $0xc20] sm:$0xff]  ;;  %v2823_v36 = vld [vmem:[%s7828_s29 + $0x11b8] sm:$0xff] }
 0x2b7   : > { %4992 = vmatprep.subr.bf16.mxu1 %v4991_v46  ;;  %v2660_v43 = vld [vmem:[%s7828_s29 + $0xca0] sm:$0xff]  ;;  %v2677_v46 = vld [vmem:[%s7828_s29 + $0xd28] sm:$0xff] }
 0x2b8   : > { %v4885_v50 = vpack.c.bf16 %v2660_v43, %v2644_v42  ;;  %v2806_v42 = vld [vmem:[%s7828_s29 + $0x1130] sm:$0xff]  ;;  %v5031_v43 = vpack.c.bf16 %v2823_v36, %v2807_v35  ;;  %v2983_v35 = vld [vmem:[%s7828_s29 + $0x16b8] sm:$0xff] }
 0x2b9   : > { %4866 = vmatpush1.bf16.msra.mxu0 %v4865_v25  ;;  %v4887_v25 = vpack.c.bf16 %v2693_v47, %v2677_v46  ;;  %v5661_v46 = vld [vmem:[%s8942_s0] sm:$0xff]  ;;  %v2839_v47 = vld [vmem:[%s7828_s29 + $0x1238] sm:$0xff] }
 0x2ba   : > { %4994 = vmatpush1.bf16.msra.mxu1 %v4993_v52  ;;  %4868 = vmatprep.subr.bf16.mxu0 %v4867_v53  ;;  %v2676_v52 = vld [vmem:[%s7828_s29 + $0xd20] sm:$0xff]  ;;  %v5035_v54 = vpack.c.bf16 %v2855_v48, %v2839_v47 }
 0x2bb   : > { %4996 = vmatprep.subr.bf16.mxu1 %v4995_v57  ;;  %v2692_v53 = vld [vmem:[%s7828_s29 + $0xda0] sm:$0xff]  ;;  %v2709_v57 = vld [vmem:[%s7828_s29 + $0xe28] sm:$0xff] }
 0x2bc   : > { %v4889_v61 = vpack.c.bf16 %v2692_v53, %v2676_v52  ;;  %v2852_v52 = vld [vmem:[%s7828_s29 + $0x12a0] sm:$0xff]  ;;  %v2838_v53 = vld [vmem:[%s7828_s29 + $0x1230] sm:$0xff] }
 0x2bd   : > { %4870 = vmatpush1.bf16.msra.mxu0 %v4869_v63  ;;  %v4891_v63 = vpack.c.bf16 %v2725_v58, %v2709_v57  ;;  %v2885_v57 = vld [vmem:[%s7828_s29 + $0x13a8] sm:$0xff]  ;;  %v2871_v58 = vld [vmem:[%s7828_s29 + $0x1338] sm:$0xff] }
 0x2be   : > { %4998 = vmatpush1.bf16.msra.mxu1 %v4997_v2  ;;  %4872 = vmatprep.subr.bf16.mxu0 %v4871_v3  ;;  %v2708_v2 = vld [vmem:[%s7828_s29 + $0xe20] sm:$0xff]  ;;  %v5039_v4 = vpack.c.bf16 %v2887_v59, %v2871_v58 }
 0x2bf   : > { %5000 = vmatprep.subr.bf16.mxu1 %v4999_v7  ;;  %v2724_v3 = vld [vmem:[%s7828_s29 + $0xea0] sm:$0xff]  ;;  %v2741_v7 = vld [vmem:[%s7828_s29 + $0xf28] sm:$0xff] }
 0x2c0   : > { %v4893_v11 = vpack.c.bf16 %v2724_v3, %v2708_v2  ;;  %v2884_v2 = vld [vmem:[%s7828_s29 + $0x13a0] sm:$0xff]  ;;  %v2870_v3 = vld [vmem:[%s7828_s29 + $0x1330] sm:$0xff] }
 0x2c1   : > { %4874 = vmatpush1.bf16.msra.mxu0 %v4873_v13  ;;  %v4895_v13 = vpack.c.bf16 %v2757_v8, %v2741_v7  ;;  %v2917_v7 = vld [vmem:[%s7828_s29 + $0x14a8] sm:$0xff]  ;;  %v2903_v8 = vld [vmem:[%s7828_s29 + $0x1438] sm:$0xff] }
 0x2c2   : > { %5002 = vmatpush1.bf16.msra.mxu1 %v5001_v14  ;;  %4876 = vmatprep.subr.bf16.mxu0 %v4875_v15  ;;  %v2740_v14 = vld [vmem:[%s7828_s29 + $0xf20] sm:$0xff]  ;;  %v5043_v16 = vpack.c.bf16 %v2919_v9, %v2903_v8 }
 0x2c3   : > { %5004 = vmatprep.subr.bf16.mxu1 %v5003_v19  ;;  %v2756_v15 = vld [vmem:[%s7828_s29 + $0xfa0] sm:$0xff]  ;;  %v2773_v19 = vld [vmem:[%s7828_s29 + $0x1028] sm:$0xff] }
 0x2c4   : > { %v4897_v23 = vpack.c.bf16 %v2756_v15, %v2740_v14  ;;  %v2916_v14 = vld [vmem:[%s7828_s29 + $0x14a0] sm:$0xff]  ;;  %v2902_v15 = vld [vmem:[%s7828_s29 + $0x1430] sm:$0xff] }
 0x2c5   : > { %4878 = vmatpush1.bf16.msra.mxu0 %v4877_v26  ;;  %v4899_v26 = vpack.c.bf16 %v2789_v20, %v2773_v19  ;;  %v2949_v19 = vld [vmem:[%s7828_s29 + $0x15a8] sm:$0xff]  ;;  %v2935_v20 = vld [vmem:[%s7828_s29 + $0x1538] sm:$0xff] }
 0x2c6   : > { %5006 = vmatpush1.bf16.msra.mxu1 %v5005_v27  ;;  %4880 = vmatprep.subr.bf16.mxu0 %v4879_v28  ;;  %v2772_v27 = vld [vmem:[%s7828_s29 + $0x1020] sm:$0xff]  ;;  %v5047_v29 = vpack.c.bf16 %v2951_v21, %v2935_v20 }
 0x2c7   : > { %5008 = vmatprep.subr.bf16.mxu1 %v5007_v33  ;;  %v2788_v28 = vld [vmem:[%s7828_s29 + $0x10a0] sm:$0xff]  ;;  %v2805_v33 = vld [vmem:[%s7828_s29 + $0x1128] sm:$0xff] }
 0x2c8   : > { %v4901_v37 = vpack.c.bf16 %v2788_v28, %v2772_v27  ;;  %v2948_v27 = vld [vmem:[%s7828_s29 + $0x15a0] sm:$0xff]  ;;  %v2934_v28 = vld [vmem:[%s7828_s29 + $0x1530] sm:$0xff] }
 0x2c9   : > { %4882 = vmatpush1.bf16.msra.mxu0 %v4881_v39  ;;  %v4903_v39 = vpack.c.bf16 %v2821_v34, %v2805_v33  ;;  %v2981_v33 = vld [vmem:[%s7828_s29 + $0x16a8] sm:$0xff]  ;;  %v2967_v34 = vld [vmem:[%s7828_s29 + $0x1638] sm:$0xff] }
 0x2ca   : > { %5010 = vmatpush1.bf16.msra.mxu1 %v5009_v40  ;;  %4884 = vmatprep.subr.bf16.mxu0 %v4883_v41  ;;  %v2804_v40 = vld [vmem:[%s7828_s29 + $0x1120] sm:$0xff] }
 0x2cb   : > { %5012 = vmatprep.subr.bf16.mxu1 %v5011_v44  ;;  %v2820_v41 = vld [vmem:[%s7828_s29 + $0x11a0] sm:$0xff]  ;;  %v2837_v44 = vld [vmem:[%s7828_s29 + $0x1228] sm:$0xff] }
 0x2cc   : > { %v4905_v49 = vpack.c.bf16 %v2820_v41, %v2804_v40  ;;  %v2980_v40 = vld [vmem:[%s7828_s29 + $0x16a0] sm:$0xff]  ;;  %v2966_v41 = vld [vmem:[%s7828_s29 + $0x1630] sm:$0xff] }
 0x2cd   : > { %4886 = vmatpush1.bf16.msra.mxu0 %v4885_v50  ;;  %v5033_v50 = vpack.c.bf16 %v2822_v0, %v2806_v42  ;;  %v5051_v42 = vpack.c.bf16 %v2983_v35, %v2967_v34  ;;  %v2997_v0 = vld [vmem:[%s7828_s29 + $0x1728] sm:$0xff] }
 0x2ce   : > { %5014 = vmatpush1.bf16.msra.mxu1 %v5013_v51  ;;  %4888 = vmatprep.subr.bf16.mxu0 %v4887_v25  ;;  %v4907_v51 = vpack.c.bf16 %v2853_v45, %v2837_v44  ;;  %v2836_v25 = vld [vmem:[%s7828_s29 + $0x1220] sm:$0xff]  ;;  %v3013_v44 = vld [vmem:[%s7828_s29 + $0x17a8] sm:$0xff]  ;;  %v2999_v45 = vld [vmem:[%s7828_s29 + $0x1738] sm:$0xff] }
 0x2cf   : > { %5016 = vmatprep.subr.bf16.mxu1 %v5015_v55  ;;  %v2854_v55 = vld [vmem:[%s7828_s29 + $0x12b0] sm:$0xff]  ;;  %v4909_v60 = vpack.c.bf16 %v2852_v52, %v2836_v25 }
 0x2d0   : > { %v2998_v25 = vld [vmem:[%s7828_s29 + $0x1730] sm:$0xff] }
 0x2d1   : > { %4890 = vmatpush1.bf16.msra.mxu0 %v4889_v61  ;;  %v5037_v61 = vpack.c.bf16 %v2854_v55, %v2838_v53  ;;  %v3014_v53 = vld [vmem:[%s7828_s29 + $0x17b0] sm:$0xff]  ;;  %v3045_v55 = vld [vmem:[%s7828_s29 + $0x18a8] sm:$0xff] }
 0x2d2   : > { %5018 = vmatpush1.bf16.msra.mxu1 %v5017_v62  ;;  %4892 = vmatprep.subr.bf16.mxu0 %v4891_v63  ;;  %v4911_v62 = vpack.c.bf16 %v2885_v57, %v2869_v56  ;;  %v2868_v63 = vld [vmem:[%s7828_s29 + $0x1320] sm:$0xff]  ;;  %v3031_v56 = vld [vmem:[%s7828_s29 + $0x1838] sm:$0xff]  ;;  %v5057_v59 = vpack.c.bf16 %v3014_v53, %v2998_v25  ;;  %v3174_v25 = vld [vmem:[%s7828_s29 + $0x1cb0] sm:$0xff] }
 0x2d3   : > { %5020 = vmatprep.subr.bf16.mxu1 %v5019_v5  ;;  %v2886_v5 = vld [vmem:[%s7828_s29 + $0x13b0] sm:$0xff]  ;;  %v4913_v10 = vpack.c.bf16 %v2884_v2, %v2868_v63  ;;  %v3047_v57 = vld [vmem:[%s7828_s29 + $0x18b8] sm:$0xff]  ;;  %v3205_v53 = vld [vmem:[%s7828_s29 + $0x1da8] sm:$0xff] }
 0x2d4   : > { %v3030_v63 = vld [vmem:[%s7828_s29 + $0x1830] sm:$0xff]  ;;  %v5059_v2 = vpack.c.bf16 %v3047_v57, %v3031_v56 }
 0x2d5   : > { %4894 = vmatpush1.bf16.msra.mxu0 %v4893_v11  ;;  %v5041_v11 = vpack.c.bf16 %v2886_v5, %v2870_v3  ;;  %v3046_v3 = vld [vmem:[%s7828_s29 + $0x18b0] sm:$0xff]  ;;  %v3077_v5 = vld [vmem:[%s7828_s29 + $0x19a8] sm:$0xff] }
 0x2d6   : > { %5022 = vmatpush1.bf16.msra.mxu1 %v5021_v12  ;;  %4896 = vmatprep.subr.bf16.mxu0 %v4895_v13  ;;  %v4915_v12 = vpack.c.bf16 %v2917_v7, %v2901_v6  ;;  %v2900_v13 = vld [vmem:[%s7828_s29 + $0x1420] sm:$0xff]  ;;  %v3063_v6 = vld [vmem:[%s7828_s29 + $0x1938] sm:$0xff]  ;;  %v5061_v9 = vpack.c.bf16 %v3046_v3, %v3030_v63  ;;  %v3206_v63 = vld [vmem:[%s7828_s29 + $0x1db0] sm:$0xff] }
 0x2d7   : > { %5024 = vmatprep.subr.bf16.mxu1 %v5023_v17  ;;  %v2918_v17 = vld [vmem:[%s7828_s29 + $0x14b0] sm:$0xff]  ;;  %v4917_v22 = vpack.c.bf16 %v2916_v14, %v2900_v13  ;;  %v3079_v7 = vld [vmem:[%s7828_s29 + $0x19b8] sm:$0xff]  ;;  %v3237_v3 = vld [vmem:[%s7828_s29 + $0x1ea8] sm:$0xff] }
 0x2d8   : > { %v3062_v13 = vld [vmem:[%s7828_s29 + $0x1930] sm:$0xff]  ;;  %v5063_v14 = vpack.c.bf16 %v3079_v7, %v3063_v6 }
 0x2d9   : > { %4898 = vmatpush1.bf16.msra.mxu0 %v4897_v23  ;;  %v5045_v23 = vpack.c.bf16 %v2918_v17, %v2902_v15  ;;  %v3078_v15 = vld [vmem:[%s7828_s29 + $0x19b0] sm:$0xff]  ;;  %v3109_v17 = vld [vmem:[%s7828_s29 + $0x1aa8] sm:$0xff] }
 0x2da   : > { %5026 = vmatpush1.bf16.msra.mxu1 %v5025_v24  ;;  %4900 = vmatprep.subr.bf16.mxu0 %v4899_v26  ;;  %v4919_v24 = vpack.c.bf16 %v2949_v19, %v2933_v18  ;;  %v2932_v26 = vld [vmem:[%s7828_s29 + $0x1520] sm:$0xff]  ;;  %v3095_v18 = vld [vmem:[%s7828_s29 + $0x1a38] sm:$0xff]  ;;  %v5065_v21 = vpack.c.bf16 %v3078_v15, %v3062_v13  ;;  %v3238_v13 = vld [vmem:[%s7828_s29 + $0x1eb0] sm:$0xff] }
 0x2db   : > { %5028 = vmatprep.subr.bf16.mxu1 %v5027_v31  ;;  %v2950_v31 = vld [vmem:[%s7828_s29 + $0x15b0] sm:$0xff]  ;;  %v4921_v36 = vpack.c.bf16 %v2948_v27, %v2932_v26  ;;  %v3111_v19 = vld [vmem:[%s7828_s29 + $0x1ab8] sm:$0xff]  ;;  %v3269_v15 = vld [vmem:[%s7828_s29 + $0x1fa8] sm:$0xff] }
 0x2dc   : > { %3635 = vmatmul.mubr.f32.vlgmr.msra.gmra.mrb[2].mxu0 %v5661_v46  ;;  %v3094_v26 = vld [vmem:[%s7828_s29 + $0x1a30] sm:$0xff]  ;;  %v5067_v27 = vpack.c.bf16 %v3111_v19, %v3095_v18 }
 0x2dd   : > { %4902 = vmatpush1.bf16.msra.mxu0 %v4901_v37  ;;  %3777 = vmatmul.mubr.f32.vlgmr.msra.gmra.mrb[2].mxu1 %v5661_v46  ;;  %v5049_v37 = vpack.c.bf16 %v2950_v31, %v2934_v28  ;;  %v3015_v46 = vld [vmem:[%s7828_s29 + $0x17b8] sm:$0xff]  ;;  %v3110_v28 = vld [vmem:[%s7828_s29 + $0x1ab0] sm:$0xff]  ;;  %v3141_v31 = vld [vmem:[%s7828_s29 + $0x1ba8] sm:$0xff] }
 0x2de   : > { %5030 = vmatpush1.bf16.msra.mxu1 %v5029_v38  ;;  %4904 = vmatprep.subr.bf16.mxu0 %v4903_v39  ;;  %v4923_v38 = vpack.c.bf16 %v2981_v33, %v2965_v32  ;;  %v2964_v39 = vld [vmem:[%s7828_s29 + $0x1620] sm:$0xff]  ;;  %v5055_v52 = vpack.c.bf16 %v3015_v46, %v2999_v45  ;;  %v3127_v32 = vld [vmem:[%s7828_s29 + $0x1b38] sm:$0xff]  ;;  %v5069_v35 = vpack.c.bf16 %v3110_v28, %v3094_v26  ;;  %v3270_v26 = vld [vmem:[%s7828_s29 + $0x1fb0] sm:$0xff] }
 0x2df   : > { %5032 = vmatprep.subr.bf16.mxu1 %v5031_v43  ;;  %3705 = vmatprep.mubr.f32.mxu0 %v8027_v30  ;;  %v2982_v43 = vld [vmem:[%s7828_s29 + $0x16b0] sm:$0xff]  ;;  %v4925_v47 = vpack.c.bf16 %v2980_v40, %v2964_v39  ;;  %v3143_v33 = vld [vmem:[%s7828_s29 + $0x1bb8] sm:$0xff]  ;;  %v2281_v28 = vld [vmem:[%s7828_s29 + $0xc8] sm:$0xff] }
 0x2e0   : > { %3847 = vmatprep.mubr.f32.mxu1 %v8027_v30  ;;  %v5053_v48 = vpack.c.bf16 %v2982_v43, %v2966_v41  ;;  %v3126_v39 = vld [vmem:[%s7828_s29 + $0x1b30] sm:$0xff]  ;;  %v5071_v40 = vpack.c.bf16 %v3143_v33, %v3127_v32  ;;  %v3173_v43 = vld [vmem:[%s7828_s29 + $0x1ca8] sm:$0xff] }
 0x2e1   : > { %4906 = vmatpush1.bf16.msra.mxu0 %v4905_v49  ;;  %v4927_v49 = vpack.c.bf16 %v3013_v44, %v2997_v0  ;;  %v3142_v41 = vld [vmem:[%s7828_s29 + $0x1bb0] sm:$0xff]  ;;  %v3159_v0 = vld [vmem:[%s7828_s29 + $0x1c38] sm:$0xff] }
 0x2e2   : > { %5034 = vmatpush1.bf16.msra.mxu1 %v5033_v50  ;;  %4908 = vmatprep.subr.bf16.mxu0 %v4907_v51  ;;  %v2996_v50 = vld [vmem:[%s7828_s29 + $0x1720] sm:$0xff]  ;;  %v3175_v44 = vld [vmem:[%s7828_s29 + $0x1cb8] sm:$0xff]  ;;  %v5073_v46 = vpack.c.bf16 %v3142_v41, %v3126_v39  ;;  %v2282_v39 = vld [vmem:[%s7828_s29 + $0xd0] sm:$0xff] }
 0x2e3   : > { %5036 = vmatprep.subr.bf16.mxu1 %v5035_v54  ;;  %v3012_v51 = vld [vmem:[%s7828_s29 + $0x17a0] sm:$0xff]  ;;  %v3029_v54 = vld [vmem:[%s7828_s29 + $0x1828] sm:$0xff] }
 0x2e4   : > { %v4929_v58 = vpack.c.bf16 %v3012_v51, %v2996_v50  ;;  %v3158_v50 = vld [vmem:[%s7828_s29 + $0x1c30] sm:$0xff]  ;;  %v5075_v51 = vpack.c.bf16 %v3175_v44, %v3159_v0  ;;  %v2313_v41 = vld [vmem:[%s7828_s29 + $0x1c8] sm:$0xff] }
 0x2e5   : > { %4910 = vmatpush1.bf16.msra.mxu0 %v4909_v60  ;;  %v4931_v60 = vpack.c.bf16 %v3045_v55, %v3029_v54  ;;  %v3191_v54 = vld [vmem:[%s7828_s29 + $0x1d38] sm:$0xff]  ;;  %v5077_v57 = vpack.c.bf16 %v3174_v25, %v3158_v50  ;;  %v2314_v50 = vld [vmem:[%s7828_s29 + $0x1d0] sm:$0xff]  ;;  %v2345_v25 = vld [vmem:[%s7828_s29 + $0x2c8] sm:$0xff] }
 0x2e6   : > { %5038 = vmatpush1.bf16.msra.mxu1 %v5037_v61  ;;  %4912 = vmatprep.subr.bf16.mxu0 %v4911_v62  ;;  %v3028_v61 = vld [vmem:[%s7828_s29 + $0x1820] sm:$0xff]  ;;  %v3207_v55 = vld [vmem:[%s7828_s29 + $0x1db8] sm:$0xff] }
 0x2e7   : > { %5040 = vmatprep.subr.bf16.mxu1 %v5039_v4  ;;  %v3044_v62 = vld [vmem:[%s7828_s29 + $0x18a0] sm:$0xff]  ;;  %v3061_v4 = vld [vmem:[%s7828_s29 + $0x1928] sm:$0xff] }
 0x2e8   : > { %v4933_v8 = vpack.c.bf16 %v3044_v62, %v3028_v61  ;;  %v3190_v61 = vld [vmem:[%s7828_s29 + $0x1d30] sm:$0xff]  ;;  %v5079_v62 = vpack.c.bf16 %v3207_v55, %v3191_v54  ;;  %v2347_v54 = vld [vmem:[%s7828_s29 + $0x2d8] sm:$0xff] }
 0x2e9   : > { %4914 = vmatpush1.bf16.msra.mxu0 %v4913_v10  ;;  %v4935_v10 = vpack.c.bf16 %v3077_v5, %v3061_v4  ;;  %v3223_v4 = vld [vmem:[%s7828_s29 + $0x1e38] sm:$0xff]  ;;  %v5081_v7 = vpack.c.bf16 %v3206_v63, %v3190_v61  ;;  %v2361_v63 = vld [vmem:[%s7828_s29 + $0x348] sm:$0xff] }
 0x2ea   : > { %5042 = vmatpush1.bf16.msra.mxu1 %v5041_v11  ;;  %4916 = vmatprep.subr.bf16.mxu0 %v4915_v12  ;;  %v3060_v11 = vld [vmem:[%s7828_s29 + $0x1920] sm:$0xff]  ;;  %v3239_v5 = vld [vmem:[%s7828_s29 + $0x1eb8] sm:$0xff] }
 0x2eb   : > { %5044 = vmatprep.subr.bf16.mxu1 %v5043_v16  ;;  %v3076_v12 = vld [vmem:[%s7828_s29 + $0x19a0] sm:$0xff]  ;;  %v3093_v16 = vld [vmem:[%s7828_s29 + $0x1a28] sm:$0xff] }
 0x2ec   : > { %v4937_v20 = vpack.c.bf16 %v3076_v12, %v3060_v11  ;;  %v3222_v11 = vld [vmem:[%s7828_s29 + $0x1e30] sm:$0xff]  ;;  %v5083_v12 = vpack.c.bf16 %v3239_v5, %v3223_v4  ;;  %v2379_v4 = vld [vmem:[%s7828_s29 + $0x3d8] sm:$0xff] }
 0x2ed   : > { %4918 = vmatpush1.bf16.msra.mxu0 %v4917_v22  ;;  %v4939_v22 = vpack.c.bf16 %v3109_v17, %v3093_v16  ;;  %v3255_v16 = vld [vmem:[%s7828_s29 + $0x1f38] sm:$0xff]  ;;  %v5085_v19 = vpack.c.bf16 %v3238_v13, %v3222_v11  ;;  %v2393_v13 = vld [vmem:[%s7828_s29 + $0x448] sm:$0xff] }
 0x2ee   : > { %5046 = vmatpush1.bf16.msra.mxu1 %v5045_v23  ;;  %4920 = vmatprep.subr.bf16.mxu0 %v4919_v24  ;;  %v3092_v23 = vld [vmem:[%s7828_s29 + $0x1a20] sm:$0xff]  ;;  %v3271_v17 = vld [vmem:[%s7828_s29 + $0x1fb8] sm:$0xff] }
 0x2ef   : > { %5048 = vmatprep.subr.bf16.mxu1 %v5047_v29  ;;  %v3108_v24 = vld [vmem:[%s7828_s29 + $0x1aa0] sm:$0xff]  ;;  %v3125_v29 = vld [vmem:[%s7828_s29 + $0x1b28] sm:$0xff] }
 0x2f0   : > { %v4941_v34 = vpack.c.bf16 %v3108_v24, %v3092_v23  ;;  %v3254_v23 = vld [vmem:[%s7828_s29 + $0x1f30] sm:$0xff]  ;;  %v5087_v24 = vpack.c.bf16 %v3271_v17, %v3255_v16  ;;  %v2411_v16 = vld [vmem:[%s7828_s29 + $0x4d8] sm:$0xff] }
 0x2f1   : > { %4922 = vmatpush1.bf16.msra.mxu0 %v4921_v36  ;;  %v4943_v36 = vpack.c.bf16 %v3141_v31, %v3125_v29  ;;  %v2267_v29 = vld [vmem:[%s7828_s29 + $0x58] sm:$0xff]  ;;  %v5089_v33 = vpack.c.bf16 %v3270_v26, %v3254_v23  ;;  %v2425_v26 = vld [vmem:[%s7828_s29 + $0x548] sm:$0xff] }
 0x2f2   : > { %5050 = vmatpush1.bf16.msra.mxu1 %v5049_v37  ;;  %4924 = vmatprep.subr.bf16.mxu0 %v4923_v38  ;;  %v3124_v37 = vld [vmem:[%s7828_s29 + $0x1b20] sm:$0xff]  ;;  %v2283_v31 = vld [vmem:[%s7828_s29 + $0xd8] sm:$0xff] }
 0x2f3   : > { %5052 = vmatprep.subr.bf16.mxu1 %v5051_v42  ;;  %v3140_v38 = vld [vmem:[%s7828_s29 + $0x1ba0] sm:$0xff]  ;;  %v3157_v42 = vld [vmem:[%s7828_s29 + $0x1c28] sm:$0xff] }
 0x2f4   : > { %v4945_v45 = vpack.c.bf16 %v3140_v38, %v3124_v37  ;;  %v2266_v37 = vld [vmem:[%s7828_s29 + $0x50] sm:$0xff]  ;;  %v5219_v38 = vpack.c.bf16 %v2283_v31, %v2267_v29  ;;  %v2443_v29 = vld [vmem:[%s7828_s29 + $0x5d8] sm:$0xff] }
 0x2f5   : > { %4926 = vmatpush1.bf16.msra.mxu0 %v4925_v47  ;;  %v4947_v47 = vpack.c.bf16 %v3173_v43, %v3157_v42  ;;  %v2299_v42 = vld [vmem:[%s7828_s29 + $0x158] sm:$0xff]  ;;  %v5221_v44 = vpack.c.bf16 %v2282_v39, %v2266_v37  ;;  %v2457_v39 = vld [vmem:[%s7828_s29 + $0x648] sm:$0xff] }
 0x2f6   : > { %5054 = vmatpush1.bf16.msra.mxu1 %v5053_v48  ;;  %4928 = vmatprep.subr.bf16.mxu0 %v4927_v49  ;;  %v3156_v48 = vld [vmem:[%s7828_s29 + $0x1c20] sm:$0xff]  ;;  %v2315_v43 = vld [vmem:[%s7828_s29 + $0x1d8] sm:$0xff] }
 0x2f7   : > { %5056 = vmatprep.subr.bf16.mxu1 %v5055_v52  ;;  %v3172_v49 = vld [vmem:[%s7828_s29 + $0x1ca0] sm:$0xff]  ;;  %v3189_v52 = vld [vmem:[%s7828_s29 + $0x1d28] sm:$0xff] }
 0x2f8   : > { %v4949_v56 = vpack.c.bf16 %v3172_v49, %v3156_v48  ;;  %v2298_v48 = vld [vmem:[%s7828_s29 + $0x150] sm:$0xff]  ;;  %v5223_v49 = vpack.c.bf16 %v2315_v43, %v2299_v42  ;;  %v2475_v42 = vld [vmem:[%s7828_s29 + $0x6d8] sm:$0xff] }
 0x2f9   : > { %4930 = vmatpush1.bf16.msra.mxu0 %v4929_v58  ;;  %v4951_v58 = vpack.c.bf16 %v3205_v53, %v3189_v52  ;;  %v5662_v52 = vld [vmem:[%s8942_s0 + $0x8] sm:$0xff]  ;;  %v2331_v53 = vld [vmem:[%s7828_s29 + $0x258] sm:$0xff] }
 0x2fa   : > { %5058 = vmatpush1.bf16.msra.mxu1 %v5057_v59  ;;  %4932 = vmatprep.subr.bf16.mxu0 %v4931_v60  ;;  %v3188_v59 = vld [vmem:[%s7828_s29 + $0x1d20] sm:$0xff]  ;;  %v5227_v61 = vpack.c.bf16 %v2347_v54, %v2331_v53 }
 0x2fb   : > { %5060 = vmatprep.subr.bf16.mxu1 %v5059_v2  ;;  %v3204_v60 = vld [vmem:[%s7828_s29 + $0x1da0] sm:$0xff]  ;;  %v3221_v2 = vld [vmem:[%s7828_s29 + $0x1e28] sm:$0xff] }
 0x2fc   : > { %v4953_v6 = vpack.c.bf16 %v3204_v60, %v3188_v59  ;;  %v2344_v59 = vld [vmem:[%s7828_s29 + $0x2c0] sm:$0xff]  ;;  %v2330_v60 = vld [vmem:[%s7828_s29 + $0x250] sm:$0xff] }
 0x2fd   : > { %4934 = vmatpush1.bf16.msra.mxu0 %v4933_v8  ;;  %v4955_v8 = vpack.c.bf16 %v3237_v3, %v3221_v2  ;;  %v2377_v2 = vld [vmem:[%s7828_s29 + $0x3c8] sm:$0xff]  ;;  %v2363_v3 = vld [vmem:[%s7828_s29 + $0x358] sm:$0xff] }
 0x2fe   : > { %5062 = vmatpush1.bf16.msra.mxu1 %v5061_v9  ;;  %4936 = vmatprep.subr.bf16.mxu0 %v4935_v10  ;;  %v3220_v9 = vld [vmem:[%s7828_s29 + $0x1e20] sm:$0xff]  ;;  %v5231_v11 = vpack.c.bf16 %v2379_v4, %v2363_v3 }
 0x2ff   : > { %5064 = vmatprep.subr.bf16.mxu1 %v5063_v14  ;;  %v3236_v10 = vld [vmem:[%s7828_s29 + $0x1ea0] sm:$0xff]  ;;  %v3253_v14 = vld [vmem:[%s7828_s29 + $0x1f28] sm:$0xff] }
 0x300   : > { %v4957_v18 = vpack.c.bf16 %v3236_v10, %v3220_v9  ;;  %v2376_v9 = vld [vmem:[%s7828_s29 + $0x3c0] sm:$0xff]  ;;  %v2362_v10 = vld [vmem:[%s7828_s29 + $0x350] sm:$0xff] }
 0x301   : > { %4938 = vmatpush1.bf16.msra.mxu0 %v4937_v20  ;;  %v4959_v20 = vpack.c.bf16 %v3269_v15, %v3253_v14  ;;  %v2409_v14 = vld [vmem:[%s7828_s29 + $0x4c8] sm:$0xff]  ;;  %v2395_v15 = vld [vmem:[%s7828_s29 + $0x458] sm:$0xff] }
 0x302   : > { %5066 = vmatpush1.bf16.msra.mxu1 %v5065_v21  ;;  %4940 = vmatprep.subr.bf16.mxu0 %v4939_v22  ;;  %v3252_v21 = vld [vmem:[%s7828_s29 + $0x1f20] sm:$0xff]  ;;  %v5235_v23 = vpack.c.bf16 %v2411_v16, %v2395_v15 }
 0x303   : > { %5068 = vmatprep.subr.bf16.mxu1 %v5067_v27  ;;  %v3268_v22 = vld [vmem:[%s7828_s29 + $0x1fa0] sm:$0xff]  ;;  %v2265_v27 = vld [vmem:[%s7828_s29 + $0x48] sm:$0xff] }
 0x304   : > { %v4961_v32 = vpack.c.bf16 %v3268_v22, %v3252_v21  ;;  %v2408_v21 = vld [vmem:[%s7828_s29 + $0x4c0] sm:$0xff]  ;;  %v2394_v22 = vld [vmem:[%s7828_s29 + $0x450] sm:$0xff] }
 0x305   : > { %4942 = vmatpush1.bf16.msra.mxu0 %v4941_v34  ;;  %v5091_v34 = vpack.c.bf16 %v2281_v28, %v2265_v27  ;;  %v2441_v27 = vld [vmem:[%s7828_s29 + $0x5c8] sm:$0xff]  ;;  %v2427_v28 = vld [vmem:[%s7828_s29 + $0x558] sm:$0xff] }
 0x306   : > { %5070 = vmatpush1.bf16.msra.mxu1 %v5069_v35  ;;  %4944 = vmatprep.subr.bf16.mxu0 %v4943_v36  ;;  %v2264_v35 = vld [vmem:[%s7828_s29 + $0x40] sm:$0xff]  ;;  %v5239_v37 = vpack.c.bf16 %v2443_v29, %v2427_v28 }
 0x307   : > { %5072 = vmatprep.subr.bf16.mxu1 %v5071_v40  ;;  %v2280_v36 = vld [vmem:[%s7828_s29 + $0xc0] sm:$0xff]  ;;  %v2297_v40 = vld [vmem:[%s7828_s29 + $0x148] sm:$0xff] }
 0x308   : > { %v5093_v0 = vpack.c.bf16 %v2280_v36, %v2264_v35  ;;  %v2440_v35 = vld [vmem:[%s7828_s29 + $0x5c0] sm:$0xff]  ;;  %v2426_v36 = vld [vmem:[%s7828_s29 + $0x550] sm:$0xff] }
 0x309   : > { %4946 = vmatpush1.bf16.msra.mxu0 %v4945_v45  ;;  %v5095_v45 = vpack.c.bf16 %v2313_v41, %v2297_v40  ;;  %v2473_v40 = vld [vmem:[%s7828_s29 + $0x6c8] sm:$0xff]  ;;  %v2459_v41 = vld [vmem:[%s7828_s29 + $0x658] sm:$0xff] }
 0x30a   : > { %5074 = vmatpush1.bf16.msra.mxu1 %v5073_v46  ;;  %4948 = vmatprep.subr.bf16.mxu0 %v4947_v47  ;;  %v2296_v46 = vld [vmem:[%s7828_s29 + $0x140] sm:$0xff] }
 0x30b   : > { %5076 = vmatprep.subr.bf16.mxu1 %v5075_v51  ;;  %v2312_v47 = vld [vmem:[%s7828_s29 + $0x1c0] sm:$0xff]  ;;  %v2329_v51 = vld [vmem:[%s7828_s29 + $0x248] sm:$0xff] }
 0x30c   : > { %v5097_v55 = vpack.c.bf16 %v2312_v47, %v2296_v46  ;;  %v2472_v46 = vld [vmem:[%s7828_s29 + $0x6c0] sm:$0xff]  ;;  %v2458_v47 = vld [vmem:[%s7828_s29 + $0x650] sm:$0xff] }
 0x30d   : > { %4950 = vmatpush1.bf16.msra.mxu0 %v4949_v56  ;;  %v5225_v56 = vpack.c.bf16 %v2314_v50, %v2298_v48  ;;  %v5243_v48 = vpack.c.bf16 %v2475_v42, %v2459_v41  ;;  %v2489_v50 = vld [vmem:[%s7828_s29 + $0x748] sm:$0xff] }
 0x30e   : > { %5078 = vmatpush1.bf16.msra.mxu1 %v5077_v57  ;;  %4952 = vmatprep.subr.bf16.mxu0 %v4951_v58  ;;  %v5099_v57 = vpack.c.bf16 %v2345_v25, %v2329_v51  ;;  %v2328_v58 = vld [vmem:[%s7828_s29 + $0x240] sm:$0xff]  ;;  %v2505_v51 = vld [vmem:[%s7828_s29 + $0x7c8] sm:$0xff]  ;;  %v2491_v25 = vld [vmem:[%s7828_s29 + $0x758] sm:$0xff] }
 0x30f   : > { %5080 = vmatprep.subr.bf16.mxu1 %v5079_v62  ;;  %v2346_v62 = vld [vmem:[%s7828_s29 + $0x2d0] sm:$0xff]  ;;  %v5101_v5 = vpack.c.bf16 %v2344_v59, %v2328_v58 }
 0x310   : > { %v2490_v58 = vld [vmem:[%s7828_s29 + $0x750] sm:$0xff] }
 0x311   : > { %4954 = vmatpush1.bf16.msra.mxu0 %v4953_v6  ;;  %v5229_v6 = vpack.c.bf16 %v2346_v62, %v2330_v60  ;;  %v2506_v60 = vld [vmem:[%s7828_s29 + $0x7d0] sm:$0xff]  ;;  %v2537_v62 = vld [vmem:[%s7828_s29 + $0x8c8] sm:$0xff] }
 0x312   : > { %5082 = vmatpush1.bf16.msra.mxu1 %v5081_v7  ;;  %4956 = vmatprep.subr.bf16.mxu0 %v4955_v8  ;;  %v5103_v7 = vpack.c.bf16 %v2377_v2, %v2361_v63  ;;  %v2360_v8 = vld [vmem:[%s7828_s29 + $0x340] sm:$0xff]  ;;  %v2523_v63 = vld [vmem:[%s7828_s29 + $0x858] sm:$0xff]  ;;  %v5249_v4 = vpack.c.bf16 %v2506_v60, %v2490_v58  ;;  %v2666_v58 = vld [vmem:[%s7828_s29 + $0xcd0] sm:$0xff] }
 0x313   : > { %5084 = vmatprep.subr.bf16.mxu1 %v5083_v12  ;;  %v2378_v12 = vld [vmem:[%s7828_s29 + $0x3d0] sm:$0xff]  ;;  %v5105_v17 = vpack.c.bf16 %v2376_v9, %v2360_v8  ;;  %v2539_v2 = vld [vmem:[%s7828_s29 + $0x8d8] sm:$0xff]  ;;  %v2697_v60 = vld [vmem:[%s7828_s29 + $0xdc8] sm:$0xff] }
 0x314   : > { %v2522_v8 = vld [vmem:[%s7828_s29 + $0x850] sm:$0xff]  ;;  %v5251_v9 = vpack.c.bf16 %v2539_v2, %v2523_v63 }
 0x315   : > { %4958 = vmatpush1.bf16.msra.mxu0 %v4957_v18  ;;  %v5233_v18 = vpack.c.bf16 %v2378_v12, %v2362_v10  ;;  %v2538_v10 = vld [vmem:[%s7828_s29 + $0x8d0] sm:$0xff]  ;;  %v2569_v12 = vld [vmem:[%s7828_s29 + $0x9c8] sm:$0xff] }
 0x316   : > { %5086 = vmatpush1.bf16.msra.mxu1 %v5085_v19  ;;  %4960 = vmatprep.subr.bf16.mxu0 %v4959_v20  ;;  %v5107_v19 = vpack.c.bf16 %v2409_v14, %v2393_v13  ;;  %v2392_v20 = vld [vmem:[%s7828_s29 + $0x440] sm:$0xff]  ;;  %v2555_v13 = vld [vmem:[%s7828_s29 + $0x958] sm:$0xff]  ;;  %v5253_v16 = vpack.c.bf16 %v2538_v10, %v2522_v8  ;;  %v2698_v8 = vld [vmem:[%s7828_s29 + $0xdd0] sm:$0xff] }
 0x317   : > { %5088 = vmatprep.subr.bf16.mxu1 %v5087_v24  ;;  %v2410_v24 = vld [vmem:[%s7828_s29 + $0x4d0] sm:$0xff]  ;;  %v5109_v31 = vpack.c.bf16 %v2408_v21, %v2392_v20  ;;  %v2571_v14 = vld [vmem:[%s7828_s29 + $0x9d8] sm:$0xff]  ;;  %v2729_v10 = vld [vmem:[%s7828_s29 + $0xec8] sm:$0xff] }
 0x318   : > { %v2554_v20 = vld [vmem:[%s7828_s29 + $0x950] sm:$0xff]  ;;  %v5255_v21 = vpack.c.bf16 %v2571_v14, %v2555_v13 }
 0x319   : > { %4962 = vmatpush1.bf16.msra.mxu0 %v4961_v32  ;;  %v5237_v32 = vpack.c.bf16 %v2410_v24, %v2394_v22  ;;  %v2570_v22 = vld [vmem:[%s7828_s29 + $0x9d0] sm:$0xff]  ;;  %v2601_v24 = vld [vmem:[%s7828_s29 + $0xac8] sm:$0xff] }
 0x31a   : > { %5090 = vmatpush1.bf16.msra.mxu1 %v5089_v33  ;;  %5092 = vmatprep.subr.bf16.mxu0 %v5091_v34  ;;  %v5111_v33 = vpack.c.bf16 %v2441_v27, %v2425_v26  ;;  %v2424_v34 = vld [vmem:[%s7828_s29 + $0x540] sm:$0xff]  ;;  %v2587_v26 = vld [vmem:[%s7828_s29 + $0xa58] sm:$0xff]  ;;  %v5257_v29 = vpack.c.bf16 %v2570_v22, %v2554_v20  ;;  %v2730_v20 = vld [vmem:[%s7828_s29 + $0xed0] sm:$0xff] }
 0x31b   : > { %5220 = vmatprep.subr.bf16.mxu1 %v5219_v38  ;;  %v2442_v38 = vld [vmem:[%s7828_s29 + $0x5d0] sm:$0xff]  ;;  %v5113_v43 = vpack.c.bf16 %v2440_v35, %v2424_v34  ;;  %v2603_v27 = vld [vmem:[%s7828_s29 + $0xad8] sm:$0xff]  ;;  %v2761_v22 = vld [vmem:[%s7828_s29 + $0xfc8] sm:$0xff] }
 0x31c   : > { %3706 = vmatmul.mubr.f32.vlgmr.msra.gmra.mrb[2].mxu0 %v5662_v52  ;;  %v2586_v34 = vld [vmem:[%s7828_s29 + $0xa50] sm:$0xff]  ;;  %v5259_v35 = vpack.c.bf16 %v2603_v27, %v2587_v26 }
 0x31d   : > { %3848 = vmatmul.mubr.f32.vlgmr.msra.gmra.mrb[2].mxu1 %v5662_v52  ;;  %5094 = vmatpush1.bf16.msra.mxu0 %v5093_v0  ;;  %v5241_v0 = vpack.c.bf16 %v2442_v38, %v2426_v36  ;;  %v2507_v52 = vld [vmem:[%s7828_s29 + $0x7d8] sm:$0xff]  ;;  %v2602_v36 = vld [vmem:[%s7828_s29 + $0xad0] sm:$0xff]  ;;  %v2633_v38 = vld [vmem:[%s7828_s29 + $0xbc8] sm:$0xff] }
 0x31e   : > { %5222 = vmatpush1.bf16.msra.mxu1 %v5221_v44  ;;  %5096 = vmatprep.subr.bf16.mxu0 %v5095_v45  ;;  %v5115_v44 = vpack.c.bf16 %v2473_v40, %v2457_v39  ;;  %v2456_v45 = vld [vmem:[%s7828_s29 + $0x640] sm:$0xff]  ;;  %v5247_v59 = vpack.c.bf16 %v2507_v52, %v2491_v25  ;;  %v2619_v39 = vld [vmem:[%s7828_s29 + $0xb58] sm:$0xff]  ;;  %v5261_v42 = vpack.c.bf16 %v2602_v36, %v2586_v34  ;;  %v2762_v34 = vld [vmem:[%s7828_s29 + $0xfd0] sm:$0xff] }
 0x31f   : > { %5224 = vmatprep.subr.bf16.mxu1 %v5223_v49  ;;  %3918 = vmatprep.mubr.f32.mxu0 %v7826_v1  ;;  %v2474_v49 = vld [vmem:[%s7828_s29 + $0x6d0] sm:$0xff]  ;;  %v5117_v53 = vpack.c.bf16 %v2472_v46, %v2456_v45  ;;  %v2635_v40 = vld [vmem:[%s7828_s29 + $0xbd8] sm:$0xff]  ;;  %v2793_v36 = vld [vmem:[%s7828_s29 + $0x10c8] sm:$0xff] }
 0x320   : > { %4060 = vmatprep.mubr.f32.mxu1 %v7826_v1  ;;  %v5245_v54 = vpack.c.bf16 %v2474_v49, %v2458_v47  ;;  %v2618_v45 = vld [vmem:[%s7828_s29 + $0xb50] sm:$0xff]  ;;  %v5263_v46 = vpack.c.bf16 %v2635_v40, %v2619_v39  ;;  %v2665_v49 = vld [vmem:[%s7828_s29 + $0xcc8] sm:$0xff] }
 0x321   : > { %5098 = vmatpush1.bf16.msra.mxu0 %v5097_v55  ;;  %v5119_v55 = vpack.c.bf16 %v2505_v51, %v2489_v50  ;;  %v2634_v47 = vld [vmem:[%s7828_s29 + $0xbd0] sm:$0xff]  ;;  %v2651_v50 = vld [vmem:[%s7828_s29 + $0xc58] sm:$0xff] }
 0x322   : > { %5226 = vmatpush1.bf16.msra.mxu1 %v5225_v56  ;;  %5100 = vmatprep.subr.bf16.mxu0 %v5099_v57  ;;  %v2488_v56 = vld [vmem:[%s7828_s29 + $0x740] sm:$0xff]  ;;  %v2667_v51 = vld [vmem:[%s7828_s29 + $0xcd8] sm:$0xff]  ;;  %v5265_v52 = vpack.c.bf16 %v2634_v47, %v2618_v45  ;;  %v2794_v45 = vld [vmem:[%s7828_s29 + $0x10d0] sm:$0xff] }
 0x323   : > { %5228 = vmatprep.subr.bf16.mxu1 %v5227_v61  ;;  %v2504_v57 = vld [vmem:[%s7828_s29 + $0x7c0] sm:$0xff]  ;;  %v2521_v61 = vld [vmem:[%s7828_s29 + $0x848] sm:$0xff] }
 0x324   : > { %v5121_v3 = vpack.c.bf16 %v2504_v57, %v2488_v56  ;;  %v2650_v56 = vld [vmem:[%s7828_s29 + $0xc50] sm:$0xff]  ;;  %v5267_v57 = vpack.c.bf16 %v2667_v51, %v2651_v50  ;;  %v2825_v47 = vld [vmem:[%s7828_s29 + $0x11c8] sm:$0xff] }
 0x325   : > { %5102 = vmatpush1.bf16.msra.mxu0 %v5101_v5  ;;  %v5123_v5 = vpack.c.bf16 %v2537_v62, %v2521_v61  ;;  %v2683_v61 = vld [vmem:[%s7828_s29 + $0xd58] sm:$0xff]  ;;  %v5269_v2 = vpack.c.bf16 %v2666_v58, %v2650_v56  ;;  %v2826_v56 = vld [vmem:[%s7828_s29 + $0x11d0] sm:$0xff]  ;;  %v2857_v58 = vld [vmem:[%s7828_s29 + $0x12c8] sm:$0xff] }
 0x326   : > { %5230 = vmatpush1.bf16.msra.mxu1 %v5229_v6  ;;  %5104 = vmatprep.subr.bf16.mxu0 %v5103_v7  ;;  %v2520_v6 = vld [vmem:[%s7828_s29 + $0x840] sm:$0xff]  ;;  %v2699_v62 = vld [vmem:[%s7828_s29 + $0xdd8] sm:$0xff] }
 0x327   : > { %5232 = vmatprep.subr.bf16.mxu1 %v5231_v11  ;;  %v2536_v7 = vld [vmem:[%s7828_s29 + $0x8c0] sm:$0xff]  ;;  %v2553_v11 = vld [vmem:[%s7828_s29 + $0x948] sm:$0xff] }
 0x328   : > { %v5125_v15 = vpack.c.bf16 %v2536_v7, %v2520_v6  ;;  %v2682_v6 = vld [vmem:[%s7828_s29 + $0xd50] sm:$0xff]  ;;  %v5271_v7 = vpack.c.bf16 %v2699_v62, %v2683_v61  ;;  %v2859_v61 = vld [vmem:[%s7828_s29 + $0x12d8] sm:$0xff] }
 0x329   : > { %5106 = vmatpush1.bf16.msra.mxu0 %v5105_v17  ;;  %v5127_v17 = vpack.c.bf16 %v2569_v12, %v2553_v11  ;;  %v2715_v11 = vld [vmem:[%s7828_s29 + $0xe58] sm:$0xff]  ;;  %v5273_v14 = vpack.c.bf16 %v2698_v8, %v2682_v6  ;;  %v2873_v8 = vld [vmem:[%s7828_s29 + $0x1348] sm:$0xff] }
 0x32a   : > { %5234 = vmatpush1.bf16.msra.mxu1 %v5233_v18  ;;  %5108 = vmatprep.subr.bf16.mxu0 %v5107_v19  ;;  %v2552_v18 = vld [vmem:[%s7828_s29 + $0x940] sm:$0xff]  ;;  %v2731_v12 = vld [vmem:[%s7828_s29 + $0xed8] sm:$0xff] }
 0x32b   : > { %5236 = vmatprep.subr.bf16.mxu1 %v5235_v23  ;;  %v2568_v19 = vld [vmem:[%s7828_s29 + $0x9c0] sm:$0xff]  ;;  %v2585_v23 = vld [vmem:[%s7828_s29 + $0xa48] sm:$0xff] }
 0x32c   : > { %v5129_v28 = vpack.c.bf16 %v2568_v19, %v2552_v18  ;;  %v2714_v18 = vld [vmem:[%s7828_s29 + $0xe50] sm:$0xff]  ;;  %v5275_v19 = vpack.c.bf16 %v2731_v12, %v2715_v11  ;;  %v2891_v11 = vld [vmem:[%s7828_s29 + $0x13d8] sm:$0xff] }
 0x32d   : > { %5110 = vmatpush1.bf16.msra.mxu0 %v5109_v31  ;;  %v5131_v31 = vpack.c.bf16 %v2601_v24, %v2585_v23  ;;  %v2747_v23 = vld [vmem:[%s7828_s29 + $0xf58] sm:$0xff]  ;;  %v5277_v27 = vpack.c.bf16 %v2730_v20, %v2714_v18  ;;  %v2905_v20 = vld [vmem:[%s7828_s29 + $0x1448] sm:$0xff] }
 0x32e   : > { %5238 = vmatpush1.bf16.msra.mxu1 %v5237_v32  ;;  %5112 = vmatprep.subr.bf16.mxu0 %v5111_v33  ;;  %v2584_v32 = vld [vmem:[%s7828_s29 + $0xa40] sm:$0xff]  ;;  %v2763_v24 = vld [vmem:[%s7828_s29 + $0xfd8] sm:$0xff] }
 0x32f   : > { %5240 = vmatprep.subr.bf16.mxu1 %v5239_v37  ;;  %v2600_v33 = vld [vmem:[%s7828_s29 + $0xac0] sm:$0xff]  ;;  %v2617_v37 = vld [vmem:[%s7828_s29 + $0xb48] sm:$0xff] }
 0x330   : > { %v5133_v41 = vpack.c.bf16 %v2600_v33, %v2584_v32  ;;  %v2746_v32 = vld [vmem:[%s7828_s29 + $0xf50] sm:$0xff]  ;;  %v5279_v33 = vpack.c.bf16 %v2763_v24, %v2747_v23  ;;  %v2923_v23 = vld [vmem:[%s7828_s29 + $0x14d8] sm:$0xff] }
 0x331   : > { %5114 = vmatpush1.bf16.msra.mxu0 %v5113_v43  ;;  %v5135_v43 = vpack.c.bf16 %v2633_v38, %v2617_v37  ;;  %v2779_v37 = vld [vmem:[%s7828_s29 + $0x1058] sm:$0xff]  ;;  %v5281_v40 = vpack.c.bf16 %v2762_v34, %v2746_v32  ;;  %v2937_v34 = vld [vmem:[%s7828_s29 + $0x1548] sm:$0xff] }
 0x332   : > { %5242 = vmatpush1.bf16.msra.mxu1 %v5241_v0  ;;  %5116 = vmatprep.subr.bf16.mxu0 %v5115_v44  ;;  %v2616_v0 = vld [vmem:[%s7828_s29 + $0xb40] sm:$0xff]  ;;  %v2795_v38 = vld [vmem:[%s7828_s29 + $0x10d8] sm:$0xff] }
 0x333   : > { %5244 = vmatprep.subr.bf16.mxu1 %v5243_v48  ;;  %v2632_v44 = vld [vmem:[%s7828_s29 + $0xbc0] sm:$0xff]  ;;  %v2649_v48 = vld [vmem:[%s7828_s29 + $0xc48] sm:$0xff] }
 0x334   : > { %v5137_v25 = vpack.c.bf16 %v2632_v44, %v2616_v0  ;;  %v2778_v0 = vld [vmem:[%s7828_s29 + $0x1050] sm:$0xff]  ;;  %v5283_v44 = vpack.c.bf16 %v2795_v38, %v2779_v37  ;;  %v2955_v37 = vld [vmem:[%s7828_s29 + $0x15d8] sm:$0xff] }
 0x335   : > { %5118 = vmatpush1.bf16.msra.mxu0 %v5117_v53  ;;  %v5139_v53 = vpack.c.bf16 %v2665_v49, %v2649_v48  ;;  %v2811_v48 = vld [vmem:[%s7828_s29 + $0x1158] sm:$0xff]  ;;  %v5285_v51 = vpack.c.bf16 %v2794_v45, %v2778_v0  ;;  %v2969_v45 = vld [vmem:[%s7828_s29 + $0x1648] sm:$0xff] }
 0x336   : > { %5246 = vmatpush1.bf16.msra.mxu1 %v5245_v54  ;;  %5120 = vmatprep.subr.bf16.mxu0 %v5119_v55  ;;  %v2648_v54 = vld [vmem:[%s7828_s29 + $0xc40] sm:$0xff]  ;;  %v2827_v49 = vld [vmem:[%s7828_s29 + $0x11d8] sm:$0xff] }
 0x337   : > { %5248 = vmatprep.subr.bf16.mxu1 %v5247_v59  ;;  %v2664_v55 = vld [vmem:[%s7828_s29 + $0xcc0] sm:$0xff]  ;;  %v2681_v59 = vld [vmem:[%s7828_s29 + $0xd48] sm:$0xff] }
 0x338   : > { %v5141_v63 = vpack.c.bf16 %v2664_v55, %v2648_v54  ;;  %v2810_v54 = vld [vmem:[%s7828_s29 + $0x1150] sm:$0xff]  ;;  %v5287_v55 = vpack.c.bf16 %v2827_v49, %v2811_v48  ;;  %v2987_v48 = vld [vmem:[%s7828_s29 + $0x16d8] sm:$0xff] }
 0x339   : > { %5122 = vmatpush1.bf16.msra.mxu0 %v5121_v3  ;;  %v5143_v3 = vpack.c.bf16 %v2697_v60, %v2681_v59  ;;  %v5663_v59 = vld [vmem:[%s8942_s0] sm:$0xff]  ;;  %v2843_v60 = vld [vmem:[%s7828_s29 + $0x1258] sm:$0xff] }
 0x33a   : > { %5250 = vmatpush1.bf16.msra.mxu1 %v5249_v4  ;;  %5124 = vmatprep.subr.bf16.mxu0 %v5123_v5  ;;  %v2680_v4 = vld [vmem:[%s7828_s29 + $0xd40] sm:$0xff]  ;;  %v5291_v6 = vpack.c.bf16 %v2859_v61, %v2843_v60  ;;  %v3003_v61 = vld [vmem:[%s7828_s29 + $0x1758] sm:$0xff] }
 0x33b   : > { %5252 = vmatprep.subr.bf16.mxu1 %v5251_v9  ;;  %v2696_v5 = vld [vmem:[%s7828_s29 + $0xdc0] sm:$0xff]  ;;  %v2713_v9 = vld [vmem:[%s7828_s29 + $0xe48] sm:$0xff] }
 0x33c   : > { %v5145_v13 = vpack.c.bf16 %v2696_v5, %v2680_v4  ;;  %v2856_v4 = vld [vmem:[%s7828_s29 + $0x12c0] sm:$0xff]  ;;  %v2842_v5 = vld [vmem:[%s7828_s29 + $0x1250] sm:$0xff] }
 0x33d   : > { %5126 = vmatpush1.bf16.msra.mxu0 %v5125_v15  ;;  %v5147_v15 = vpack.c.bf16 %v2729_v10, %v2713_v9  ;;  %v2889_v9 = vld [vmem:[%s7828_s29 + $0x13c8] sm:$0xff]  ;;  %v2875_v10 = vld [vmem:[%s7828_s29 + $0x1358] sm:$0xff] }
 0x33e   : > { %5254 = vmatpush1.bf16.msra.mxu1 %v5253_v16  ;;  %5128 = vmatprep.subr.bf16.mxu0 %v5127_v17  ;;  %v2712_v16 = vld [vmem:[%s7828_s29 + $0xe40] sm:$0xff]  ;;  %v5295_v18 = vpack.c.bf16 %v2891_v11, %v2875_v10  ;;  %v3018_v11 = vld [vmem:[%s7828_s29 + $0x17d0] sm:$0xff] }
 0x33f   : > { %5256 = vmatprep.subr.bf16.mxu1 %v5255_v21  ;;  %v2728_v17 = vld [vmem:[%s7828_s29 + $0xec0] sm:$0xff]  ;;  %v2745_v21 = vld [vmem:[%s7828_s29 + $0xf48] sm:$0xff] }
 0x340   : > { %v5149_v26 = vpack.c.bf16 %v2728_v17, %v2712_v16  ;;  %v2888_v16 = vld [vmem:[%s7828_s29 + $0x13c0] sm:$0xff]  ;;  %v2874_v17 = vld [vmem:[%s7828_s29 + $0x1350] sm:$0xff] }
 0x341   : > { %5130 = vmatpush1.bf16.msra.mxu0 %v5129_v28  ;;  %v5151_v28 = vpack.c.bf16 %v2761_v22, %v2745_v21  ;;  %v2921_v21 = vld [vmem:[%s7828_s29 + $0x14c8] sm:$0xff]  ;;  %v2907_v22 = vld [vmem:[%s7828_s29 + $0x1458] sm:$0xff] }
 0x342   : > { %5258 = vmatpush1.bf16.msra.mxu1 %v5257_v29  ;;  %5132 = vmatprep.subr.bf16.mxu0 %v5131_v31  ;;  %v2744_v29 = vld [vmem:[%s7828_s29 + $0xf40] sm:$0xff]  ;;  %v5299_v32 = vpack.c.bf16 %v2923_v23, %v2907_v22  ;;  %v3050_v23 = vld [vmem:[%s7828_s29 + $0x18d0] sm:$0xff] }
 0x343   : > { %5260 = vmatprep.subr.bf16.mxu1 %v5259_v35  ;;  %v2760_v31 = vld [vmem:[%s7828_s29 + $0xfc0] sm:$0xff]  ;;  %v2777_v35 = vld [vmem:[%s7828_s29 + $0x1048] sm:$0xff] }
 0x344   : > { %v5153_v39 = vpack.c.bf16 %v2760_v31, %v2744_v29  ;;  %v2920_v29 = vld [vmem:[%s7828_s29 + $0x14c0] sm:$0xff]  ;;  %v2906_v31 = vld [vmem:[%s7828_s29 + $0x1450] sm:$0xff] }
 0x345   : > { %5134 = vmatpush1.bf16.msra.mxu0 %v5133_v41  ;;  %v5155_v41 = vpack.c.bf16 %v2793_v36, %v2777_v35  ;;  %v2953_v35 = vld [vmem:[%s7828_s29 + $0x15c8] sm:$0xff]  ;;  %v2939_v36 = vld [vmem:[%s7828_s29 + $0x1558] sm:$0xff] }
 0x346   : > { %5262 = vmatpush1.bf16.msra.mxu1 %v5261_v42  ;;  %5136 = vmatprep.subr.bf16.mxu0 %v5135_v43  ;;  %v2776_v42 = vld [vmem:[%s7828_s29 + $0x1040] sm:$0xff]  ;;  %v5303_v0 = vpack.c.bf16 %v2955_v37, %v2939_v36  ;;  %v3082_v37 = vld [vmem:[%s7828_s29 + $0x19d0] sm:$0xff] }
 0x347   : > { %5264 = vmatprep.subr.bf16.mxu1 %v5263_v46  ;;  %v2792_v43 = vld [vmem:[%s7828_s29 + $0x10c0] sm:$0xff]  ;;  %v2809_v46 = vld [vmem:[%s7828_s29 + $0x1148] sm:$0xff] }
 0x348   : > { %v5157_v50 = vpack.c.bf16 %v2792_v43, %v2776_v42  ;;  %v2952_v42 = vld [vmem:[%s7828_s29 + $0x15c0] sm:$0xff]  ;;  %v2938_v43 = vld [vmem:[%s7828_s29 + $0x1550] sm:$0xff] }
 0x349   : > { %5138 = vmatpush1.bf16.msra.mxu0 %v5137_v25  ;;  %v5159_v25 = vpack.c.bf16 %v2825_v47, %v2809_v46  ;;  %v2985_v46 = vld [vmem:[%s7828_s29 + $0x16c8] sm:$0xff]  ;;  %v2971_v47 = vld [vmem:[%s7828_s29 + $0x1658] sm:$0xff] }
 0x34a   : > { %5266 = vmatpush1.bf16.msra.mxu1 %v5265_v52  ;;  %5140 = vmatprep.subr.bf16.mxu0 %v5139_v53  ;;  %v2808_v52 = vld [vmem:[%s7828_s29 + $0x1140] sm:$0xff] }
 0x34b   : > { %5268 = vmatprep.subr.bf16.mxu1 %v5267_v57  ;;  %v2824_v53 = vld [vmem:[%s7828_s29 + $0x11c0] sm:$0xff]  ;;  %v2841_v57 = vld [vmem:[%s7828_s29 + $0x1248] sm:$0xff] }
 0x34c   : > { %v5161_v62 = vpack.c.bf16 %v2824_v53, %v2808_v52  ;;  %v2984_v52 = vld [vmem:[%s7828_s29 + $0x16c0] sm:$0xff]  ;;  %v2970_v53 = vld [vmem:[%s7828_s29 + $0x1650] sm:$0xff] }
 0x34d   : > { %5142 = vmatpush1.bf16.msra.mxu0 %v5141_v63  ;;  %v5289_v63 = vpack.c.bf16 %v2826_v56, %v2810_v54  ;;  %v2986_v56 = vld [vmem:[%s7828_s29 + $0x16d0] sm:$0xff] }
 0x34e   : > { %5270 = vmatpush1.bf16.msra.mxu1 %v5269_v2  ;;  %5144 = vmatprep.subr.bf16.mxu0 %v5143_v3  ;;  %v5163_v2 = vpack.c.bf16 %v2857_v58, %v2841_v57  ;;  %v2840_v3 = vld [vmem:[%s7828_s29 + $0x1240] sm:$0xff]  ;;  %v3001_v57 = vld [vmem:[%s7828_s29 + $0x1748] sm:$0xff] }
 0x34f   : > { %5272 = vmatprep.subr.bf16.mxu1 %v5271_v7  ;;  %v2858_v7 = vld [vmem:[%s7828_s29 + $0x12d0] sm:$0xff]  ;;  %v5165_v12 = vpack.c.bf16 %v2856_v4, %v2840_v3  ;;  %v3017_v58 = vld [vmem:[%s7828_s29 + $0x17c8] sm:$0xff] }
 0x351   : > { %5146 = vmatpush1.bf16.msra.mxu0 %v5145_v13  ;;  %v5293_v13 = vpack.c.bf16 %v2858_v7, %v2842_v5  ;;  %v5309_v5 = vpack.c.bf16 %v2986_v56, %v2970_v53  ;;  %v3000_v7 = vld [vmem:[%s7828_s29 + $0x1740] sm:$0xff] }
 0x352   : > { %5274 = vmatpush1.bf16.msra.mxu1 %v5273_v14  ;;  %5148 = vmatprep.subr.bf16.mxu0 %v5147_v15  ;;  %v5167_v14 = vpack.c.bf16 %v2889_v9, %v2873_v8  ;;  %v2872_v15 = vld [vmem:[%s7828_s29 + $0x1340] sm:$0xff]  ;;  %v3002_v9 = vld [vmem:[%s7828_s29 + $0x1750] sm:$0xff] }
 0x353   : > { %5276 = vmatprep.subr.bf16.mxu1 %v5275_v19  ;;  %v2890_v19 = vld [vmem:[%s7828_s29 + $0x13d0] sm:$0xff]  ;;  %v5169_v24 = vpack.c.bf16 %v2888_v16, %v2872_v15  ;;  %v3016_v8 = vld [vmem:[%s7828_s29 + $0x17c0] sm:$0xff]  ;;  %v3051_v15 = vld [vmem:[%s7828_s29 + $0x18d8] sm:$0xff] }
 0x354   : > { %v5185_v16 = vpack.c.bf16 %v3016_v8, %v3000_v7  ;;  %v3144_v56 = vld [vmem:[%s7828_s29 + $0x1bc0] sm:$0xff]  ;;  %v3162_v7 = vld [vmem:[%s7828_s29 + $0x1c50] sm:$0xff] }
 0x355   : > { %5150 = vmatpush1.bf16.msra.mxu0 %v5149_v26  ;;  %v5297_v26 = vpack.c.bf16 %v2890_v19, %v2874_v17  ;;  %v5313_v17 = vpack.c.bf16 %v3018_v11, %v3002_v9  ;;  %v3032_v19 = vld [vmem:[%s7828_s29 + $0x1840] sm:$0xff]  ;;  %v3178_v9 = vld [vmem:[%s7828_s29 + $0x1cd0] sm:$0xff]  ;;  %v3209_v11 = vld [vmem:[%s7828_s29 + $0x1dc8] sm:$0xff] }
 0x356   : > { %5278 = vmatpush1.bf16.msra.mxu1 %v5277_v27  ;;  %5152 = vmatprep.subr.bf16.mxu0 %v5151_v28  ;;  %v5171_v27 = vpack.c.bf16 %v2921_v21, %v2905_v20  ;;  %v2904_v28 = vld [vmem:[%s7828_s29 + $0x1440] sm:$0xff]  ;;  %v3034_v21 = vld [vmem:[%s7828_s29 + $0x1850] sm:$0xff] }
 0x357   : > { %5280 = vmatprep.subr.bf16.mxu1 %v5279_v33  ;;  %v2922_v33 = vld [vmem:[%s7828_s29 + $0x14d0] sm:$0xff]  ;;  %v5173_v38 = vpack.c.bf16 %v2920_v29, %v2904_v28  ;;  %v3048_v20 = vld [vmem:[%s7828_s29 + $0x18c0] sm:$0xff]  ;;  %v3083_v28 = vld [vmem:[%s7828_s29 + $0x19d8] sm:$0xff] }
 0x358   : > { %v5189_v29 = vpack.c.bf16 %v3048_v20, %v3032_v19  ;;  %v3194_v19 = vld [vmem:[%s7828_s29 + $0x1d50] sm:$0xff] }
 0x359   : > { %5154 = vmatpush1.bf16.msra.mxu0 %v5153_v39  ;;  %v5301_v39 = vpack.c.bf16 %v2922_v33, %v2906_v31  ;;  %v5317_v31 = vpack.c.bf16 %v3050_v23, %v3034_v21  ;;  %v3064_v33 = vld [vmem:[%s7828_s29 + $0x1940] sm:$0xff]  ;;  %v3210_v21 = vld [vmem:[%s7828_s29 + $0x1dd0] sm:$0xff]  ;;  %v3241_v23 = vld [vmem:[%s7828_s29 + $0x1ec8] sm:$0xff] }
 0x35a   : > { %5282 = vmatpush1.bf16.msra.mxu1 %v5281_v40  ;;  %5156 = vmatprep.subr.bf16.mxu0 %v5155_v41  ;;  %v5175_v40 = vpack.c.bf16 %v2953_v35, %v2937_v34  ;;  %v2936_v41 = vld [vmem:[%s7828_s29 + $0x1540] sm:$0xff]  ;;  %v3066_v35 = vld [vmem:[%s7828_s29 + $0x1950] sm:$0xff] }
 0x35b   : > { %5284 = vmatprep.subr.bf16.mxu1 %v5283_v44  ;;  %v2954_v44 = vld [vmem:[%s7828_s29 + $0x15d0] sm:$0xff]  ;;  %v5177_v49 = vpack.c.bf16 %v2952_v42, %v2936_v41  ;;  %v3080_v34 = vld [vmem:[%s7828_s29 + $0x19c0] sm:$0xff]  ;;  %v3115_v41 = vld [vmem:[%s7828_s29 + $0x1ad8] sm:$0xff] }
 0x35c   : > { %3919 = vmatmul.mubr.f32.vlgmr.msra.gmra.mrb[4].mxu0 %v5663_v59  ;;  %v5193_v42 = vpack.c.bf16 %v3080_v34, %v3064_v33  ;;  %v3226_v33 = vld [vmem:[%s7828_s29 + $0x1e50] sm:$0xff] }
 0x35d   : > { %5158 = vmatpush1.bf16.msra.mxu0 %v5157_v50  ;;  %4061 = vmatmul.mubr.f32.vlgmr.msra.gmra.mrb[4].mxu1 %v5663_v59  ;;  %v5305_v50 = vpack.c.bf16 %v2954_v44, %v2938_v43  ;;  %v5321_v43 = vpack.c.bf16 %v3082_v37, %v3066_v35  ;;  %v3096_v44 = vld [vmem:[%s7828_s29 + $0x1a40] sm:$0xff]  ;;  %v3242_v35 = vld [vmem:[%s7828_s29 + $0x1ed0] sm:$0xff]  ;;  %v3273_v37 = vld [vmem:[%s7828_s29 + $0x1fc8] sm:$0xff] }
 0x35e   : > { %5286 = vmatpush1.bf16.msra.mxu1 %v5285_v51  ;;  %5160 = vmatprep.subr.bf16.mxu0 %v5159_v25  ;;  %v5179_v51 = vpack.c.bf16 %v2985_v46, %v2969_v45  ;;  %v2968_v25 = vld [vmem:[%s7828_s29 + $0x1640] sm:$0xff]  ;;  %v3098_v46 = vld [vmem:[%s7828_s29 + $0x1a50] sm:$0xff] }
 0x35f   : > { %5288 = vmatprep.subr.bf16.mxu1 %v5287_v55  ;;  %3989 = vmatprep.mubr.f32.mxu0 %v8027_v30  ;;  %v5307_v55 = vpack.c.bf16 %v2987_v48, %v2971_v47  ;;  %v5181_v3 = vpack.c.bf16 %v2984_v52, %v2968_v25  ;;  %v3112_v45 = vld [vmem:[%s7828_s29 + $0x1ac0] sm:$0xff]  ;;  %v3114_v48 = vld [vmem:[%s7828_s29 + $0x1ad0] sm:$0xff]  ;;  %v3147_v25 = vld [vmem:[%s7828_s29 + $0x1bd8] sm:$0xff] }
 0x360   : > { %4131 = vmatprep.mubr.f32.mxu1 %v8027_v30  ;;  %v5197_v52 = vpack.c.bf16 %v3112_v45, %v3096_v44  ;;  %v5325_v53 = vpack.c.bf16 %v3114_v48, %v3098_v46  ;;  %v3258_v44 = vld [vmem:[%s7828_s29 + $0x1f50] sm:$0xff]  ;;  %v2285_v48 = vld [vmem:[%s7828_s29 + $0xe8] sm:$0xff] }
 0x361   : > { %5162 = vmatpush1.bf16.msra.mxu0 %v5161_v62  ;;  %v3019_v62 = vld [vmem:[%s7828_s29 + $0x17d8] sm:$0xff]  ;;  %v3274_v46 = vld [vmem:[%s7828_s29 + $0x1fd0] sm:$0xff] }
 0x362   : > { %5290 = vmatpush1.bf16.msra.mxu1 %v5289_v63  ;;  %5164 = vmatprep.subr.bf16.mxu0 %v5163_v2  ;;  %v5311_v10 = vpack.c.bf16 %v3019_v62, %v3003_v61  ;;  %v3177_v61 = vld [vmem:[%s7828_s29 + $0x1cc8] sm:$0xff]  ;;  %v3163_v62 = vld [vmem:[%s7828_s29 + $0x1c58] sm:$0xff] }
 0x363   : > { %5292 = vmatprep.subr.bf16.mxu1 %v5291_v6  ;;  %v5183_v6 = vpack.c.bf16 %v3017_v58, %v3001_v57  ;;  %v3130_v57 = vld [vmem:[%s7828_s29 + $0x1b50] sm:$0xff] }
 0x365   : > { %5166 = vmatpush1.bf16.msra.mxu0 %v5165_v12  ;;  %v3033_v12 = vld [vmem:[%s7828_s29 + $0x1848] sm:$0xff] }
 0x366   : > { %5294 = vmatpush1.bf16.msra.mxu1 %v5293_v13  ;;  %5168 = vmatprep.subr.bf16.mxu0 %v5167_v14  ;;  %v3049_v13 = vld [vmem:[%s7828_s29 + $0x18c8] sm:$0xff]  ;;  %v3035_v14 = vld [vmem:[%s7828_s29 + $0x1858] sm:$0xff] }
 0x367   : > { %5296 = vmatprep.subr.bf16.mxu1 %v5295_v18  ;;  %v5187_v18 = vpack.c.bf16 %v3049_v13, %v3033_v12  ;;  %v5315_v22 = vpack.c.bf16 %v3051_v15, %v3035_v14  ;;  %v3195_v12 = vld [vmem:[%s7828_s29 + $0x1d58] sm:$0xff]  ;;  %v5333_v15 = vpack.c.bf16 %v3178_v9, %v3162_v7  ;;  %v2318_v7 = vld [vmem:[%s7828_s29 + $0x1f0] sm:$0xff]  ;;  %v2349_v9 = vld [vmem:[%s7828_s29 + $0x2e8] sm:$0xff] }
 0x368   : > { %v3211_v13 = vld [vmem:[%s7828_s29 + $0x1dd8] sm:$0xff] }
 0x369   : > { %5170 = vmatpush1.bf16.msra.mxu0 %v5169_v24  ;;  %v3065_v24 = vld [vmem:[%s7828_s29 + $0x1948] sm:$0xff]  ;;  %v5335_v20 = vpack.c.bf16 %v3211_v13, %v3195_v12  ;;  %v2351_v12 = vld [vmem:[%s7828_s29 + $0x2f8] sm:$0xff] }
 0x36a   : > { %5298 = vmatpush1.bf16.msra.mxu1 %v5297_v26  ;;  %5172 = vmatprep.subr.bf16.mxu0 %v5171_v27  ;;  %v3081_v26 = vld [vmem:[%s7828_s29 + $0x19c8] sm:$0xff]  ;;  %v3067_v27 = vld [vmem:[%s7828_s29 + $0x1958] sm:$0xff] }
 0x36b   : > { %5300 = vmatprep.subr.bf16.mxu1 %v5299_v32  ;;  %v5191_v32 = vpack.c.bf16 %v3081_v26, %v3065_v24  ;;  %v5319_v36 = vpack.c.bf16 %v3083_v28, %v3067_v27  ;;  %v3227_v24 = vld [vmem:[%s7828_s29 + $0x1e58] sm:$0xff]  ;;  %v5337_v28 = vpack.c.bf16 %v3210_v21, %v3194_v19  ;;  %v2365_v21 = vld [vmem:[%s7828_s29 + $0x368] sm:$0xff] }
 0x36c   : > { %v3243_v26 = vld [vmem:[%s7828_s29 + $0x1ed8] sm:$0xff] }
 0x36d   : > { %5174 = vmatpush1.bf16.msra.mxu0 %v5173_v38  ;;  %v3097_v38 = vld [vmem:[%s7828_s29 + $0x1a48] sm:$0xff]  ;;  %v5339_v34 = vpack.c.bf16 %v3243_v26, %v3227_v24  ;;  %v2383_v24 = vld [vmem:[%s7828_s29 + $0x3f8] sm:$0xff] }
 0x36e   : > { %5302 = vmatpush1.bf16.msra.mxu1 %v5301_v39  ;;  %5176 = vmatprep.subr.bf16.mxu0 %v5175_v40  ;;  %v3113_v39 = vld [vmem:[%s7828_s29 + $0x1ac8] sm:$0xff]  ;;  %v3099_v40 = vld [vmem:[%s7828_s29 + $0x1a58] sm:$0xff] }
 0x36f   : > { %v3423_v54 = vpop.f32.mrb[0].mxu0  ;;  %5304 = vmatprep.subr.bf16.mxu1 %v5303_v0  ;;  %v5195_v0 = vpack.c.bf16 %v3113_v39, %v3097_v38  ;;  %v5323_v47 = vpack.c.bf16 %v3115_v41, %v3099_v40  ;;  %v3259_v38 = vld [vmem:[%s7828_s29 + $0x1f58] sm:$0xff]  ;;  %v5341_v41 = vpack.c.bf16 %v3242_v35, %v3226_v33  ;;  %v2397_v35 = vld [vmem:[%s7828_s29 + $0x468] sm:$0xff] }
 0x370   : > { %v3565_v59 = vpop.f32.mrb[0].mxu1  ;;  %v3425_v60 = vpop.f32.mrb[1].mxu0  ;;  %v3275_v39 = vld [vmem:[%s7828_s29 + $0x1fd8] sm:$0xff] }
 0x371   : > { %v4438_v63 = vcombine.low %v3423_v54, %v3425_v60  ;;  %v3567_v2 = vpop.f32.mrb[1].mxu1  ;;  %5178 = vmatpush1.bf16.msra.mxu0 %v5177_v49  ;;  %v3129_v49 = vld [vmem:[%s7828_s29 + $0x1b48] sm:$0xff]  ;;  %v5343_v45 = vpack.c.bf16 %v3275_v39, %v3259_v38 }
 0x372   : > { %v4439_v4 = vcombine.low %v3565_v59, %v3567_v2  ;;  %5306 = vmatpush1.bf16.msra.mxu1 %v5305_v50  ;;  %5180 = vmatprep.subr.bf16.mxu0 %v5179_v51  ;;  %v3145_v50 = vld [vmem:[%s7828_s29 + $0x1bc8] sm:$0xff]  ;;  %v3131_v51 = vld [vmem:[%s7828_s29 + $0x1b58] sm:$0xff]  ;;  %v3146_v59 = vld [vmem:[%s7828_s29 + $0x1bd0] sm:$0xff] }
 0x373   : > { %4454 = vst [vmem:[%s8575_s20] sm:$0xff] %v4438_v63  ;;  %5308 = vmatprep.subr.bf16.mxu1 %v5307_v55  ;;  %v5199_v54 = vpack.c.bf16 %v3145_v50, %v3129_v49  ;;  %v3128_v55 = vld [vmem:[%s7828_s29 + $0x1b40] sm:$0xff]  ;;  %v5327_v58 = vpack.c.bf16 %v3147_v25, %v3131_v51  ;;  %v3161_v60 = vld [vmem:[%s7828_s29 + $0x1c48] sm:$0xff]  ;;  %v3179_v63 = vld [vmem:[%s7828_s29 + $0x1cd8] sm:$0xff]  ;;  %v5345_v25 = vpack.c.bf16 %v3274_v46, %v3258_v44 }
 0x374   : > { %4455 = vst [vmem:[%s8575_s20 + $0x8] sm:$0xff] %v4439_v4  ;;  %v5201_v2 = vpack.c.bf16 %v3144_v56, %v3128_v55  ;;  %v5203_v4 = vpack.c.bf16 %v3177_v61, %v3161_v60  ;;  %v5331_v8 = vpack.c.bf16 %v3179_v63, %v3163_v62  ;;  %v2271_v49 = vld [vmem:[%s7828_s29 + $0x78] sm:$0xff]  ;;  %v2270_v55 = vld [vmem:[%s7828_s29 + $0x70] sm:$0xff]  ;;  %v2445_v46 = vld [vmem:[%s7828_s29 + $0x5e8] sm:$0xff] }
 0x375   : > { %5182 = vmatpush1.bf16.msra.mxu0 %v5181_v3  ;;  %v5329_v3 = vpack.c.bf16 %v3146_v59, %v3130_v57  ;;  %v2287_v50 = vld [vmem:[%s7828_s29 + $0xf8] sm:$0xff]  ;;  %v2286_v57 = vld [vmem:[%s7828_s29 + $0xf0] sm:$0xff]  ;;  %v2317_v59 = vld [vmem:[%s7828_s29 + $0x1e8] sm:$0xff] }
 0x376   : > { %5310 = vmatpush1.bf16.msra.mxu1 %v5309_v5  ;;  %5184 = vmatprep.subr.bf16.mxu0 %v5183_v6  ;;  %v3160_v5 = vld [vmem:[%s7828_s29 + $0x1c40] sm:$0xff]  ;;  %v5475_v56 = vpack.c.bf16 %v2287_v50, %v2271_v49  ;;  %v2303_v60 = vld [vmem:[%s7828_s29 + $0x178] sm:$0xff]  ;;  %v5477_v63 = vpack.c.bf16 %v2286_v57, %v2270_v55  ;;  %v2414_v44 = vld [vmem:[%s7828_s29 + $0x4f0] sm:$0xff] }
 0x377   : > { %5312 = vmatprep.subr.bf16.mxu1 %v5311_v10  ;;  %v3176_v6 = vld [vmem:[%s7828_s29 + $0x1cc0] sm:$0xff]  ;;  %v3193_v10 = vld [vmem:[%s7828_s29 + $0x1d48] sm:$0xff]  ;;  %v2319_v61 = vld [vmem:[%s7828_s29 + $0x1f8] sm:$0xff] }
 0x378   : > { %v5205_v14 = vpack.c.bf16 %v3176_v6, %v3160_v5  ;;  %v2302_v5 = vld [vmem:[%s7828_s29 + $0x170] sm:$0xff]  ;;  %v5479_v6 = vpack.c.bf16 %v2319_v61, %v2303_v60  ;;  %v2477_v57 = vld [vmem:[%s7828_s29 + $0x6e8] sm:$0xff] }
 0x379   : > { %5186 = vmatpush1.bf16.msra.mxu0 %v5185_v16  ;;  %v5207_v16 = vpack.c.bf16 %v3209_v11, %v3193_v10  ;;  %v8670_v10 = vld [vmem:[%s8942_s0 + $0x8] sm:$0xff]  ;;  %v2335_v11 = vld [vmem:[%s7828_s29 + $0x278] sm:$0xff]  ;;  %v2446_v55 = vld [vmem:[%s7828_s29 + $0x5f0] sm:$0xff] }
 0x37a   : > { %5314 = vmatpush1.bf16.msra.mxu1 %v5313_v17  ;;  %5188 = vmatprep.subr.bf16.mxu0 %v5187_v18  ;;  %v3192_v17 = vld [vmem:[%s7828_s29 + $0x1d40] sm:$0xff]  ;;  %v5483_v19 = vpack.c.bf16 %v2351_v12, %v2335_v11 }
 0x37b   : > { %5316 = vmatprep.subr.bf16.mxu1 %v5315_v22  ;;  %v3208_v18 = vld [vmem:[%s7828_s29 + $0x1dc0] sm:$0xff]  ;;  %v3225_v22 = vld [vmem:[%s7828_s29 + $0x1e48] sm:$0xff] }
 0x37c   : > { %v5209_v27 = vpack.c.bf16 %v3208_v18, %v3192_v17  ;;  %v2348_v17 = vld [vmem:[%s7828_s29 + $0x2e0] sm:$0xff]  ;;  %v2334_v18 = vld [vmem:[%s7828_s29 + $0x270] sm:$0xff] }
 0x37d   : > { %5190 = vmatpush1.bf16.msra.mxu0 %v5189_v29  ;;  %v5211_v29 = vpack.c.bf16 %v3241_v23, %v3225_v22  ;;  %v2381_v22 = vld [vmem:[%s7828_s29 + $0x3e8] sm:$0xff]  ;;  %v2367_v23 = vld [vmem:[%s7828_s29 + $0x378] sm:$0xff] }
 0x37e   : > { %5318 = vmatpush1.bf16.msra.mxu1 %v5317_v31  ;;  %5192 = vmatprep.subr.bf16.mxu0 %v5191_v32  ;;  %v3224_v31 = vld [vmem:[%s7828_s29 + $0x1e40] sm:$0xff]  ;;  %v5487_v33 = vpack.c.bf16 %v2383_v24, %v2367_v23 }
 0x37f   : > { %5320 = vmatprep.subr.bf16.mxu1 %v5319_v36  ;;  %v3240_v32 = vld [vmem:[%s7828_s29 + $0x1ec0] sm:$0xff]  ;;  %v3257_v36 = vld [vmem:[%s7828_s29 + $0x1f48] sm:$0xff] }
 0x380   : > { %v5213_v40 = vpack.c.bf16 %v3240_v32, %v3224_v31  ;;  %v2380_v31 = vld [vmem:[%s7828_s29 + $0x3e0] sm:$0xff]  ;;  %v2366_v32 = vld [vmem:[%s7828_s29 + $0x370] sm:$0xff] }
 0x381   : > { %5194 = vmatpush1.bf16.msra.mxu0 %v5193_v42  ;;  %v5215_v42 = vpack.c.bf16 %v3273_v37, %v3257_v36  ;;  %v2399_v36 = vld [vmem:[%s7828_s29 + $0x478] sm:$0xff] }
 0x382   : > { %5322 = vmatpush1.bf16.msra.mxu1 %v5321_v43  ;;  %5196 = vmatprep.subr.bf16.mxu0 %v5195_v0  ;;  %v3256_v43 = vld [vmem:[%s7828_s29 + $0x1f40] sm:$0xff]  ;;  %v2415_v37 = vld [vmem:[%s7828_s29 + $0x4f8] sm:$0xff] }
 0x383   : > { %5324 = vmatprep.subr.bf16.mxu1 %v5323_v47  ;;  %v3272_v0 = vld [vmem:[%s7828_s29 + $0x1fc0] sm:$0xff]  ;;  %v2269_v47 = vld [vmem:[%s7828_s29 + $0x68] sm:$0xff] }
 0x384   : > { %v5217_v51 = vpack.c.bf16 %v3272_v0, %v3256_v43  ;;  %v2398_v43 = vld [vmem:[%s7828_s29 + $0x470] sm:$0xff]  ;;  %v5491_v0 = vpack.c.bf16 %v2415_v37, %v2399_v36 }
 0x385   : > { %5198 = vmatpush1.bf16.msra.mxu0 %v5197_v52  ;;  %v5347_v52 = vpack.c.bf16 %v2285_v48, %v2269_v47  ;;  %v2431_v47 = vld [vmem:[%s7828_s29 + $0x578] sm:$0xff]  ;;  %v5493_v50 = vpack.c.bf16 %v2414_v44, %v2398_v43  ;;  %v2574_v43 = vld [vmem:[%s7828_s29 + $0x9f0] sm:$0xff]  ;;  %v2605_v44 = vld [vmem:[%s7828_s29 + $0xae8] sm:$0xff] }
 0x386   : > { %5326 = vmatpush1.bf16.msra.mxu1 %v5325_v53  ;;  %5200 = vmatprep.subr.bf16.mxu0 %v5199_v54  ;;  %v2268_v53 = vld [vmem:[%s7828_s29 + $0x60] sm:$0xff]  ;;  %v2447_v48 = vld [vmem:[%s7828_s29 + $0x5f8] sm:$0xff] }
 0x387   : > { %5328 = vmatprep.subr.bf16.mxu1 %v5327_v58  ;;  %v2284_v54 = vld [vmem:[%s7828_s29 + $0xe0] sm:$0xff]  ;;  %v2301_v58 = vld [vmem:[%s7828_s29 + $0x168] sm:$0xff] }
 0x388   : > { %v5349_v62 = vpack.c.bf16 %v2284_v54, %v2268_v53  ;;  %v2430_v53 = vld [vmem:[%s7828_s29 + $0x570] sm:$0xff]  ;;  %v5495_v54 = vpack.c.bf16 %v2447_v48, %v2431_v47 }
 0x389   : > { %5202 = vmatpush1.bf16.msra.mxu0 %v5201_v2  ;;  %v5351_v2 = vpack.c.bf16 %v2317_v59, %v2301_v58  ;;  %v2463_v58 = vld [vmem:[%s7828_s29 + $0x678] sm:$0xff]  ;;  %v5497_v61 = vpack.c.bf16 %v2446_v55, %v2430_v53  ;;  %v2606_v53 = vld [vmem:[%s7828_s29 + $0xaf0] sm:$0xff]  ;;  %v2637_v55 = vld [vmem:[%s7828_s29 + $0xbe8] sm:$0xff] }
 0x38a   : > { %5330 = vmatpush1.bf16.msra.mxu1 %v5329_v3  ;;  %5204 = vmatprep.subr.bf16.mxu0 %v5203_v4  ;;  %v2300_v3 = vld [vmem:[%s7828_s29 + $0x160] sm:$0xff]  ;;  %v2479_v59 = vld [vmem:[%s7828_s29 + $0x6f8] sm:$0xff] }
 0x38b   : > { %5332 = vmatprep.subr.bf16.mxu1 %v5331_v8  ;;  %v2316_v4 = vld [vmem:[%s7828_s29 + $0x1e0] sm:$0xff]  ;;  %v2333_v8 = vld [vmem:[%s7828_s29 + $0x268] sm:$0xff] }
 0x38c   : > { %v5353_v13 = vpack.c.bf16 %v2316_v4, %v2300_v3  ;;  %v2462_v3 = vld [vmem:[%s7828_s29 + $0x670] sm:$0xff]  ;;  %v5499_v4 = vpack.c.bf16 %v2479_v59, %v2463_v58 }
 0x38d   : > { %5206 = vmatpush1.bf16.msra.mxu0 %v5205_v14  ;;  %v5481_v14 = vpack.c.bf16 %v2318_v7, %v2302_v5  ;;  %v2478_v5 = vld [vmem:[%s7828_s29 + $0x6f0] sm:$0xff]  ;;  %v2509_v7 = vld [vmem:[%s7828_s29 + $0x7e8] sm:$0xff] }
 0x38e   : > { %5334 = vmatpush1.bf16.msra.mxu1 %v5333_v15  ;;  %5208 = vmatprep.subr.bf16.mxu0 %v5207_v16  ;;  %v5355_v15 = vpack.c.bf16 %v2349_v9, %v2333_v8  ;;  %v2332_v16 = vld [vmem:[%s7828_s29 + $0x260] sm:$0xff]  ;;  %v2495_v8 = vld [vmem:[%s7828_s29 + $0x778] sm:$0xff]  ;;  %v5501_v12 = vpack.c.bf16 %v2478_v5, %v2462_v3  ;;  %v2638_v3 = vld [vmem:[%s7828_s29 + $0xbf0] sm:$0xff] }
 0x38f   : > { %5336 = vmatprep.subr.bf16.mxu1 %v5335_v20  ;;  %v2350_v20 = vld [vmem:[%s7828_s29 + $0x2f0] sm:$0xff]  ;;  %v5357_v26 = vpack.c.bf16 %v2348_v17, %v2332_v16  ;;  %v2511_v9 = vld [vmem:[%s7828_s29 + $0x7f8] sm:$0xff]  ;;  %v2669_v5 = vld [vmem:[%s7828_s29 + $0xce8] sm:$0xff] }
 0x390   : > { %v2494_v16 = vld [vmem:[%s7828_s29 + $0x770] sm:$0xff]  ;;  %v5503_v17 = vpack.c.bf16 %v2511_v9, %v2495_v8 }
 0x391   : > { %5210 = vmatpush1.bf16.msra.mxu0 %v5209_v27  ;;  %v5485_v27 = vpack.c.bf16 %v2350_v20, %v2334_v18  ;;  %v2510_v18 = vld [vmem:[%s7828_s29 + $0x7f0] sm:$0xff]  ;;  %v2541_v20 = vld [vmem:[%s7828_s29 + $0x8e8] sm:$0xff] }
 0x392   : > { %5338 = vmatpush1.bf16.msra.mxu1 %v5337_v28  ;;  %5212 = vmatprep.subr.bf16.mxu0 %v5211_v29  ;;  %v5359_v28 = vpack.c.bf16 %v2381_v22, %v2365_v21  ;;  %v2364_v29 = vld [vmem:[%s7828_s29 + $0x360] sm:$0xff]  ;;  %v2527_v21 = vld [vmem:[%s7828_s29 + $0x878] sm:$0xff]  ;;  %v5505_v24 = vpack.c.bf16 %v2510_v18, %v2494_v16  ;;  %v2670_v16 = vld [vmem:[%s7828_s29 + $0xcf0] sm:$0xff] }
 0x393   : > { %5340 = vmatprep.subr.bf16.mxu1 %v5339_v34  ;;  %v2382_v34 = vld [vmem:[%s7828_s29 + $0x3f0] sm:$0xff]  ;;  %v5361_v38 = vpack.c.bf16 %v2380_v31, %v2364_v29  ;;  %v2543_v22 = vld [vmem:[%s7828_s29 + $0x8f8] sm:$0xff]  ;;  %v2701_v18 = vld [vmem:[%s7828_s29 + $0xde8] sm:$0xff] }
 0x394   : > { %v5489_v39 = vpack.c.bf16 %v2382_v34, %v2366_v32  ;;  %v2526_v29 = vld [vmem:[%s7828_s29 + $0x870] sm:$0xff]  ;;  %v5507_v31 = vpack.c.bf16 %v2543_v22, %v2527_v21  ;;  %v2573_v34 = vld [vmem:[%s7828_s29 + $0x9e8] sm:$0xff] }
 0x395   : > { %5214 = vmatpush1.bf16.msra.mxu0 %v5213_v40  ;;  %v2542_v32 = vld [vmem:[%s7828_s29 + $0x8f0] sm:$0xff] }
 0x396   : > { %5342 = vmatpush1.bf16.msra.mxu1 %v5341_v41  ;;  %5216 = vmatprep.subr.bf16.mxu0 %v5215_v42  ;;  %v2396_v41 = vld [vmem:[%s7828_s29 + $0x460] sm:$0xff]  ;;  %v5509_v37 = vpack.c.bf16 %v2542_v32, %v2526_v29  ;;  %v2702_v29 = vld [vmem:[%s7828_s29 + $0xdf0] sm:$0xff]  ;;  %v2733_v32 = vld [vmem:[%s7828_s29 + $0xee8] sm:$0xff] }
 0x397   : > { %5344 = vmatprep.subr.bf16.mxu1 %v5343_v45  ;;  %v2412_v42 = vld [vmem:[%s7828_s29 + $0x4e0] sm:$0xff]  ;;  %v2429_v45 = vld [vmem:[%s7828_s29 + $0x568] sm:$0xff] }
 0x398   : > { %v5365_v49 = vpack.c.bf16 %v2412_v42, %v2396_v41  ;;  %v2558_v41 = vld [vmem:[%s7828_s29 + $0x970] sm:$0xff] }
 0x399   : > { %5218 = vmatpush1.bf16.msra.mxu0 %v5217_v51  ;;  %v5367_v51 = vpack.c.bf16 %v2445_v46, %v2429_v45  ;;  %v2591_v45 = vld [vmem:[%s7828_s29 + $0xa78] sm:$0xff]  ;;  %v5513_v48 = vpack.c.bf16 %v2574_v43, %v2558_v41  ;;  %v2734_v41 = vld [vmem:[%s7828_s29 + $0xef0] sm:$0xff]  ;;  %v2765_v43 = vld [vmem:[%s7828_s29 + $0xfe8] sm:$0xff] }
 0x39a   : > { %5346 = vmatpush1.bf16.msra.mxu1 %v5345_v25  ;;  %5348 = vmatprep.subr.bf16.mxu0 %v5347_v52  ;;  %v2428_v25 = vld [vmem:[%s7828_s29 + $0x560] sm:$0xff]  ;;  %v2607_v46 = vld [vmem:[%s7828_s29 + $0xaf8] sm:$0xff] }
 0x39b   : > { %5476 = vmatprep.subr.bf16.mxu1 %v5475_v56  ;;  %v2444_v52 = vld [vmem:[%s7828_s29 + $0x5e0] sm:$0xff]  ;;  %v2461_v56 = vld [vmem:[%s7828_s29 + $0x668] sm:$0xff] }
 0x39c   : > { %3990 = vmatmul.mubr.f32.vlgmr.msra.gmra.mrb[4].mxu0 %v8670_v10  ;;  %v5369_v60 = vpack.c.bf16 %v2444_v52, %v2428_v25  ;;  %v2590_v25 = vld [vmem:[%s7828_s29 + $0xa70] sm:$0xff]  ;;  %v5515_v52 = vpack.c.bf16 %v2607_v46, %v2591_v45 }
 0x39d   : > { %4132 = vmatmul.mubr.f32.vlgmr.msra.gmra.mrb[4].mxu1 %v8670_v10  ;;  %5350 = vmatpush1.bf16.msra.mxu0 %v5349_v62  ;;  %v5371_v62 = vpack.c.bf16 %v2477_v57, %v2461_v56  ;;  %v2623_v56 = vld [vmem:[%s7828_s29 + $0xb78] sm:$0xff]  ;;  %v5517_v59 = vpack.c.bf16 %v2606_v53, %v2590_v25  ;;  %v2766_v25 = vld [vmem:[%s7828_s29 + $0xff0] sm:$0xff]  ;;  %v2797_v53 = vld [vmem:[%s7828_s29 + $0x10e8] sm:$0xff] }
 0x39e   : > { %5478 = vmatpush1.bf16.msra.mxu1 %v5477_v63  ;;  %5352 = vmatprep.subr.bf16.mxu0 %v5351_v2  ;;  %v2460_v63 = vld [vmem:[%s7828_s29 + $0x660] sm:$0xff]  ;;  %v2639_v57 = vld [vmem:[%s7828_s29 + $0xbf8] sm:$0xff] }
 0x39f   : > { %5480 = vmatprep.subr.bf16.mxu1 %v5479_v6  ;;  %4202 = vmatprep.mubr.f32.mxu0 %v7826_v1  ;;  %v2476_v2 = vld [vmem:[%s7828_s29 + $0x6e0] sm:$0xff]  ;;  %v2493_v6 = vld [vmem:[%s7828_s29 + $0x768] sm:$0xff] }
 0x3a0   : > { %4344 = vmatprep.mubr.f32.mxu1 %v7826_v1  ;;  %v2413_v1 = vld [vmem:[%s7828_s29 + $0x4e8] sm:$0xff]  ;;  %v5373_v11 = vpack.c.bf16 %v2476_v2, %v2460_v63  ;;  %v2622_v63 = vld [vmem:[%s7828_s29 + $0xb70] sm:$0xff]  ;;  %v5519_v2 = vpack.c.bf16 %v2639_v57, %v2623_v56 }
 0x3a1   : > { %5354 = vmatpush1.bf16.msra.mxu0 %v5353_v13  ;;  %v5363_v40 = vpack.c.bf16 %v2413_v1, %v2397_v35  ;;  %v5375_v13 = vpack.c.bf16 %v2509_v7, %v2493_v6  ;;  %v2559_v35 = vld [vmem:[%s7828_s29 + $0x978] sm:$0xff]  ;;  %v5521_v9 = vpack.c.bf16 %v2638_v3, %v2622_v63  ;;  %v2798_v63 = vld [vmem:[%s7828_s29 + $0x10f0] sm:$0xff]  ;;  %v2829_v3 = vld [vmem:[%s7828_s29 + $0x11e8] sm:$0xff] }
 0x3a2   : > { %5482 = vmatpush1.bf16.msra.mxu1 %v5481_v14  ;;  %5356 = vmatprep.subr.bf16.mxu0 %v5355_v15  ;;  %v2492_v14 = vld [vmem:[%s7828_s29 + $0x760] sm:$0xff]  ;;  %v2575_v1 = vld [vmem:[%s7828_s29 + $0x9f8] sm:$0xff] }
 0x3a3   : > { %5484 = vmatprep.subr.bf16.mxu1 %v5483_v19  ;;  %v2508_v15 = vld [vmem:[%s7828_s29 + $0x7e0] sm:$0xff]  ;;  %v2525_v19 = vld [vmem:[%s7828_s29 + $0x868] sm:$0xff]  ;;  %v5511_v42 = vpack.c.bf16 %v2575_v1, %v2559_v35  ;;  %v2655_v6 = vld [vmem:[%s7828_s29 + $0xc78] sm:$0xff] }
 0x3a4   : > { %v5377_v23 = vpack.c.bf16 %v2508_v15, %v2492_v14  ;;  %v2671_v7 = vld [vmem:[%s7828_s29 + $0xcf8] sm:$0xff]  ;;  %v2654_v14 = vld [vmem:[%s7828_s29 + $0xc70] sm:$0xff] }
 0x3a5   : > { %5358 = vmatpush1.bf16.msra.mxu0 %v5357_v26  ;;  %v5379_v26 = vpack.c.bf16 %v2541_v20, %v2525_v19  ;;  %v5523_v15 = vpack.c.bf16 %v2671_v7, %v2655_v6  ;;  %v2687_v19 = vld [vmem:[%s7828_s29 + $0xd78] sm:$0xff]  ;;  %v5525_v22 = vpack.c.bf16 %v2670_v16, %v2654_v14  ;;  %v2830_v14 = vld [vmem:[%s7828_s29 + $0x11f0] sm:$0xff]  ;;  %v2861_v16 = vld [vmem:[%s7828_s29 + $0x12e8] sm:$0xff] }
 0x3a6   : > { %5486 = vmatpush1.bf16.msra.mxu1 %v5485_v27  ;;  %5360 = vmatprep.subr.bf16.mxu0 %v5359_v28  ;;  %v2524_v27 = vld [vmem:[%s7828_s29 + $0x860] sm:$0xff]  ;;  %v2703_v20 = vld [vmem:[%s7828_s29 + $0xdf8] sm:$0xff] }
 0x3a7   : > { %5488 = vmatprep.subr.bf16.mxu1 %v5487_v33  ;;  %v2540_v28 = vld [vmem:[%s7828_s29 + $0x8e0] sm:$0xff]  ;;  %v2557_v33 = vld [vmem:[%s7828_s29 + $0x968] sm:$0xff] }
 0x3a8   : > { %v5381_v36 = vpack.c.bf16 %v2540_v28, %v2524_v27  ;;  %v2686_v27 = vld [vmem:[%s7828_s29 + $0xd70] sm:$0xff]  ;;  %v5527_v28 = vpack.c.bf16 %v2703_v20, %v2687_v19  ;;  %v2863_v19 = vld [vmem:[%s7828_s29 + $0x12f8] sm:$0xff] }
 0x3a9   : > { %5362 = vmatpush1.bf16.msra.mxu0 %v5361_v38  ;;  %v5383_v38 = vpack.c.bf16 %v2573_v34, %v2557_v33  ;;  %v2719_v33 = vld [vmem:[%s7828_s29 + $0xe78] sm:$0xff]  ;;  %v5529_v1 = vpack.c.bf16 %v2702_v29, %v2686_v27  ;;  %v2877_v29 = vld [vmem:[%s7828_s29 + $0x1368] sm:$0xff] }
 0x3aa   : > { %5490 = vmatpush1.bf16.msra.mxu1 %v5489_v39  ;;  %5364 = vmatprep.subr.bf16.mxu0 %v5363_v40  ;;  %v2556_v39 = vld [vmem:[%s7828_s29 + $0x960] sm:$0xff]  ;;  %v2735_v34 = vld [vmem:[%s7828_s29 + $0xef8] sm:$0xff] }
 0x3ab   : > { %5492 = vmatprep.subr.bf16.mxu1 %v5491_v0  ;;  %v2572_v40 = vld [vmem:[%s7828_s29 + $0x9e0] sm:$0xff]  ;;  %v2589_v0 = vld [vmem:[%s7828_s29 + $0xa68] sm:$0xff] }
 0x3ac   : > { %v5385_v47 = vpack.c.bf16 %v2572_v40, %v2556_v39  ;;  %v2718_v39 = vld [vmem:[%s7828_s29 + $0xe70] sm:$0xff]  ;;  %v5531_v40 = vpack.c.bf16 %v2735_v34, %v2719_v33  ;;  %v2895_v33 = vld [vmem:[%s7828_s29 + $0x13f8] sm:$0xff] }
 0x3ad   : > { %5366 = vmatpush1.bf16.msra.mxu0 %v5365_v49  ;;  %v5387_v49 = vpack.c.bf16 %v2605_v44, %v2589_v0  ;;  %v2751_v0 = vld [vmem:[%s7828_s29 + $0xf78] sm:$0xff]  ;;  %v5533_v46 = vpack.c.bf16 %v2734_v41, %v2718_v39  ;;  %v2909_v41 = vld [vmem:[%s7828_s29 + $0x1468] sm:$0xff] }
 0x3ae   : > { %5494 = vmatpush1.bf16.msra.mxu1 %v5493_v50  ;;  %5368 = vmatprep.subr.bf16.mxu0 %v5367_v51  ;;  %v2588_v50 = vld [vmem:[%s7828_s29 + $0xa60] sm:$0xff]  ;;  %v2767_v44 = vld [vmem:[%s7828_s29 + $0xff8] sm:$0xff] }
 0x3af   : > { %5496 = vmatprep.subr.bf16.mxu1 %v5495_v54  ;;  %v2604_v51 = vld [vmem:[%s7828_s29 + $0xae0] sm:$0xff]  ;;  %v2621_v54 = vld [vmem:[%s7828_s29 + $0xb68] sm:$0xff] }
 0x3b0   : > { %v5389_v58 = vpack.c.bf16 %v2604_v51, %v2588_v50  ;;  %v2750_v50 = vld [vmem:[%s7828_s29 + $0xf70] sm:$0xff]  ;;  %v5535_v51 = vpack.c.bf16 %v2767_v44, %v2751_v0 }
 0x3b1   : > { %5370 = vmatpush1.bf16.msra.mxu0 %v5369_v60  ;;  %v5391_v60 = vpack.c.bf16 %v2637_v55, %v2621_v54  ;;  %v2783_v54 = vld [vmem:[%s7828_s29 + $0x1078] sm:$0xff]  ;;  %v5537_v57 = vpack.c.bf16 %v2766_v25, %v2750_v50  ;;  %v2926_v50 = vld [vmem:[%s7828_s29 + $0x14f0] sm:$0xff]  ;;  %v2957_v25 = vld [vmem:[%s7828_s29 + $0x15e8] sm:$0xff] }
 0x3b2   : > { %5498 = vmatpush1.bf16.msra.mxu1 %v5497_v61  ;;  %5372 = vmatprep.subr.bf16.mxu0 %v5371_v62  ;;  %v2620_v61 = vld [vmem:[%s7828_s29 + $0xb60] sm:$0xff]  ;;  %v2799_v55 = vld [vmem:[%s7828_s29 + $0x10f8] sm:$0xff] }
 0x3b3   : > { %5500 = vmatprep.subr.bf16.mxu1 %v5499_v4  ;;  %v2636_v62 = vld [vmem:[%s7828_s29 + $0xbe0] sm:$0xff]  ;;  %v2653_v4 = vld [vmem:[%s7828_s29 + $0xc68] sm:$0xff] }
 0x3b4   : > { %v5393_v8 = vpack.c.bf16 %v2636_v62, %v2620_v61  ;;  %v2782_v61 = vld [vmem:[%s7828_s29 + $0x1070] sm:$0xff]  ;;  %v5539_v62 = vpack.c.bf16 %v2799_v55, %v2783_v54 }
 0x3b5   : > { %5374 = vmatpush1.bf16.msra.mxu0 %v5373_v11  ;;  %v5395_v11 = vpack.c.bf16 %v2669_v5, %v2653_v4  ;;  %v2815_v4 = vld [vmem:[%s7828_s29 + $0x1178] sm:$0xff]  ;;  %v5541_v7 = vpack.c.bf16 %v2798_v63, %v2782_v61  ;;  %v2958_v61 = vld [vmem:[%s7828_s29 + $0x15f0] sm:$0xff]  ;;  %v2989_v63 = vld [vmem:[%s7828_s29 + $0x16e8] sm:$0xff] }
 0x3b6   : > { %5502 = vmatpush1.bf16.msra.mxu1 %v5501_v12  ;;  %5376 = vmatprep.subr.bf16.mxu0 %v5375_v13  ;;  %v2652_v12 = vld [vmem:[%s7828_s29 + $0xc60] sm:$0xff]  ;;  %v2831_v5 = vld [vmem:[%s7828_s29 + $0x11f8] sm:$0xff] }
 0x3b7   : > { %5504 = vmatprep.subr.bf16.mxu1 %v5503_v17  ;;  %v2668_v13 = vld [vmem:[%s7828_s29 + $0xce0] sm:$0xff]  ;;  %v2685_v17 = vld [vmem:[%s7828_s29 + $0xd68] sm:$0xff] }
 0x3b8   : > { %v5397_v21 = vpack.c.bf16 %v2668_v13, %v2652_v12  ;;  %v2814_v12 = vld [vmem:[%s7828_s29 + $0x1170] sm:$0xff]  ;;  %v5543_v13 = vpack.c.bf16 %v2831_v5, %v2815_v4 }
 0x3b9   : > { %5378 = vmatpush1.bf16.msra.mxu0 %v5377_v23  ;;  %v5399_v23 = vpack.c.bf16 %v2701_v18, %v2685_v17  ;;  %v5665_v17 = vld [vmem:[%s8942_s0] sm:$0xff]  ;;  %v2847_v18 = vld [vmem:[%s7828_s29 + $0x1278] sm:$0xff] }
 0x3ba   : > { %5506 = vmatpush1.bf16.msra.mxu1 %v5505_v24  ;;  %5380 = vmatprep.subr.bf16.mxu0 %v5379_v26  ;;  %v2684_v24 = vld [vmem:[%s7828_s29 + $0xd60] sm:$0xff]  ;;  %v5547_v27 = vpack.c.bf16 %v2863_v19, %v2847_v18  ;;  %v3007_v18 = vld [vmem:[%s7828_s29 + $0x1778] sm:$0xff] }
 0x3bb   : > { %5508 = vmatprep.subr.bf16.mxu1 %v5507_v31  ;;  %v2700_v26 = vld [vmem:[%s7828_s29 + $0xde0] sm:$0xff]  ;;  %v2717_v31 = vld [vmem:[%s7828_s29 + $0xe68] sm:$0xff]  ;;  %v3023_v19 = vld [vmem:[%s7828_s29 + $0x17f8] sm:$0xff] }
 0x3bc   : > { %v5401_v35 = vpack.c.bf16 %v2700_v26, %v2684_v24  ;;  %v2860_v24 = vld [vmem:[%s7828_s29 + $0x12e0] sm:$0xff]  ;;  %v2846_v26 = vld [vmem:[%s7828_s29 + $0x1270] sm:$0xff] }
 0x3bd   : > { %5382 = vmatpush1.bf16.msra.mxu0 %v5381_v36  ;;  %v5403_v36 = vpack.c.bf16 %v2733_v32, %v2717_v31  ;;  %v2893_v31 = vld [vmem:[%s7828_s29 + $0x13e8] sm:$0xff]  ;;  %v2879_v32 = vld [vmem:[%s7828_s29 + $0x1378] sm:$0xff] }
 0x3be   : > { %5510 = vmatpush1.bf16.msra.mxu1 %v5509_v37  ;;  %5384 = vmatprep.subr.bf16.mxu0 %v5383_v38  ;;  %v2716_v37 = vld [vmem:[%s7828_s29 + $0xe60] sm:$0xff]  ;;  %v5551_v39 = vpack.c.bf16 %v2895_v33, %v2879_v32  ;;  %v3022_v32 = vld [vmem:[%s7828_s29 + $0x17f0] sm:$0xff]  ;;  %v3037_v33 = vld [vmem:[%s7828_s29 + $0x1868] sm:$0xff] }
 0x3bf   : > { %5512 = vmatprep.subr.bf16.mxu1 %v5511_v42  ;;  %v2732_v38 = vld [vmem:[%s7828_s29 + $0xee0] sm:$0xff]  ;;  %v2749_v42 = vld [vmem:[%s7828_s29 + $0xf68] sm:$0xff] }
 0x3c0   : > { %v5405_v45 = vpack.c.bf16 %v2732_v38, %v2716_v37  ;;  %v2892_v37 = vld [vmem:[%s7828_s29 + $0x13e0] sm:$0xff]  ;;  %v2878_v38 = vld [vmem:[%s7828_s29 + $0x1370] sm:$0xff] }
 0x3c1   : > { %5386 = vmatpush1.bf16.msra.mxu0 %v5385_v47  ;;  %v5407_v47 = vpack.c.bf16 %v2765_v43, %v2749_v42  ;;  %v2911_v42 = vld [vmem:[%s7828_s29 + $0x1478] sm:$0xff] }
 0x3c2   : > { %5514 = vmatpush1.bf16.msra.mxu1 %v5513_v48  ;;  %5388 = vmatprep.subr.bf16.mxu0 %v5387_v49  ;;  %v2748_v48 = vld [vmem:[%s7828_s29 + $0xf60] sm:$0xff]  ;;  %v2927_v43 = vld [vmem:[%s7828_s29 + $0x14f8] sm:$0xff] }
 0x3c3   : > { %5516 = vmatprep.subr.bf16.mxu1 %v5515_v52  ;;  %v2764_v49 = vld [vmem:[%s7828_s29 + $0xfe0] sm:$0xff]  ;;  %v2781_v52 = vld [vmem:[%s7828_s29 + $0x1068] sm:$0xff] }
 0x3c4   : > { %v5409_v56 = vpack.c.bf16 %v2764_v49, %v2748_v48  ;;  %v2910_v48 = vld [vmem:[%s7828_s29 + $0x1470] sm:$0xff]  ;;  %v5555_v49 = vpack.c.bf16 %v2927_v43, %v2911_v42  ;;  %v3069_v43 = vld [vmem:[%s7828_s29 + $0x1968] sm:$0xff] }
 0x3c5   : > { %5390 = vmatpush1.bf16.msra.mxu0 %v5389_v58  ;;  %v5411_v58 = vpack.c.bf16 %v2797_v53, %v2781_v52  ;;  %v2943_v52 = vld [vmem:[%s7828_s29 + $0x1578] sm:$0xff]  ;;  %v5557_v55 = vpack.c.bf16 %v2926_v50, %v2910_v48  ;;  %v3054_v42 = vld [vmem:[%s7828_s29 + $0x18f0] sm:$0xff]  ;;  %v3084_v50 = vld [vmem:[%s7828_s29 + $0x19e0] sm:$0xff] }
 0x3c6   : > { %5518 = vmatpush1.bf16.msra.mxu1 %v5517_v59  ;;  %5392 = vmatprep.subr.bf16.mxu0 %v5391_v60  ;;  %v2780_v59 = vld [vmem:[%s7828_s29 + $0x1060] sm:$0xff]  ;;  %v2959_v53 = vld [vmem:[%s7828_s29 + $0x15f8] sm:$0xff] }
 0x3c7   : > { %5520 = vmatprep.subr.bf16.mxu1 %v5519_v2  ;;  %v2796_v60 = vld [vmem:[%s7828_s29 + $0x10e0] sm:$0xff]  ;;  %v2813_v2 = vld [vmem:[%s7828_s29 + $0x1168] sm:$0xff] }
 0x3c8   : > { %v5413_v6 = vpack.c.bf16 %v2796_v60, %v2780_v59  ;;  %v2942_v59 = vld [vmem:[%s7828_s29 + $0x1570] sm:$0xff]  ;;  %v5559_v60 = vpack.c.bf16 %v2959_v53, %v2943_v52  ;;  %v3101_v53 = vld [vmem:[%s7828_s29 + $0x1a68] sm:$0xff] }
 0x3c9   : > { %5394 = vmatpush1.bf16.msra.mxu0 %v5393_v8  ;;  %v5415_v8 = vpack.c.bf16 %v2829_v3, %v2813_v2  ;;  %v2975_v2 = vld [vmem:[%s7828_s29 + $0x1678] sm:$0xff]  ;;  %v5561_v5 = vpack.c.bf16 %v2958_v61, %v2942_v59  ;;  %v3086_v52 = vld [vmem:[%s7828_s29 + $0x19f0] sm:$0xff]  ;;  %v3116_v61 = vld [vmem:[%s7828_s29 + $0x1ae0] sm:$0xff] }
 0x3ca   : > { %5522 = vmatpush1.bf16.msra.mxu1 %v5521_v9  ;;  %5396 = vmatprep.subr.bf16.mxu0 %v5395_v11  ;;  %v2812_v9 = vld [vmem:[%s7828_s29 + $0x1160] sm:$0xff]  ;;  %v2991_v3 = vld [vmem:[%s7828_s29 + $0x16f8] sm:$0xff] }
 0x3cb   : > { %5524 = vmatprep.subr.bf16.mxu1 %v5523_v15  ;;  %v2828_v11 = vld [vmem:[%s7828_s29 + $0x11e0] sm:$0xff]  ;;  %v2845_v15 = vld [vmem:[%s7828_s29 + $0x1268] sm:$0xff] }
 0x3cc   : > { %v5417_v20 = vpack.c.bf16 %v2828_v11, %v2812_v9  ;;  %v2974_v9 = vld [vmem:[%s7828_s29 + $0x1670] sm:$0xff] }
 0x3cd   : > { %5398 = vmatpush1.bf16.msra.mxu0 %v5397_v21  ;;  %v5545_v21 = vpack.c.bf16 %v2830_v14, %v2814_v12  ;;  %v5563_v12 = vpack.c.bf16 %v2991_v3, %v2975_v2  ;;  %v3005_v14 = vld [vmem:[%s7828_s29 + $0x1768] sm:$0xff]  ;;  %v3118_v2 = vld [vmem:[%s7828_s29 + $0x1af0] sm:$0xff] }
 0x3ce   : > { %5526 = vmatpush1.bf16.msra.mxu1 %v5525_v22  ;;  %5400 = vmatprep.subr.bf16.mxu0 %v5399_v23  ;;  %v5419_v22 = vpack.c.bf16 %v2861_v16, %v2845_v15  ;;  %v2844_v23 = vld [vmem:[%s7828_s29 + $0x1260] sm:$0xff]  ;;  %v3021_v15 = vld [vmem:[%s7828_s29 + $0x17e8] sm:$0xff] }
 0x3cf   : > { %5528 = vmatprep.subr.bf16.mxu1 %v5527_v28  ;;  %v2862_v28 = vld [vmem:[%s7828_s29 + $0x12f0] sm:$0xff]  ;;  %v5421_v34 = vpack.c.bf16 %v2860_v24, %v2844_v23  ;;  %v3133_v3 = vld [vmem:[%s7828_s29 + $0x1b68] sm:$0xff] }
 0x3d1   : > { %5402 = vmatpush1.bf16.msra.mxu0 %v5401_v35  ;;  %v5549_v35 = vpack.c.bf16 %v2862_v28, %v2846_v26  ;;  %v5439_v26 = vpack.c.bf16 %v3021_v15, %v3005_v14  ;;  %v3020_v28 = vld [vmem:[%s7828_s29 + $0x17e0] sm:$0xff]  ;;  %v3150_v15 = vld [vmem:[%s7828_s29 + $0x1bf0] sm:$0xff] }
 0x3d2   : > { %5530 = vmatpush1.bf16.msra.mxu1 %v5529_v1  ;;  %5404 = vmatprep.subr.bf16.mxu0 %v5403_v36  ;;  %v5423_v1 = vpack.c.bf16 %v2893_v31, %v2877_v29  ;;  %v2876_v36 = vld [vmem:[%s7828_s29 + $0x1360] sm:$0xff]  ;;  %v3006_v29 = vld [vmem:[%s7828_s29 + $0x1770] sm:$0xff]  ;;  %v5567_v31 = vpack.c.bf16 %v3023_v19, %v3007_v18  ;;  %v3167_v18 = vld [vmem:[%s7828_s29 + $0x1c78] sm:$0xff] }
 0x3d3   : > { %5532 = vmatprep.subr.bf16.mxu1 %v5531_v40  ;;  %v2894_v40 = vld [vmem:[%s7828_s29 + $0x13f0] sm:$0xff]  ;;  %v5425_v0 = vpack.c.bf16 %v2892_v37, %v2876_v36  ;;  %v5569_v37 = vpack.c.bf16 %v3022_v32, %v3006_v29  ;;  %v3183_v19 = vld [vmem:[%s7828_s29 + $0x1cf8] sm:$0xff]  ;;  %v3197_v29 = vld [vmem:[%s7828_s29 + $0x1d68] sm:$0xff] }
 0x3d4   : > { %v5553_v44 = vpack.c.bf16 %v2894_v40, %v2878_v38  ;;  %v3052_v40 = vld [vmem:[%s7828_s29 + $0x18e0] sm:$0xff]  ;;  %v3199_v32 = vld [vmem:[%s7828_s29 + $0x1d78] sm:$0xff] }
 0x3d5   : > { %5406 = vmatpush1.bf16.msra.mxu0 %v5405_v45 }
 0x3d6   : > { %5534 = vmatpush1.bf16.msra.mxu1 %v5533_v46  ;;  %5408 = vmatprep.subr.bf16.mxu0 %v5407_v47  ;;  %v2908_v46 = vld [vmem:[%s7828_s29 + $0x1460] sm:$0xff] }
 0x3d7   : > { %5536 = vmatprep.subr.bf16.mxu1 %v5535_v51  ;;  %v2924_v47 = vld [vmem:[%s7828_s29 + $0x14e0] sm:$0xff]  ;;  %v2941_v51 = vld [vmem:[%s7828_s29 + $0x1568] sm:$0xff] }
 0x3d8   : > { %v5429_v54 = vpack.c.bf16 %v2924_v47, %v2908_v46 }
 0x3d9   : > { %5410 = vmatpush1.bf16.msra.mxu0 %v5409_v56  ;;  %v5431_v56 = vpack.c.bf16 %v2957_v25, %v2941_v51  ;;  %v3070_v51 = vld [vmem:[%s7828_s29 + $0x1970] sm:$0xff] }
 0x3da   : > { %5538 = vmatpush1.bf16.msra.mxu1 %v5537_v57  ;;  %5412 = vmatprep.subr.bf16.mxu0 %v5411_v58  ;;  %v2940_v57 = vld [vmem:[%s7828_s29 + $0x1560] sm:$0xff] }
 0x3db   : > { %5540 = vmatprep.subr.bf16.mxu1 %v5539_v62  ;;  %v2956_v58 = vld [vmem:[%s7828_s29 + $0x15e0] sm:$0xff]  ;;  %v2973_v62 = vld [vmem:[%s7828_s29 + $0x1668] sm:$0xff] }
 0x3dc   : > { %4203 = vmatmul.mubr.f32.vlgmr.msra.gmra.mrb[6].mxu0 %v5665_v17  ;;  %v5433_v4 = vpack.c.bf16 %v2956_v58, %v2940_v57  ;;  %v5577_v58 = vpack.c.bf16 %v3086_v52, %v3070_v51  ;;  %v3261_v51 = vld [vmem:[%s7828_s29 + $0x1f68] sm:$0xff]  ;;  %v3263_v52 = vld [vmem:[%s7828_s29 + $0x1f78] sm:$0xff] }
 0x3dd   : > { %5414 = vmatpush1.bf16.msra.mxu0 %v5413_v6  ;;  %4345 = vmatmul.mubr.f32.vlgmr.msra.gmra.mrb[6].mxu1 %v5665_v17  ;;  %v5435_v6 = vpack.c.bf16 %v2989_v63, %v2973_v62  ;;  %v3102_v62 = vld [vmem:[%s7828_s29 + $0x1a70] sm:$0xff] }
 0x3de   : > { %5542 = vmatpush1.bf16.msra.mxu1 %v5541_v7  ;;  %5416 = vmatprep.subr.bf16.mxu0 %v5415_v8  ;;  %v2972_v7 = vld [vmem:[%s7828_s29 + $0x1660] sm:$0xff] }
 0x3df   : > { %5544 = vmatprep.subr.bf16.mxu1 %v5543_v13  ;;  %4273 = vmatprep.mubr.f32.mxu0 %v8027_v30  ;;  %v2988_v8 = vld [vmem:[%s7828_s29 + $0x16e0] sm:$0xff]  ;;  %v2990_v13 = vld [vmem:[%s7828_s29 + $0x16f0] sm:$0xff] }
 0x3e0   : > { %4415 = vmatprep.mubr.f32.mxu1 %v8027_v30  ;;  %v2925_v30 = vld [vmem:[%s7828_s29 + $0x14e8] sm:$0xff]  ;;  %v5565_v24 = vpack.c.bf16 %v2990_v13, %v2974_v9  ;;  %v3134_v13 = vld [vmem:[%s7828_s29 + $0x1b70] sm:$0xff] }
 0x3e1   : > { %5418 = vmatpush1.bf16.msra.mxu0 %v5417_v20  ;;  %v5427_v45 = vpack.c.bf16 %v2925_v30, %v2909_v41  ;;  %v3038_v41 = vld [vmem:[%s7828_s29 + $0x1870] sm:$0xff] }
 0x3e2   : > { %5546 = vmatpush1.bf16.msra.mxu1 %v5545_v21  ;;  %5420 = vmatprep.subr.bf16.mxu0 %v5419_v22  ;;  %v5437_v22 = vpack.c.bf16 %v2988_v8, %v2972_v7  ;;  %v5573_v47 = vpack.c.bf16 %v3054_v42, %v3038_v41  ;;  %v5581_v8 = vpack.c.bf16 %v3118_v2, %v3102_v62  ;;  %v3229_v41 = vld [vmem:[%s7828_s29 + $0x1e68] sm:$0xff]  ;;  %v3231_v42 = vld [vmem:[%s7828_s29 + $0x1e78] sm:$0xff] }
 0x3e3   : > { %5548 = vmatprep.subr.bf16.mxu1 %v5547_v27  ;;  %v3004_v27 = vld [vmem:[%s7828_s29 + $0x1760] sm:$0xff] }
 0x3e4   : > { %v5441_v36 = vpack.c.bf16 %v3020_v28, %v3004_v27  ;;  %v5587_v27 = vpack.c.bf16 %v3183_v19, %v3167_v18  ;;  %v3182_v28 = vld [vmem:[%s7828_s29 + $0x1cf0] sm:$0xff] }
 0x3e5   : > { %5422 = vmatpush1.bf16.msra.mxu0 %v5421_v34  ;;  %v3053_v34 = vld [vmem:[%s7828_s29 + $0x18e8] sm:$0xff] }
 0x3e6   : > { %5550 = vmatpush1.bf16.msra.mxu1 %v5549_v35  ;;  %5424 = vmatprep.subr.bf16.mxu0 %v5423_v1  ;;  %v3039_v35 = vld [vmem:[%s7828_s29 + $0x1878] sm:$0xff]  ;;  %v5443_v38 = vpack.c.bf16 %v3053_v34, %v3037_v33 }
 0x3e7   : > { %5552 = vmatprep.subr.bf16.mxu1 %v5551_v39  ;;  %v3055_v1 = vld [vmem:[%s7828_s29 + $0x18f8] sm:$0xff]  ;;  %v3036_v39 = vld [vmem:[%s7828_s29 + $0x1860] sm:$0xff] }
 0x3e8   : > { %v5571_v30 = vpack.c.bf16 %v3055_v1, %v3039_v35  ;;  %v5445_v46 = vpack.c.bf16 %v3052_v40, %v3036_v39  ;;  %v3215_v33 = vld [vmem:[%s7828_s29 + $0x1df8] sm:$0xff]  ;;  %v3214_v40 = vld [vmem:[%s7828_s29 + $0x1df0] sm:$0xff] }
 0x3e9   : > { %5426 = vmatpush1.bf16.msra.mxu0 %v5425_v0  ;;  %v3085_v0 = vld [vmem:[%s7828_s29 + $0x19e8] sm:$0xff]  ;;  %v5591_v39 = vpack.c.bf16 %v3215_v33, %v3199_v32 }
 0x3ea   : > { %5554 = vmatpush1.bf16.msra.mxu1 %v5553_v44  ;;  %5428 = vmatprep.subr.bf16.mxu0 %v5427_v45  ;;  %v3071_v44 = vld [vmem:[%s7828_s29 + $0x1978] sm:$0xff]  ;;  %v5447_v48 = vpack.c.bf16 %v3085_v0, %v3069_v43 }
 0x3eb   : > { %5556 = vmatprep.subr.bf16.mxu1 %v5555_v49  ;;  %v3087_v45 = vld [vmem:[%s7828_s29 + $0x19f8] sm:$0xff]  ;;  %v3068_v49 = vld [vmem:[%s7828_s29 + $0x1960] sm:$0xff] }
 0x3ec   : > { %v5575_v25 = vpack.c.bf16 %v3087_v45, %v3071_v44  ;;  %v5449_v57 = vpack.c.bf16 %v3084_v50, %v3068_v49  ;;  %v3247_v43 = vld [vmem:[%s7828_s29 + $0x1ef8] sm:$0xff]  ;;  %v3246_v50 = vld [vmem:[%s7828_s29 + $0x1ef0] sm:$0xff] }
 0x3ed   : > { %5430 = vmatpush1.bf16.msra.mxu0 %v5429_v54  ;;  %v3117_v54 = vld [vmem:[%s7828_s29 + $0x1ae8] sm:$0xff]  ;;  %v5595_v49 = vpack.c.bf16 %v3247_v43, %v3231_v42 }
 0x3ee   : > { %5558 = vmatpush1.bf16.msra.mxu1 %v5557_v55  ;;  %5432 = vmatprep.subr.bf16.mxu0 %v5431_v56  ;;  %v3103_v55 = vld [vmem:[%s7828_s29 + $0x1a78] sm:$0xff]  ;;  %v5451_v59 = vpack.c.bf16 %v3117_v54, %v3101_v53 }
 0x3ef   : > { %v3707_v11 = vpop.f32.mrb[2].mxu0  ;;  %5560 = vmatprep.subr.bf16.mxu1 %v5559_v60  ;;  %v3119_v56 = vld [vmem:[%s7828_s29 + $0x1af8] sm:$0xff]  ;;  %v3100_v60 = vld [vmem:[%s7828_s29 + $0x1a60] sm:$0xff] }
 0x3f0   : > { %v3849_v16 = vpop.f32.mrb[2].mxu1  ;;  %v3709_v17 = vpop.f32.mrb[3].mxu0  ;;  %v5579_v63 = vpack.c.bf16 %v3119_v56, %v3103_v55  ;;  %v5453_v7 = vpack.c.bf16 %v3116_v61, %v3100_v60  ;;  %v3279_v53 = vld [vmem:[%s7828_s29 + $0x1ff8] sm:$0xff]  ;;  %v3262_v60 = vld [vmem:[%s7828_s29 + $0x1f70] sm:$0xff] }
 0x3f1   : > { %v4440_v20 = vcombine.low %v3707_v11, %v3709_v17  ;;  %v3851_v21 = vpop.f32.mrb[3].mxu1  ;;  %5434 = vmatpush1.bf16.msra.mxu0 %v5433_v4  ;;  %v3149_v4 = vld [vmem:[%s7828_s29 + $0x1be8] sm:$0xff]  ;;  %v3132_v11 = vld [vmem:[%s7828_s29 + $0x1b60] sm:$0xff]  ;;  %v3278_v61 = vld [vmem:[%s7828_s29 + $0x1ff0] sm:$0xff] }
 0x3f2   : > { %v4441_v23 = vcombine.low %v3849_v16, %v3851_v21  ;;  %5562 = vmatpush1.bf16.msra.mxu1 %v5561_v5  ;;  %5436 = vmatprep.subr.bf16.mxu0 %v5435_v6  ;;  %v3135_v5 = vld [vmem:[%s7828_s29 + $0x1b78] sm:$0xff]  ;;  %v5455_v9 = vpack.c.bf16 %v3149_v4, %v3133_v3  ;;  %v3165_v16 = vld [vmem:[%s7828_s29 + $0x1c68] sm:$0xff]  ;;  %v5585_v21 = vpack.c.bf16 %v3150_v15, %v3134_v13 }
 0x3f3   : > { %4456 = vst [vmem:[%s8575_s20 + $0x10] sm:$0xff] %v4440_v20  ;;  %5564 = vmatprep.subr.bf16.mxu1 %v5563_v12  ;;  %v3151_v6 = vld [vmem:[%s7828_s29 + $0x1bf8] sm:$0xff]  ;;  %v3148_v12 = vld [vmem:[%s7828_s29 + $0x1be0] sm:$0xff]  ;;  %v3181_v17 = vld [vmem:[%s7828_s29 + $0x1ce8] sm:$0xff] }
 0x3f4   : > { %4457 = vst [vmem:[%s8575_s20 + $0x18] sm:$0xff] %v4441_v23  ;;  %v5583_v14 = vpack.c.bf16 %v3151_v6, %v3135_v5  ;;  %v5457_v20 = vpack.c.bf16 %v3148_v12, %v3132_v11  ;;  %v3164_v23 = vld [vmem:[%s7828_s29 + $0x1c60] sm:$0xff] }
 0x3f5   : > { %5438 = vmatpush1.bf16.msra.mxu0 %v5437_v22  ;;  %v5459_v22 = vpack.c.bf16 %v3181_v17, %v3165_v16 }
 0x3f6   : > { %5566 = vmatpush1.bf16.msra.mxu1 %v5565_v24  ;;  %5440 = vmatprep.subr.bf16.mxu0 %v5439_v26  ;;  %v3180_v24 = vld [vmem:[%s7828_s29 + $0x1ce0] sm:$0xff]  ;;  %v3166_v26 = vld [vmem:[%s7828_s29 + $0x1c70] sm:$0xff] }
 0x3f7   : > { %5568 = vmatprep.subr.bf16.mxu1 %v5567_v31  ;;  %v3213_v31 = vld [vmem:[%s7828_s29 + $0x1de8] sm:$0xff]  ;;  %v5461_v34 = vpack.c.bf16 %v3180_v24, %v3164_v23  ;;  %v5589_v35 = vpack.c.bf16 %v3182_v28, %v3166_v26 }
 0x3f8   : > { %v5463_v1 = vpack.c.bf16 %v3213_v31, %v3197_v29 }
 0x3f9   : > { %5442 = vmatpush1.bf16.msra.mxu0 %v5441_v36  ;;  %v3196_v36 = vld [vmem:[%s7828_s29 + $0x1d60] sm:$0xff] }
 0x3fa   : > { %5570 = vmatpush1.bf16.msra.mxu1 %v5569_v37  ;;  %5444 = vmatprep.subr.bf16.mxu0 %v5443_v38  ;;  %v3212_v37 = vld [vmem:[%s7828_s29 + $0x1de0] sm:$0xff]  ;;  %v3198_v38 = vld [vmem:[%s7828_s29 + $0x1d70] sm:$0xff] }
 0x3fb   : > { %5572 = vmatprep.subr.bf16.mxu1 %v5571_v30  ;;  %v3245_v30 = vld [vmem:[%s7828_s29 + $0x1ee8] sm:$0xff]  ;;  %v5465_v0 = vpack.c.bf16 %v3212_v37, %v3196_v36  ;;  %v5593_v44 = vpack.c.bf16 %v3214_v40, %v3198_v38 }
 0x3fc   : > { %v5467_v45 = vpack.c.bf16 %v3245_v30, %v3229_v41 }
 0x3fd   : > { %5446 = vmatpush1.bf16.msra.mxu0 %v5445_v46  ;;  %v3228_v46 = vld [vmem:[%s7828_s29 + $0x1e60] sm:$0xff] }
 0x3fe   : > { %5574 = vmatpush1.bf16.msra.mxu1 %v5573_v47  ;;  %5448 = vmatprep.subr.bf16.mxu0 %v5447_v48  ;;  %v3244_v47 = vld [vmem:[%s7828_s29 + $0x1ee0] sm:$0xff]  ;;  %v3230_v48 = vld [vmem:[%s7828_s29 + $0x1e70] sm:$0xff] }
 0x3ff   : > { %5576 = vmatprep.subr.bf16.mxu1 %v5575_v25  ;;  %v3277_v25 = vld [vmem:[%s7828_s29 + $0x1fe8] sm:$0xff]  ;;  %v5469_v54 = vpack.c.bf16 %v3244_v47, %v3228_v46  ;;  %v5597_v55 = vpack.c.bf16 %v3246_v50, %v3230_v48 }
 0x400   : > { %v5471_v56 = vpack.c.bf16 %v3277_v25, %v3261_v51 }
 0x401   : > { %5450 = vmatpush1.bf16.msra.mxu0 %v5449_v57  ;;  %v3260_v57 = vld [vmem:[%s7828_s29 + $0x1f60] sm:$0xff] }
 0x402   : > { %5578 = vmatpush1.bf16.msra.mxu1 %v5577_v58  ;;  %5452 = vmatprep.subr.bf16.mxu0 %v5451_v59  ;;  %v3276_v58 = vld [vmem:[%s7828_s29 + $0x1fe0] sm:$0xff]  ;;  %v5599_v59 = vpack.c.bf16 %v3279_v53, %v3263_v52 }
 0x403   : > { %5580 = vmatprep.subr.bf16.mxu1 %v5579_v63  ;;  %v5473_v62 = vpack.c.bf16 %v3276_v58, %v3260_v57  ;;  %v5601_v63 = vpack.c.bf16 %v3278_v61, %v3262_v60 }
 0x405   : > { %5454 = vmatpush1.bf16.msra.mxu0 %v5453_v7 }
 0x406   : > { %5582 = vmatpush1.bf16.msra.mxu1 %v5581_v8  ;;  %5456 = vmatprep.subr.bf16.mxu0 %v5455_v9 }
 0x407   : > { %5584 = vmatprep.subr.bf16.mxu1 %v5583_v14 }
 0x409   : > { %5458 = vmatpush1.bf16.msra.mxu0 %v5457_v20 }
 0x40a   : > { %5586 = vmatpush1.bf16.msra.mxu1 %v5585_v21  ;;  %5460 = vmatprep.subr.bf16.mxu0 %v5459_v22 }
 0x40b   : > { %5588 = vmatprep.subr.bf16.mxu1 %v5587_v27 }
 0x40d   : > { %5462 = vmatpush1.bf16.msra.mxu0 %v5461_v34 }
 0x40e   : > { %5590 = vmatpush1.bf16.msra.mxu1 %v5589_v35  ;;  %5464 = vmatprep.subr.bf16.mxu0 %v5463_v1 }
 0x40f   : > { %5592 = vmatprep.subr.bf16.mxu1 %v5591_v39 }
 0x411   : > { %5466 = vmatpush1.bf16.msra.mxu0 %v5465_v0 }
 0x412   : > { %5594 = vmatpush1.bf16.msra.mxu1 %v5593_v44  ;;  %5468 = vmatprep.subr.bf16.mxu0 %v5467_v45 }
 0x413   : > { %5596 = vmatprep.subr.bf16.mxu1 %v5595_v49 }
 0x415   : > { %5470 = vmatpush1.bf16.msra.mxu0 %v5469_v54 }
 0x416   : > { %5598 = vmatpush1.bf16.msra.mxu1 %v5597_v55  ;;  %5472 = vmatprep.subr.bf16.mxu0 %v5471_v56 }
 0x417   : > { %5600 = vmatprep.subr.bf16.mxu1 %v5599_v59 }
 0x419   : > { %5474 = vmatpush1.bf16.msra.mxu0 %v5473_v62 }
 0x41a   : > { %5602 = vmatpush1.bf16.msra.mxu1 %v5601_v63 }
 0x41c   : > { %4274 = vmatmul.mubr.f32.vlgmr.msra.gmra.mrb[6].mxu0 %v8670_v10 }
 0x41d   : > { %4416 = vmatmul.mubr.f32.vlgmr.msra.gmra.mrb[6].mxu1 %v8670_v10 }
 0x46f   : > { %v3991_v2 = vpop.f32.mrb[4].mxu0 }
 0x470   : > { %v4133_v3 = vpop.f32.mrb[4].mxu1  ;;  %v3993_v4 = vpop.f32.mrb[5].mxu0 }
 0x471   : > { %v4442_v5 = vcombine.low %v3991_v2, %v3993_v4  ;;  %v4135_v6 = vpop.f32.mrb[5].mxu1 }
 0x472   : > { %v4443_v7 = vcombine.low %v4133_v3, %v4135_v6 }
 0x473   : > { %4458 = vst [vmem:[%s8575_s20 + $0x20] sm:$0xff] %v4442_v5 }
 0x474   : > { %4459 = vst [vmem:[%s8575_s20 + $0x28] sm:$0xff] %v4443_v7 }
 0x4ef   : > { %v4275_v8 = vpop.f32.mrb[6].mxu0 }
 0x4f0   : > { %v4417_v9 = vpop.f32.mrb[6].mxu1  ;;  %v4277_v11 = vpop.f32.mrb[7].mxu0 }
 0x4f1   : > { %v4444_v12 = vcombine.low %v4275_v8, %v4277_v11  ;;  %v4419_v13 = vpop.f32.mrb[7].mxu1 }
 0x4f2   : > { %v4445_v14 = vcombine.low %v4417_v9, %v4419_v13 }
 0x4f3   : > { %4460 = vst [vmem:[%s8575_s20 + $0x30] sm:$0xff] %v4444_v12 }
 0x4f4   : > { %4461 = vst [vmem:[%s8575_s20 + $0x38] sm:$0xff] %v4445_v14 }
 0x4f5 PF: > { %s12_s13 = sadd.s32 1, %s5704_s13   ;;  %s8946_s9 = smov %s5692_s10 }
 0x4f6   : > { %p9_p10 = scmp.ge.s32.totalorder %s12_s13, 4   ;;  %s8947_s10 = smov %s5756_s17 }
 0x4f7   : > { %s8948_s11 = smov %s5700_s12  ;;  %s8949_s12 = smov %s8951_s14 }
 0x4f8   :  { %11 = sbr.rel (!%p9_p10) target bundleno = 3 (0x3), region = 89 }

</bundles_post_ra>
